<compile_context>
chip_gen: v5e
topology: v5e:2x2
jax: 0.10.0
libtpu: 0.0.40
codegen_flags: <defaults>
</compile_context>

<pallas_src>
import numpy as np
import jax
import jax.numpy as jnp
from jax.experimental import pallas as pl
from jax.experimental.pallas import tpu as pltpu

HIGH = jax.lax.Precision.HIGHEST  # only used by the pure-JAX reference


# ----------------------------------------------------------------------------
# In-kernel building blocks
# ----------------------------------------------------------------------------
def _stage_padded(x, pad_ref):
    """Stage activation x into a persistent VMEM pad scratch.

    Only the 1-pixel border is zeroed (cheap); the interior is fully
    overwritten each call, so no full-buffer zeroing is needed.  Done every
    call (not once) so it is safe when grid steps are split across cores.
    """
    B, H, W, C = x.shape
    pad_ref[:, 0:1, :, :] = jnp.zeros((B, 1, W + 2, C), x.dtype)
    pad_ref[:, H + 1:H + 2, :, :] = jnp.zeros((B, 1, W + 2, C), x.dtype)
    pad_ref[:, :, 0:1, :] = jnp.zeros((B, H + 2, 1, C), x.dtype)
    pad_ref[:, :, W + 1:W + 2, :] = jnp.zeros((B, H + 2, 1, C), x.dtype)
    pad_ref[:, 1:H + 1, 1:W + 1, :] = x


def _conv3x3_relu_pool(pad_ref, w_ref, b_ref):
    """Conv3x3(pad=1)+bias+ReLU+MaxPool2 on an already-padded (B,H+2,W+2,Cin)
    ref.  3 row-slab matmuls (K=3*Cin) accumulated in f32."""
    B, Hp, Wp, Cin = pad_ref.shape
    H, W = Hp - 2, Wp - 2
    Cout = w_ref.shape[-1]
    acc = None
    for dy in range(3):
        slab = jnp.concatenate(
            [pad_ref[:, dy:dy + H, dx:dx + W, :] for dx in range(3)], axis=-1)
        lhs = slab.reshape(B * H * W, 3 * Cin).astype(jnp.bfloat16)
        d = jnp.dot(lhs, w_ref[dy * 3 * Cin:(dy + 1) * 3 * Cin, :],
                    preferred_element_type=jnp.float32)
        acc = d if acc is None else acc + d
    y = jnp.maximum(acc + b_ref[...], 0.0).reshape(B * H, W, Cout)
    # fused 2x2 max-pool (rows are (b, h); H even so pairs never cross images)
    y = jnp.max(y.reshape(B * H, W // 2, 2, Cout), axis=2)
    y = jnp.max(y.reshape(B * H // 2, 2, W // 2, Cout), axis=1)
    return y.reshape(B, H // 2, W // 2, Cout)


def _deconv2x2_relu(x, w_ref, b_ref):
    """ConvTranspose2d(k=2,s=2)+bias+ReLU in tap-packed (deferred-interleave)
    form.  x: (M, Cin) rows = pixels (order irrelevant for the per-pixel
    decoder); returns (4*M, Cout) with rows ordered (pixel, tap)."""
    t = jnp.dot(x.astype(jnp.bfloat16), w_ref[...],
                preferred_element_type=jnp.float32)
    t = jnp.maximum(t + b_ref[...], 0.0)                       # (M, 4*Cout)
    m = t.shape[0]
    cout = t.shape[1] // 4
    parts = [t[:, k * cout:(k + 1) * cout].reshape(m, 1, cout)
             for k in range(4)]
    return jnp.concatenate(parts, axis=1).reshape(4 * m, cout)


def _cnn7_kernel(x_ref, w1, b1, w2, b2, w3, b3,
                 wd1, bd1, wd2, bd2, wd3, bd3, whT, bhT, perm,
                 o_ref, p2, p3):
    B = x_ref.shape[0]
    npix = perm.shape[0]                                       # 256 = 16*16

    # ---- encoder: Conv3x3+ReLU+Pool x3 (input arrives pre-padded) ----
    a = _conv3x3_relu_pool(x_ref, w1, b1)                      # (B, 8, 8, 32)
    _stage_padded(a, p2)
    a = _conv3x3_relu_pool(p2, w2, b2)                         # (B, 4, 4, 64)
    _stage_padded(a, p3)
    a = _conv3x3_relu_pool(p3, w3, b3)                         # (B, 2, 2, 128)

    # ---- decoder: tap-packed deconvs, spatial interleave deferred ----
    a = a.reshape(B * 4, 128)
    a = _deconv2x2_relu(a, wd1, bd1)                           # (B*16,  64)
    a = _deconv2x2_relu(a, wd2, bd2)                           # (B*64,  32)
    a = _deconv2x2_relu(a, wd3, bd3)                           # (B*256, 16)

    # ---- 1x1 head, computed channels-first (single small transpose) ----
    aT = a.T.astype(jnp.bfloat16)                              # (16, B*256)
    yT = jnp.dot(whT[...], aT,
                 preferred_element_type=jnp.float32) + bhT[...]  # (16, B*256)

    # ---- single deferred interleave: constant permutation matmul maps the
    # scrambled (pixel, tap, tap, tap) order to raster order; the result is
    # already lane-dense (pixels on the 128-lane axis).
    P = perm[...]
    for b in range(B):
        ob = jnp.dot(yT[:, b * npix:(b + 1) * npix], P,
                     preferred_element_type=jnp.float32)       # (16, 256) raster
        o_ref[b] = ob[:9, :]


# ----------------------------------------------------------------------------
# Parameters: PyTorch layouts at init, packed once for the kernel
# ----------------------------------------------------------------------------
def init_params(key):
    ks = iter(jax.random.split(key, 16))

    def uinit(k, shape, fan_in):
        s = 1.0 / jnp.sqrt(jnp.float32(fan_in))
        return jax.random.uniform(k, shape, jnp.float32, -s, s)

    convs = []
    for cin, cout in [(3, 32), (32, 64), (64, 128)]:
        w = uinit(next(ks), (cout, cin, 3, 3), cin * 9)        # OIHW (PyTorch)
        b = uinit(next(ks), (cout,), cin * 9)
        convs.append((w, b))
    deconvs = []
    for cin, cout in [(128, 64), (64, 32), (32, 16)]:
        w = uinit(next(ks), (cin, cout, 2, 2), cin * 4)        # IOHW (PyTorch)
        b = uinit(next(ks), (cout,), cin * 4)
        deconvs.append((w, b))
    wh = uinit(next(ks), (9, 16, 1, 1), 16)                    # OIHW
    bh = uinit(next(ks), (9,), 16)
    return {"convs": convs, "deconvs": deconvs, "head": (wh, bh)}


def _unscramble_matrix(Hc=2, Wc=2, levels=3):
    """(256_scrambled, 256_raster) permutation: scrambled row order is
    (h2, w2, k1, k2, k3) produced by the deferred tap-packing; raster is
    h*16 + w of the true 16x16 output grid."""
    side = Hc * (2 ** levels)
    P = np.zeros((Hc * Wc * 4 ** levels, side * side), np.float32)
    for h2 in range(Hc):
        for w2 in range(Wc):
            for k1 in range(4):
                for k2 in range(4):
                    for k3 in range(4):
                        dy1, dx1 = divmod(k1, 2)
                        dy2, dx2 = divmod(k2, 2)
                        dy3, dx3 = divmod(k3, 2)
                        s = (((h2 * Wc + w2) * 4 + k1) * 4 + k2) * 4 + k3
                        h = 8 * h2 + 4 * dy1 + 2 * dy2 + dy3
                        w = 8 * w2 + 4 * dx1 + 2 * dx2 + dx3
                        P[s, h * side + w] = 1.0
    return jnp.asarray(P)


def pack_params(params):
    """One-time re-layout of PyTorch weights into kernel-ready matrices."""
    conv_w, conv_b = [], []
    for i, (w, b) in enumerate(params["convs"]):
        hwio = jnp.transpose(w, (2, 3, 1, 0))                  # OIHW -> HWIO
        if i == 0:                                             # pad Cin 3 -> 8
            hwio = jnp.pad(hwio, ((0, 0), (0, 0), (0, 8 - hwio.shape[2]), (0, 0)))
        cin, cout = hwio.shape[2], hwio.shape[3]
        conv_w.append(hwio.reshape(9 * cin, cout).astype(jnp.bfloat16))
        conv_b.append(b.reshape(1, cout).astype(jnp.float32))
    dec_w, dec_b = [], []
    for w, b in params["deconvs"]:
        cout = w.shape[1]
        taps = [w[:, :, dy, dx] for dy in range(2) for dx in range(2)]
        dec_w.append(jnp.concatenate(taps, axis=1).astype(jnp.bfloat16))   # (Cin, 4*Cout)
        dec_b.append(jnp.tile(b.reshape(1, cout), (1, 4)).astype(jnp.float32))
    whp, bhp = params["head"]
    head_wT = whp[:, :, 0, 0]                                  # (9, 16) = (Cout, Cin)
    head_wT = jnp.pad(head_wT, ((0, 16 - head_wT.shape[0]), (0, 0))).astype(jnp.bfloat16)
    head_bT = jnp.pad(bhp, ((0, 16 - bhp.shape[0]),)).reshape(16, 1).astype(jnp.float32)
    return {"conv_w": conv_w, "conv_b": conv_b,
            "dec_w": dec_w, "dec_b": dec_b,
            "head_wT": head_wT, "head_bT": head_bT,
            "perm": _unscramble_matrix()}


# ----------------------------------------------------------------------------
# Fused forward: one pallas_call, grid over batch blocks
# ----------------------------------------------------------------------------
def _const_spec(a):
    return pl.BlockSpec(a.shape, lambda n: (0,) * a.ndim)


def cnn_7_layers(packed, x_nchw):
    x = jnp.transpose(x_nchw, (0, 2, 3, 1)).astype(jnp.float32)     # -> NHWC
    N, H, W, C = x.shape
    # one fused wrapper-side pad: 1px spatial halo + Cin 3 -> 8
    x = jnp.pad(x, ((0, 0), (1, 1), (1, 1), (0, 8 - C)))
    # >= 2 grid steps when the batch allows it so both v7x TensorCores get
    # work; on single-TC chips the extra step costs ~0.35us.  Batch block B
    # is folded into the matmul M dimension inside the kernel.
    n_steps = 2 if (N > 1 and N % 2 == 0) else 1
    B = N // n_steps

    args = (x,
            packed["conv_w"][0], packed["conv_b"][0],
            packed["conv_w"][1], packed["conv_b"][1],
            packed["conv_w"][2], packed["conv_b"][2],
            packed["dec_w"][0], packed["dec_b"][0],
            packed["dec_w"][1], packed["dec_b"][1],
            packed["dec_w"][2], packed["dec_b"][2],
            packed["head_wT"], packed["head_bT"], packed["perm"])
    in_specs = [pl.BlockSpec((B, H + 2, W + 2, 8), lambda n: (n, 0, 0, 0))]
    in_specs += [_const_spec(a) for a in args[1:]]

    out = pl.pallas_call(
        _cnn7_kernel,
        out_shape=jax.ShapeDtypeStruct((N, 9, H * W), jnp.float32),
        grid=(n_steps,),
        in_specs=in_specs,
        out_specs=pl.BlockSpec((B, 9, H * W), lambda n: (n, 0, 0)),
        scratch_shapes=[
            pltpu.VMEM((B, H // 2 + 2, W // 2 + 2, 32), jnp.float32),
            pltpu.VMEM((B, H // 4 + 2, W // 4 + 2, 64), jnp.float32),
        ],
        compiler_params=pltpu.CompilerParams(
            dimension_semantics=("parallel",)),
    )(*args)
    # lane-dense (N, 9, 256) -> NCHW is a free reshape (no transpose)
    return out.reshape(N, 9, H, W)


# ----------------------------------------------------------------------------
# Pure-JAX reference (f32-exact) for correctness check
# ----------------------------------------------------------------------------
def _ref_forward(params, x_nchw):
    x = jnp.transpose(x_nchw, (0, 2, 3, 1)).astype(jnp.float32)
    for w, b in params["convs"]:
        wh = jnp.transpose(w, (2, 3, 1, 0))
        N, H, W, _ = x.shape
        xp = jnp.pad(x, ((0, 0), (1, 1), (1, 1), (0, 0)))
        acc = jnp.zeros((N, H, W, wh.shape[-1]), jnp.float32)
        for dy in range(3):
            for dx in range(3):
                acc = acc + jnp.einsum("nhwc,co->nhwo",
                                       xp[:, dy:dy + H, dx:dx + W, :],
                                       wh[dy, dx], precision=HIGH)
        x = jnp.maximum(acc + b, 0.0)
        N, H, W, C = x.shape
        x = x.reshape(N, H // 2, 2, W // 2, 2, C).max(axis=(2, 4))
    for w, b in params["deconvs"]:
        wt = jnp.transpose(w, (2, 3, 0, 1))                    # (2,2,Cin,Cout)
        N, H, W, _ = x.shape
        y = jnp.einsum("nhwc,ijco->nhwijo", x, wt, precision=HIGH)
        y = jnp.transpose(y, (0, 1, 3, 2, 4, 5)).reshape(N, 2 * H, 2 * W, -1)
        x = jnp.maximum(y + b, 0.0)
    wh, bh = params["head"]
    x = jnp.einsum("nhwc,co->nhwo", x, wh[:, :, 0, 0].T, precision=HIGH) + bh
    return jnp.transpose(x, (0, 3, 1, 2))


# ----------------------------------------------------------------------------
if __name__ == "__main__":
    key = jax.random.PRNGKey(0)
    pkey, xkey = jax.random.split(key)
    params = init_params(pkey)
    packed = pack_params(params)
    x = jax.random.normal(xkey, (2, 3, 16, 16), jnp.float32)   # NCHW like PyTorch

    out = jax.block_until_ready(jax.jit(cnn_7_layers)(packed, x))
    assert out.shape == (2, 9, 16, 16), out.shape

    ref = jax.block_until_ready(jax.jit(_ref_forward)(params, x))
    max_err = float(jnp.max(jnp.abs(out - ref)))
    # kernel runs bf16 MXU passes (explicit casts); reference is f32-exact
    assert max_err < 5e-2, f"mismatch vs reference: {max_err}"

    print("KERNEL_OK")
</pallas_src>

<mosaic_0001>
module attributes {stable_mosaic.version = 11 : i64} {
  func.func @_cnn7_kernel(%arg0: i32, %arg1: memref<1x18x18x8xf32, #tpu.memory_space<vmem>>, %arg2: memref<72x32xbf16, #tpu.memory_space<vmem>>, %arg3: memref<1x32xf32, #tpu.memory_space<vmem>>, %arg4: memref<288x64xbf16, #tpu.memory_space<vmem>>, %arg5: memref<1x64xf32, #tpu.memory_space<vmem>>, %arg6: memref<576x128xbf16, #tpu.memory_space<vmem>>, %arg7: memref<1x128xf32, #tpu.memory_space<vmem>>, %arg8: memref<128x256xbf16, #tpu.memory_space<vmem>>, %arg9: memref<1x256xf32, #tpu.memory_space<vmem>>, %arg10: memref<64x128xbf16, #tpu.memory_space<vmem>>, %arg11: memref<1x128xf32, #tpu.memory_space<vmem>>, %arg12: memref<32x64xbf16, #tpu.memory_space<vmem>>, %arg13: memref<1x64xf32, #tpu.memory_space<vmem>>, %arg14: memref<16x16xbf16, #tpu.memory_space<vmem>>, %arg15: memref<16x1xf32, #tpu.memory_space<vmem>>, %arg16: memref<256x256xf32, #tpu.memory_space<vmem>>, %arg17: memref<1x9x256xf32, #tpu.memory_space<vmem>>, %arg18: memref<1x10x10x32xf32, #tpu.memory_space<vmem>>, %arg19: memref<1x6x6x64xf32, #tpu.memory_space<vmem>>) attributes {dimension_semantics = [#tpu.dimension_semantics<parallel>], iteration_bounds = array<i64: 2>, scalar_prefetch = 0 : i64, scratch_operands = 2 : i64, tpu.core_type = #tpu.core_type<tc>, window_params = [{transform_indices = @transform_0, window_bounds = array<i64: 1, 18, 18, 8>}, {pipeline_mode = #tpu.pipeline_mode<synchronous>, transform_indices = @transform_1, window_bounds = array<i64: 72, 32>}, {pipeline_mode = #tpu.pipeline_mode<synchronous>, transform_indices = @transform_2, window_bounds = array<i64: 1, 32>}, {pipeline_mode = #tpu.pipeline_mode<synchronous>, transform_indices = @transform_3, window_bounds = array<i64: 288, 64>}, {pipeline_mode = #tpu.pipeline_mode<synchronous>, transform_indices = @transform_4, window_bounds = array<i64: 1, 64>}, {pipeline_mode = #tpu.pipeline_mode<synchronous>, transform_indices = @transform_5, window_bounds = array<i64: 576, 128>}, {pipeline_mode = #tpu.pipeline_mode<synchronous>, transform_indices = @transform_6, window_bounds = array<i64: 1, 128>}, {pipeline_mode = #tpu.pipeline_mode<synchronous>, transform_indices = @transform_7, window_bounds = array<i64: 128, 256>}, {pipeline_mode = #tpu.pipeline_mode<synchronous>, transform_indices = @transform_8, window_bounds = array<i64: 1, 256>}, {pipeline_mode = #tpu.pipeline_mode<synchronous>, transform_indices = @transform_9, window_bounds = array<i64: 64, 128>}, {pipeline_mode = #tpu.pipeline_mode<synchronous>, transform_indices = @transform_10, window_bounds = array<i64: 1, 128>}, {pipeline_mode = #tpu.pipeline_mode<synchronous>, transform_indices = @transform_11, window_bounds = array<i64: 32, 64>}, {pipeline_mode = #tpu.pipeline_mode<synchronous>, transform_indices = @transform_12, window_bounds = array<i64: 1, 64>}, {pipeline_mode = #tpu.pipeline_mode<synchronous>, transform_indices = @transform_13, window_bounds = array<i64: 16, 16>}, {pipeline_mode = #tpu.pipeline_mode<synchronous>, transform_indices = @transform_14, window_bounds = array<i64: 16, 1>}, {pipeline_mode = #tpu.pipeline_mode<synchronous>, transform_indices = @transform_15, window_bounds = array<i64: 256, 256>}, {transform_indices = @transform_16, window_bounds = array<i64: 1, 9, 256>}]} {
    %c0 = arith.constant 0 : index
    %c0_0 = arith.constant 0 : index
    %c0_1 = arith.constant 0 : index
    %c0_2 = arith.constant 0 : index
    %0 = vector.load %arg1[%c0, %c0_0, %c0_1, %c0_2] : memref<1x18x18x8xf32, #tpu.memory_space<vmem>>, vector<1x16x16x8xf32>
    %c0_3 = arith.constant 0 : index
    %c0_4 = arith.constant 0 : index
    %c1 = arith.constant 1 : index
    %c0_5 = arith.constant 0 : index
    %1 = vector.load %arg1[%c0_3, %c0_4, %c1, %c0_5] : memref<1x18x18x8xf32, #tpu.memory_space<vmem>>, vector<1x16x16x8xf32>
    %c0_6 = arith.constant 0 : index
    %c0_7 = arith.constant 0 : index
    %c2 = arith.constant 2 : index
    %c0_8 = arith.constant 0 : index
    %2 = vector.load %arg1[%c0_6, %c0_7, %c2, %c0_8] : memref<1x18x18x8xf32, #tpu.memory_space<vmem>>, vector<1x16x16x8xf32>
    %3 = tpu.concatenate %0, %1, %2 in 3 : vector<1x16x16x8xf32>, vector<1x16x16x8xf32>, vector<1x16x16x8xf32> -> vector<1x16x16x24xf32>
    %4 = vector.shape_cast %3 : vector<1x16x16x24xf32> to vector<256x24xf32>
    %5 = arith.truncf %4 : vector<256x24xf32> to vector<256x24xbf16>
    %c0_9 = arith.constant 0 : index
    %c0_10 = arith.constant 0 : index
    %6 = vector.load %arg2[%c0_9, %c0_10] : memref<72x32xbf16, #tpu.memory_space<vmem>>, vector<24x32xbf16>
    %cst = arith.constant dense<0.000000e+00> : vector<256x32xf32>
    %7 = tpu.matmul %5, %6, %cst {dimension_numbers = #tpu.dot_dimension_numbers<[1], [0], [0], [1], [0, 0, 1, 1], [], []>} : vector<256x24xbf16>, vector<24x32xbf16>, vector<256x32xf32> -> vector<256x32xf32>
    %c0_11 = arith.constant 0 : index
    %c1_12 = arith.constant 1 : index
    %c0_13 = arith.constant 0 : index
    %c0_14 = arith.constant 0 : index
    %8 = vector.load %arg1[%c0_11, %c1_12, %c0_13, %c0_14] : memref<1x18x18x8xf32, #tpu.memory_space<vmem>>, vector<1x16x16x8xf32>
    %c0_15 = arith.constant 0 : index
    %c1_16 = arith.constant 1 : index
    %c1_17 = arith.constant 1 : index
    %c0_18 = arith.constant 0 : index
    %9 = vector.load %arg1[%c0_15, %c1_16, %c1_17, %c0_18] : memref<1x18x18x8xf32, #tpu.memory_space<vmem>>, vector<1x16x16x8xf32>
    %c0_19 = arith.constant 0 : index
    %c1_20 = arith.constant 1 : index
    %c2_21 = arith.constant 2 : index
    %c0_22 = arith.constant 0 : index
    %10 = vector.load %arg1[%c0_19, %c1_20, %c2_21, %c0_22] : memref<1x18x18x8xf32, #tpu.memory_space<vmem>>, vector<1x16x16x8xf32>
    %11 = tpu.concatenate %8, %9, %10 in 3 : vector<1x16x16x8xf32>, vector<1x16x16x8xf32>, vector<1x16x16x8xf32> -> vector<1x16x16x24xf32>
    %12 = vector.shape_cast %11 : vector<1x16x16x24xf32> to vector<256x24xf32>
    %13 = arith.truncf %12 : vector<256x24xf32> to vector<256x24xbf16>
    %c24 = arith.constant 24 : index
    %c0_23 = arith.constant 0 : index
    %14 = vector.load %arg2[%c24, %c0_23] : memref<72x32xbf16, #tpu.memory_space<vmem>>, vector<24x32xbf16>
    %cst_24 = arith.constant dense<0.000000e+00> : vector<256x32xf32>
    %15 = tpu.matmul %13, %14, %cst_24 {dimension_numbers = #tpu.dot_dimension_numbers<[1], [0], [0], [1], [0, 0, 1, 1], [], []>} : vector<256x24xbf16>, vector<24x32xbf16>, vector<256x32xf32> -> vector<256x32xf32>
    %16 = arith.addf %7, %15 : vector<256x32xf32>
    %c0_25 = arith.constant 0 : index
    %c2_26 = arith.constant 2 : index
    %c0_27 = arith.constant 0 : index
    %c0_28 = arith.constant 0 : index
    %17 = vector.load %arg1[%c0_25, %c2_26, %c0_27, %c0_28] : memref<1x18x18x8xf32, #tpu.memory_space<vmem>>, vector<1x16x16x8xf32>
    %c0_29 = arith.constant 0 : index
    %c2_30 = arith.constant 2 : index
    %c1_31 = arith.constant 1 : index
    %c0_32 = arith.constant 0 : index
    %18 = vector.load %arg1[%c0_29, %c2_30, %c1_31, %c0_32] : memref<1x18x18x8xf32, #tpu.memory_space<vmem>>, vector<1x16x16x8xf32>
    %c0_33 = arith.constant 0 : index
    %c2_34 = arith.constant 2 : index
    %c2_35 = arith.constant 2 : index
    %c0_36 = arith.constant 0 : index
    %19 = vector.load %arg1[%c0_33, %c2_34, %c2_35, %c0_36] : memref<1x18x18x8xf32, #tpu.memory_space<vmem>>, vector<1x16x16x8xf32>
    %20 = tpu.concatenate %17, %18, %19 in 3 : vector<1x16x16x8xf32>, vector<1x16x16x8xf32>, vector<1x16x16x8xf32> -> vector<1x16x16x24xf32>
    %21 = vector.shape_cast %20 : vector<1x16x16x24xf32> to vector<256x24xf32>
    %22 = arith.truncf %21 : vector<256x24xf32> to vector<256x24xbf16>
    %c48 = arith.constant 48 : index
    %c0_37 = arith.constant 0 : index
    %23 = vector.load %arg2[%c48, %c0_37] : memref<72x32xbf16, #tpu.memory_space<vmem>>, vector<24x32xbf16>
    %cst_38 = arith.constant dense<0.000000e+00> : vector<256x32xf32>
    %24 = tpu.matmul %22, %23, %cst_38 {dimension_numbers = #tpu.dot_dimension_numbers<[1], [0], [0], [1], [0, 0, 1, 1], [], []>} : vector<256x24xbf16>, vector<24x32xbf16>, vector<256x32xf32> -> vector<256x32xf32>
    %25 = arith.addf %16, %24 : vector<256x32xf32>
    %c0_39 = arith.constant 0 : index
    %c0_40 = arith.constant 0 : index
    %26 = vector.load %arg3[%c0_39, %c0_40] : memref<1x32xf32, #tpu.memory_space<vmem>>, vector<1x32xf32>
    %27 = vector.broadcast %26 : vector<1x32xf32> to vector<256x32xf32>
    %28 = arith.addf %25, %27 : vector<256x32xf32>
    %cst_41 = arith.constant 0.000000e+00 : f32
    %29 = vector.broadcast %cst_41 : f32 to vector<256x32xf32>
    %30 = arith.maximumf %28, %29 : vector<256x32xf32>
    %31 = vector.shape_cast %30 : vector<256x32xf32> to vector<16x16x32xf32>
    %32 = vector.shape_cast %31 : vector<16x16x32xf32> to vector<16x8x2x32xf32>
    %cst_42 = arith.constant dense<0xFF800000> : vector<16x8x32xf32>
    %33 = vector.multi_reduction <maximumf>, %32, %cst_42 [2] : vector<16x8x2x32xf32> to vector<16x8x32xf32>
    %34 = vector.shape_cast %33 : vector<16x8x32xf32> to vector<8x2x8x32xf32>
    %cst_43 = arith.constant dense<0xFF800000> : vector<8x8x32xf32>
    %35 = vector.multi_reduction <maximumf>, %34, %cst_43 [1] : vector<8x2x8x32xf32> to vector<8x8x32xf32>
    %36 = vector.shape_cast %35 : vector<8x8x32xf32> to vector<1x8x8x32xf32>
    %cst_44 = arith.constant 0.000000e+00 : f32
    %37 = vector.broadcast %cst_44 : f32 to vector<1x1x10x32xf32>
    %c0_45 = arith.constant 0 : index
    %c0_46 = arith.constant 0 : index
    %c0_47 = arith.constant 0 : index
    %c0_48 = arith.constant 0 : index
    %38 = vector.load %arg18[%c0_45, %c0_46, %c0_47, %c0_48] : memref<1x10x10x32xf32, #tpu.memory_space<vmem>>, vector<1x1x10x32xf32>
    tpu.vector_store %arg18[%c0_45, %c0_46, %c0_47, %c0_48], %37 {strides = array<i32>} : memref<1x10x10x32xf32, #tpu.memory_space<vmem>>, vector<1x1x10x32xf32>,
    %cst_49 = arith.constant 0.000000e+00 : f32
    %39 = vector.broadcast %cst_49 : f32 to vector<1x1x10x32xf32>
    %c0_50 = arith.constant 0 : index
    %c9 = arith.constant 9 : index
    %c0_51 = arith.constant 0 : index
    %c0_52 = arith.constant 0 : index
    %40 = vector.load %arg18[%c0_50, %c9, %c0_51, %c0_52] : memref<1x10x10x32xf32, #tpu.memory_space<vmem>>, vector<1x1x10x32xf32>
    tpu.vector_store %arg18[%c0_50, %c9, %c0_51, %c0_52], %39 {strides = array<i32>} : memref<1x10x10x32xf32, #tpu.memory_space<vmem>>, vector<1x1x10x32xf32>,
    %cst_53 = arith.constant 0.000000e+00 : f32
    %41 = vector.broadcast %cst_53 : f32 to vector<1x10x1x32xf32>
    %c0_54 = arith.constant 0 : index
    %c0_55 = arith.constant 0 : index
    %c0_56 = arith.constant 0 : index
    %c0_57 = arith.constant 0 : index
    %42 = vector.load %arg18[%c0_54, %c0_55, %c0_56, %c0_57] : memref<1x10x10x32xf32, #tpu.memory_space<vmem>>, vector<1x10x1x32xf32>
    tpu.vector_store %arg18[%c0_54, %c0_55, %c0_56, %c0_57], %41 {strides = array<i32>} : memref<1x10x10x32xf32, #tpu.memory_space<vmem>>, vector<1x10x1x32xf32>,
    %cst_58 = arith.constant 0.000000e+00 : f32
    %43 = vector.broadcast %cst_58 : f32 to vector<1x10x1x32xf32>
    %c0_59 = arith.constant 0 : index
    %c0_60 = arith.constant 0 : index
    %c9_61 = arith.constant 9 : index
    %c0_62 = arith.constant 0 : index
    %44 = vector.load %arg18[%c0_59, %c0_60, %c9_61, %c0_62] : memref<1x10x10x32xf32, #tpu.memory_space<vmem>>, vector<1x10x1x32xf32>
    tpu.vector_store %arg18[%c0_59, %c0_60, %c9_61, %c0_62], %43 {strides = array<i32>} : memref<1x10x10x32xf32, #tpu.memory_space<vmem>>, vector<1x10x1x32xf32>,
    %c0_63 = arith.constant 0 : index
    %c1_64 = arith.constant 1 : index
    %c1_65 = arith.constant 1 : index
    %c0_66 = arith.constant 0 : index
    %45 = vector.load %arg18[%c0_63, %c1_64, %c1_65, %c0_66] : memref<1x10x10x32xf32, #tpu.memory_space<vmem>>, vector<1x8x8x32xf32>
    tpu.vector_store %arg18[%c0_63, %c1_64, %c1_65, %c0_66], %36 {strides = array<i32>} : memref<1x10x10x32xf32, #tpu.memory_space<vmem>>, vector<1x8x8x32xf32>,
    %c0_67 = arith.constant 0 : index
    %c0_68 = arith.constant 0 : index
    %c0_69 = arith.constant 0 : index
    %c0_70 = arith.constant 0 : index
    %46 = vector.load %arg18[%c0_67, %c0_68, %c0_69, %c0_70] : memref<1x10x10x32xf32, #tpu.memory_space<vmem>>, vector<1x8x8x32xf32>
    %c0_71 = arith.constant 0 : index
    %c0_72 = arith.constant 0 : index
    %c1_73 = arith.constant 1 : index
    %c0_74 = arith.constant 0 : index
    %47 = vector.load %arg18[%c0_71, %c0_72, %c1_73, %c0_74] : memref<1x10x10x32xf32, #tpu.memory_space<vmem>>, vector<1x8x8x32xf32>
    %c0_75 = arith.constant 0 : index
    %c0_76 = arith.constant 0 : index
    %c2_77 = arith.constant 2 : index
    %c0_78 = arith.constant 0 : index
    %48 = vector.load %arg18[%c0_75, %c0_76, %c2_77, %c0_78] : memref<1x10x10x32xf32, #tpu.memory_space<vmem>>, vector<1x8x8x32xf32>
    %49 = tpu.concatenate %46, %47, %48 in 3 : vector<1x8x8x32xf32>, vector<1x8x8x32xf32>, vector<1x8x8x32xf32> -> vector<1x8x8x96xf32>
    %50 = vector.shape_cast %49 : vector<1x8x8x96xf32> to vector<64x96xf32>
    %51 = arith.truncf %50 : vector<64x96xf32> to vector<64x96xbf16>
    %c0_79 = arith.constant 0 : index
    %c0_80 = arith.constant 0 : index
    %52 = vector.load %arg4[%c0_79, %c0_80] : memref<288x64xbf16, #tpu.memory_space<vmem>>, vector<96x64xbf16>
    %cst_81 = arith.constant dense<0.000000e+00> : vector<64x64xf32>
    %53 = tpu.matmul %51, %52, %cst_81 {dimension_numbers = #tpu.dot_dimension_numbers<[1], [0], [0], [1], [0, 0, 1, 1], [], []>} : vector<64x96xbf16>, vector<96x64xbf16>, vector<64x64xf32> -> vector<64x64xf32>
    %c0_82 = arith.constant 0 : index
    %c1_83 = arith.constant 1 : index
    %c0_84 = arith.constant 0 : index
    %c0_85 = arith.constant 0 : index
    %54 = vector.load %arg18[%c0_82, %c1_83, %c0_84, %c0_85] : memref<1x10x10x32xf32, #tpu.memory_space<vmem>>, vector<1x8x8x32xf32>
    %c0_86 = arith.constant 0 : index
    %c1_87 = arith.constant 1 : index
    %c1_88 = arith.constant 1 : index
    %c0_89 = arith.constant 0 : index
    %55 = vector.load %arg18[%c0_86, %c1_87, %c1_88, %c0_89] : memref<1x10x10x32xf32, #tpu.memory_space<vmem>>, vector<1x8x8x32xf32>
    %c0_90 = arith.constant 0 : index
    %c1_91 = arith.constant 1 : index
    %c2_92 = arith.constant 2 : index
    %c0_93 = arith.constant 0 : index
    %56 = vector.load %arg18[%c0_90, %c1_91, %c2_92, %c0_93] : memref<1x10x10x32xf32, #tpu.memory_space<vmem>>, vector<1x8x8x32xf32>
    %57 = tpu.concatenate %54, %55, %56 in 3 : vector<1x8x8x32xf32>, vector<1x8x8x32xf32>, vector<1x8x8x32xf32> -> vector<1x8x8x96xf32>
    %58 = vector.shape_cast %57 : vector<1x8x8x96xf32> to vector<64x96xf32>
    %59 = arith.truncf %58 : vector<64x96xf32> to vector<64x96xbf16>
    %c96 = arith.constant 96 : index
    %c0_94 = arith.constant 0 : index
    %60 = vector.load %arg4[%c96, %c0_94] : memref<288x64xbf16, #tpu.memory_space<vmem>>, vector<96x64xbf16>
    %cst_95 = arith.constant dense<0.000000e+00> : vector<64x64xf32>
    %61 = tpu.matmul %59, %60, %cst_95 {dimension_numbers = #tpu.dot_dimension_numbers<[1], [0], [0], [1], [0, 0, 1, 1], [], []>} : vector<64x96xbf16>, vector<96x64xbf16>, vector<64x64xf32> -> vector<64x64xf32>
    %62 = arith.addf %53, %61 : vector<64x64xf32>
    %c0_96 = arith.constant 0 : index
    %c2_97 = arith.constant 2 : index
    %c0_98 = arith.constant 0 : index
    %c0_99 = arith.constant 0 : index
    %63 = vector.load %arg18[%c0_96, %c2_97, %c0_98, %c0_99] : memref<1x10x10x32xf32, #tpu.memory_space<vmem>>, vector<1x8x8x32xf32>
    %c0_100 = arith.constant 0 : index
    %c2_101 = arith.constant 2 : index
    %c1_102 = arith.constant 1 : index
    %c0_103 = arith.constant 0 : index
    %64 = vector.load %arg18[%c0_100, %c2_101, %c1_102, %c0_103] : memref<1x10x10x32xf32, #tpu.memory_space<vmem>>, vector<1x8x8x32xf32>
    %c0_104 = arith.constant 0 : index
    %c2_105 = arith.constant 2 : index
    %c2_106 = arith.constant 2 : index
    %c0_107 = arith.constant 0 : index
    %65 = vector.load %arg18[%c0_104, %c2_105, %c2_106, %c0_107] : memref<1x10x10x32xf32, #tpu.memory_space<vmem>>, vector<1x8x8x32xf32>
    %66 = tpu.concatenate %63, %64, %65 in 3 : vector<1x8x8x32xf32>, vector<1x8x8x32xf32>, vector<1x8x8x32xf32> -> vector<1x8x8x96xf32>
    %67 = vector.shape_cast %66 : vector<1x8x8x96xf32> to vector<64x96xf32>
    %68 = arith.truncf %67 : vector<64x96xf32> to vector<64x96xbf16>
    %c192 = arith.constant 192 : index
    %c0_108 = arith.constant 0 : index
    %69 = vector.load %arg4[%c192, %c0_108] : memref<288x64xbf16, #tpu.memory_space<vmem>>, vector<96x64xbf16>
    %cst_109 = arith.constant dense<0.000000e+00> : vector<64x64xf32>
    %70 = tpu.matmul %68, %69, %cst_109 {dimension_numbers = #tpu.dot_dimension_numbers<[1], [0], [0], [1], [0, 0, 1, 1], [], []>} : vector<64x96xbf16>, vector<96x64xbf16>, vector<64x64xf32> -> vector<64x64xf32>
    %71 = arith.addf %62, %70 : vector<64x64xf32>
    %c0_110 = arith.constant 0 : index
    %c0_111 = arith.constant 0 : index
    %72 = vector.load %arg5[%c0_110, %c0_111] : memref<1x64xf32, #tpu.memory_space<vmem>>, vector<1x64xf32>
    %73 = vector.broadcast %72 : vector<1x64xf32> to vector<64x64xf32>
    %74 = arith.addf %71, %73 : vector<64x64xf32>
    %cst_112 = arith.constant 0.000000e+00 : f32
    %75 = vector.broadcast %cst_112 : f32 to vector<64x64xf32>
    %76 = arith.maximumf %74, %75 : vector<64x64xf32>
    %77 = vector.shape_cast %76 : vector<64x64xf32> to vector<8x8x64xf32>
    %78 = vector.shape_cast %77 : vector<8x8x64xf32> to vector<8x4x2x64xf32>
    %cst_113 = arith.constant dense<0xFF800000> : vector<8x4x64xf32>
    %79 = vector.multi_reduction <maximumf>, %78, %cst_113 [2] : vector<8x4x2x64xf32> to vector<8x4x64xf32>
    %80 = vector.shape_cast %79 : vector<8x4x64xf32> to vector<4x2x4x64xf32>
    %cst_114 = arith.constant dense<0xFF800000> : vector<4x4x64xf32>
    %81 = vector.multi_reduction <maximumf>, %80, %cst_114 [1] : vector<4x2x4x64xf32> to vector<4x4x64xf32>
    %82 = vector.shape_cast %81 : vector<4x4x64xf32> to vector<1x4x4x64xf32>
    %cst_115 = arith.constant 0.000000e+00 : f32
    %83 = vector.broadcast %cst_115 : f32 to vector<1x1x6x64xf32>
    %c0_116 = arith.constant 0 : index
    %c0_117 = arith.constant 0 : index
    %c0_118 = arith.constant 0 : index
    %c0_119 = arith.constant 0 : index
    %84 = vector.load %arg19[%c0_116, %c0_117, %c0_118, %c0_119] : memref<1x6x6x64xf32, #tpu.memory_space<vmem>>, vector<1x1x6x64xf32>
    tpu.vector_store %arg19[%c0_116, %c0_117, %c0_118, %c0_119], %83 {strides = array<i32>} : memref<1x6x6x64xf32, #tpu.memory_space<vmem>>, vector<1x1x6x64xf32>,
    %cst_120 = arith.constant 0.000000e+00 : f32
    %85 = vector.broadcast %cst_120 : f32 to vector<1x1x6x64xf32>
    %c0_121 = arith.constant 0 : index
    %c5 = arith.constant 5 : index
    %c0_122 = arith.constant 0 : index
    %c0_123 = arith.constant 0 : index
    %86 = vector.load %arg19[%c0_121, %c5, %c0_122, %c0_123] : memref<1x6x6x64xf32, #tpu.memory_space<vmem>>, vector<1x1x6x64xf32>
    tpu.vector_store %arg19[%c0_121, %c5, %c0_122, %c0_123], %85 {strides = array<i32>} : memref<1x6x6x64xf32, #tpu.memory_space<vmem>>, vector<1x1x6x64xf32>,
    %cst_124 = arith.constant 0.000000e+00 : f32
    %87 = vector.broadcast %cst_124 : f32 to vector<1x6x1x64xf32>
    %c0_125 = arith.constant 0 : index
    %c0_126 = arith.constant 0 : index
    %c0_127 = arith.constant 0 : index
    %c0_128 = arith.constant 0 : index
    %88 = vector.load %arg19[%c0_125, %c0_126, %c0_127, %c0_128] : memref<1x6x6x64xf32, #tpu.memory_space<vmem>>, vector<1x6x1x64xf32>
    tpu.vector_store %arg19[%c0_125, %c0_126, %c0_127, %c0_128], %87 {strides = array<i32>} : memref<1x6x6x64xf32, #tpu.memory_space<vmem>>, vector<1x6x1x64xf32>,
    %cst_129 = arith.constant 0.000000e+00 : f32
    %89 = vector.broadcast %cst_129 : f32 to vector<1x6x1x64xf32>
    %c0_130 = arith.constant 0 : index
    %c0_131 = arith.constant 0 : index
    %c5_132 = arith.constant 5 : index
    %c0_133 = arith.constant 0 : index
    %90 = vector.load %arg19[%c0_130, %c0_131, %c5_132, %c0_133] : memref<1x6x6x64xf32, #tpu.memory_space<vmem>>, vector<1x6x1x64xf32>
    tpu.vector_store %arg19[%c0_130, %c0_131, %c5_132, %c0_133], %89 {strides = array<i32>} : memref<1x6x6x64xf32, #tpu.memory_space<vmem>>, vector<1x6x1x64xf32>,
    %c0_134 = arith.constant 0 : index
    %c1_135 = arith.constant 1 : index
    %c1_136 = arith.constant 1 : index
    %c0_137 = arith.constant 0 : index
    %91 = vector.load %arg19[%c0_134, %c1_135, %c1_136, %c0_137] : memref<1x6x6x64xf32, #tpu.memory_space<vmem>>, vector<1x4x4x64xf32>
    tpu.vector_store %arg19[%c0_134, %c1_135, %c1_136, %c0_137], %82 {strides = array<i32>} : memref<1x6x6x64xf32, #tpu.memory_space<vmem>>, vector<1x4x4x64xf32>,
    %c0_138 = arith.constant 0 : index
    %c0_139 = arith.constant 0 : index
    %c0_140 = arith.constant 0 : index
    %c0_141 = arith.constant 0 : index
    %92 = vector.load %arg19[%c0_138, %c0_139, %c0_140, %c0_141] : memref<1x6x6x64xf32, #tpu.memory_space<vmem>>, vector<1x4x4x64xf32>
    %c0_142 = arith.constant 0 : index
    %c0_143 = arith.constant 0 : index
    %c1_144 = arith.constant 1 : index
    %c0_145 = arith.constant 0 : index
    %93 = vector.load %arg19[%c0_142, %c0_143, %c1_144, %c0_145] : memref<1x6x6x64xf32, #tpu.memory_space<vmem>>, vector<1x4x4x64xf32>
    %c0_146 = arith.constant 0 : index
    %c0_147 = arith.constant 0 : index
    %c2_148 = arith.constant 2 : index
    %c0_149 = arith.constant 0 : index
    %94 = vector.load %arg19[%c0_146, %c0_147, %c2_148, %c0_149] : memref<1x6x6x64xf32, #tpu.memory_space<vmem>>, vector<1x4x4x64xf32>
    %95 = tpu.concatenate %92, %93, %94 in 3 : vector<1x4x4x64xf32>, vector<1x4x4x64xf32>, vector<1x4x4x64xf32> -> vector<1x4x4x192xf32>
    %96 = vector.shape_cast %95 : vector<1x4x4x192xf32> to vector<16x192xf32>
    %97 = arith.truncf %96 : vector<16x192xf32> to vector<16x192xbf16>
    %c0_150 = arith.constant 0 : index
    %c0_151 = arith.constant 0 : index
    %98 = vector.load %arg6[%c0_150, %c0_151] : memref<576x128xbf16, #tpu.memory_space<vmem>>, vector<192x128xbf16>
    %cst_152 = arith.constant dense<0.000000e+00> : vector<16x128xf32>
    %99 = tpu.matmul %97, %98, %cst_152 {dimension_numbers = #tpu.dot_dimension_numbers<[1], [0], [0], [1], [0, 0, 1, 1], [], []>} : vector<16x192xbf16>, vector<192x128xbf16>, vector<16x128xf32> -> vector<16x128xf32>
    %c0_153 = arith.constant 0 : index
    %c1_154 = arith.constant 1 : index
    %c0_155 = arith.constant 0 : index
    %c0_156 = arith.constant 0 : index
    %100 = vector.load %arg19[%c0_153, %c1_154, %c0_155, %c0_156] : memref<1x6x6x64xf32, #tpu.memory_space<vmem>>, vector<1x4x4x64xf32>
    %c0_157 = arith.constant 0 : index
    %c1_158 = arith.constant 1 : index
    %c1_159 = arith.constant 1 : index
    %c0_160 = arith.constant 0 : index
    %101 = vector.load %arg19[%c0_157, %c1_158, %c1_159, %c0_160] : memref<1x6x6x64xf32, #tpu.memory_space<vmem>>, vector<1x4x4x64xf32>
    %c0_161 = arith.constant 0 : index
    %c1_162 = arith.constant 1 : index
    %c2_163 = arith.constant 2 : index
    %c0_164 = arith.constant 0 : index
    %102 = vector.load %arg19[%c0_161, %c1_162, %c2_163, %c0_164] : memref<1x6x6x64xf32, #tpu.memory_space<vmem>>, vector<1x4x4x64xf32>
    %103 = tpu.concatenate %100, %101, %102 in 3 : vector<1x4x4x64xf32>, vector<1x4x4x64xf32>, vector<1x4x4x64xf32> -> vector<1x4x4x192xf32>
    %104 = vector.shape_cast %103 : vector<1x4x4x192xf32> to vector<16x192xf32>
    %105 = arith.truncf %104 : vector<16x192xf32> to vector<16x192xbf16>
    %c192_165 = arith.constant 192 : index
    %c0_166 = arith.constant 0 : index
    %106 = vector.load %arg6[%c192_165, %c0_166] : memref<576x128xbf16, #tpu.memory_space<vmem>>, vector<192x128xbf16>
    %cst_167 = arith.constant dense<0.000000e+00> : vector<16x128xf32>
    %107 = tpu.matmul %105, %106, %cst_167 {dimension_numbers = #tpu.dot_dimension_numbers<[1], [0], [0], [1], [0, 0, 1, 1], [], []>} : vector<16x192xbf16>, vector<192x128xbf16>, vector<16x128xf32> -> vector<16x128xf32>
    %108 = arith.addf %99, %107 : vector<16x128xf32>
    %c0_168 = arith.constant 0 : index
    %c2_169 = arith.constant 2 : index
    %c0_170 = arith.constant 0 : index
    %c0_171 = arith.constant 0 : index
    %109 = vector.load %arg19[%c0_168, %c2_169, %c0_170, %c0_171] : memref<1x6x6x64xf32, #tpu.memory_space<vmem>>, vector<1x4x4x64xf32>
    %c0_172 = arith.constant 0 : index
    %c2_173 = arith.constant 2 : index
    %c1_174 = arith.constant 1 : index
    %c0_175 = arith.constant 0 : index
    %110 = vector.load %arg19[%c0_172, %c2_173, %c1_174, %c0_175] : memref<1x6x6x64xf32, #tpu.memory_space<vmem>>, vector<1x4x4x64xf32>
    %c0_176 = arith.constant 0 : index
    %c2_177 = arith.constant 2 : index
    %c2_178 = arith.constant 2 : index
    %c0_179 = arith.constant 0 : index
    %111 = vector.load %arg19[%c0_176, %c2_177, %c2_178, %c0_179] : memref<1x6x6x64xf32, #tpu.memory_space<vmem>>, vector<1x4x4x64xf32>
    %112 = tpu.concatenate %109, %110, %111 in 3 : vector<1x4x4x64xf32>, vector<1x4x4x64xf32>, vector<1x4x4x64xf32> -> vector<1x4x4x192xf32>
    %113 = vector.shape_cast %112 : vector<1x4x4x192xf32> to vector<16x192xf32>
    %114 = arith.truncf %113 : vector<16x192xf32> to vector<16x192xbf16>
    %c384 = arith.constant 384 : index
    %c0_180 = arith.constant 0 : index
    %115 = vector.load %arg6[%c384, %c0_180] : memref<576x128xbf16, #tpu.memory_space<vmem>>, vector<192x128xbf16>
    %cst_181 = arith.constant dense<0.000000e+00> : vector<16x128xf32>
    %116 = tpu.matmul %114, %115, %cst_181 {dimension_numbers = #tpu.dot_dimension_numbers<[1], [0], [0], [1], [0, 0, 1, 1], [], []>} : vector<16x192xbf16>, vector<192x128xbf16>, vector<16x128xf32> -> vector<16x128xf32>
    %117 = arith.addf %108, %116 : vector<16x128xf32>
    %c0_182 = arith.constant 0 : index
    %c0_183 = arith.constant 0 : index
    %118 = vector.load %arg7[%c0_182, %c0_183] : memref<1x128xf32, #tpu.memory_space<vmem>>, vector<1x128xf32>
    %119 = vector.broadcast %118 : vector<1x128xf32> to vector<16x128xf32>
    %120 = arith.addf %117, %119 : vector<16x128xf32>
    %cst_184 = arith.constant 0.000000e+00 : f32
    %121 = vector.broadcast %cst_184 : f32 to vector<16x128xf32>
    %122 = arith.maximumf %120, %121 : vector<16x128xf32>
    %123 = vector.shape_cast %122 : vector<16x128xf32> to vector<4x4x128xf32>
    %124 = vector.shape_cast %123 : vector<4x4x128xf32> to vector<4x2x2x128xf32>
    %cst_185 = arith.constant dense<0xFF800000> : vector<4x2x128xf32>
    %125 = vector.multi_reduction <maximumf>, %124, %cst_185 [2] : vector<4x2x2x128xf32> to vector<4x2x128xf32>
    %126 = vector.shape_cast %125 : vector<4x2x128xf32> to vector<2x2x2x128xf32>
    %cst_186 = arith.constant dense<0xFF800000> : vector<2x2x128xf32>
    %127 = vector.multi_reduction <maximumf>, %126, %cst_186 [1] : vector<2x2x2x128xf32> to vector<2x2x128xf32>
    %128 = vector.shape_cast %127 : vector<2x2x128xf32> to vector<1x2x2x128xf32>
    %129 = vector.shape_cast %128 : vector<1x2x2x128xf32> to vector<4x128xf32>
    %130 = arith.truncf %129 : vector<4x128xf32> to vector<4x128xbf16>
    %c0_187 = arith.constant 0 : index
    %c0_188 = arith.constant 0 : index
    %131 = vector.load %arg8[%c0_187, %c0_188] : memref<128x256xbf16, #tpu.memory_space<vmem>>, vector<128x256xbf16>
    %cst_189 = arith.constant dense<0.000000e+00> : vector<4x256xf32>
    %132 = tpu.matmul %130, %131, %cst_189 {dimension_numbers = #tpu.dot_dimension_numbers<[1], [0], [0], [1], [0, 0, 1, 1], [], []>} : vector<4x128xbf16>, vector<128x256xbf16>, vector<4x256xf32> -> vector<4x256xf32>
    %c0_190 = arith.constant 0 : index
    %c0_191 = arith.constant 0 : index
    %133 = vector.load %arg9[%c0_190, %c0_191] : memref<1x256xf32, #tpu.memory_space<vmem>>, vector<1x256xf32>
    %134 = vector.broadcast %133 : vector<1x256xf32> to vector<4x256xf32>
    %135 = arith.addf %132, %134 : vector<4x256xf32>
    %cst_192 = arith.constant 0.000000e+00 : f32
    %136 = vector.broadcast %cst_192 : f32 to vector<4x256xf32>
    %137 = arith.maximumf %135, %136 : vector<4x256xf32>
    %138 = vector.extract_strided_slice %137 {offsets = [0, 0], sizes = [4, 64], strides = [1, 1]} : vector<4x256xf32> to vector<4x64xf32>
    %139 = vector.shape_cast %138 : vector<4x64xf32> to vector<4x1x64xf32>
    %140 = vector.extract_strided_slice %137 {offsets = [0, 64], sizes = [4, 64], strides = [1, 1]} : vector<4x256xf32> to vector<4x64xf32>
    %141 = vector.shape_cast %140 : vector<4x64xf32> to vector<4x1x64xf32>
    %142 = vector.extract_strided_slice %137 {offsets = [0, 128], sizes = [4, 64], strides = [1, 1]} : vector<4x256xf32> to vector<4x64xf32>
    %143 = vector.shape_cast %142 : vector<4x64xf32> to vector<4x1x64xf32>
    %144 = vector.extract_strided_slice %137 {offsets = [0, 192], sizes = [4, 64], strides = [1, 1]} : vector<4x256xf32> to vector<4x64xf32>
    %145 = vector.shape_cast %144 : vector<4x64xf32> to vector<4x1x64xf32>
    %146 = tpu.concatenate %139, %141, %143, %145 in 1 : vector<4x1x64xf32>, vector<4x1x64xf32>, vector<4x1x64xf32>, vector<4x1x64xf32> -> vector<4x4x64xf32>
    %147 = vector.shape_cast %146 : vector<4x4x64xf32> to vector<16x64xf32>
    %148 = arith.truncf %147 : vector<16x64xf32> to vector<16x64xbf16>
    %c0_193 = arith.constant 0 : index
    %c0_194 = arith.constant 0 : index
    %149 = vector.load %arg10[%c0_193, %c0_194] : memref<64x128xbf16, #tpu.memory_space<vmem>>, vector<64x128xbf16>
    %cst_195 = arith.constant dense<0.000000e+00> : vector<16x128xf32>
    %150 = tpu.matmul %148, %149, %cst_195 {dimension_numbers = #tpu.dot_dimension_numbers<[1], [0], [0], [1], [0, 0, 1, 1], [], []>} : vector<16x64xbf16>, vector<64x128xbf16>, vector<16x128xf32> -> vector<16x128xf32>
    %c0_196 = arith.constant 0 : index
    %c0_197 = arith.constant 0 : index
    %151 = vector.load %arg11[%c0_196, %c0_197] : memref<1x128xf32, #tpu.memory_space<vmem>>, vector<1x128xf32>
    %152 = vector.broadcast %151 : vector<1x128xf32> to vector<16x128xf32>
    %153 = arith.addf %150, %152 : vector<16x128xf32>
    %cst_198 = arith.constant 0.000000e+00 : f32
    %154 = vector.broadcast %cst_198 : f32 to vector<16x128xf32>
    %155 = arith.maximumf %153, %154 : vector<16x128xf32>
    %156 = vector.extract_strided_slice %155 {offsets = [0, 0], sizes = [16, 32], strides = [1, 1]} : vector<16x128xf32> to vector<16x32xf32>
    %157 = vector.shape_cast %156 : vector<16x32xf32> to vector<16x1x32xf32>
    %158 = vector.extract_strided_slice %155 {offsets = [0, 32], sizes = [16, 32], strides = [1, 1]} : vector<16x128xf32> to vector<16x32xf32>
    %159 = vector.shape_cast %158 : vector<16x32xf32> to vector<16x1x32xf32>
    %160 = vector.extract_strided_slice %155 {offsets = [0, 64], sizes = [16, 32], strides = [1, 1]} : vector<16x128xf32> to vector<16x32xf32>
    %161 = vector.shape_cast %160 : vector<16x32xf32> to vector<16x1x32xf32>
    %162 = vector.extract_strided_slice %155 {offsets = [0, 96], sizes = [16, 32], strides = [1, 1]} : vector<16x128xf32> to vector<16x32xf32>
    %163 = vector.shape_cast %162 : vector<16x32xf32> to vector<16x1x32xf32>
    %164 = tpu.concatenate %157, %159, %161, %163 in 1 : vector<16x1x32xf32>, vector<16x1x32xf32>, vector<16x1x32xf32>, vector<16x1x32xf32> -> vector<16x4x32xf32>
    %165 = vector.shape_cast %164 : vector<16x4x32xf32> to vector<64x32xf32>
    %166 = arith.truncf %165 : vector<64x32xf32> to vector<64x32xbf16>
    %c0_199 = arith.constant 0 : index
    %c0_200 = arith.constant 0 : index
    %167 = vector.load %arg12[%c0_199, %c0_200] : memref<32x64xbf16, #tpu.memory_space<vmem>>, vector<32x64xbf16>
    %cst_201 = arith.constant dense<0.000000e+00> : vector<64x64xf32>
    %168 = tpu.matmul %166, %167, %cst_201 {dimension_numbers = #tpu.dot_dimension_numbers<[1], [0], [0], [1], [0, 0, 1, 1], [], []>} : vector<64x32xbf16>, vector<32x64xbf16>, vector<64x64xf32> -> vector<64x64xf32>
    %c0_202 = arith.constant 0 : index
    %c0_203 = arith.constant 0 : index
    %169 = vector.load %arg13[%c0_202, %c0_203] : memref<1x64xf32, #tpu.memory_space<vmem>>, vector<1x64xf32>
    %170 = vector.broadcast %169 : vector<1x64xf32> to vector<64x64xf32>
    %171 = arith.addf %168, %170 : vector<64x64xf32>
    %cst_204 = arith.constant 0.000000e+00 : f32
    %172 = vector.broadcast %cst_204 : f32 to vector<64x64xf32>
    %173 = arith.maximumf %171, %172 : vector<64x64xf32>
    %174 = vector.extract_strided_slice %173 {offsets = [0, 0], sizes = [64, 16], strides = [1, 1]} : vector<64x64xf32> to vector<64x16xf32>
    %175 = vector.shape_cast %174 : vector<64x16xf32> to vector<64x1x16xf32>
    %176 = vector.extract_strided_slice %173 {offsets = [0, 16], sizes = [64, 16], strides = [1, 1]} : vector<64x64xf32> to vector<64x16xf32>
    %177 = vector.shape_cast %176 : vector<64x16xf32> to vector<64x1x16xf32>
    %178 = vector.extract_strided_slice %173 {offsets = [0, 32], sizes = [64, 16], strides = [1, 1]} : vector<64x64xf32> to vector<64x16xf32>
    %179 = vector.shape_cast %178 : vector<64x16xf32> to vector<64x1x16xf32>
    %180 = vector.extract_strided_slice %173 {offsets = [0, 48], sizes = [64, 16], strides = [1, 1]} : vector<64x64xf32> to vector<64x16xf32>
    %181 = vector.shape_cast %180 : vector<64x16xf32> to vector<64x1x16xf32>
    %182 = tpu.concatenate %175, %177, %179, %181 in 1 : vector<64x1x16xf32>, vector<64x1x16xf32>, vector<64x1x16xf32>, vector<64x1x16xf32> -> vector<64x4x16xf32>
    %183 = vector.shape_cast %182 : vector<64x4x16xf32> to vector<256x16xf32>
    %184 = tpu.transpose %183, [1, 0] : vector<256x16xf32> -> vector<16x256xf32>
    %185 = arith.truncf %184 : vector<16x256xf32> to vector<16x256xbf16>
    %c0_205 = arith.constant 0 : index
    %c0_206 = arith.constant 0 : index
    %186 = vector.load %arg14[%c0_205, %c0_206] : memref<16x16xbf16, #tpu.memory_space<vmem>>, vector<16x16xbf16>
    %cst_207 = arith.constant dense<0.000000e+00> : vector<16x256xf32>
    %187 = tpu.matmul %186, %185, %cst_207 {dimension_numbers = #tpu.dot_dimension_numbers<[1], [0], [0], [1], [0, 0, 1, 1], [], []>} : vector<16x16xbf16>, vector<16x256xbf16>, vector<16x256xf32> -> vector<16x256xf32>
    %c0_208 = arith.constant 0 : index
    %c0_209 = arith.constant 0 : index
    %188 = vector.load %arg15[%c0_208, %c0_209] : memref<16x1xf32, #tpu.memory_space<vmem>>, vector<16x1xf32>
    %189 = vector.broadcast %188 : vector<16x1xf32> to vector<16x256xf32>
    %190 = arith.addf %187, %189 : vector<16x256xf32>
    %c0_210 = arith.constant 0 : index
    %c0_211 = arith.constant 0 : index
    %191 = vector.load %arg16[%c0_210, %c0_211] : memref<256x256xf32, #tpu.memory_space<vmem>>, vector<256x256xf32>
    %cst_212 = arith.constant dense<0.000000e+00> : vector<16x256xf32>
    %192 = tpu.matmul %190, %191, %cst_212 {dimension_numbers = #tpu.dot_dimension_numbers<[1], [0], [0], [1], [0, 0, 1, 1], [], []>} : vector<16x256xf32>, vector<256x256xf32>, vector<16x256xf32> -> vector<16x256xf32>
    %193 = vector.extract_strided_slice %192 {offsets = [0, 0], sizes = [9, 256], strides = [1, 1]} : vector<16x256xf32> to vector<9x256xf32>
    %c0_213 = arith.constant 0 : index
    %c0_214 = arith.constant 0 : index
    %c0_215 = arith.constant 0 : index
    %194 = vector.load %arg17[%c0_213, %c0_214, %c0_215] : memref<1x9x256xf32, #tpu.memory_space<vmem>>, vector<1x9x256xf32>
    %195 = vector.shape_cast %194 : vector<1x9x256xf32> to vector<9x256xf32>
    %196 = vector.shape_cast %193 : vector<9x256xf32> to vector<1x9x256xf32>
    tpu.vector_store %arg17[%c0_213, %c0_214, %c0_215], %196 {strides = array<i32>} : memref<1x9x256xf32, #tpu.memory_space<vmem>>, vector<1x9x256xf32>,
    return
  }
  func.func @transform_0(%arg0: i32) -> (i32, i32, i32, i32) {
    %c0_i32 = arith.constant 0 : i32
    %c0_i32_0 = arith.constant 0 : i32
    %c0_i32_1 = arith.constant 0 : i32
    %c0_i32_2 = arith.constant 0 : i32
    return %arg0, %c0_i32, %c0_i32_0, %c0_i32_1 : i32, i32, i32, i32
  }
  func.func @transform_1(%arg0: i32) -> (i32, i32) {
    %c0_i32 = arith.constant 0 : i32
    %c0_i32_0 = arith.constant 0 : i32
    %c0_i32_1 = arith.constant 0 : i32
    return %c0_i32, %c0_i32_0 : i32, i32
  }
  func.func @transform_2(%arg0: i32) -> (i32, i32) {
    %c0_i32 = arith.constant 0 : i32
    %c0_i32_0 = arith.constant 0 : i32
    %c0_i32_1 = arith.constant 0 : i32
    return %c0_i32, %c0_i32_0 : i32, i32
  }
  func.func @transform_3(%arg0: i32) -> (i32, i32) {
    %c0_i32 = arith.constant 0 : i32
    %c0_i32_0 = arith.constant 0 : i32
    %c0_i32_1 = arith.constant 0 : i32
    return %c0_i32, %c0_i32_0 : i32, i32
  }
  func.func @transform_4(%arg0: i32) -> (i32, i32) {
    %c0_i32 = arith.constant 0 : i32
    %c0_i32_0 = arith.constant 0 : i32
    %c0_i32_1 = arith.constant 0 : i32
    return %c0_i32, %c0_i32_0 : i32, i32
  }
  func.func @transform_5(%arg0: i32) -> (i32, i32) {
    %c0_i32 = arith.constant 0 : i32
    %c0_i32_0 = arith.constant 0 : i32
    %c0_i32_1 = arith.constant 0 : i32
    return %c0_i32, %c0_i32_0 : i32, i32
  }
  func.func @transform_6(%arg0: i32) -> (i32, i32) {
    %c0_i32 = arith.constant 0 : i32
    %c0_i32_0 = arith.constant 0 : i32
    %c0_i32_1 = arith.constant 0 : i32
    return %c0_i32, %c0_i32_0 : i32, i32
  }
  func.func @transform_7(%arg0: i32) -> (i32, i32) {
    %c0_i32 = arith.constant 0 : i32
    %c0_i32_0 = arith.constant 0 : i32
    %c0_i32_1 = arith.constant 0 : i32
    return %c0_i32, %c0_i32_0 : i32, i32
  }
  func.func @transform_8(%arg0: i32) -> (i32, i32) {
    %c0_i32 = arith.constant 0 : i32
    %c0_i32_0 = arith.constant 0 : i32
    %c0_i32_1 = arith.constant 0 : i32
    return %c0_i32, %c0_i32_0 : i32, i32
  }
  func.func @transform_9(%arg0: i32) -> (i32, i32) {
    %c0_i32 = arith.constant 0 : i32
    %c0_i32_0 = arith.constant 0 : i32
    %c0_i32_1 = arith.constant 0 : i32
    return %c0_i32, %c0_i32_0 : i32, i32
  }
  func.func @transform_10(%arg0: i32) -> (i32, i32) {
    %c0_i32 = arith.constant 0 : i32
    %c0_i32_0 = arith.constant 0 : i32
    %c0_i32_1 = arith.constant 0 : i32
    return %c0_i32, %c0_i32_0 : i32, i32
  }
  func.func @transform_11(%arg0: i32) -> (i32, i32) {
    %c0_i32 = arith.constant 0 : i32
    %c0_i32_0 = arith.constant 0 : i32
    %c0_i32_1 = arith.constant 0 : i32
    return %c0_i32, %c0_i32_0 : i32, i32
  }
  func.func @transform_12(%arg0: i32) -> (i32, i32) {
    %c0_i32 = arith.constant 0 : i32
    %c0_i32_0 = arith.constant 0 : i32
    %c0_i32_1 = arith.constant 0 : i32
    return %c0_i32, %c0_i32_0 : i32, i32
  }
  func.func @transform_13(%arg0: i32) -> (i32, i32) {
    %c0_i32 = arith.constant 0 : i32
    %c0_i32_0 = arith.constant 0 : i32
    %c0_i32_1 = arith.constant 0 : i32
    return %c0_i32, %c0_i32_0 : i32, i32
  }
  func.func @transform_14(%arg0: i32) -> (i32, i32) {
    %c0_i32 = arith.constant 0 : i32
    %c0_i32_0 = arith.constant 0 : i32
    %c0_i32_1 = arith.constant 0 : i32
    return %c0_i32, %c0_i32_0 : i32, i32
  }
  func.func @transform_15(%arg0: i32) -> (i32, i32) {
    %c0_i32 = arith.constant 0 : i32
    %c0_i32_0 = arith.constant 0 : i32
    %c0_i32_1 = arith.constant 0 : i32
    return %c0_i32, %c0_i32_0 : i32, i32
  }
  func.func @transform_16(%arg0: i32) -> (i32, i32, i32) {
    %c0_i32 = arith.constant 0 : i32
    %c0_i32_0 = arith.constant 0 : i32
    %c0_i32_1 = arith.constant 0 : i32
    return %arg0, %c0_i32, %c0_i32_0 : i32, i32, i32
  }
}

</mosaic_0001>

<bundles_post_ra>
// kernel: cnn_7_layers.1
= control target key start
LH: loop header
LB: loop body
LE: loop exit
PB: predicated region body
PF: predicated region fallthrough
CT: control target
= control target key end

     0   :  { %s9106_s21 = smov 0   ;;  %s12602_s0 = inlined_call_operand.vmem [shape: f32[2,18,18,8], index: 0, kind: input, shape index: {}]   ;;  %s12603_s1 = inlined_call_operand.vmem [shape: bf16[72,32], index: 1, kind: input, shape index: {}]   ;;  %s12604_s2 = inlined_call_operand.vmem [shape: f32[1,32], index: 2, kind: input, shape index: {}]   ;;  %s12605_s3 = inlined_call_operand.vmem [shape: bf16[288,64], index: 3, kind: input, shape index: {}]   ;;  %s12606_s4 = inlined_call_operand.vmem [shape: f32[1,64], index: 4, kind: input, shape index: {}]   ;;  %s12607_s5 = inlined_call_operand.vmem [shape: bf16[576,128], index: 5, kind: input, shape index: {}]   ;;  %s12608_s6 = inlined_call_operand.vmem [shape: f32[1,128], index: 6, kind: input, shape index: {}]   ;;  %s12609_s7 = inlined_call_operand.vmem [shape: bf16[128,256], index: 7, kind: input, shape index: {}]   ;;  %s12610_s8 = inlined_call_operand.vmem [shape: f32[1,256], index: 8, kind: input, shape index: {}]   ;;  %s12611_s9 = inlined_call_operand.vmem [shape: bf16[64,128], index: 9, kind: input, shape index: {}]   ;;  %s12612_s10 = inlined_call_operand.vmem [shape: f32[1,128], index: 10, kind: input, shape index: {}]   ;;  %s12613_s11 = inlined_call_operand.vmem [shape: bf16[32,64], index: 11, kind: input, shape index: {}]   ;;  %s12614_s12 = inlined_call_operand.vmem [shape: f32[1,64], index: 12, kind: input, shape index: {}]   ;;  %s12615_s13 = inlined_call_operand.vmem [shape: bf16[16,16], index: 13, kind: input, shape index: {}]   ;;  %s12616_s14 = inlined_call_operand.vmem [shape: f32[16,1], index: 14, kind: input, shape index: {}]   ;;  %s12617_s15 = inlined_call_operand.vmem [shape: f32[256,256], index: 15, kind: input, shape index: {}]   ;;  %s12618_s16 = inlined_call_operand.vmem [shape: f32[2,9,256], index: 16, kind: output, shape index: {}]  }
   0x1   :  { %12619 = sst [smem:[#allocation4_spill]] %s12602_s0 }
   0x2 LB: > { %s7660_s22 = sadd.s32 4294967295, %s9010_s21   ;;  %p7664_p0 = scmp.ge.s32.totalorder %s9010_s21, 1  ;;  %s9010_s21 = sphi %s9106_s21, %s26_s21  }
   0x3   : > { %p462_p1 = scmp.lt.s32.totalorder %s9010_s21, 3 }
   0x5   : > { %p463_p2 = pnand %p7664_p0, %p462_p1 }
   0x6   : > { %p512_p3 = scmp.lt.s32.totalorder (!%p463_p2), %s7660_s22, 1  ;;  %s12620_s26 = sld [smem:[#allocation4_spill]] (!%p463_p2) }
   0x7   : > { %466 = sbr.rel (%p463_p2) target bundleno = 3177 (0xc69), region = 84  ;;  %s9012_s28 = smov (!%p463_p2), 8  }
   0x8   : > { %s9013_s29 = smov (!%p463_p2), 16   ;;  %s9015_s19 = smov (!%p463_p2), 32  }
   0x9   : > { %s9017_s30 = smov (!%p463_p2), 96   ;;  %s9018_s18 = smov (!%p463_p2), 112  }
   0xa   : > { %s9019_s20 = smov (!%p463_p2), 80  }
   0xc   : > { %s12622_s22 = smov (!%p512_p3, %s7660_s22), 1  ;;  %v959_v48 = vld [vmem:[%s12603_s1 + $0x8] sm:$0xf]  ;;  %vm1454_vm0 = vcmask 1043456   ;;  %v8253_v52 = vld [vmem:[%s12603_s1] sm:$0xff]  ;;  %vm875_vm1 = vcmask 64512  }
   0xd   : > { %s8333_s23 = smul.u32 432, %s12622_s22  ;;  %v1552_v49 = vunpack.c.l.b16 %v959_v48  ;;  %v2131_v53 = vld [vmem:[%s12603_s1 + $0x20] sm:$0xf]  ;;  %v1395_v55 = vld [vmem:[%s12603_s1 + $0x14] sm:$0xf]  ;;  %vm908_vm2 = vcmask 130048  }
   0xe   : > { %v2137_v54 = vunpack.c.l.b16 %v2131_v53  ;;  %v1401_v56 = vunpack.c.l.b16 %v1395_v55  ;;  %vm1405_vm3 = vcmask 195584   ;;  %vm2605_vm4 = vcmask 254976   ;;  %s8252_s0 = sshll.u32 %s12622_s22, 5 }
   0xf   : > { %s9120_s27 = scalar_lea.vmem %s12620_s26, %s8333_s23  ;;  %v1554_v50 = vpack.c.b16 %v1552_v49, %v1552_v49  ;;  %vm3502_vm5 = vcmask 261120   ;;  %vm3785_vm6 = vcmask 1041409   ;;  %vm3787_vm7 = vcmask 1042434  }
  0x10   : > { %v7836_v0 = vld [vmem:[%s9120_s27 + $0x31] sm:$0xff]  ;;  %v7837_v1 = vld [vmem:[%s9120_s27 + $0x39] sm:$0xff]  ;;  %v555_v2 = vld [vmem:[%s9120_s27 + $0x1] sm:$0xff]  ;;  %v2139_v57 = vpack.c.b16 %v2137_v54, %v2137_v54  ;;  %v1403_v58 = vpack.c.b16 %v1401_v56, %v1401_v56  ;;  %vm3789_vm8 = vcmask 1043459   ;;  %vm3791_vm9 = vcmask 1044484  }
  0x11   : > { %v8351_v3 = vpack.i.bf16 %v7837_v1, %v7836_v0  ;;  %v556_v4 = vld [vmem:[%s9120_s27 + $0x9] sm:$0xff]  ;;  %v7868_v6 = vld [vmem:[%s9120_s27 + $0x32] sm:$0xff]  ;;  %v7869_v7 = vld [vmem:[%s9120_s27 + $0x3a] sm:$0xff]  ;;  %v1605_v51 = vsel %vm1454_vm0, %v1554_v50, 0  ;;  %vm3793_vm10 = vcmask 1045509   ;;  %vm3795_vm11 = vcmask 1046534  }
  0x12   : > { %v8361_v5 = vpack.i.bf16 %v556_v4, %v555_v2  ;;  %v587_v8 = vld [vmem:[%s9120_s27 + $0x2] sm:$0xff]  ;;  %v7700_v9 = vld [vmem:[%s9120_s27 + $0x19] sm:$0xff]  ;;  %v588_v11 = vld [vmem:[%s9120_s27 + $0xa] sm:$0xff]  ;;  %v8356_v13 = vpack.i.bf16 %v7869_v7, %v7868_v6  ;;  %1613 = vmatpush.bf16.msra.mxu1 %v1605_v51  ;;  %v2190_v61 = vsel %vm1454_vm0, %v2139_v57, 0  ;;  %v1456_v0 = vsel %vm1454_vm0, %v1403_v58, 0 }
  0x13   : > { %8352 = vrot.lane.b32.xlu0 %v8351_v3, %s9012_s28  ;;  %v7701_v10 = vld [vmem:[%s9120_s27 + $0x21] sm:$0xff]  ;;  %v8371_v12 = vpack.i.bf16 %v588_v11, %v587_v8  ;;  %v7838_v17 = vld [vmem:[%s9120_s27 + $0x49] sm:$0xff]  ;;  %v7839_v18 = vld [vmem:[%s9120_s27 + $0x51] sm:$0xff]  ;;  %2198 = vmatpush.bf16.msra.mxu2 %v2190_v61  ;;  %vm3797_vm12 = vcmask 1047559   ;;  %vm3700_vm13 = vcmask 253952   ;;  %vm3961_vm14 = vcmask 523264  }
  0x14   : > { %8362 = vrot.lane.b32.xlu1 %v8361_v5, %s9012_s28  ;;  %v8366_v14 = vpack.i.bf16 %v7701_v10, %v7700_v9  ;;  %v589_v15 = vld [vmem:[%s9120_s27 + $0x1a] sm:$0xff]  ;;  %v590_v16 = vld [vmem:[%s9120_s27 + $0x22] sm:$0xff]  ;;  %v7870_v19 = vld [vmem:[%s9120_s27 + $0x4a] sm:$0xff]  ;;  %v8381_v22 = vpack.i.bf16 %v7839_v18, %v7838_v17  ;;  %1464 = vmatpush.bf16.msra.mxu0 %v1456_v0  ;;  %vm4142_vm15 = vcmask 785408  }
  0x15   : > { %8372 = vrot.lane.b32.xlu2 %v8371_v12, %s9013_s29  ;;  %v7871_v20 = vld [vmem:[%s9120_s27 + $0x52] sm:$0xff]  ;;  %v8401_v21 = vpack.i.bf16 %v590_v16, %v589_v15  ;;  %v7840_v24 = vld [vmem:[%s9120_s27 + $0x61] sm:$0xff]  ;;  %v7841_v25 = vld [vmem:[%s9120_s27 + $0x69] sm:$0xff] }
  0x16   : > { %v8386_v23 = vpack.i.bf16 %v7871_v20, %v7870_v19  ;;  %v7872_v26 = vld [vmem:[%s9120_s27 + $0x62] sm:$0xff]  ;;  %v7873_v27 = vld [vmem:[%s9120_s27 + $0x6a] sm:$0xff]  ;;  %v8411_v28 = vpack.i.bf16 %v7841_v25, %v7840_v24  ;;  %v7842_v30 = vld [vmem:[%s9120_s27 + $0x79] sm:$0xff]  ;;  %1614 = vmatpush.bf16.msra.mxu1 %v8253_v52 }
  0x17   : > { %v8416_v29 = vpack.i.bf16 %v7873_v27, %v7872_v26  ;;  %v7843_v31 = vld [vmem:[%s9120_s27 + $0x81] sm:$0xff]  ;;  %v7844_v36 = vld [vmem:[%s9120_s27 + $0x91] sm:$0xff]  ;;  %v7845_v37 = vld [vmem:[%s9120_s27 + $0x99] sm:$0xff] }
  0x18   : > { %v7874_v32 = vld [vmem:[%s9120_s27 + $0x7a] sm:$0xff]  ;;  %v7875_v33 = vld [vmem:[%s9120_s27 + $0x82] sm:$0xff]  ;;  %v8441_v34 = vpack.i.bf16 %v7843_v31, %v7842_v30  ;;  %v7876_v38 = vld [vmem:[%s9120_s27 + $0x92] sm:$0xff]  ;;  %v8471_v40 = vpack.i.bf16 %v7845_v37, %v7844_v36 }
  0x19   : > { %v8446_v35 = vpack.i.bf16 %v7875_v33, %v7874_v32  ;;  %v7877_v39 = vld [vmem:[%s9120_s27 + $0x9a] sm:$0xff]  ;;  %v7846_v42 = vld [vmem:[%s9120_s27 + $0xa9] sm:$0xff]  ;;  %v7847_v43 = vld [vmem:[%s9120_s27 + $0xb1] sm:$0xff] }
  0x1a   : > { %v8476_v41 = vpack.i.bf16 %v7877_v39, %v7876_v38  ;;  %v7878_v44 = vld [vmem:[%s9120_s27 + $0xaa] sm:$0xff]  ;;  %v7879_v45 = vld [vmem:[%s9120_s27 + $0xb2] sm:$0xff]  ;;  %v9183_v46 = vpack.i.bf16 %v7847_v43, %v7846_v42  ;;  %v7848_v59 = vld [vmem:[%s9120_s27 + $0xc1] sm:$0xff] }
  0x1b   : > { %8357 = vrot.lane.b32.xlu0 %v8356_v13, %s9013_s29  ;;  %v9185_v47 = vpack.i.bf16 %v7879_v45, %v7878_v44  ;;  %v7849_v60 = vld [vmem:[%s9120_s27 + $0xc9] sm:$0xff]  ;;  %v8255_v2 = vld [vmem:[%s12603_s1 + $0x18] sm:$0xff]  ;;  %v7851_v8 = vld [vmem:[%s9120_s27 + $0xe1] sm:$0xff] }
  0x1c   : > { %8367 = vrot.lane.b32.xlu1 %v8366_v14, %s9012_s28  ;;  %v7880_v62 = vld [vmem:[%s9120_s27 + $0xc2] sm:$0xff]  ;;  %v7881_v63 = vld [vmem:[%s9120_s27 + $0xca] sm:$0xff]  ;;  %v9214_v1 = vpack.i.bf16 %v7849_v60, %v7848_v59  ;;  %2199 = vmatpush.bf16.msra.mxu2 %v8255_v2  ;;  %v7850_v7 = vld [vmem:[%s9120_s27 + $0xd9] sm:$0xff] }
  0x1d   : > { %8377 = vrot.lane.b32.xlu2 %v8401_v21, %s9013_s29  ;;  %v9222_v4 = vpack.i.bf16 %v7881_v63, %v7880_v62  ;;  %v7882_v9 = vld [vmem:[%s9120_s27 + $0xda] sm:$0xff]  ;;  %v7883_v10 = vld [vmem:[%s9120_s27 + $0xe2] sm:$0xff]  ;;  %v9239_v11 = vpack.i.bf16 %v7851_v8, %v7850_v7  ;;  %v7852_v26 = vld [vmem:[%s9120_s27 + $0xf1] sm:$0xff] }
  0x1e   : > { %v9241_v12 = vpack.i.bf16 %v7883_v10, %v7882_v9  ;;  %v523_v18 = vld [vmem:[%s9120_s27] sm:$0xff]  ;;  %v524_v19 = vld [vmem:[%s9120_s27 + $0x8] sm:$0xff]  ;;  %v9268_v32 = vld [vmem:[%s9120_s27 + $0x30] sm:$0xff] }
  0x1f   : > { %v7853_v27 = vld [vmem:[%s9120_s27 + $0xf9] sm:$0xff]  ;;  %v9305_v63 = vld [vmem:[%s9120_s27 + $0x48] sm:$0xff]  ;;  %v9308_v0 = vld [vmem:[%s9120_s27 + $0x50] sm:$0xff] }
  0x20   : > { %v9271_v33 = vld [vmem:[%s9120_s27 + $0x38] sm:$0xff]  ;;  %v7669_v44 = vld [vmem:[%s9120_s27 + $0x20] sm:$0xff]  ;;  %v7854_v9 = vld [vmem:[%s9120_s27 + $0x109] sm:$0xff] }
  0x21   : > { %v7884_v36 = vld [vmem:[%s9120_s27 + $0xf2] sm:$0xff]  ;;  %v7885_v37 = vld [vmem:[%s9120_s27 + $0xfa] sm:$0xff] }
  0x22   : > { %v7668_v43 = vld [vmem:[%s9120_s27 + $0x18] sm:$0xff]  ;;  %v9288_v51 = vpack.i.bf16 %v7885_v37, %v7884_v36 }
  0x23   : > { %8382 = vrot.lane.b32.xlu0 %v8381_v22, %s9012_s28  ;;  %v7855_v10 = vld [vmem:[%s9120_s27 + $0x111] sm:$0xff] }
  0x24   : > { %8387 = vrot.lane.b32.xlu1 %v8386_v23, %s9013_s29 }
  0x25   : > { %8392 = vrot.lane.b32.xlu2 %v8366_v14, %s9012_s28 }
  0x2b   : > { %8397 = vrot.lane.b32.xlu0 %v8351_v3, %s9012_s28 }
  0x2c   : > { %8402 = vrot.lane.b32.xlu1 %v8401_v21, %s9013_s29 }
  0x2d   : > { %8407 = vrot.lane.b32.xlu2 %v8356_v13, %s9013_s29 }
  0x33   : > { %8412 = vrot.lane.b32.xlu0 %v8411_v28, %s9012_s28 }
  0x34   : > { %8417 = vrot.lane.b32.xlu1 %v8416_v29, %s9013_s29 }
  0x35   : > { %8422 = vrot.lane.b32.xlu2 %v8351_v3, %s9012_s28  ;;  %v8254_v3 = vld [vmem:[%s12603_s1 + $0xc] sm:$0xff] }
  0x36   : > { %1465 = vmatpush.bf16.msra.mxu0 %v8254_v3 }
  0x3b   : > { %8427 = vrot.lane.b32.xlu0 %v8381_v22, %s9012_s28 }
  0x3c   : > { %8432 = vrot.lane.b32.xlu1 %v8356_v13, %s9013_s29 }
  0x3d   : > { %8437 = vrot.lane.b32.xlu2 %v8386_v23, %s9013_s29 }
  0x43   : > { %8442 = vrot.lane.b32.xlu0 %v8441_v34, %s9012_s28 }
  0x44   : > { %8447 = vrot.lane.b32.xlu1 %v8446_v35, %s9013_s29 }
  0x45   : > { %8452 = vrot.lane.b32.xlu2 %v8381_v22, %s9012_s28 }
  0x4b   : > { %8457 = vrot.lane.b32.xlu0 %v8411_v28, %s9012_s28 }
  0x4c   : > { %8462 = vrot.lane.b32.xlu1 %v8386_v23, %s9013_s29 }
  0x4d   : > { %8467 = vrot.lane.b32.xlu2 %v8416_v29, %s9013_s29 }
  0x53   : > { %8472 = vrot.lane.b32.xlu0 %v8471_v40, %s9012_s28 }
  0x54   : > { %8477 = vrot.lane.b32.xlu1 %v8476_v41, %s9013_s29 }
  0x55   : > { %8482 = vrot.lane.b32.xlu2 %v8411_v28, %s9012_s28 }
  0x5b   : > { %8487 = vrot.lane.b32.xlu0 %v8441_v34, %s9012_s28 }
  0x5c   : > { %8492 = vrot.lane.b32.xlu1 %v8416_v29, %s9013_s29 }
  0x5d   : > { %8497 = vrot.lane.b32.xlu2 %v8446_v35, %s9013_s29 }
  0x63   : > { %8502 = vrot.lane.b32.xlu0 %v9183_v46, %s9012_s28 }
  0x64   : > { %8507 = vrot.lane.b32.xlu1 %v9185_v47, %s9013_s29 }
  0x65   : > { %8512 = vrot.lane.b32.xlu2 %v8441_v34, %s9012_s28 }
  0x6b   : > { %8517 = vrot.lane.b32.xlu0 %v8471_v40, %s9012_s28 }
  0x6c   : > { %8522 = vrot.lane.b32.xlu1 %v8446_v35, %s9013_s29  ;;  %v9274_v35 = vpack.i.bf16 %v7853_v27, %v7852_v26 }
  0x6d   : > { %8527 = vrot.lane.b32.xlu2 %v8476_v41, %s9013_s29 }
  0x6f   : > { %v8373_v5 = vpop.permute.xlu2 %8372 }
  0x70   : > { %v8375_v16 = vunpack.i.h.bf16 %v8373_v5  ;;  %v8374_v17 = vunpack.i.l.bf16 %v8373_v5 }
  0x73   : > { %8532 = vrot.lane.b32.xlu0 %v9214_v1, %s9012_s28 }
  0x74   : > { %8537 = vrot.lane.b32.xlu1 %v9222_v4, %s9013_s29 }
  0x75   : > { %8542 = vrot.lane.b32.xlu2 %v8471_v40, %s9012_s28 }
  0x77   : > { %v9230_v6 = vpop.permute.xlu2 %8377 }
  0x78   : > { %v8379_v42 = vunpack.i.l.bf16 %v9230_v6 }
  0x7b   : > { %8547 = vrot.lane.b32.xlu0 %v9183_v46, %s9012_s28 }
  0x7c   : > { %8552 = vrot.lane.b32.xlu1 %v8476_v41, %s9013_s29  ;;  %v8380_v41 = vunpack.i.h.bf16 %v9230_v6 }
  0x7d   : > { %8557 = vrot.lane.b32.xlu2 %v9185_v47, %s9013_s29 }
  0x7f   : > { %v9245_v13 = vpop.permute.xlu2 %8392 }
  0x80   : > { %v8394_v8 = vunpack.i.l.bf16 %v9245_v13 }
  0x83   : > { %8562 = vrot.lane.b32.xlu0 %v9239_v11, %s9012_s28 }
  0x84   : > { %8567 = vrot.lane.b32.xlu1 %v9241_v12, %s9013_s29 }
  0x85   : > { %v8353_v14 = vpop.permute.xlu0 %8352  ;;  %8572 = vrot.lane.b32.xlu2 %v9183_v46, %s9012_s28 }
  0x86   : > { %v8363_v15 = vpop.permute.xlu1 %8362  ;;  %v8355_v29 = vunpack.i.h.bf16 %v8353_v14  ;;  %v8354_v30 = vunpack.i.l.bf16 %v8353_v14  ;;  %v8395_v14 = vunpack.i.h.bf16 %v9245_v13 }
  0x87   : > { %v8365_v20 = vunpack.i.h.bf16 %v8363_v15  ;;  %v8364_v21 = vunpack.i.l.bf16 %v8363_v15  ;;  %v9261_v28 = vpop.permute.xlu2 %8407  ;;  %v7887_v15 = vld [vmem:[%s9120_s27 + $0x112] sm:$0xff] }
  0x88   : > { %v2050_v48 = vsel %vm875_vm1, %v9271_v33, %v8355_v29  ;;  %v879_v27 = vsel %vm875_vm1, %v7669_v44, %v8395_v14 }
  0x89   : > { %v876_v22 = vsel %vm875_vm1, %v523_v18, %v8364_v21  ;;  %v877_v23 = vsel %vm875_vm1, %v524_v19, %v8365_v20  ;;  %v8409_v18 = vunpack.i.l.bf16 %v9261_v28 }
  0x8a   : > { %v909_v24 = vsel %vm908_vm2, %v876_v22, %v8374_v17  ;;  %v910_v25 = vsel %vm908_vm2, %v877_v23, %v8375_v16  ;;  %v8410_v17 = vunpack.i.h.bf16 %v9261_v28 }
  0x8b   : > { %8577 = vrot.lane.b32.xlu0 %v9214_v1, %s9012_s28  ;;  %v941_v31 = vpack.c.bf16 %v910_v25, %v909_v24  ;;  %v9332_v24 = vpack.i.bf16 %v7855_v10, %v7854_v9 }
  0x8c   : > { %8582 = vrot.lane.b32.xlu1 %v9185_v47, %s9013_s29  ;;  %v2049_v47 = vsel %vm875_vm1, %v9268_v32, %v8354_v30 }
  0x8d   : > { %7788 = vmatmul.msk.bf16.vlgmr.msra.gmra.mxu1 %vm1405_vm3, %v941_v31  ;;  %v8358_v34 = vpop.permute.xlu0 %8357  ;;  %8587 = vrot.lane.b32.xlu2 %v9222_v4, %s9013_s29 }
  0x8e   : > { %v8360_v38 = vunpack.i.h.bf16 %v8358_v34  ;;  %v8359_v39 = vunpack.i.l.bf16 %v8358_v34  ;;  %v8368_v40 = vpop.permute.xlu1 %8367 }
  0x8f   : > { %v8370_v45 = vunpack.i.h.bf16 %v8368_v40  ;;  %v8369_v46 = vunpack.i.l.bf16 %v8368_v40  ;;  %v9296_v57 = vpop.permute.xlu2 %8422 }
  0x90   : > { %v2081_v49 = vsel %vm908_vm2, %v2049_v47, %v8359_v39  ;;  %v2082_v50 = vsel %vm908_vm2, %v2050_v48, %v8360_v38 }
  0x91   : > { %v2113_v52 = vpack.c.bf16 %v2082_v50, %v2081_v49  ;;  %v1313_v53 = vsel %vm875_vm1, %v7668_v43, %v8369_v46  ;;  %v1314_v54 = vsel %vm875_vm1, %v7669_v44, %v8370_v45  ;;  %v9358_v45 = vld [vmem:[%s9120_s27 + $0x60] sm:$0xff]  ;;  %v9361_v46 = vld [vmem:[%s9120_s27 + $0x68] sm:$0xff] }
  0x92   : > { %v1345_v55 = vsel %vm908_vm2, %v1313_v53, %v8379_v42  ;;  %v1346_v56 = vsel %vm908_vm2, %v1314_v54, %v8380_v41  ;;  %v8424_v53 = vunpack.i.l.bf16 %v9296_v57  ;;  %v7856_v54 = vld [vmem:[%s9120_s27 + $0x121] sm:$0xff] }
  0x93   : > { %7904 = vmatmul.msk.bf16.vlgmr.msra.gmra.mxu2 %vm1405_vm3, %v2113_v52  ;;  %8592 = vrot.lane.b32.xlu0 %v9274_v35, %s9012_s28  ;;  %v1377_v58 = vpack.c.bf16 %v1346_v56, %v1345_v55  ;;  %v7857_v55 = vld [vmem:[%s9120_s27 + $0x129] sm:$0xff]  ;;  %v8425_v56 = vunpack.i.h.bf16 %v9296_v57 }
  0x94   : > { %8597 = vrot.lane.b32.xlu1 %v9288_v51, %s9013_s29 }
  0x95   : > { %7768 = vmatmul.msk.bf16.vlgmr.msra.gmra.mxu0 %vm1405_vm3, %v1377_v58  ;;  %v8383_v59 = vpop.permute.xlu0 %8382  ;;  %8602 = vrot.lane.b32.xlu2 %v9214_v1, %s9012_s28  ;;  %v7886_v1 = vld [vmem:[%s9120_s27 + $0x10a] sm:$0xff]  ;;  %v881_v14 = vsel %vm875_vm1, %v9271_v33, %v8425_v56 }
  0x96   : > { %v8385_v60 = vunpack.i.h.bf16 %v8383_v59  ;;  %v8384_v61 = vunpack.i.l.bf16 %v8383_v59  ;;  %v8388_v62 = vpop.permute.xlu1 %8387  ;;  %v9334_v26 = vpack.i.bf16 %v7887_v15, %v7886_v1  ;;  %v7889_v58 = vld [vmem:[%s9120_s27 + $0x12a] sm:$0xff] }
  0x97   : > { %v8390_v2 = vunpack.i.h.bf16 %v8388_v62  ;;  %v8389_v3 = vunpack.i.l.bf16 %v8388_v62  ;;  %v9316_v7 = vpop.permute.xlu2 %8437 }
  0x98   : > { %v2051_v5 = vsel %vm875_vm1, %v9305_v63, %v8384_v61  ;;  %v2052_v6 = vsel %vm875_vm1, %v9308_v0, %v8385_v60  ;;  %v8440_v60 = vunpack.i.h.bf16 %v9316_v7  ;;  %v8439_v61 = vunpack.i.l.bf16 %v9316_v7 }
  0x99   : > { %v2083_v19 = vsel %vm908_vm2, %v2051_v5, %v8389_v3  ;;  %v2084_v20 = vsel %vm908_vm2, %v2052_v6, %v8390_v2 }
  0x9a   : > { %v2114_v29 = vpack.c.bf16 %v2084_v20, %v2083_v19 }
  0x9b   : > { %8607 = vrot.lane.b32.xlu0 %v9239_v11, %s9012_s28 }
  0x9c   : > { %8612 = vrot.lane.b32.xlu1 %v9222_v4, %s9013_s29  ;;  %v878_v4 = vsel %vm875_vm1, %v7668_v43, %v8394_v8  ;;  %v9385_v8 = vpack.i.bf16 %v7857_v55, %v7856_v54 }
  0x9d   : > { %v8398_v16 = vpop.permute.xlu0 %8397  ;;  %8617 = vrot.lane.b32.xlu2 %v9241_v12, %s9013_s29 }
  0x9e   : > { %v8400_v21 = vunpack.i.h.bf16 %v8398_v16  ;;  %v8399_v22 = vunpack.i.l.bf16 %v8398_v16  ;;  %v8403_v23 = vpop.permute.xlu1 %8402 }
  0x9f   : > { %v8405_v13 = vunpack.i.h.bf16 %v8403_v23  ;;  %v8404_v25 = vunpack.i.l.bf16 %v8403_v23  ;;  %v9348_v40 = vpop.permute.xlu2 %8452 }
  0xa0   : > { %v1315_v28 = vsel %vm875_vm1, %v9268_v32, %v8399_v22  ;;  %v1316_v30 = vsel %vm875_vm1, %v9271_v33, %v8400_v21 }
  0xa1   : > { %v911_v31 = vsel %vm908_vm2, %v878_v4, %v8404_v25  ;;  %v912_v34 = vsel %vm908_vm2, %v879_v27, %v8405_v13  ;;  %v1347_v36 = vsel %vm908_vm2, %v1315_v28, %v8409_v18  ;;  %v1348_v37 = vsel %vm908_vm2, %v1316_v30, %v8410_v17  ;;  %v9413_v25 = vld [vmem:[%s9120_s27 + $0x78] sm:$0xff]  ;;  %v9416_v4 = vld [vmem:[%s9120_s27 + $0x80] sm:$0xff] }
  0xa2   : > { %v942_v38 = vpack.c.bf16 %v912_v34, %v911_v31  ;;  %v1378_v39 = vpack.c.bf16 %v1348_v37, %v1347_v36  ;;  %v8454_v34 = vunpack.i.l.bf16 %v9348_v40  ;;  %v7858_v36 = vld [vmem:[%s9120_s27 + $0x139] sm:$0xff]  ;;  %v7859_v37 = vld [vmem:[%s9120_s27 + $0x141] sm:$0xff] }
  0xa3   : > { %8622 = vrot.lane.b32.xlu0 %v9332_v24, %s9012_s28  ;;  %7905 = vmatmul.msk.bf16.gmra.mxu2 %vm1405_vm3, %v2114_v29 }
  0xa4   : > { %8627 = vrot.lane.b32.xlu1 %v9334_v26, %s9013_s29  ;;  %7789 = vmatmul.msk.bf16.gmra.mxu1 %vm1405_vm3, %v942_v38  ;;  %v8455_v38 = vunpack.i.h.bf16 %v9348_v40 }
  0xa5   : > { %7769 = vmatmul.msk.bf16.gmra.mxu0 %vm1405_vm3, %v1378_v39  ;;  %v8413_v41 = vpop.permute.xlu0 %8412  ;;  %8632 = vrot.lane.b32.xlu2 %v9239_v11, %s9012_s28  ;;  %v7888_v11 = vld [vmem:[%s9120_s27 + $0x122] sm:$0xff] }
  0xa6   : > { %v8415_v42 = vunpack.i.h.bf16 %v8413_v41  ;;  %v8414_v43 = vunpack.i.l.bf16 %v8413_v41  ;;  %v8418_v44 = vpop.permute.xlu1 %8417  ;;  %v9387_v10 = vpack.i.bf16 %v7889_v58, %v7888_v11  ;;  %v7891_v39 = vld [vmem:[%s9120_s27 + $0x142] sm:$0xff]  ;;  %v883_v56 = vsel %vm875_vm1, %v9308_v0, %v8455_v38 }
  0xa7   : > { %v8420_v47 = vunpack.i.h.bf16 %v8418_v44  ;;  %v8419_v48 = vunpack.i.l.bf16 %v8418_v44  ;;  %v9369_v52 = vpop.permute.xlu2 %8467 }
  0xa8   : > { %v2053_v49 = vsel %vm875_vm1, %v9358_v45, %v8414_v43  ;;  %v2054_v50 = vsel %vm875_vm1, %v9361_v46, %v8415_v42  ;;  %v8470_v42 = vunpack.i.h.bf16 %v9369_v52  ;;  %v8469_v43 = vunpack.i.l.bf16 %v9369_v52 }
  0xa9   : > { %v2085_v62 = vsel %vm908_vm2, %v2053_v49, %v8419_v48  ;;  %v2086_v2 = vsel %vm908_vm2, %v2054_v50, %v8420_v47 }
  0xaa   : > { %v2115_v7 = vpack.c.bf16 %v2086_v2, %v2085_v62 }
  0xab   : > { %8637 = vrot.lane.b32.xlu0 %v9274_v35, %s9012_s28 }
  0xac   : > { %8642 = vrot.lane.b32.xlu1 %v9241_v12, %s9013_s29  ;;  %v880_v12 = vsel %vm875_vm1, %v9268_v32, %v8424_v53  ;;  %v9440_v53 = vpack.i.bf16 %v7859_v37, %v7858_v36 }
  0xad   : > { %v8428_v59 = vpop.permute.xlu0 %8427  ;;  %8647 = vrot.lane.b32.xlu2 %v9288_v51, %s9013_s29 }
  0xae   : > { %v8430_v3 = vunpack.i.h.bf16 %v8428_v59  ;;  %v8429_v5 = vunpack.i.l.bf16 %v8428_v59  ;;  %v8433_v6 = vpop.permute.xlu1 %8432 }
  0xaf   : > { %v8435_v57 = vunpack.i.h.bf16 %v8433_v6  ;;  %v8434_v9 = vunpack.i.l.bf16 %v8433_v6  ;;  %v9403_v20 = vpop.permute.xlu2 %8482 }
  0xb0   : > { %v1317_v1 = vsel %vm875_vm1, %v9305_v63, %v8429_v5  ;;  %v1318_v15 = vsel %vm875_vm1, %v9308_v0, %v8430_v3 }
  0xb1   : > { %v913_v16 = vsel %vm908_vm2, %v880_v12, %v8434_v9  ;;  %v914_v17 = vsel %vm908_vm2, %v881_v14, %v8435_v57  ;;  %v1349_v32 = vsel %vm908_vm2, %v1317_v1, %v8439_v61  ;;  %v1350_v33 = vsel %vm908_vm2, %v1318_v15, %v8440_v60  ;;  %v9468_v9 = vld [vmem:[%s9120_s27 + $0x90] sm:$0xff]  ;;  %v9471_v12 = vld [vmem:[%s9120_s27 + $0x98] sm:$0xff] }
  0xb2   : > { %v943_v18 = vpack.c.bf16 %v914_v17, %v913_v16  ;;  %v1379_v19 = vpack.c.bf16 %v1350_v33, %v1349_v32  ;;  %v8484_v17 = vunpack.i.l.bf16 %v9403_v20  ;;  %v7860_v32 = vld [vmem:[%s9120_s27 + $0x151] sm:$0xff]  ;;  %v7861_v33 = vld [vmem:[%s9120_s27 + $0x159] sm:$0xff] }
  0xb3   : > { %8652 = vrot.lane.b32.xlu0 %v9385_v8, %s9012_s28  ;;  %7906 = vmatmul.msk.bf16.gmra.mxu2 %vm1405_vm3, %v2115_v7 }
  0xb4   : > { %8657 = vrot.lane.b32.xlu1 %v9387_v10, %s9013_s29  ;;  %7790 = vmatmul.msk.bf16.gmra.mxu1 %vm1405_vm3, %v943_v18  ;;  %v8485_v18 = vunpack.i.h.bf16 %v9403_v20 }
  0xb5   : > { %7770 = vmatmul.msk.bf16.gmra.mxu0 %vm1405_vm3, %v1379_v19  ;;  %v8443_v21 = vpop.permute.xlu0 %8442  ;;  %8662 = vrot.lane.b32.xlu2 %v9274_v35, %s9012_s28  ;;  %v7890_v35 = vld [vmem:[%s9120_s27 + $0x13a] sm:$0xff] }
  0xb6   : > { %v8445_v22 = vunpack.i.h.bf16 %v8443_v21  ;;  %v8444_v23 = vunpack.i.l.bf16 %v8443_v21  ;;  %v8448_v13 = vpop.permute.xlu1 %8447  ;;  %v9442_v55 = vpack.i.bf16 %v7891_v39, %v7890_v35  ;;  %v7893_v19 = vld [vmem:[%s9120_s27 + $0x15a] sm:$0xff]  ;;  %v885_v38 = vsel %vm875_vm1, %v9361_v46, %v8485_v18 }
  0xb7   : > { %v8450_v27 = vunpack.i.h.bf16 %v8448_v13  ;;  %v8449_v29 = vunpack.i.l.bf16 %v8448_v13  ;;  %v9424_v31 = vpop.permute.xlu2 %8497 }
  0xb8   : > { %v2055_v28 = vsel %vm875_vm1, %v9413_v25, %v8444_v23  ;;  %v2056_v30 = vsel %vm875_vm1, %v9416_v4, %v8445_v22  ;;  %v8500_v22 = vunpack.i.h.bf16 %v9424_v31  ;;  %v8499_v23 = vunpack.i.l.bf16 %v9424_v31 }
  0xb9   : > { %v2087_v44 = vsel %vm908_vm2, %v2055_v28, %v8449_v29  ;;  %v2088_v47 = vsel %vm908_vm2, %v2056_v30, %v8450_v27 }
  0xba   : > { %v2116_v52 = vpack.c.bf16 %v2088_v47, %v2087_v44 }
  0xbb   : > { %8667 = vrot.lane.b32.xlu0 %v9332_v24, %s9012_s28 }
  0xbc   : > { %8672 = vrot.lane.b32.xlu1 %v9288_v51, %s9013_s29  ;;  %v882_v51 = vsel %vm875_vm1, %v9305_v63, %v8454_v34  ;;  %v9495_v34 = vpack.i.bf16 %v7861_v33, %v7860_v32 }
  0xbd   : > { %v8458_v41 = vpop.permute.xlu0 %8457  ;;  %8677 = vrot.lane.b32.xlu2 %v9334_v26, %s9013_s29 }
  0xbe   : > { %v8460_v48 = vunpack.i.h.bf16 %v8458_v41  ;;  %v8459_v49 = vunpack.i.l.bf16 %v8458_v41  ;;  %v8463_v50 = vpop.permute.xlu1 %8462 }
  0xbf   : > { %v8465_v40 = vunpack.i.h.bf16 %v8463_v50  ;;  %v8464_v54 = vunpack.i.l.bf16 %v8463_v50  ;;  %v9458_v2 = vpop.permute.xlu2 %8512 }
  0xc0   : > { %v1319_v11 = vsel %vm875_vm1, %v9358_v45, %v8459_v49  ;;  %v1320_v58 = vsel %vm875_vm1, %v9361_v46, %v8460_v48 }
  0xc1   : > { %v915_v59 = vsel %vm908_vm2, %v882_v51, %v8464_v54  ;;  %v916_v60 = vsel %vm908_vm2, %v883_v56, %v8465_v40  ;;  %v1351_v63 = vsel %vm908_vm2, %v1319_v11, %v8469_v43  ;;  %v1352_v0 = vsel %vm908_vm2, %v1320_v58, %v8470_v42  ;;  %v9523_v54 = vld [vmem:[%s9120_s27 + $0xa8] sm:$0xff]  ;;  %v9526_v51 = vld [vmem:[%s9120_s27 + $0xb0] sm:$0xff] }
  0xc2   : > { %v944_v61 = vpack.c.bf16 %v916_v60, %v915_v59  ;;  %v1380_v62 = vpack.c.bf16 %v1352_v0, %v1351_v63  ;;  %v8514_v60 = vunpack.i.l.bf16 %v9458_v2  ;;  %v7862_v63 = vld [vmem:[%s9120_s27 + $0x169] sm:$0xff]  ;;  %v7863_v0 = vld [vmem:[%s9120_s27 + $0x171] sm:$0xff] }
  0xc3   : > { %8682 = vrot.lane.b32.xlu0 %v9440_v53, %s9012_s28  ;;  %7907 = vmatmul.msk.bf16.gmra.mxu2 %vm1405_vm3, %v2116_v52 }
  0xc4   : > { %8687 = vrot.lane.b32.xlu1 %v9442_v55, %s9013_s29  ;;  %7791 = vmatmul.msk.bf16.gmra.mxu1 %vm1405_vm3, %v944_v61  ;;  %v8515_v61 = vunpack.i.h.bf16 %v9458_v2 }
  0xc5   : > { %7771 = vmatmul.msk.bf16.gmra.mxu0 %vm1405_vm3, %v1380_v62  ;;  %v8473_v3 = vpop.permute.xlu0 %8472  ;;  %8692 = vrot.lane.b32.xlu2 %v9332_v24, %s9012_s28  ;;  %v7892_v24 = vld [vmem:[%s9120_s27 + $0x152] sm:$0xff] }
  0xc6   : > { %v8475_v5 = vunpack.i.h.bf16 %v8473_v3  ;;  %v8474_v6 = vunpack.i.l.bf16 %v8473_v3  ;;  %v8478_v57 = vpop.permute.xlu1 %8477  ;;  %v9497_v37 = vpack.i.bf16 %v7893_v19, %v7892_v24  ;;  %v7895_v62 = vld [vmem:[%s9120_s27 + $0x172] sm:$0xff]  ;;  %v887_v18 = vsel %vm875_vm1, %v9416_v4, %v8515_v61 }
  0xc7   : > { %v8480_v14 = vunpack.i.h.bf16 %v8478_v57  ;;  %v8479_v7 = vunpack.i.l.bf16 %v8478_v57  ;;  %v9479_v16 = vpop.permute.xlu2 %8527 }
  0xc8   : > { %v2057_v1 = vsel %vm875_vm1, %v9468_v9, %v8474_v6  ;;  %v2058_v15 = vsel %vm875_vm1, %v9471_v12, %v8475_v5  ;;  %v8530_v5 = vunpack.i.h.bf16 %v9479_v16  ;;  %v8529_v6 = vunpack.i.l.bf16 %v9479_v16 }
  0xc9   : > { %v2089_v13 = vsel %vm908_vm2, %v2057_v1, %v8479_v7  ;;  %v2090_v27 = vsel %vm908_vm2, %v2058_v15, %v8480_v14 }
  0xca   : > { %v2117_v31 = vpack.c.bf16 %v2090_v27, %v2089_v13 }
  0xcb   : > { %8697 = vrot.lane.b32.xlu0 %v9385_v8, %s9012_s28 }
  0xcc   : > { %8702 = vrot.lane.b32.xlu1 %v9334_v26, %s9013_s29  ;;  %v884_v26 = vsel %vm875_vm1, %v9358_v45, %v8484_v17  ;;  %v9550_v17 = vpack.i.bf16 %v7863_v0, %v7862_v63 }
  0xcd   : > { %v8488_v21 = vpop.permute.xlu0 %8487  ;;  %8707 = vrot.lane.b32.xlu2 %v9387_v10, %s9013_s29 }
  0xce   : > { %v8490_v29 = vunpack.i.h.bf16 %v8488_v21  ;;  %v8489_v28 = vunpack.i.l.bf16 %v8488_v21  ;;  %v8493_v30 = vpop.permute.xlu1 %8492 }
  0xcf   : > { %v8495_v20 = vunpack.i.h.bf16 %v8493_v30  ;;  %v8494_v36 = vunpack.i.l.bf16 %v8493_v30  ;;  %v9513_v47 = vpop.permute.xlu2 %8542 }
  0xd0   : > { %v1321_v35 = vsel %vm875_vm1, %v9413_v25, %v8489_v28  ;;  %v1322_v39 = vsel %vm875_vm1, %v9416_v4, %v8490_v29 }
  0xd1   : > { %v917_v41 = vsel %vm908_vm2, %v884_v26, %v8494_v36  ;;  %v918_v42 = vsel %vm908_vm2, %v885_v38, %v8495_v20  ;;  %v1353_v45 = vsel %vm908_vm2, %v1321_v35, %v8499_v23  ;;  %v1354_v46 = vsel %vm908_vm2, %v1322_v39, %v8500_v22  ;;  %v9578_v36 = vld [vmem:[%s9120_s27 + $0xc0] sm:$0xff]  ;;  %v9581_v26 = vld [vmem:[%s9120_s27 + $0xc8] sm:$0xff] }
  0xd2   : > { %v945_v43 = vpack.c.bf16 %v918_v42, %v917_v41  ;;  %v1381_v44 = vpack.c.bf16 %v1354_v46, %v1353_v45  ;;  %v8544_v41 = vunpack.i.l.bf16 %v9513_v47  ;;  %v7864_v42 = vld [vmem:[%s9120_s27 + $0x181] sm:$0xff]  ;;  %v7865_v45 = vld [vmem:[%s9120_s27 + $0x189] sm:$0xff]  ;;  %v8545_v46 = vunpack.i.h.bf16 %v9513_v47 }
  0xd3   : > { %8712 = vrot.lane.b32.xlu0 %v9495_v34, %s9012_s28  ;;  %7908 = vmatmul.msk.bf16.gmra.mxu2 %vm1405_vm3, %v2117_v31  ;;  %v9605_v47 = vpack.i.bf16 %v7865_v45, %v7864_v42 }
  0xd4   : > { %8717 = vrot.lane.b32.xlu1 %v9497_v37, %s9013_s29  ;;  %7792 = vmatmul.msk.bf16.gmra.mxu1 %vm1405_vm3, %v945_v43  ;;  %v7897_v43 = vld [vmem:[%s9120_s27 + $0x18a] sm:$0xff]  ;;  %v888_v0 = vsel %vm875_vm1, %v9468_v9, %v8544_v41 }
  0xd5   : > { %7772 = vmatmul.msk.bf16.gmra.mxu0 %vm1405_vm3, %v1381_v44  ;;  %v8503_v48 = vpop.permute.xlu0 %8502  ;;  %8722 = vrot.lane.b32.xlu2 %v9385_v8, %s9012_s28  ;;  %v7894_v8 = vld [vmem:[%s9120_s27 + $0x16a] sm:$0xff] }
  0xd6   : > { %v8505_v49 = vunpack.i.h.bf16 %v8503_v48  ;;  %v8504_v50 = vunpack.i.l.bf16 %v8503_v48  ;;  %v8508_v40 = vpop.permute.xlu1 %8507  ;;  %v9552_v33 = vpack.i.bf16 %v7895_v62, %v7894_v8 }
  0xd7   : > { %v8510_v56 = vunpack.i.h.bf16 %v8508_v40  ;;  %v8509_v52 = vunpack.i.l.bf16 %v8508_v40  ;;  %v9534_v59 = vpop.permute.xlu2 %8557 }
  0xd8   : > { %v2059_v11 = vsel %vm875_vm1, %v9523_v54, %v8504_v50  ;;  %v2060_v58 = vsel %vm875_vm1, %v9526_v51, %v8505_v49  ;;  %v8560_v48 = vunpack.i.h.bf16 %v9534_v59  ;;  %v8559_v49 = vunpack.i.l.bf16 %v9534_v59 }
  0xd9   : > { %v2091_v57 = vsel %vm908_vm2, %v2059_v11, %v8509_v52  ;;  %v2092_v14 = vsel %vm908_vm2, %v2060_v58, %v8510_v56  ;;  %v889_v59 = vsel %vm875_vm1, %v9471_v12, %v8545_v46 }
  0xda   : > { %v2118_v16 = vpack.c.bf16 %v2092_v14, %v2091_v57 }
  0xdb   : > { %8727 = vrot.lane.b32.xlu0 %v9440_v53, %s9012_s28 }
  0xdc   : > { %8732 = vrot.lane.b32.xlu1 %v9387_v10, %s9013_s29  ;;  %v886_v10 = vsel %vm875_vm1, %v9413_v25, %v8514_v60 }
  0xdd   : > { %v8518_v3 = vpop.permute.xlu0 %8517  ;;  %8737 = vrot.lane.b32.xlu2 %v9442_v55, %s9013_s29 }
  0xde   : > { %v8520_v7 = vunpack.i.h.bf16 %v8518_v3  ;;  %v8519_v1 = vunpack.i.l.bf16 %v8518_v3  ;;  %v8523_v15 = vpop.permute.xlu1 %8522 }
  0xdf   : > { %v8525_v2 = vunpack.i.h.bf16 %v8523_v15  ;;  %v8524_v32 = vunpack.i.l.bf16 %v8523_v15  ;;  %v9571_v27 = vpop.permute.xlu2 %8572 }
  0xe0   : > { %v1323_v24 = vsel %vm875_vm1, %v9468_v9, %v8519_v1  ;;  %v1324_v19 = vsel %vm875_vm1, %v9471_v12, %v8520_v7 }
  0xe1   : > { %v919_v21 = vsel %vm908_vm2, %v886_v10, %v8524_v32  ;;  %v920_v22 = vsel %vm908_vm2, %v887_v18, %v8525_v2  ;;  %v1355_v25 = vsel %vm908_vm2, %v1323_v24, %v8529_v6  ;;  %v1356_v4 = vsel %vm908_vm2, %v1324_v19, %v8530_v5  ;;  %v9631_v2 = vld [vmem:[%s9120_s27 + $0xd8] sm:$0xff]  ;;  %v9634_v32 = vld [vmem:[%s9120_s27 + $0xe0] sm:$0xff] }
  0xe2   : > { %v946_v23 = vpack.c.bf16 %v920_v22, %v919_v21  ;;  %v1382_v13 = vpack.c.bf16 %v1356_v4, %v1355_v25  ;;  %v8574_v21 = vunpack.i.l.bf16 %v9571_v27  ;;  %v7866_v22 = vld [vmem:[%s9120_s27 + $0x199] sm:$0xff]  ;;  %v7867_v25 = vld [vmem:[%s9120_s27 + $0x1a1] sm:$0xff]  ;;  %v8575_v4 = vunpack.i.h.bf16 %v9571_v27 }
  0xe3   : > { %8742 = vrot.lane.b32.xlu0 %v9550_v17, %s9012_s28  ;;  %7909 = vmatmul.msk.bf16.gmra.mxu2 %vm1405_vm3, %v2118_v16 }
  0xe4   : > { %8747 = vrot.lane.b32.xlu1 %v9552_v33, %s9013_s29  ;;  %7793 = vmatmul.msk.bf16.gmra.mxu1 %vm1405_vm3, %v946_v23  ;;  %v7899_v23 = vld [vmem:[%s9120_s27 + $0x1a2] sm:$0xff]  ;;  %v891_v45 = vsel %vm875_vm1, %v9526_v51, %v8575_v4 }
  0xe5   : > { %7773 = vmatmul.msk.bf16.gmra.mxu0 %vm1405_vm3, %v1382_v13  ;;  %v8533_v29 = vpop.permute.xlu0 %8532  ;;  %8752 = vrot.lane.b32.xlu2 %v9440_v53, %s9012_s28  ;;  %v7896_v53 = vld [vmem:[%s9120_s27 + $0x182] sm:$0xff] }
  0xe6   : > { %v8535_v28 = vunpack.i.h.bf16 %v8533_v29  ;;  %v8534_v30 = vunpack.i.l.bf16 %v8533_v29  ;;  %v8538_v20 = vpop.permute.xlu1 %8537  ;;  %v9607_v63 = vpack.i.bf16 %v7897_v43, %v7896_v53 }
  0xe7   : > { %v8540_v38 = vunpack.i.h.bf16 %v8538_v20  ;;  %v8539_v31 = vunpack.i.l.bf16 %v8538_v20  ;;  %v9603_v56 = vpop.permute.xlu2 %8587 }
  0xe8   : > { %v2061_v35 = vsel %vm875_vm1, %v9578_v36, %v8534_v30  ;;  %v2062_v39 = vsel %vm875_vm1, %v9581_v26, %v8535_v28  ;;  %v8590_v29 = vunpack.i.h.bf16 %v9603_v56  ;;  %v8589_v28 = vunpack.i.l.bf16 %v9603_v56 }
  0xe9   : > { %v2093_v50 = vsel %vm908_vm2, %v2061_v35, %v8539_v31  ;;  %v2094_v40 = vsel %vm908_vm2, %v2062_v39, %v8540_v38  ;;  %v8801_v39 = vpack.i.bf16 %v7867_v25, %v7866_v22 }
  0xea   : > { %v2119_v61 = vpack.c.bf16 %v2094_v40, %v2093_v50 }
  0xeb   : > { %8757 = vrot.lane.b32.xlu0 %v9495_v34, %s9012_s28 }
  0xec   : > { %8762 = vrot.lane.b32.xlu1 %v9442_v55, %s9013_s29 }
  0xed   : > { %v8548_v44 = vpop.permute.xlu0 %8547  ;;  %8767 = vrot.lane.b32.xlu2 %v9497_v37, %s9013_s29 }
  0xee   : > { %v8550_v52 = vunpack.i.h.bf16 %v8548_v44  ;;  %v8549_v11 = vunpack.i.l.bf16 %v8548_v44  ;;  %v8553_v58 = vpop.permute.xlu1 %8552 }
  0xef   : > { %v8555_v60 = vunpack.i.h.bf16 %v8553_v58  ;;  %v8554_v55 = vunpack.i.l.bf16 %v8553_v58  ;;  %v9636_v10 = vpop.permute.xlu2 %8602 }
  0xf0   : > { %v1325_v8 = vsel %vm875_vm1, %v9523_v54, %v8549_v11  ;;  %v1326_v62 = vsel %vm875_vm1, %v9526_v51, %v8550_v52 }
  0xf1   : > { %v921_v3 = vsel %vm908_vm2, %v888_v0, %v8554_v55  ;;  %v922_v5 = vsel %vm908_vm2, %v889_v59, %v8555_v60  ;;  %v1357_v9 = vsel %vm908_vm2, %v1325_v8, %v8559_v49  ;;  %v1358_v12 = vsel %vm908_vm2, %v1326_v62, %v8560_v48  ;;  %v9678_v60 = vld [vmem:[%s9120_s27 + $0xf0] sm:$0xff]  ;;  %v9681_v55 = vld [vmem:[%s9120_s27 + $0xf8] sm:$0xff] }
  0xf2   : > { %v947_v6 = vpack.c.bf16 %v922_v5, %v921_v3  ;;  %v1383_v57 = vpack.c.bf16 %v1358_v12, %v1357_v9  ;;  %v8604_v62 = vunpack.i.l.bf16 %v9636_v10  ;;  %v8605_v5 = vunpack.i.h.bf16 %v9636_v10 }
  0xf3   : > { %8772 = vrot.lane.b32.xlu0 %v9605_v47, %s9012_s28  ;;  %7910 = vmatmul.msk.bf16.gmra.mxu2 %vm1405_vm3, %v2119_v61 }
  0xf4   : > { %8777 = vrot.lane.b32.xlu1 %v9607_v63, %s9013_s29  ;;  %7794 = vmatmul.msk.bf16.gmra.mxu1 %vm1405_vm3, %v947_v6  ;;  %v893_v10 = vsel %vm875_vm1, %v9581_v26, %v8605_v5 }
  0xf5   : > { %7774 = vmatmul.msk.bf16.gmra.mxu0 %vm1405_vm3, %v1383_v57  ;;  %v8563_v14 = vpop.permute.xlu0 %8562  ;;  %8782 = vrot.lane.b32.xlu2 %v9495_v34, %s9012_s28  ;;  %v7898_v34 = vld [vmem:[%s9120_s27 + $0x19a] sm:$0xff] }
  0xf6   : > { %v8565_v7 = vunpack.i.h.bf16 %v8563_v14  ;;  %v8564_v1 = vunpack.i.l.bf16 %v8563_v14  ;;  %v8568_v15 = vpop.permute.xlu1 %8567  ;;  %v8806_v42 = vpack.i.bf16 %v7899_v23, %v7898_v34 }
  0xf7   : > { %v8570_v18 = vunpack.i.h.bf16 %v8568_v15  ;;  %v8569_v16 = vunpack.i.l.bf16 %v8568_v15  ;;  %v8618_v49 = vpop.permute.xlu2 %8617 }
  0xf8   : > { %v2063_v24 = vsel %vm875_vm1, %v9631_v2, %v8564_v1  ;;  %v2064_v19 = vsel %vm875_vm1, %v9634_v32, %v8565_v7  ;;  %v8620_v9 = vunpack.i.h.bf16 %v8618_v49  ;;  %v8619_v12 = vunpack.i.l.bf16 %v8618_v49 }
  0xf9   : > { %v2095_v30 = vsel %vm908_vm2, %v2063_v24, %v8569_v16  ;;  %v2096_v20 = vsel %vm908_vm2, %v2064_v19, %v8570_v18 }
  0xfa   : > { %v2120_v46 = vpack.c.bf16 %v2096_v20, %v2095_v30  ;;  %v9725_v30 = vld [vmem:[%s9120_s27 + $0x110] sm:$0xff] }
  0xfb   : > { %8787 = vrot.lane.b32.xlu0 %v9550_v17, %s9012_s28 }
  0xfc   : > { %8792 = vrot.lane.b32.xlu1 %v9497_v37, %s9013_s29  ;;  %v890_v37 = vsel %vm875_vm1, %v9523_v54, %v8574_v21 }
  0xfd   : > { %v8578_v13 = vpop.permute.xlu0 %8577  ;;  %8797 = vrot.lane.b32.xlu2 %v9552_v33, %s9013_s29 }
  0xfe   : > { %v8580_v38 = vunpack.i.h.bf16 %v8578_v13  ;;  %v8579_v31 = vunpack.i.l.bf16 %v8578_v13  ;;  %v8583_v35 = vpop.permute.xlu1 %8582  ;;  %v9717_v13 = vld [vmem:[%s12604_s2] ss:$0 sm:$0xff] }
  0xff   : > { %v8585_v41 = vunpack.i.h.bf16 %v8583_v35  ;;  %v8584_v27 = vunpack.i.l.bf16 %v8583_v35  ;;  %v8633_v3 = vpop.permute.xlu2 %8632 }
 0x100   : > { %v1327_v53 = vsel %vm875_vm1, %v9578_v36, %v8579_v31  ;;  %v1328_v43 = vsel %vm875_vm1, %v9581_v26, %v8580_v38 }
 0x101   : > { %v923_v44 = vsel %vm908_vm2, %v890_v37, %v8584_v27  ;;  %v924_v48 = vsel %vm908_vm2, %v891_v45, %v8585_v41  ;;  %v1359_v54 = vsel %vm908_vm2, %v1327_v53, %v8589_v28  ;;  %v1360_v51 = vsel %vm908_vm2, %v1328_v43, %v8590_v29  ;;  %v9722_v28 = vld [vmem:[%s9120_s27 + $0x108] sm:$0xff] }
 0x102   : > { %v948_v50 = vpack.c.bf16 %v924_v48, %v923_v44  ;;  %v1384_v40 = vpack.c.bf16 %v1360_v51, %v1359_v54  ;;  %v8634_v37 = vunpack.i.l.bf16 %v8633_v3 }
 0x103   : > { %8802 = vrot.lane.b32.xlu0 %v8801_v39, %s9012_s28  ;;  %7911 = vmatmul.msk.bf16.gmra.mxu2 %vm1405_vm3, %v2120_v46 }
 0x104   : > { %8807 = vrot.lane.b32.xlu1 %v8806_v42, %s9013_s29  ;;  %7795 = vmatmul.msk.bf16.gmra.mxu1 %vm1405_vm3, %v948_v50  ;;  %v8635_v42 = vunpack.i.h.bf16 %v8633_v3  ;;  %v894_v49 = vsel %vm875_vm1, %v9631_v2, %v8634_v37 }
 0x105   : > { %7775 = vmatmul.msk.bf16.gmra.mxu0 %vm1405_vm3, %v1384_v40  ;;  %v8593_v56 = vpop.permute.xlu0 %8592  ;;  %8812 = vrot.lane.b32.xlu2 %v9550_v17, %s9012_s28 }
 0x106   : > { %v8595_v52 = vunpack.i.h.bf16 %v8593_v56  ;;  %v8594_v11 = vunpack.i.l.bf16 %v8593_v56  ;;  %v8598_v58 = vpop.permute.xlu1 %8597  ;;  %v895_v50 = vsel %vm875_vm1, %v9634_v32, %v8635_v42 }
 0x107   : > { %v8600_v0 = vunpack.i.h.bf16 %v8598_v58  ;;  %v8599_v59 = vunpack.i.l.bf16 %v8598_v58  ;;  %v9719_v29 = vpop.permute.xlu2 %8647 }
 0x108   : > { %v2065_v61 = vsel %vm875_vm1, %v9678_v60, %v8594_v11  ;;  %v2066_v8 = vsel %vm875_vm1, %v9681_v55, %v8595_v52  ;;  %v8649_v51 = vunpack.i.l.bf16 %v9719_v29 }
 0x109   : > { %v2097_v6 = vsel %vm908_vm2, %v2065_v61, %v8599_v59  ;;  %v2098_v57 = vsel %vm908_vm2, %v2066_v8, %v8600_v0 }
 0x10a   : > { %v2121_v16 = vpack.c.bf16 %v2098_v57, %v2097_v6  ;;  %v1616_v34 = vpop.f32.mrf.mxu1 }
 0x10b   : > { %8817 = vrot.lane.b32.xlu0 %v9605_v47, %s9012_s28  ;;  %v892_v47 = vsel %vm875_vm1, %v9578_v36, %v8604_v62 }
 0x10c   : > { %8822 = vrot.lane.b32.xlu1 %v9552_v33, %s9013_s29 }
 0x10d   : > { %v8608_v17 = vpop.permute.xlu0 %8607  ;;  %8827 = vrot.lane.b32.xlu2 %v9607_v63, %s9013_s29  ;;  %s521_s29 = scalar_lea.vmem %s12618_s16, %s8252_s0 }
 0x10e   : > { %v8610_v14 = vunpack.i.h.bf16 %v8608_v17  ;;  %v8609_v7 = vunpack.i.l.bf16 %v8608_v17  ;;  %v8613_v1 = vpop.permute.xlu1 %8612 }
 0x10f   : > { %v8615_v15 = vunpack.i.h.bf16 %v8613_v1  ;;  %v8614_v18 = vunpack.i.l.bf16 %v8613_v1  ;;  %v9743_v6 = vpop.permute.xlu2 %8662 }
 0x110   : > { %v1329_v33 = vsel %vm875_vm1, %v9631_v2, %v8609_v7  ;;  %v1330_v24 = vsel %vm875_vm1, %v9634_v32, %v8610_v14 }
 0x111   : > { %v925_v19 = vsel %vm908_vm2, %v892_v47, %v8614_v18  ;;  %v926_v21 = vsel %vm908_vm2, %v893_v10, %v8615_v15  ;;  %v1361_v36 = vsel %vm908_vm2, %v1329_v33, %v8619_v12  ;;  %v1362_v26 = vsel %vm908_vm2, %v1330_v24, %v8620_v9 }
 0x112   : > { %v1467_v22 = vpop.f32.mrf.mxu0  ;;  %v949_v25 = vpack.c.bf16 %v926_v21, %v925_v19  ;;  %v1385_v4 = vpack.c.bf16 %v1362_v26, %v1361_v36  ;;  %v1618_v56 = vpop.f32.mrf.mxu1  ;;  %v8650_v36 = vunpack.i.h.bf16 %v9719_v29 }
 0x113   : > { %7912 = vmatmul.msk.bf16.gmra.mxu2 %vm1405_vm3, %v2121_v16  ;;  %v1617_v23 = vadd.f32 %v1616_v34, %v1467_v22 }
 0x114   : > { %7796 = vmatmul.msk.bf16.gmra.mxu1 %vm1405_vm3, %v949_v25 }
 0x115   : > { %7776 = vmatmul.msk.bf16.gmra.mxu0 %vm1405_vm3, %v1385_v4  ;;  %v8623_v63 = vpop.permute.xlu0 %8622 }
 0x116   : > { %v8625_v20 = vunpack.i.h.bf16 %v8623_v63  ;;  %v8624_v38 = vunpack.i.l.bf16 %v8623_v63  ;;  %v8628_v31 = vpop.permute.xlu1 %8627  ;;  %v2201_v35 = vpop.f32.mrf.mxu2 }
 0x117   : > { %v8630_v39 = vunpack.i.h.bf16 %v8628_v31  ;;  %v8629_v41 = vunpack.i.l.bf16 %v8628_v31  ;;  %v2281_v27 = vadd.f32 %v2201_v35, %v1617_v23 }
 0x118   : > { %v2067_v45 = vsel %vm875_vm1, %v9722_v28, %v8624_v38  ;;  %v2068_v46 = vsel %vm875_vm1, %v9725_v30, %v8625_v20 }
 0x119   : > { %v2317_v53 = vadd.f32 %v9717_v13, %v2281_v27  ;;  %v2099_v43 = vsel %vm908_vm2, %v2067_v45, %v8629_v41  ;;  %v2100_v44 = vsel %vm908_vm2, %v2068_v46, %v8630_v39 }
 0x11a   : > { %v1469_v54 = vpop.f32.mrf.mxu0  ;;  %v2122_v40 = vpack.c.bf16 %v2100_v44, %v2099_v43 }
 0x11b   : > { %v2349_v48 = vmax.f32 %v2317_v53, 0.0  ;;  %v1619_v8 = vadd.f32 %v1618_v56, %v1469_v54 }
 0x11d   : > { %v2413_v52 = vrot.slane %v2349_v48, 2  ;;  %v2414_v11 = vrot.slane %v2349_v48, 4  ;;  %v2415_v58 = vrot.slane %v2349_v48, 6  ;;  %v2606_v0 = vsel %vm2605_vm4, %v2349_v48, -inf  ;;  %v8638_v59 = vpop.permute.xlu0 %8637 }
 0x11e   : > { %v2607_v61 = vrot.slane %v2606_v0, 4  ;;  %v8640_v62 = vunpack.i.h.bf16 %v8638_v59  ;;  %v8639_v3 = vunpack.i.l.bf16 %v8638_v59  ;;  %v8643_v5 = vpop.permute.xlu1 %8642  ;;  %v2203_v17 = vpop.f32.mrf.mxu2  ;;  %v8665_v59 = vunpack.i.h.bf16 %v9743_v6 }
 0x11f   : > { %v2613_v9 = vsel %vm2605_vm4, %v2413_v52, -inf  ;;  %v2620_v2 = vsel %vm2605_vm4, %v2414_v11, -inf  ;;  %v2627_v32 = vsel %vm2605_vm4, %v2415_v58, -inf  ;;  %v8645_v12 = vunpack.i.h.bf16 %v8643_v5  ;;  %v9763_v52 = vpop.permute.xlu2 %8677 }
 0x120   : > { %v2608_v57 = vmax.f32 %v2606_v0, %v2607_v61  ;;  %v2614_v14 = vrot.slane %v2613_v9, 4  ;;  %v2621_v7 = vrot.slane %v2620_v2, 4  ;;  %v2628_v1 = vrot.slane %v2627_v32, 4 }
 0x121   : > { %v8644_v15 = vunpack.i.l.bf16 %v8643_v5  ;;  %v2282_v18 = vadd.f32 %v2203_v17, %v1619_v8  ;;  %v928_v47 = vsel %vm908_vm2, %v895_v50, %v8645_v12  ;;  %v1331_v10 = vsel %vm875_vm1, %v9678_v60, %v8639_v3  ;;  %v1621_v63 = vpop.f32.mrf.mxu1 }
 0x122   : > { %v2609_v16 = vrot.slane %v2608_v57, 2  ;;  %v2615_v33 = vmax.f32 %v2613_v9, %v2614_v14  ;;  %v2622_v24 = vmax.f32 %v2620_v2, %v2621_v7  ;;  %v2629_v19 = vmax.f32 %v2627_v32, %v2628_v1  ;;  %v1472_v20 = vpop.f32.mrf.mxu0 }
 0x123   : > { %v2318_v21 = vadd.f32 %v9717_v13, %v2282_v18  ;;  %v927_v26 = vsel %vm908_vm2, %v894_v49, %v8644_v15  ;;  %7913 = vmatmul.msk.bf16.gmra.mxu2 %vm1405_vm3, %v2122_v40  ;;  %v1332_v31 = vsel %vm875_vm1, %v9681_v55, %v8640_v62  ;;  %v1363_v35 = vsel %vm908_vm2, %v1331_v10, %v8649_v51 }
 0x124   : > { %v2610_v22 = vmax.f32 %v2608_v57, %v2609_v16  ;;  %v2616_v25 = vrot.slane %v2615_v33, 2  ;;  %v2623_v4 = vrot.slane %v2622_v24, 2  ;;  %v2630_v34 = vrot.slane %v2629_v19, 2 }
 0x125   : > { %v2350_v23 = vmax.f32 %v2318_v21, 0.0  ;;  %v950_v38 = vpack.c.bf16 %v928_v47, %v927_v26  ;;  %v9757_v53 = vpop.permute.xlu0 %8652  ;;  %v1364_v49 = vsel %vm908_vm2, %v1332_v31, %v8650_v36  ;;  %v8664_v61 = vunpack.i.l.bf16 %v9743_v6 }
 0x126   : > { %v2611_v39 = vrot.slane %v2610_v22, 1  ;;  %v2617_v41 = vmax.f32 %v2615_v33, %v2616_v25  ;;  %v2624_v29 = vmax.f32 %v2622_v24, %v2623_v4  ;;  %v2631_v27 = vmax.f32 %v2629_v19, %v2630_v34  ;;  %v2206_v43 = vpop.f32.mrf.mxu2  ;;  %v9765_v0 = vpop.permute.xlu1 %8657 }
 0x127   : > { %v2416_v42 = vrot.slane %v2350_v23, 2  ;;  %v2417_v37 = vrot.slane %v2350_v23, 4  ;;  %v2418_v45 = vrot.slane %v2350_v23, 6  ;;  %v2634_v46 = vsel %vm2605_vm4, %v2350_v23, -inf  ;;  %7797 = vmatmul.msk.bf16.gmra.mxu1 %vm1405_vm3, %v950_v38 }
 0x128   : > { %v2618_v44 = vrot.slane %v2617_v41, 1  ;;  %v2625_v48 = vrot.slane %v2624_v29, 1  ;;  %v2632_v54 = vrot.slane %v2631_v27, 1  ;;  %v2635_v51 = vrot.slane %v2634_v46, 4 }
 0x129   : > { %v2641_v50 = vsel %vm2605_vm4, %v2416_v42, -inf  ;;  %v2648_v40 = vsel %vm2605_vm4, %v2417_v37, -inf  ;;  %v2655_v56 = vsel %vm2605_vm4, %v2418_v45, -inf  ;;  %v2612_v11 = vmax.f32 %v2610_v22, %v2611_v39  ;;  %v1623_v19 = vpop.f32.mrf.mxu1 }
 0x12a   : > { %v2619_v58 = vmax.f32 %v2617_v41, %v2618_v44  ;;  %v2636_v8 = vmax.f32 %v2634_v46, %v2635_v51  ;;  %v2642_v62 = vrot.slane %v2641_v50, 4  ;;  %v2649_v3 = vrot.slane %v2648_v40, 4  ;;  %v1474_v21 = vpop.f32.mrf.mxu0 }
 0x12b   : > { %v2656_v5 = vrot.slane %v2655_v56, 4  ;;  %v2626_v17 = vmax.f32 %v2624_v29, %v2625_v48  ;;  %v2633_v9 = vmax.f32 %v2631_v27, %v2632_v54  ;;  %v1386_v2 = vpack.c.bf16 %v1364_v49, %v1363_v35 }
 0x12c   : > { %v8680_v32 = vunpack.i.h.bf16 %v9763_v52  ;;  %v2637_v12 = vrot.slane %v2636_v8, 2  ;;  %v2643_v57 = vmax.f32 %v2641_v50, %v2642_v62  ;;  %v2650_v14 = vmax.f32 %v2648_v40, %v2649_v3 }
 0x12d   : > { %v2657_v7 = vmax.f32 %v2655_v56, %v2656_v5  ;;  %v9771_v1 = vsel %vm3502_vm5, %v2612_v11, -inf  ;;  %v9774_v15 = vsel %vm3502_vm5, %v2619_v58, -inf  ;;  %v1622_v18 = vadd.f32 %v1621_v63, %v1472_v20  ;;  %7777 = vmatmul.msk.bf16.gmra.mxu0 %vm1405_vm3, %v1386_v2  ;;  %v9785_v20 = vpop.permute.xlu0 %8667 }
 0x12e   : > { %v8679_v47 = vunpack.i.l.bf16 %v9763_v52  ;;  %v2638_v10 = vmax.f32 %v2636_v8, %v2637_v12  ;;  %v2644_v16 = vrot.slane %v2643_v57, 2  ;;  %v2651_v33 = vrot.slane %v2650_v14, 2  ;;  %v2208_v38 = vpop.f32.mrf.mxu2  ;;  %v9792_v44 = vpop.permute.xlu1 %8672 }
 0x12f   : > { %v2658_v24 = vrot.slane %v2657_v7, 2  ;;  %v9779_v36 = vsel %vm3502_vm5, %v2626_v17, -inf  ;;  %v9782_v26 = vsel %vm3502_vm5, %v2633_v9, -inf  ;;  %v8655_v22 = vunpack.i.h.bf16 %v9757_v53 }
 0x130   : > { %v2283_v25 = vadd.f32 %v2206_v43, %v1622_v18  ;;  %v2639_v4 = vrot.slane %v2638_v10, 1  ;;  %v2645_v34 = vmax.f32 %v2643_v57, %v2644_v16  ;;  %v2652_v23 = vmax.f32 %v2650_v14, %v2651_v33 }
 0x131   : > { %v2659_v63 = vmax.f32 %v2657_v7, %v2658_v24  ;;  %v8654_v31 = vunpack.i.l.bf16 %v9757_v53  ;;  %v8660_v35 = vunpack.i.h.bf16 %v9765_v0  ;;  %v1624_v41 = vadd.f32 %v1623_v19, %v1474_v21 }
 0x132   : > { %v2319_v39 = vadd.f32 %v9717_v13, %v2283_v25  ;;  %v2640_v29 = vmax.f32 %v2638_v10, %v2639_v4  ;;  %v2646_v27 = vrot.slane %v2645_v34, 1  ;;  %v2653_v42 = vrot.slane %v2652_v23, 1 }
 0x133   : > { %v2660_v37 = vrot.slane %v2659_v63, 1  ;;  %v8659_v45 = vunpack.i.l.bf16 %v9765_v0  ;;  %v8670_v43 = vunpack.i.h.bf16 %v9785_v20  ;;  %v2284_v48 = vadd.f32 %v2208_v38, %v1624_v41 }
 0x134   : > { %v2351_v46 = vmax.f32 %v2319_v39, 0.0  ;;  %v2647_v54 = vmax.f32 %v2645_v34, %v2646_v27  ;;  %v2654_v49 = vmax.f32 %v2652_v23, %v2653_v42  ;;  %v8669_v50 = vunpack.i.l.bf16 %v9785_v20 }
 0x135   : > { %v2661_v51 = vmax.f32 %v2659_v63, %v2660_v37  ;;  %v9797_v8 = vsel %vm3502_vm5, %v2640_v29, -inf  ;;  %v8675_v3 = vunpack.i.h.bf16 %v9792_v44  ;;  %v8674_v5 = vunpack.i.l.bf16 %v9792_v44 }
 0x136   : > { %v2419_v40 = vrot.slane %v2351_v46, 2  ;;  %v2420_v56 = vrot.slane %v2351_v46, 4  ;;  %v2421_v11 = vrot.slane %v2351_v46, 6  ;;  %v2662_v58 = vsel %vm2605_vm4, %v2351_v46, -inf }
 0x137   : > { %v2663_v62 = vrot.slane %v2662_v58, 4  ;;  %v2320_v12 = vadd.f32 %v9717_v13, %v2284_v48  ;;  %v9806_v10 = vsel %vm3502_vm5, %v2647_v54, -inf  ;;  %v9809_v16 = vsel %vm3502_vm5, %v2654_v49, -inf  ;;  %v1626_v54 = vpop.f32.mrf.mxu1  ;;  %v1477_v49 = vpop.f32.mrf.mxu0 }
 0x138   : > { %v2669_v17 = vsel %vm2605_vm4, %v2419_v40, -inf  ;;  %v2676_v9 = vsel %vm2605_vm4, %v2420_v56, -inf  ;;  %v2683_v2 = vsel %vm2605_vm4, %v2421_v11, -inf  ;;  %v9812_v33 = vsel %vm3502_vm5, %v2661_v51, -inf }
 0x139   : > { %v2664_v57 = vmax.f32 %v2662_v58, %v2663_v62  ;;  %v2670_v14 = vrot.slane %v2669_v17, 4  ;;  %v2677_v7 = vrot.slane %v2676_v9, 4  ;;  %v2684_v18 = vrot.slane %v2683_v2, 4 }
 0x13a   : > { %v2352_v24 = vmax.f32 %v2320_v12, 0.0 }
 0x13b   : > { %v2665_v19 = vrot.slane %v2664_v57, 2  ;;  %v2671_v21 = vmax.f32 %v2669_v17, %v2670_v14  ;;  %v2678_v25 = vmax.f32 %v2676_v9, %v2677_v7  ;;  %v2685_v4 = vmax.f32 %v2683_v2, %v2684_v18 }
 0x13c   : > { %v2422_v34 = vrot.slane %v2352_v24, 2  ;;  %v2423_v23 = vrot.slane %v2352_v24, 4  ;;  %v2424_v63 = vrot.slane %v2352_v24, 6  ;;  %v2690_v38 = vsel %vm2605_vm4, %v2352_v24, -inf }
 0x13d   : > { %v2666_v39 = vmax.f32 %v2664_v57, %v2665_v19  ;;  %v2672_v41 = vrot.slane %v2671_v21, 2  ;;  %v2679_v29 = vrot.slane %v2678_v25, 2  ;;  %v2686_v27 = vrot.slane %v2685_v4, 2 }
 0x13e   : > { %v2691_v42 = vrot.slane %v2690_v38, 4  ;;  %v2697_v37 = vsel %vm2605_vm4, %v2422_v34, -inf  ;;  %v2704_v46 = vsel %vm2605_vm4, %v2423_v23, -inf  ;;  %v2711_v48 = vsel %vm2605_vm4, %v2424_v63, -inf }
 0x13f   : > { %v2667_v51 = vrot.slane %v2666_v39, 1  ;;  %v2673_v40 = vmax.f32 %v2671_v21, %v2672_v41  ;;  %v2680_v56 = vmax.f32 %v2678_v25, %v2679_v29  ;;  %v2687_v11 = vmax.f32 %v2685_v4, %v2686_v27 }
 0x140   : > { %v2692_v58 = vmax.f32 %v2690_v38, %v2691_v42  ;;  %v2698_v62 = vrot.slane %v2697_v37, 4  ;;  %v2705_v17 = vrot.slane %v2704_v46, 4  ;;  %v2712_v9 = vrot.slane %v2711_v48, 4 }
 0x141   : > { %v2668_v2 = vmax.f32 %v2666_v39, %v2667_v51  ;;  %v2674_v12 = vrot.slane %v2673_v40, 1  ;;  %v2681_v57 = vrot.slane %v2680_v56, 1  ;;  %v2688_v14 = vrot.slane %v2687_v11, 1 }
 0x142   : > { %v2693_v7 = vrot.slane %v2692_v58, 2  ;;  %v2699_v18 = vmax.f32 %v2697_v37, %v2698_v62  ;;  %v2706_v24 = vmax.f32 %v2704_v46, %v2705_v17  ;;  %v2713_v19 = vmax.f32 %v2711_v48, %v2712_v9  ;;  %v9830_v62 = vpop.permute.xlu2 %8692  ;;  %v2211_v17 = vpop.f32.mrf.mxu2 }
 0x143   : > { %v2675_v34 = vmax.f32 %v2673_v40, %v2674_v12  ;;  %v2682_v23 = vmax.f32 %v2680_v56, %v2681_v57  ;;  %v2689_v63 = vmax.f32 %v2687_v11, %v2688_v14  ;;  %v3504_v21 = vsel %vm3502_vm5, %v2668_v2, -inf  ;;  %v9828_v40 = vpop.permute.xlu1 %8687  ;;  %v1628_v2 = vpop.f32.mrf.mxu1 }
 0x144   : > { %v3505_v25 = vmax.f32 %v9771_v1, %v3504_v21  ;;  %v2694_v4 = vmax.f32 %v2692_v58, %v2693_v7  ;;  %v2700_v38 = vrot.slane %v2699_v18, 2  ;;  %v2707_v41 = vrot.slane %v2706_v24, 2  ;;  %v9826_v1 = vpop.permute.xlu0 %8682  ;;  %v1479_v12 = vpop.f32.mrf.mxu0 }
 0x145   : > { %v3507_v39 = vsel %vm3502_vm5, %v2675_v34, -inf  ;;  %v3510_v29 = vsel %vm3502_vm5, %v2682_v23, -inf  ;;  %v3513_v27 = vsel %vm3502_vm5, %v2689_v63, -inf  ;;  %v2714_v42 = vrot.slane %v2713_v19, 2 }
 0x146   : > { %v3508_v37 = vmax.f32 %v9774_v15, %v3507_v39  ;;  %v3511_v46 = vmax.f32 %v9779_v36, %v3510_v29  ;;  %v3514_v48 = vmax.f32 %v9782_v26, %v3513_v27  ;;  %v2695_v51 = vrot.slane %v2694_v4, 1 }
 0x147   : > { %v2701_v56 = vmax.f32 %v2699_v18, %v2700_v38  ;;  %v2708_v11 = vmax.f32 %v2706_v24, %v2707_v41  ;;  %v2715_v58 = vmax.f32 %v2713_v19, %v2714_v42  ;;  %v1627_v9 = vadd.f32 %v1626_v54, %v1477_v49  ;;  %v9839_v24 = vld [vmem:[%s9120_s27 + $0x120] sm:$0xff]  ;;  %v9842_v19 = vld [vmem:[%s9120_s27 + $0x128] sm:$0xff] }
 0x148   : > { %v3786_v15 = vsel %vm3785_vm6, %v3508_v37, %v3505_v25  ;;  %v2696_v36 = vmax.f32 %v2694_v4, %v2695_v51  ;;  %v896_v26 = vsel %vm875_vm1, %v9678_v60, %v8664_v61  ;;  %v897_v60 = vsel %vm875_vm1, %v9681_v55, %v8665_v59 }
 0x149   : > { %v3788_v57 = vsel %vm3787_vm7, %v3511_v46, %v3786_v15  ;;  %v2702_v14 = vrot.slane %v2701_v56, 1  ;;  %v2709_v7 = vrot.slane %v2708_v11, 1  ;;  %v2716_v18 = vrot.slane %v2715_v58, 1  ;;  %v9906_v15 = vld [vmem:[%s9120_s27 + $0x138] sm:$0xff] }
 0x14a   : > { %v3790_v34 = vsel %vm3789_vm8, %v3514_v48, %v3788_v57  ;;  %v3516_v54 = vsel %vm3502_vm5, %v2696_v36, -inf  ;;  %v929_v61 = vsel %vm908_vm2, %v896_v26, %v8674_v5  ;;  %v930_v25 = vsel %vm908_vm2, %v897_v60, %v8675_v3  ;;  %v8708_v27 = vpop.permute.xlu2 %8707  ;;  %v2213_v42 = vpop.f32.mrf.mxu2  ;;  %v9909_v36 = vld [vmem:[%s9120_s27 + $0x140] sm:$0xff] }
 0x14b   : > { %v2703_v49 = vmax.f32 %v2701_v56, %v2702_v14  ;;  %v2710_v23 = vmax.f32 %v2708_v11, %v2709_v7  ;;  %v2717_v63 = vmax.f32 %v2715_v58, %v2716_v18  ;;  %v3517_v21 = vmax.f32 %v9797_v8, %v3516_v54  ;;  %v8703_v20 = vpop.permute.xlu1 %8702  ;;  %v1631_v48 = vpop.f32.mrf.mxu1 }
 0x14c   : > { %v2069_v6 = vsel %vm875_vm1, %v9839_v24, %v8654_v31  ;;  %v2070_v55 = vsel %vm875_vm1, %v9842_v19, %v8655_v22  ;;  %v1333_v59 = vsel %vm875_vm1, %v9722_v28, %v8669_v50  ;;  %v951_v22 = vpack.c.bf16 %v930_v25, %v929_v61  ;;  %v1482_v51 = vpop.f32.mrf.mxu0 }
 0x14d   : > { %v3519_v8 = vsel %vm3502_vm5, %v2703_v49, -inf  ;;  %v3522_v44 = vsel %vm3502_vm5, %v2710_v23, -inf  ;;  %v3525_v3 = vsel %vm3502_vm5, %v2717_v63, -inf  ;;  %v3792_v5 = vsel %vm3791_vm9, %v3517_v21, %v3790_v34 }
 0x14e   : > { %v3520_v31 = vmax.f32 %v9806_v10, %v3519_v8  ;;  %v3523_v53 = vmax.f32 %v9809_v16, %v3522_v44  ;;  %v3526_v4 = vmax.f32 %v9812_v33, %v3525_v3  ;;  %v2101_v38 = vsel %vm908_vm2, %v2069_v6, %v8659_v45  ;;  %7798 = vmatmul.msk.bf16.gmra.mxu1 %vm1405_vm3, %v951_v22  ;;  %v8698_v45 = vpop.permute.xlu0 %8697 }
 0x14f   : > { %v2102_v50 = vsel %vm908_vm2, %v2070_v55, %v8660_v35  ;;  %v1334_v41 = vsel %vm875_vm1, %v9725_v30, %v8670_v43  ;;  %v1365_v10 = vsel %vm908_vm2, %v1333_v59, %v8679_v47  ;;  %v8685_v35 = vunpack.i.h.bf16 %v9826_v1 }
 0x150   : > { %v3794_v16 = vsel %vm3793_vm10, %v3520_v31, %v3792_v5  ;;  %v2123_v33 = vpack.c.bf16 %v2102_v50, %v2101_v38  ;;  %v1366_v0 = vsel %vm908_vm2, %v1334_v41, %v8680_v32  ;;  %v8684_v29 = vunpack.i.l.bf16 %v9826_v1 }
 0x151   : > { %v3796_v39 = vsel %vm3795_vm11, %v3523_v53, %v3794_v16  ;;  %v1387_v43 = vpack.c.bf16 %v1366_v0, %v1365_v10  ;;  %v8690_v47 = vunpack.i.h.bf16 %v9828_v40  ;;  %v8689_v52 = vunpack.i.l.bf16 %v9828_v40 }
 0x152   : > { %v3798_v37 = vsel %vm3797_vm12, %v3526_v4, %v3796_v39  ;;  %7914 = vmatmul.msk.bf16.gmra.mxu2 %vm1405_vm3, %v2123_v33  ;;  %v8695_v32 = vunpack.i.h.bf16 %v9830_v62  ;;  %v8694_v46 = vunpack.i.l.bf16 %v9830_v62  ;;  %v2285_v1 = vadd.f32 %v2211_v17, %v1627_v9 }
 0x153   : > { %3857 = vst.msk [vmem:[#allocation2 + $0x11] sm:$0xff] %vm3502_vm5, %v3798_v37  ;;  %7778 = vmatmul.msk.bf16.gmra.mxu0 %vm1405_vm3, %v1387_v43  ;;  %v1629_v56 = vadd.f32 %v1628_v2, %v1479_v12  ;;  %v8700_v11 = vunpack.i.h.bf16 %v8698_v45  ;;  %v8699_v58 = vunpack.i.l.bf16 %v8698_v45  ;;  %v8705_v26 = vunpack.i.h.bf16 %v8703_v20 }
 0x154   : > { %v8704_v40 = vunpack.i.l.bf16 %v8703_v20  ;;  %v8710_v57 = vunpack.i.h.bf16 %v8708_v27  ;;  %v8709_v14 = vunpack.i.l.bf16 %v8708_v27  ;;  %v2321_v62 = vadd.f32 %v9717_v13, %v2285_v1 }
 0x155   : > { %v2286_v7 = vadd.f32 %v2213_v42, %v1629_v56  ;;  %v9912_v18 = vadd.f32 %v1631_v48, %v1482_v51  ;;  %v898_v34 = vsel %vm875_vm1, %v9722_v28, %v8694_v46  ;;  %v899_v17 = vsel %vm875_vm1, %v9725_v30, %v8695_v32 }
 0x156   : > { %v931_v9 = vsel %vm908_vm2, %v898_v34, %v8704_v40  ;;  %v2071_v2 = vsel %vm875_vm1, %v9906_v15, %v8684_v29  ;;  %v2072_v12 = vsel %vm875_vm1, %v9909_v36, %v8685_v35  ;;  %v2353_v54 = vmax.f32 %v2321_v62, 0.0  ;;  %v8713_v46 = vpop.permute.xlu0 %8712 }
 0x157   : > { %v2322_v60 = vadd.f32 %v9717_v13, %v2286_v7  ;;  %v932_v61 = vsel %vm908_vm2, %v899_v17, %v8705_v26  ;;  %v2103_v49 = vsel %vm908_vm2, %v2071_v2, %v8689_v52  ;;  %v2104_v28 = vsel %vm908_vm2, %v2072_v12, %v8690_v47  ;;  %v8723_v17 = vpop.permute.xlu2 %8722 }
 0x158   : > { %v952_v23 = vpack.c.bf16 %v932_v61, %v931_v9  ;;  %v1335_v30 = vsel %vm875_vm1, %v9839_v24, %v8699_v58  ;;  %v1336_v63 = vsel %vm875_vm1, %v9842_v19, %v8700_v11  ;;  %v2425_v21 = vrot.slane %v2353_v54, 2 }
 0x159   : > { %v2426_v25 = vrot.slane %v2353_v54, 4  ;;  %v2427_v6 = vrot.slane %v2353_v54, 6  ;;  %v2718_v55 = vsel %vm2605_vm4, %v2353_v54, -inf  ;;  %v2354_v8 = vmax.f32 %v2322_v60, 0.0  ;;  %v2216_v60 = vpop.f32.mrf.mxu2 }
 0x15a   : > { %v2719_v59 = vrot.slane %v2718_v55, 4  ;;  %v2124_v44 = vpack.c.bf16 %v2104_v28, %v2103_v49  ;;  %v9933_v3 = vsel %vm908_vm2, %v1335_v30, %v8709_v14  ;;  %v2725_v5 = vsel %vm2605_vm4, %v2425_v21, -inf }
 0x15b   : > { %v2732_v31 = vsel %vm2605_vm4, %v2426_v25, -inf  ;;  %v2739_v53 = vsel %vm2605_vm4, %v2427_v6, -inf  ;;  %v9939_v4 = vsel %vm908_vm2, %v1336_v63, %v8710_v57  ;;  %v2726_v38 = vrot.slane %v2725_v5, 4  ;;  %v8718_v57 = vpop.permute.xlu1 %8717  ;;  %v1633_v6 = vpop.f32.mrf.mxu1 }
 0x15c   : > { %v2720_v22 = vmax.f32 %v2718_v55, %v2719_v59  ;;  %v2733_v50 = vrot.slane %v2732_v31, 4  ;;  %v2740_v41 = vrot.slane %v2739_v53, 4  ;;  %v2428_v10 = vrot.slane %v2354_v8, 2  ;;  %v1484_v55 = vpop.f32.mrf.mxu0 }
 0x15d   : > { %v2429_v16 = vrot.slane %v2354_v8, 4  ;;  %v2430_v33 = vrot.slane %v2354_v8, 6  ;;  %v2746_v0 = vsel %vm2605_vm4, %v2354_v8, -inf  ;;  %v2727_v45 = vmax.f32 %v2725_v5, %v2726_v38 }
 0x15e   : > { %v2721_v35 = vrot.slane %v2720_v22, 2  ;;  %v2734_v20 = vmax.f32 %v2732_v31, %v2733_v50  ;;  %v2741_v39 = vmax.f32 %v2739_v53, %v2740_v41  ;;  %v2747_v43 = vrot.slane %v2746_v0, 4  ;;  %7799 = vmatmul.msk.bf16.gmra.mxu1 %vm1405_vm3, %v952_v23 }
 0x15f   : > { %v2753_v29 = vsel %vm2605_vm4, %v2428_v10, -inf  ;;  %v2760_v47 = vsel %vm2605_vm4, %v2429_v16, -inf  ;;  %v2767_v27 = vsel %vm2605_vm4, %v2430_v33, -inf  ;;  %v2728_v37 = vrot.slane %v2727_v45, 2  ;;  %v9962_v33 = vld [vmem:[%s9120_s27 + $0x150] sm:$0xff] }
 0x160   : > { %v2722_v42 = vmax.f32 %v2720_v22, %v2721_v35  ;;  %v2735_v52 = vrot.slane %v2734_v20, 2  ;;  %v2742_v32 = vrot.slane %v2741_v39, 2  ;;  %v2748_v48 = vmax.f32 %v2746_v0, %v2747_v43  ;;  %v9965_v0 = vld [vmem:[%s9120_s27 + $0x158] sm:$0xff]  ;;  %v8728_v43 = vpop.permute.xlu0 %8727 }
 0x161   : > { %v2754_v51 = vrot.slane %v2753_v29, 4  ;;  %v2761_v1 = vrot.slane %v2760_v47, 4  ;;  %v2768_v56 = vrot.slane %v2767_v27, 4  ;;  %v2729_v58 = vmax.f32 %v2727_v45, %v2728_v37 }
 0x162   : > { %v2723_v11 = vrot.slane %v2722_v42, 1  ;;  %v2736_v26 = vmax.f32 %v2734_v20, %v2735_v52  ;;  %v2743_v40 = vmax.f32 %v2741_v39, %v2742_v32  ;;  %7915 = vmatmul.msk.bf16.gmra.mxu2 %vm1405_vm3, %v2124_v44  ;;  %v2749_v14 = vrot.slane %v2748_v48, 2 }
 0x163   : > { %v2755_v62 = vmax.f32 %v2753_v29, %v2754_v51  ;;  %v2762_v7 = vmax.f32 %v2760_v47, %v2761_v1  ;;  %v2769_v34 = vmax.f32 %v2767_v27, %v2768_v56  ;;  %v2730_v2 = vrot.slane %v2729_v58, 1  ;;  %v8733_v32 = vpop.permute.xlu1 %8732  ;;  %v8738_v56 = vpop.permute.xlu2 %8737 }
 0x164   : > { %v2724_v9 = vmax.f32 %v2722_v42, %v2723_v11  ;;  %v2737_v12 = vrot.slane %v2736_v26, 1  ;;  %v2744_v54 = vrot.slane %v2743_v40, 1  ;;  %v2750_v61 = vmax.f32 %v2748_v48, %v2749_v14 }
 0x165   : > { %v2756_v49 = vrot.slane %v2755_v62, 2  ;;  %v2763_v23 = vrot.slane %v2762_v7, 2  ;;  %v2770_v28 = vrot.slane %v2769_v34, 2  ;;  %v2731_v30 = vmax.f32 %v2729_v58, %v2730_v2 }
 0x166   : > { %v2738_v63 = vmax.f32 %v2736_v26, %v2737_v12  ;;  %v2745_v21 = vmax.f32 %v2743_v40, %v2744_v54  ;;  %v9948_v25 = vsel %vm3502_vm5, %v2724_v9, -inf  ;;  %v2751_v59 = vrot.slane %v2750_v61, 1  ;;  %v1636_v54 = vpop.f32.mrf.mxu1 }
 0x167   : > { %v2757_v8 = vmax.f32 %v2755_v62, %v2756_v49  ;;  %v2764_v44 = vmax.f32 %v2762_v7, %v2763_v23  ;;  %v2771_v5 = vmax.f32 %v2769_v34, %v2770_v28  ;;  %v9951_v31 = vsel %vm3502_vm5, %v2731_v30, -inf }
 0x168   : > { %v9954_v53 = vsel %vm3502_vm5, %v2738_v63, -inf  ;;  %v9957_v22 = vsel %vm3502_vm5, %v2745_v21, -inf  ;;  %v1388_v38 = vpack.c.bf16 %v9939_v4, %v9933_v3  ;;  %v2752_v50 = vmax.f32 %v2750_v61, %v2751_v59  ;;  %v1487_v61 = vpop.f32.mrf.mxu0 }
 0x169   : > { %v2758_v41 = vrot.slane %v2757_v8, 1  ;;  %v2765_v10 = vrot.slane %v2764_v44, 1  ;;  %v2772_v16 = vrot.slane %v2771_v5, 1  ;;  %v8715_v35 = vunpack.i.h.bf16 %v8713_v46 }
 0x16a   : > { %7779 = vmatmul.msk.bf16.gmra.mxu0 %vm1405_vm3, %v1388_v38  ;;  %v8714_v45 = vunpack.i.l.bf16 %v8713_v46  ;;  %v8720_v20 = vunpack.i.h.bf16 %v8718_v57  ;;  %v8719_v39 = vunpack.i.l.bf16 %v8718_v57  ;;  %v9969_v3 = vsel %vm3502_vm5, %v2752_v50, -inf  ;;  %v2218_v57 = vpop.f32.mrf.mxu2  ;;  %v10004_v38 = vpop.permute.xlu0 %8742 }
 0x16b   : > { %v2759_v29 = vmax.f32 %v2757_v8, %v2758_v41  ;;  %v2766_v47 = vmax.f32 %v2764_v44, %v2765_v10  ;;  %v2773_v27 = vmax.f32 %v2771_v5, %v2772_v16  ;;  %v2074_v4 = vsel %vm875_vm1, %v9965_v0, %v8715_v35 }
 0x16c   : > { %v2073_v42 = vsel %vm875_vm1, %v9962_v33, %v8714_v45  ;;  %v8725_v37 = vunpack.i.h.bf16 %v8723_v17  ;;  %v8724_v52 = vunpack.i.l.bf16 %v8723_v17  ;;  %v2106_v1 = vsel %vm908_vm2, %v2074_v4, %v8720_v20 }
 0x16d   : > { %v9976_v46 = vsel %vm3502_vm5, %v2759_v29, -inf  ;;  %v9979_v48 = vsel %vm3502_vm5, %v2766_v47, -inf  ;;  %v9982_v51 = vsel %vm3502_vm5, %v2773_v27, -inf  ;;  %v2105_v11 = vsel %vm908_vm2, %v2073_v42, %v8719_v39 }
 0x16e   : > { %v900_v58 = vsel %vm875_vm1, %v9839_v24, %v8724_v52  ;;  %v901_v26 = vsel %vm875_vm1, %v9842_v19, %v8725_v37  ;;  %v2287_v40 = vadd.f32 %v2216_v60, %v9912_v18  ;;  %v1634_v14 = vadd.f32 %v1633_v6, %v1484_v55 }
 0x16f   : > { %v8730_v62 = vunpack.i.h.bf16 %v8728_v43  ;;  %v8729_v7 = vunpack.i.l.bf16 %v8728_v43  ;;  %v8735_v34 = vunpack.i.h.bf16 %v8733_v32  ;;  %v8734_v9 = vunpack.i.l.bf16 %v8733_v32 }
 0x170   : > { %v2323_v17 = vadd.f32 %v9717_v13, %v2287_v40  ;;  %v8740_v2 = vunpack.i.h.bf16 %v8738_v56  ;;  %v8739_v12 = vunpack.i.l.bf16 %v8738_v56  ;;  %v2288_v60 = vadd.f32 %v2218_v57, %v1634_v14 }
 0x171   : > { %v1337_v24 = vsel %vm875_vm1, %v9906_v15, %v8729_v7  ;;  %v1338_v19 = vsel %vm875_vm1, %v9909_v36, %v8730_v62  ;;  %v934_v18 = vsel %vm908_vm2, %v901_v26, %v8735_v34  ;;  %v933_v23 = vsel %vm908_vm2, %v900_v58, %v8734_v9 }
 0x172   : > { %v2355_v49 = vmax.f32 %v2323_v17, 0.0  ;;  %v1370_v28 = vsel %vm908_vm2, %v1338_v19, %v8740_v2  ;;  %v1369_v30 = vsel %vm908_vm2, %v1337_v24, %v8739_v12  ;;  %v2324_v63 = vadd.f32 %v9717_v13, %v2288_v60 }
 0x173   : > { %v10001_v21 = vadd.f32 %v1636_v54, %v1487_v61  ;;  %v953_v6 = vpack.c.bf16 %v934_v18, %v933_v23  ;;  %v2125_v55 = vpack.c.bf16 %v2106_v1, %v2105_v11  ;;  %v1389_v10 = vpack.c.bf16 %v1370_v28, %v1369_v30 }
 0x174   : > { %v2431_v59 = vrot.slane %v2355_v49, 2  ;;  %v2432_v8 = vrot.slane %v2355_v49, 4  ;;  %v2433_v44 = vrot.slane %v2355_v49, 6  ;;  %v2774_v5 = vsel %vm2605_vm4, %v2355_v49, -inf }
 0x175   : > { %v2775_v50 = vrot.slane %v2774_v5, 4  ;;  %v2356_v41 = vmax.f32 %v2324_v63, 0.0  ;;  %7800 = vmatmul.msk.bf16.gmra.mxu1 %vm1405_vm3, %v953_v6  ;;  %7916 = vmatmul.msk.bf16.gmra.mxu2 %vm1405_vm3, %v2125_v55  ;;  %v8745_v13 = vunpack.i.h.bf16 %v10004_v38  ;;  %v8744_v20 = vunpack.i.l.bf16 %v10004_v38 }
 0x176   : > { %v2781_v16 = vsel %vm2605_vm4, %v2431_v59, -inf  ;;  %v2788_v35 = vsel %vm2605_vm4, %v2432_v8, -inf  ;;  %v2795_v45 = vsel %vm2605_vm4, %v2433_v44, -inf  ;;  %v8748_v44 = vpop.permute.xlu1 %8747 }
 0x177   : > { %v2776_v39 = vmax.f32 %v2774_v5, %v2775_v50  ;;  %v2782_v43 = vrot.slane %v2781_v16, 4  ;;  %v2789_v29 = vrot.slane %v2788_v35, 4  ;;  %v2796_v47 = vrot.slane %v2795_v45, 4 }
 0x178   : > { %v2434_v27 = vrot.slane %v2356_v41, 2  ;;  %v2435_v4 = vrot.slane %v2356_v41, 4  ;;  %v2436_v42 = vrot.slane %v2356_v41, 6  ;;  %v2802_v37 = vsel %vm2605_vm4, %v2356_v41, -inf }
 0x179   : > { %v2777_v52 = vrot.slane %v2776_v39, 2  ;;  %v2783_v32 = vmax.f32 %v2781_v16, %v2782_v43  ;;  %v2790_v1 = vmax.f32 %v2788_v35, %v2789_v29  ;;  %v2797_v56 = vmax.f32 %v2795_v45, %v2796_v47  ;;  %v10021_v43 = vld [vmem:[%s9120_s27 + $0x170] sm:$0xff]  ;;  %v8753_v29 = vpop.permute.xlu2 %8752  ;;  %v2221_v47 = vpop.f32.mrf.mxu2 }
 0x17a   : > { %v2803_v11 = vrot.slane %v2802_v37, 4  ;;  %v2809_v58 = vsel %vm2605_vm4, %v2434_v27, -inf  ;;  %v2816_v26 = vsel %vm2605_vm4, %v2435_v4, -inf  ;;  %v2823_v40 = vsel %vm2605_vm4, %v2436_v42, -inf  ;;  %7780 = vmatmul.msk.bf16.gmra.mxu0 %vm1405_vm3, %v1389_v10 }
 0x17b   : > { %v2778_v57 = vmax.f32 %v2776_v39, %v2777_v52  ;;  %v2784_v14 = vrot.slane %v2783_v32, 2  ;;  %v2791_v62 = vrot.slane %v2790_v1, 2  ;;  %v2798_v7 = vrot.slane %v2797_v56, 2  ;;  %v10027_v52 = vld [vmem:[%s9120_s27 + $0x168] sm:$0xff] }
 0x17c   : > { %v2804_v34 = vmax.f32 %v2802_v37, %v2803_v11  ;;  %v2810_v17 = vrot.slane %v2809_v58, 4  ;;  %v2817_v9 = vrot.slane %v2816_v26, 4  ;;  %v2824_v2 = vrot.slane %v2823_v40, 4 }
 0x17d   : > { %v2779_v12 = vrot.slane %v2778_v57, 1  ;;  %v2785_v54 = vmax.f32 %v2783_v32, %v2784_v14  ;;  %v2792_v61 = vmax.f32 %v2790_v1, %v2791_v62  ;;  %v2799_v24 = vmax.f32 %v2797_v56, %v2798_v7  ;;  %v1638_v32 = vpop.f32.mrf.mxu1  ;;  %v1489_v1 = vpop.f32.mrf.mxu0 }
 0x17e   : > { %v2805_v19 = vrot.slane %v2804_v34, 2  ;;  %v2811_v18 = vmax.f32 %v2809_v58, %v2810_v17  ;;  %v2818_v60 = vmax.f32 %v2816_v26, %v2817_v9  ;;  %v2825_v49 = vmax.f32 %v2823_v40, %v2824_v2 }
 0x17f   : > { %v2780_v23 = vmax.f32 %v2778_v57, %v2779_v12  ;;  %v2786_v28 = vrot.slane %v2785_v54, 1  ;;  %v2793_v30 = vrot.slane %v2792_v61, 1  ;;  %v2800_v63 = vrot.slane %v2799_v24, 1 }
 0x180   : > { %v2806_v6 = vmax.f32 %v2804_v34, %v2805_v19  ;;  %v2812_v55 = vrot.slane %v2811_v18, 2  ;;  %v2819_v59 = vrot.slane %v2818_v60, 2  ;;  %v2826_v8 = vrot.slane %v2825_v49, 2  ;;  %v8758_v19 = vpop.permute.xlu0 %8757 }
 0x181   : > { %v2787_v5 = vmax.f32 %v2785_v54, %v2786_v28  ;;  %v2794_v50 = vmax.f32 %v2792_v61, %v2793_v30  ;;  %v2801_v41 = vmax.f32 %v2799_v24, %v2800_v63  ;;  %v3528_v10 = vsel %vm3502_vm5, %v2780_v23, -inf }
 0x182   : > { %v3529_v16 = vmax.f32 %v9948_v25, %v3528_v10  ;;  %v2807_v35 = vrot.slane %v2806_v6, 1  ;;  %v2813_v45 = vmax.f32 %v2811_v18, %v2812_v55  ;;  %v2820_v39 = vmax.f32 %v2818_v60, %v2819_v59 }
 0x183   : > { %v3531_v27 = vsel %vm3502_vm5, %v2787_v5, -inf  ;;  %v3534_v4 = vsel %vm3502_vm5, %v2794_v50, -inf  ;;  %v3537_v42 = vsel %vm3502_vm5, %v2801_v41, -inf  ;;  %v2827_v37 = vmax.f32 %v2825_v49, %v2826_v8  ;;  %v10064_v50 = vld [vmem:[%s12604_s2] ss:$0 sm:$0xff] }
 0x184   : > { %v3532_v25 = vmax.f32 %v9951_v31, %v3531_v27  ;;  %v3535_v56 = vmax.f32 %v9954_v53, %v3534_v4  ;;  %v3538_v11 = vmax.f32 %v9957_v22, %v3537_v42  ;;  %v2808_v58 = vmax.f32 %v2806_v6, %v2807_v35 }
 0x185   : > { %v2814_v26 = vrot.slane %v2813_v45, 1  ;;  %v2821_v40 = vrot.slane %v2820_v39, 1  ;;  %v2828_v57 = vrot.slane %v2827_v37, 1  ;;  %v2076_v14 = vsel %vm875_vm1, %v10021_v43, %v8745_v13  ;;  %v1641_v41 = vpop.f32.mrf.mxu1  ;;  %v1492_v10 = vpop.f32.mrf.mxu0 }
 0x186   : > { %v3799_v62 = vsel %vm3785_vm6, %v3532_v25, %v3529_v16  ;;  %v3540_v7 = vsel %vm3502_vm5, %v2808_v58, -inf  ;;  %v2075_v31 = vsel %vm875_vm1, %v10027_v52, %v8744_v20  ;;  %v8750_v53 = vunpack.i.h.bf16 %v8748_v44 }
 0x187   : > { %v3800_v22 = vsel %vm3787_vm7, %v3535_v56, %v3799_v62  ;;  %v2815_v34 = vmax.f32 %v2813_v45, %v2814_v26  ;;  %v2822_v17 = vmax.f32 %v2820_v39, %v2821_v40  ;;  %v2829_v9 = vmax.f32 %v2827_v37, %v2828_v57 }
 0x188   : > { %v3801_v2 = vsel %vm3789_vm8, %v3538_v11, %v3800_v22  ;;  %v3541_v12 = vmax.f32 %v9969_v3, %v3540_v7  ;;  %v2108_v13 = vsel %vm908_vm2, %v2076_v14, %v8750_v53  ;;  %v8749_v54 = vunpack.i.l.bf16 %v8748_v44  ;;  %v8763_v3 = vpop.permute.xlu1 %8762  ;;  %v8768_v44 = vpop.permute.xlu2 %8767 }
 0x189   : > { %v3543_v61 = vsel %vm3502_vm5, %v2815_v34, -inf  ;;  %v3546_v38 = vsel %vm3502_vm5, %v2822_v17, -inf  ;;  %v3549_v24 = vsel %vm3502_vm5, %v2829_v9, -inf  ;;  %v8755_v20 = vunpack.i.h.bf16 %v8753_v29  ;;  %v10085_v9 = vpop.permute.xlu0 %8772 }
 0x18a   : > { %v3544_v18 = vmax.f32 %v9976_v46, %v3543_v61  ;;  %v3547_v60 = vmax.f32 %v9979_v48, %v3546_v38  ;;  %v3550_v49 = vmax.f32 %v9982_v51, %v3549_v24  ;;  %v3802_v23 = vsel %vm3791_vm9, %v3541_v12, %v3801_v2  ;;  %v2223_v48 = vpop.f32.mrf.mxu2 }
 0x18b   : > { %v2107_v28 = vsel %vm908_vm2, %v2075_v31, %v8749_v54  ;;  %v8754_v30 = vunpack.i.l.bf16 %v8753_v29  ;;  %v903_v63 = vsel %vm875_vm1, %v9909_v36, %v8755_v20  ;;  %v2289_v6 = vadd.f32 %v2221_v47, %v10001_v21 }
 0x18c   : > { %v3803_v55 = vsel %vm3793_vm10, %v3544_v18, %v3802_v23  ;;  %v1639_v59 = vadd.f32 %v1638_v32, %v1489_v1  ;;  %v8760_v8 = vunpack.i.h.bf16 %v8758_v19  ;;  %v8759_v46 = vunpack.i.l.bf16 %v8758_v19 }
 0x18d   : > { %v3804_v51 = vsel %vm3795_vm11, %v3547_v60, %v3803_v55  ;;  %v902_v5 = vsel %vm875_vm1, %v9906_v15, %v8754_v30  ;;  %v2325_v36 = vadd.f32 %v10064_v50, %v2289_v6  ;;  %v8765_v21 = vunpack.i.h.bf16 %v8763_v3 }
 0x18e   : > { %v3805_v16 = vsel %vm3797_vm12, %v3550_v49, %v3804_v51  ;;  %v1339_v35 = vsel %vm875_vm1, %v9962_v33, %v8759_v46  ;;  %v1340_v45 = vsel %vm875_vm1, %v9965_v0, %v8760_v8  ;;  %v8764_v39 = vunpack.i.l.bf16 %v8763_v3 }
 0x18f   : > { %3858 = vst.msk [vmem:[#allocation2 + $0x21] sm:$0xff] %vm3502_vm5, %v3805_v16  ;;  %v2357_v15 = vmax.f32 %v2325_v36, 0.0  ;;  %v936_v29 = vsel %vm908_vm2, %v903_v63, %v8765_v21  ;;  %v8770_v47 = vunpack.i.h.bf16 %v8768_v44  ;;  %v8769_v27 = vunpack.i.l.bf16 %v8768_v44 }
 0x190   : > { %v935_v4 = vsel %vm908_vm2, %v902_v5, %v8764_v39  ;;  %v2290_v42 = vadd.f32 %v2223_v48, %v1639_v59  ;;  %v10075_v37 = vadd.f32 %v1641_v41, %v1492_v10  ;;  %v2126_v32 = vpack.c.bf16 %v2108_v13, %v2107_v28  ;;  %v8778_v41 = vpop.permute.xlu1 %8777  ;;  %v8783_v39 = vpop.permute.xlu2 %8782 }
 0x191   : > { %v2437_v1 = vrot.slane %v2357_v15, 2  ;;  %v2438_v25 = vrot.slane %v2357_v15, 4  ;;  %v2439_v56 = vrot.slane %v2357_v15, 6  ;;  %v2830_v11 = vsel %vm2605_vm4, %v2357_v15, -inf }
 0x192   : > { %v2831_v58 = vrot.slane %v2830_v11, 4  ;;  %v1372_v26 = vsel %vm908_vm2, %v1340_v45, %v8770_v47  ;;  %v1371_v40 = vsel %vm908_vm2, %v1339_v35, %v8769_v27  ;;  %v2326_v57 = vadd.f32 %v10064_v50, %v2290_v42  ;;  %7917 = vmatmul.msk.bf16.gmra.mxu2 %vm1405_vm3, %v2126_v32  ;;  %v2226_v15 = vpop.f32.mrf.mxu2  ;;  %v10096_v42 = vld [vmem:[%s9120_s27 + $0x188] sm:$0xff]  ;;  %v1643_v32 = vpop.f32.mrf.mxu1 }
 0x193   : > { %v2837_v14 = vsel %vm2605_vm4, %v2437_v1, -inf  ;;  %v2844_v62 = vsel %vm2605_vm4, %v2438_v25, -inf  ;;  %v2851_v7 = vsel %vm2605_vm4, %v2439_v56, -inf  ;;  %v954_v31 = vpack.c.bf16 %v936_v29, %v935_v4  ;;  %v1494_v1 = vpop.f32.mrf.mxu0 }
 0x194   : > { %v2832_v53 = vmax.f32 %v2830_v11, %v2831_v58  ;;  %v2838_v22 = vrot.slane %v2837_v14, 4  ;;  %v2845_v34 = vrot.slane %v2844_v62, 4  ;;  %v2852_v17 = vrot.slane %v2851_v7, 4 }
 0x195   : > { %v2358_v2 = vmax.f32 %v2326_v57, 0.0  ;;  %7801 = vmatmul.msk.bf16.gmra.mxu1 %vm1405_vm3, %v954_v31  ;;  %v1390_v12 = vpack.c.bf16 %v1372_v26, %v1371_v40  ;;  %v8775_v13 = vunpack.i.h.bf16 %v10085_v9  ;;  %v8774_v54 = vunpack.i.l.bf16 %v10085_v9 }
 0x196   : > { %v2833_v61 = vrot.slane %v2832_v53, 2  ;;  %v2839_v38 = vmax.f32 %v2837_v14, %v2838_v22  ;;  %v2846_v24 = vmax.f32 %v2844_v62, %v2845_v34  ;;  %v2853_v20 = vmax.f32 %v2851_v7, %v2852_v17  ;;  %v10102_v62 = vld [vmem:[%s9120_s27 + $0x180] sm:$0xff] }
 0x197   : > { %v2440_v19 = vrot.slane %v2358_v2, 2  ;;  %v2441_v18 = vrot.slane %v2358_v2, 4  ;;  %v2442_v60 = vrot.slane %v2358_v2, 6  ;;  %v2858_v49 = vsel %vm2605_vm4, %v2358_v2, -inf  ;;  %7781 = vmatmul.msk.bf16.gmra.mxu0 %vm1405_vm3, %v1390_v12 }
 0x198   : > { %v2834_v23 = vmax.f32 %v2832_v53, %v2833_v61  ;;  %v2840_v3 = vrot.slane %v2839_v38, 2  ;;  %v2847_v28 = vrot.slane %v2846_v24, 2  ;;  %v2854_v30 = vrot.slane %v2853_v20, 2 }
 0x199   : > { %v2859_v63 = vrot.slane %v2858_v49, 4  ;;  %v2865_v6 = vsel %vm2605_vm4, %v2440_v19, -inf  ;;  %v2872_v55 = vsel %vm2605_vm4, %v2441_v18, -inf  ;;  %v2879_v59 = vsel %vm2605_vm4, %v2442_v60, -inf }
 0x19a   : > { %v2835_v8 = vrot.slane %v2834_v23, 1  ;;  %v2841_v46 = vmax.f32 %v2839_v38, %v2840_v3  ;;  %v2848_v44 = vmax.f32 %v2846_v24, %v2847_v28  ;;  %v2855_v48 = vmax.f32 %v2853_v20, %v2854_v30 }
 0x19b   : > { %v2860_v51 = vmax.f32 %v2858_v49, %v2859_v63  ;;  %v2866_v5 = vrot.slane %v2865_v6, 4  ;;  %v2873_v36 = vrot.slane %v2872_v55, 4  ;;  %v2880_v21 = vrot.slane %v2879_v59, 4  ;;  %v8788_v49 = vpop.permute.xlu0 %8787 }
 0x19c   : > { %v2836_v10 = vmax.f32 %v2834_v23, %v2835_v8  ;;  %v2842_v16 = vrot.slane %v2841_v46, 1  ;;  %v2849_v35 = vrot.slane %v2848_v44, 1  ;;  %v2856_v45 = vrot.slane %v2855_v48, 1 }
 0x19d   : > { %v2861_v29 = vrot.slane %v2860_v51, 2  ;;  %v2867_v47 = vmax.f32 %v2865_v6, %v2866_v5  ;;  %v2874_v27 = vmax.f32 %v2872_v55, %v2873_v36  ;;  %v2881_v4 = vmax.f32 %v2879_v59, %v2880_v21  ;;  %v8793_v55 = vpop.permute.xlu1 %8792 }
 0x19e   : > { %v2843_v25 = vmax.f32 %v2841_v46, %v2842_v16  ;;  %v2850_v56 = vmax.f32 %v2848_v44, %v2849_v35  ;;  %v2857_v11 = vmax.f32 %v2855_v48, %v2856_v45  ;;  %v10099_v58 = vsel %vm3502_vm5, %v2836_v10, -inf  ;;  %v8798_v48 = vpop.permute.xlu2 %8797  ;;  %v1497_v10 = vpop.f32.mrf.mxu0 }
 0x19f   : > { %v2862_v26 = vmax.f32 %v2860_v51, %v2861_v29  ;;  %v2868_v40 = vrot.slane %v2867_v47, 2  ;;  %v2875_v57 = vrot.slane %v2874_v27, 2  ;;  %v2882_v14 = vrot.slane %v2881_v4, 2  ;;  %v2228_v51 = vpop.f32.mrf.mxu2 }
 0x1a0   : > { %v10105_v7 = vsel %vm3502_vm5, %v2843_v25, -inf  ;;  %v10108_v31 = vsel %vm3502_vm5, %v2850_v56, -inf  ;;  %v10111_v53 = vsel %vm3502_vm5, %v2857_v11, -inf  ;;  %v2078_v22 = vsel %vm875_vm1, %v10096_v42, %v8775_v13 }
 0x1a1   : > { %v2863_v34 = vrot.slane %v2862_v26, 1  ;;  %v2869_v17 = vmax.f32 %v2867_v47, %v2868_v40  ;;  %v2876_v9 = vmax.f32 %v2874_v27, %v2875_v57  ;;  %v2883_v2 = vmax.f32 %v2881_v4, %v2882_v14 }
 0x1a2   : > { %v2077_v12 = vsel %vm875_vm1, %v10102_v62, %v8774_v54  ;;  %v8780_v61 = vunpack.i.h.bf16 %v8778_v41  ;;  %v8779_v38 = vunpack.i.l.bf16 %v8778_v41  ;;  %v8785_v24 = vunpack.i.h.bf16 %v8783_v39  ;;  %v1646_v41 = vpop.f32.mrf.mxu1 }
 0x1a3   : > { %v2864_v20 = vmax.f32 %v2862_v26, %v2863_v34  ;;  %v2870_v19 = vrot.slane %v2869_v17, 1  ;;  %v2877_v18 = vrot.slane %v2876_v9, 1  ;;  %v2884_v60 = vrot.slane %v2883_v2, 1 }
 0x1a4   : > { %v2110_v23 = vsel %vm908_vm2, %v2078_v22, %v8780_v61  ;;  %v2109_v3 = vsel %vm908_vm2, %v2077_v12, %v8779_v38  ;;  %v8784_v13 = vunpack.i.l.bf16 %v8783_v39  ;;  %v905_v28 = vsel %vm875_vm1, %v9965_v0, %v8785_v24 }
 0x1a5   : > { %v2871_v30 = vmax.f32 %v2869_v17, %v2870_v19  ;;  %v2878_v63 = vmax.f32 %v2876_v9, %v2877_v18  ;;  %v2885_v6 = vmax.f32 %v2883_v2, %v2884_v60  ;;  %v10122_v54 = vsel %vm3502_vm5, %v2864_v20, -inf }
 0x1a6   : > { %v904_v59 = vsel %vm875_vm1, %v9962_v33, %v8784_v13  ;;  %v2291_v8 = vadd.f32 %v2226_v15, %v10075_v37  ;;  %v1644_v46 = vadd.f32 %v1643_v32, %v1494_v1  ;;  %v8790_v44 = vunpack.i.h.bf16 %v8788_v49 }
 0x1a7   : > { %v10128_v5 = vsel %vm3502_vm5, %v2871_v30, -inf  ;;  %v10131_v0 = vsel %vm3502_vm5, %v2878_v63, -inf  ;;  %v10134_v36 = vsel %vm3502_vm5, %v2885_v6, -inf  ;;  %v8789_v21 = vunpack.i.l.bf16 %v8788_v49 }
 0x1a8   : > { %v2327_v33 = vadd.f32 %v10064_v50, %v2291_v8  ;;  %v1342_v37 = vsel %vm875_vm1, %v10021_v43, %v8790_v44  ;;  %v8795_v16 = vunpack.i.h.bf16 %v8793_v55  ;;  %v8794_v35 = vunpack.i.l.bf16 %v8793_v55 }
 0x1a9   : > { %v1341_v45 = vsel %vm875_vm1, %v10027_v52, %v8789_v21  ;;  %v8800_v39 = vunpack.i.h.bf16 %v8798_v48  ;;  %v8799_v15 = vunpack.i.l.bf16 %v8798_v48  ;;  %v2292_v29 = vadd.f32 %v2228_v51, %v1644_v46 }
 0x1aa   : > { %v2359_v47 = vmax.f32 %v2327_v33, 0.0  ;;  %v937_v27 = vsel %vm908_vm2, %v904_v59, %v8794_v35  ;;  %v938_v4 = vsel %vm908_vm2, %v905_v28, %v8795_v16  ;;  %v10143_v32 = vadd.f32 %v1646_v41, %v1497_v10 }
 0x1ab   : > { %v1374_v1 = vsel %vm908_vm2, %v1342_v37, %v8800_v39  ;;  %v1373_v25 = vsel %vm908_vm2, %v1341_v45, %v8799_v15  ;;  %v2328_v56 = vadd.f32 %v10064_v50, %v2292_v29  ;;  %v955_v11 = vpack.c.bf16 %v938_v4, %v937_v27 }
 0x1ac   : > { %v2443_v26 = vrot.slane %v2359_v47, 2  ;;  %v2444_v40 = vrot.slane %v2359_v47, 4  ;;  %v2445_v57 = vrot.slane %v2359_v47, 6  ;;  %v2886_v14 = vsel %vm2605_vm4, %v2359_v47, -inf }
 0x1ad   : > { %v2887_v22 = vrot.slane %v2886_v14, 4  ;;  %v2360_v34 = vmax.f32 %v2328_v56, 0.0  ;;  %7802 = vmatmul.msk.bf16.gmra.mxu1 %vm1405_vm3, %v955_v11  ;;  %v2127_v17 = vpack.c.bf16 %v2110_v23, %v2109_v3  ;;  %v1391_v9 = vpack.c.bf16 %v1374_v1, %v1373_v25 }
 0x1ae   : > { %v2893_v2 = vsel %vm2605_vm4, %v2443_v26, -inf  ;;  %v2900_v12 = vsel %vm2605_vm4, %v2444_v40, -inf  ;;  %v2907_v61 = vsel %vm2605_vm4, %v2445_v57, -inf  ;;  %v9014_v18 = vmov 0.0   ;;  %v8803_v57 = vpop.permute.xlu0 %8802 }
 0x1af   : > { %v2888_v38 = vmax.f32 %v2886_v14, %v2887_v22  ;;  %v2894_v24 = vrot.slane %v2893_v2, 4  ;;  %v2901_v20 = vrot.slane %v2900_v12, 4  ;;  %v2908_v19 = vrot.slane %v2907_v61, 4  ;;  %7918 = vmatmul.msk.bf16.gmra.mxu2 %vm1405_vm3, %v2127_v17  ;;  %7782 = vmatmul.msk.bf16.gmra.mxu0 %vm1405_vm3, %v1391_v9  ;;  %3695 = vst.msk [vmem:[#allocation2] sm:$0xff] %vm3502_vm5, %v9014_v18  ;;  %v10167_v14 = vpop.f32.mrf.mxu2 }
 0x1b0   : > { %v2446_v60 = vrot.slane %v2360_v34, 2  ;;  %v2447_v49 = vrot.slane %v2360_v34, 4  ;;  %v2448_v23 = vrot.slane %v2360_v34, 6  ;;  %v2914_v3 = vsel %vm2605_vm4, %v2360_v34, -inf  ;;  %3696 = vst.msk [vmem:[#allocation2 + $0x8] sm:$0x3] %vm2605_vm4, %v9014_v18 }
 0x1b1   : > { %v2889_v13 = vrot.slane %v2888_v38, 2  ;;  %v2895_v28 = vmax.f32 %v2893_v2, %v2894_v24  ;;  %v2902_v30 = vmax.f32 %v2900_v12, %v2901_v20  ;;  %v2909_v63 = vmax.f32 %v2907_v61, %v2908_v19  ;;  %3698 = vst.msk [vmem:[#allocation2 + $0x90] sm:$0xff] %vm3502_vm5, %v9014_v18  ;;  %v10171_v24 = vpop.permute.xlu1 %8807 }
 0x1b2   : > { %v2915_v6 = vrot.slane %v2914_v3, 4  ;;  %v2921_v55 = vsel %vm2605_vm4, %v2446_v60, -inf  ;;  %v2928_v59 = vsel %vm2605_vm4, %v2447_v49, -inf  ;;  %v2935_v8 = vsel %vm2605_vm4, %v2448_v23, -inf  ;;  %3699 = vst.msk [vmem:[#allocation2 + $0x98] sm:$0x3] %vm2605_vm4, %v9014_v18 }
 0x1b3   : > { %v2890_v46 = vmax.f32 %v2888_v38, %v2889_v13  ;;  %v2896_v44 = vrot.slane %v2895_v28, 2  ;;  %v2903_v48 = vrot.slane %v2902_v30, 2  ;;  %v2910_v51 = vrot.slane %v2909_v63, 2  ;;  %v3995_v23 = vld [vmem:[#allocation2 + $0x21] sm:$0xff]  ;;  %3712 = vst.msk [vmem:[#allocation2 + $0x19] sm:$0x1] %vm3700_vm13, %v9014_v18 }
 0x1b4   : > { %v2916_v21 = vmax.f32 %v2914_v3, %v2915_v6  ;;  %v2922_v41 = vrot.slane %v2921_v55, 4  ;;  %v2929_v10 = vrot.slane %v2928_v59, 4  ;;  %v2936_v33 = vrot.slane %v2935_v8, 4  ;;  %v10176_v3 = vpop.permute.xlu2 %8812  ;;  %3713 = vst.msk [vmem:[#allocation2 + $0x29] sm:$0x1] %vm3700_vm13, %v9014_v18 }
 0x1b5   : > { %v2891_v37 = vrot.slane %v2890_v46, 1  ;;  %v2897_v16 = vmax.f32 %v2895_v28, %v2896_v44  ;;  %v2904_v35 = vmax.f32 %v2902_v30, %v2903_v48  ;;  %v2911_v45 = vmax.f32 %v2909_v63, %v2910_v51  ;;  %3702 = vst.msk [vmem:[#allocation2 + $0x10] sm:$0x1] %vm3700_vm13, %v9014_v18 }
 0x1b6   : > { %v2917_v39 = vrot.slane %v2916_v21, 2  ;;  %v2923_v15 = vmax.f32 %v2921_v55, %v2922_v41  ;;  %v2930_v29 = vmax.f32 %v2928_v59, %v2929_v10  ;;  %v2937_v47 = vmax.f32 %v2935_v8, %v2936_v33  ;;  %v3994_v59 = vld [vmem:[#allocation2 + $0x11] sm:$0xff]  ;;  %v1648_v41 = vpop.f32.mrf.mxu1  ;;  %v1499_v10 = vpop.f32.mrf.mxu0  ;;  %3703 = vst.msk [vmem:[#allocation2 + $0x20] sm:$0x1] %vm3700_vm13, %v9014_v18 }
 0x1b7   : > { %v2892_v27 = vmax.f32 %v2890_v46, %v2891_v37  ;;  %v2898_v4 = vrot.slane %v2897_v16, 1  ;;  %v2905_v1 = vrot.slane %v2904_v35, 1  ;;  %v2912_v25 = vrot.slane %v2911_v45, 1  ;;  %v7835_v8 = vld [vmem:[%s9120_s27 + $0x1a0] sm:$0xff]  ;;  %3704 = vst.msk [vmem:[#allocation2 + $0x30] sm:$0x1] %vm3700_vm13, %v9014_v18 }
 0x1b8   : > { %v2918_v56 = vmax.f32 %v2916_v21, %v2917_v39  ;;  %v2924_v11 = vrot.slane %v2923_v15, 2  ;;  %v2931_v26 = vrot.slane %v2930_v29, 2  ;;  %v2938_v40 = vrot.slane %v2937_v47, 2  ;;  %3705 = vst.msk [vmem:[#allocation2 + $0x40] sm:$0x1] %vm3700_vm13, %v9014_v18 }
 0x1b9   : > { %v2899_v22 = vmax.f32 %v2897_v16, %v2898_v4  ;;  %v2906_v34 = vmax.f32 %v2904_v35, %v2905_v1  ;;  %v2913_v17 = vmax.f32 %v2911_v45, %v2912_v25  ;;  %v3552_v9 = vsel %vm3502_vm5, %v2892_v27, -inf  ;;  %v7834_v16 = vld [vmem:[%s9120_s27 + $0x198] sm:$0xff]  ;;  %v8818_v25 = vpop.permute.xlu0 %8817  ;;  %3706 = vst.msk [vmem:[#allocation2 + $0x50] sm:$0x1] %vm3700_vm13, %v9014_v18  ;;  %s9016_s27 = smov 64  }
 0x1ba   : > { %v3553_v2 = vmax.f32 %v10099_v58, %v3552_v9  ;;  %v2919_v12 = vrot.slane %v2918_v56, 1  ;;  %v2925_v61 = vmax.f32 %v2923_v15, %v2924_v11  ;;  %v2932_v38 = vmax.f32 %v2930_v29, %v2931_v26  ;;  %3707 = vst.msk [vmem:[#allocation2 + $0x60] sm:$0x1] %vm3700_vm13, %v9014_v18 }
 0x1bb   : > { %v3555_v20 = vsel %vm3502_vm5, %v2899_v22, -inf  ;;  %v3558_v19 = vsel %vm3502_vm5, %v2906_v34, -inf  ;;  %v3561_v60 = vsel %vm3502_vm5, %v2913_v17, -inf  ;;  %v2939_v49 = vmax.f32 %v2937_v47, %v2938_v40  ;;  %v8823_v34 = vpop.permute.xlu1 %8822  ;;  %3708 = vst.msk [vmem:[#allocation2 + $0x70] sm:$0x1] %vm3700_vm13, %v9014_v18 }
 0x1bc   : > { %v3556_v13 = vmax.f32 %v10105_v7, %v3555_v20  ;;  %v3559_v58 = vmax.f32 %v10108_v31, %v3558_v19  ;;  %v3562_v28 = vmax.f32 %v10111_v53, %v3561_v60  ;;  %v2920_v30 = vmax.f32 %v2918_v56, %v2919_v12  ;;  %v2233_v56 = vpop.f32.mrf.mxu2  ;;  %v4003_v20 = vld [vmem:[#allocation2 + $0x22] sm:$0xff]  ;;  %3709 = vst.msk [vmem:[#allocation2 + $0x80] sm:$0x1] %vm3700_vm13, %v9014_v18 }
 0x1bd   : > { %v2926_v63 = vrot.slane %v2925_v61, 1  ;;  %v2933_v6 = vrot.slane %v2932_v38, 1  ;;  %v2940_v55 = vrot.slane %v2939_v49, 1  ;;  %v8831_v7 = vpack.i.bf16 %v3995_v23, %v3994_v59  ;;  %3714 = vst.msk [vmem:[#allocation2 + $0x39] sm:$0x1] %vm3700_vm13, %v9014_v18 }
 0x1be   : > { %v3806_v46 = vsel %vm3785_vm6, %v3556_v13, %v3553_v2  ;;  %v3564_v44 = vsel %vm3502_vm5, %v2920_v30, -inf  ;;  %v8805_v48 = vunpack.i.h.bf16 %v8803_v57  ;;  %v8804_v45 = vunpack.i.l.bf16 %v8803_v57  ;;  %3715 = vst.msk [vmem:[#allocation2 + $0x49] sm:$0x1] %vm3700_vm13, %v9014_v18 }
 0x1bf   : > { %v3807_v31 = vsel %vm3787_vm7, %v3559_v58, %v3806_v46  ;;  %v2927_v53 = vmax.f32 %v2925_v61, %v2926_v63  ;;  %v2934_v51 = vmax.f32 %v2932_v38, %v2933_v6  ;;  %v2941_v21 = vmax.f32 %v2939_v49, %v2940_v55  ;;  %8832 = vrot.lane.b32.xlu0 %v8831_v7, %s9015_s19  ;;  %v8828_v61 = vpop.permute.xlu2 %8827  ;;  %v10248_v63 = vpop.f32.mrf.mxu1 }
 0x1c0   : > { %v3808_v33 = vsel %vm3789_vm8, %v3562_v28, %v3807_v31  ;;  %v3565_v37 = vmax.f32 %v10122_v54, %v3564_v44  ;;  %v2080_v35 = vsel %vm875_vm1, %v7835_v8, %v8805_v48  ;;  %v8810_v54 = vunpack.i.h.bf16 %v10171_v24  ;;  %v10250_v6 = vpop.f32.mrf.mxu0  ;;  %3716 = vst.msk [vmem:[#allocation2 + $0x59] sm:$0x1] %vm3700_vm13, %v9014_v18 }
 0x1c1   : > { %v3567_v39 = vsel %vm3502_vm5, %v2927_v53, -inf  ;;  %v3570_v15 = vsel %vm3502_vm5, %v2934_v51, -inf  ;;  %v3573_v29 = vsel %vm3502_vm5, %v2941_v21, -inf  ;;  %v2079_v11 = vsel %vm875_vm1, %v7834_v16, %v8804_v45  ;;  %3717 = vst.msk [vmem:[#allocation2 + $0x69] sm:$0x1] %vm3700_vm13, %v9014_v18 }
 0x1c2   : > { %v3568_v47 = vmax.f32 %v10128_v5, %v3567_v39  ;;  %v3571_v27 = vmax.f32 %v10131_v0, %v3570_v15  ;;  %v3574_v4 = vmax.f32 %v10134_v36, %v3573_v29  ;;  %v3809_v1 = vsel %vm3791_vm9, %v3565_v37, %v3808_v33  ;;  %3718 = vst.msk [vmem:[#allocation2 + $0x79] sm:$0x1] %vm3700_vm13, %v9014_v18 }
 0x1c3   : > { %v10212_v26 = vsel %vm908_vm2, %v2080_v35, %v8810_v54  ;;  %v8809_v5 = vunpack.i.l.bf16 %v10171_v24  ;;  %v8815_v0 = vunpack.i.h.bf16 %v10176_v3  ;;  %v8814_v40 = vunpack.i.l.bf16 %v10176_v3  ;;  %v4002_v24 = vld [vmem:[#allocation2 + $0x12] sm:$0xff]  ;;  %3719 = vst.msk [vmem:[#allocation2 + $0x89] sm:$0x1] %vm3700_vm13, %v9014_v18 }
 0x1c4   : > { %v3810_v36 = vsel %vm3793_vm10, %v3568_v47, %v3809_v1  ;;  %v2293_v57 = vadd.f32 %v10167_v14, %v10143_v32  ;;  %v1649_v22 = vadd.f32 %v1648_v41, %v1499_v10  ;;  %v8820_v12 = vunpack.i.h.bf16 %v8818_v25  ;;  %v2236_v21 = vpop.f32.mrf.mxu2  ;;  %3701 = vst.msk [vmem:[#allocation2] sm:$0x1] %vm3700_vm13, %v9014_v18 }
 0x1c5   : > { %v3811_v17 = vsel %vm3795_vm11, %v3571_v27, %v3810_v36  ;;  %v10226_v9 = vsel %vm908_vm2, %v2079_v11, %v8809_v5  ;;  %v907_v2 = vsel %vm875_vm1, %v10021_v43, %v8815_v0  ;;  %v906_v32 = vsel %vm875_vm1, %v10027_v52, %v8814_v40  ;;  %3710 = vst.msk [vmem:[#allocation2 + $0x90] sm:$0x1] %vm3700_vm13, %v9014_v18 }
 0x1c6   : > { %v3812_v38 = vsel %vm3797_vm12, %v3574_v4, %v3811_v17  ;;  %v2329_v14 = vadd.f32 %v10064_v50, %v2293_v57  ;;  %v8819_v19 = vunpack.i.l.bf16 %v8818_v25  ;;  %v8836_v60 = vpack.i.bf16 %v4003_v20, %v4002_v24  ;;  %3711 = vst.msk [vmem:[#allocation2 + $0x9] sm:$0x1] %vm3700_vm13, %v9014_v18 }
 0x1c7   : > { %3859 = vst.msk [vmem:[#allocation2 + $0x31] sm:$0xff] %vm3502_vm5, %v3812_v38  ;;  %v1344_v43 = vsel %vm875_vm1, %v10096_v42, %v8820_v12  ;;  %v8825_v49 = vunpack.i.h.bf16 %v8823_v34  ;;  %v8824_v23 = vunpack.i.l.bf16 %v8823_v34  ;;  %v8830_v58 = vunpack.i.h.bf16 %v8828_v61 }
 0x1c8   : > { %v2361_v3 = vmax.f32 %v2329_v14, 0.0  ;;  %v1343_v13 = vsel %vm875_vm1, %v10102_v62, %v8819_v19  ;;  %v8829_v52 = vunpack.i.l.bf16 %v8828_v61  ;;  %8837 = vrot.lane.b32.xlu1 %v8836_v60, %s9016_s27  ;;  %v2294_v30 = vadd.f32 %v2233_v56, %v1649_v22  ;;  %3720 = vst.msk [vmem:[#allocation2 + $0x99] sm:$0x1] %vm3700_vm13, %v9014_v18  ;;  %v1504_v12 = vpop.f32.mrf.mxu0 }
 0x1c9   : > { %v939_v28 = vsel %vm908_vm2, %v906_v32, %v8824_v23  ;;  %v940_v42 = vsel %vm908_vm2, %v907_v2, %v8825_v49  ;;  %v1376_v44 = vsel %vm908_vm2, %v1344_v43, %v8830_v58  ;;  %v2128_v45 = vpack.c.bf16 %v10212_v26, %v10226_v9  ;;  %v1653_v2 = vpop.f32.mrf.mxu1 }
 0x1ca   : > { %v2449_v62 = vrot.slane %v2361_v3, 2  ;;  %v2450_v55 = vrot.slane %v2361_v3, 4  ;;  %v2451_v59 = vrot.slane %v2361_v3, 6  ;;  %v2942_v8 = vsel %vm2605_vm4, %v2361_v3, -inf }
 0x1cb   : > { %v2943_v46 = vrot.slane %v2942_v8, 4  ;;  %v1375_v7 = vsel %vm908_vm2, %v1343_v13, %v8829_v52  ;;  %v2330_v48 = vadd.f32 %v10064_v50, %v2294_v30  ;;  %v956_v35 = vpack.c.bf16 %v940_v42, %v939_v28  ;;  %7919 = vmatmul.msk.bf16.gmra.mxu2 %vm1405_vm3, %v2128_v45 }
 0x1cc   : > { %v2949_v31 = vsel %vm2605_vm4, %v2449_v62, -inf  ;;  %v2956_v53 = vsel %vm2605_vm4, %v2450_v55, -inf  ;;  %v2963_v51 = vsel %vm2605_vm4, %v2451_v59, -inf  ;;  %v1392_v39 = vpack.c.bf16 %v1376_v44, %v1375_v7  ;;  %v2238_v3 = vpop.f32.mrf.mxu2 }
 0x1cd   : > { %v2944_v41 = vmax.f32 %v2942_v8, %v2943_v46  ;;  %v2950_v10 = vrot.slane %v2949_v31, 4  ;;  %v2957_v33 = vrot.slane %v2956_v53, 4  ;;  %v2964_v37 = vrot.slane %v2963_v51, 4  ;;  %7803 = vmatmul.msk.bf16.gmra.mxu1 %vm1405_vm3, %v956_v35 }
 0x1ce   : > { %v2362_v16 = vmax.f32 %v2330_v48, 0.0  ;;  %7783 = vmatmul.msk.bf16.gmra.mxu0 %vm1405_vm3, %v1392_v39  ;;  %v1652_v58 = vadd.f32 %v10248_v63, %v10250_v6  ;;  %vm4543_vm1 = vcmask 517120   ;;  %vm4816_vm3 = vcmask 521216  }
 0x1cf   : > { %v2945_v15 = vrot.slane %v2944_v41, 2  ;;  %v2951_v29 = vmax.f32 %v2949_v31, %v2950_v10  ;;  %v2958_v54 = vmax.f32 %v2956_v53, %v2957_v33  ;;  %v2965_v47 = vmax.f32 %v2963_v51, %v2964_v37  ;;  %4817 = vst.msk [vmem:[#allocation3] sm:$0x3f] %vm4816_vm3, %v9014_v18 }
 0x1d0   : > { %v2452_v27 = vrot.slane %v2362_v16, 2  ;;  %v2453_v4 = vrot.slane %v2362_v16, 4  ;;  %v2454_v1 = vrot.slane %v2362_v16, 6  ;;  %v2970_v25 = vsel %vm2605_vm4, %v2362_v16, -inf  ;;  %v1507_v35 = vpop.f32.mrf.mxu0  ;;  %4819 = vst.msk [vmem:[#allocation3 + $0x28] sm:$0x3f] %vm4816_vm3, %v9014_v18 }
 0x1d1   : > { %v2946_v56 = vmax.f32 %v2944_v41, %v2945_v15  ;;  %v2952_v11 = vrot.slane %v2951_v29, 2  ;;  %v2959_v26 = vrot.slane %v2958_v54, 2  ;;  %v2966_v5 = vrot.slane %v2965_v47, 2 }
 0x1d2   : > { %v2971_v0 = vrot.slane %v2970_v25, 4  ;;  %v2977_v36 = vsel %vm2605_vm4, %v2452_v27, -inf  ;;  %v2984_v40 = vsel %vm2605_vm4, %v2453_v4, -inf  ;;  %v2991_v57 = vsel %vm2605_vm4, %v2454_v1, -inf }
 0x1d3   : > { %v2947_v22 = vrot.slane %v2946_v56, 1  ;;  %v2953_v34 = vmax.f32 %v2951_v29, %v2952_v11  ;;  %v2960_v17 = vmax.f32 %v2958_v54, %v2959_v26  ;;  %v2967_v9 = vmax.f32 %v2965_v47, %v2966_v5 }
 0x1d4   : > { %v2972_v61 = vmax.f32 %v2970_v25, %v2971_v0  ;;  %v2978_v38 = vrot.slane %v2977_v36, 4  ;;  %v2985_v24 = vrot.slane %v2984_v40, 4  ;;  %v2992_v20 = vrot.slane %v2991_v57, 4  ;;  %v2241_v26 = vpop.f32.mrf.mxu2 }
 0x1d5   : > { %v2954_v32 = vrot.slane %v2953_v34, 1  ;;  %v2961_v14 = vrot.slane %v2960_v17, 1  ;;  %v2968_v19 = vrot.slane %v2967_v9, 1  ;;  %v2948_v13 = vmax.f32 %v2946_v56, %v2947_v22 }
 0x1d6   : > { %v2973_v60 = vrot.slane %v2972_v61, 2  ;;  %v2979_v43 = vmax.f32 %v2977_v36, %v2978_v38  ;;  %v2986_v49 = vmax.f32 %v2984_v40, %v2985_v24  ;;  %v2993_v23 = vmax.f32 %v2991_v57, %v2992_v20 }
 0x1d7   : > { %v2955_v62 = vmax.f32 %v2953_v34, %v2954_v32  ;;  %v2962_v55 = vmax.f32 %v2960_v17, %v2961_v14  ;;  %v2969_v59 = vmax.f32 %v2967_v9, %v2968_v19  ;;  %v2295_v8 = vadd.f32 %v2236_v21, %v1652_v58  ;;  %v1656_v21 = vpop.f32.mrf.mxu1 }
 0x1d8   : > { %v2974_v52 = vmax.f32 %v2972_v61, %v2973_v60  ;;  %v2980_v28 = vrot.slane %v2979_v43, 2  ;;  %v2987_v42 = vrot.slane %v2986_v49, 2  ;;  %v2994_v30 = vrot.slane %v2993_v23, 2 }
 0x1d9   : > { %v2331_v31 = vadd.f32 %v10064_v50, %v2295_v8  ;;  %v1654_v53 = vadd.f32 %v1653_v2, %v1504_v12  ;;  %v10290_v63 = vsel %vm3502_vm5, %v2948_v13, -inf  ;;  %v10293_v6 = vsel %vm3502_vm5, %v2955_v62, -inf }
 0x1da   : > { %v2975_v46 = vrot.slane %v2974_v52, 1  ;;  %v2981_v44 = vmax.f32 %v2979_v43, %v2980_v28  ;;  %v2988_v7 = vmax.f32 %v2986_v49, %v2987_v42  ;;  %v2995_v48 = vmax.f32 %v2993_v23, %v2994_v30 }
 0x1db   : > { %v2363_v37 = vmax.f32 %v2331_v31, 0.0  ;;  %v2296_v16 = vadd.f32 %v2238_v3, %v1654_v53  ;;  %v10296_v45 = vsel %vm3502_vm5, %v2962_v55, -inf  ;;  %v10299_v39 = vsel %vm3502_vm5, %v2969_v59, -inf }
 0x1dc   : > { %v2976_v51 = vmax.f32 %v2974_v52, %v2975_v46  ;;  %v2982_v41 = vrot.slane %v2981_v44, 1  ;;  %v2989_v10 = vrot.slane %v2988_v7, 1  ;;  %v2996_v33 = vrot.slane %v2995_v48, 1 }
 0x1dd   : > { %v2455_v54 = vrot.slane %v2363_v37, 2  ;;  %v2456_v47 = vrot.slane %v2363_v37, 4  ;;  %v2457_v27 = vrot.slane %v2363_v37, 6  ;;  %v2998_v4 = vsel %vm2605_vm4, %v2363_v37, -inf }
 0x1de   : > { %v2983_v15 = vmax.f32 %v2981_v44, %v2982_v41  ;;  %v2990_v29 = vmax.f32 %v2988_v7, %v2989_v10  ;;  %v2997_v1 = vmax.f32 %v2995_v48, %v2996_v33  ;;  %v10303_v25 = vsel %vm3502_vm5, %v2976_v51, -inf }
 0x1df   : > { %v2999_v56 = vrot.slane %v2998_v4, 4  ;;  %v1657_v11 = vadd.f32 %v1656_v21, %v1507_v35  ;;  %v3005_v5 = vsel %vm2605_vm4, %v2455_v54, -inf  ;;  %v3012_v0 = vsel %vm2605_vm4, %v2456_v47, -inf  ;;  %v1509_v54 = vpop.f32.mrf.mxu0 }
 0x1e0   : > { %v3019_v36 = vsel %vm2605_vm4, %v2457_v27, -inf  ;;  %v2332_v40 = vadd.f32 %v10064_v50, %v2296_v16  ;;  %v3006_v22 = vrot.slane %v3005_v5, 4  ;;  %v3013_v34 = vrot.slane %v3012_v0, 4 }
 0x1e1   : > { %v3000_v57 = vmax.f32 %v2998_v4, %v2999_v56  ;;  %v3020_v17 = vrot.slane %v3019_v36, 4  ;;  %v10310_v9 = vsel %vm3502_vm5, %v2983_v15, -inf  ;;  %v10313_v2 = vsel %vm3502_vm5, %v2990_v29, -inf  ;;  %v1658_v29 = vpop.f32.mrf.mxu1 }
 0x1e2   : > { %v2364_v12 = vmax.f32 %v2332_v40, 0.0  ;;  %v2297_v61 = vadd.f32 %v2241_v26, %v1657_v11  ;;  %v3007_v24 = vmax.f32 %v3005_v5, %v3006_v22  ;;  %v3014_v20 = vmax.f32 %v3012_v0, %v3013_v34  ;;  %v2243_v11 = vpop.f32.mrf.mxu2 }
 0x1e3   : > { %v3001_v38 = vrot.slane %v3000_v57, 2  ;;  %v3021_v32 = vmax.f32 %v3019_v36, %v3020_v17  ;;  %v3596_v47 = vsel %vm3502_vm5, %v2997_v1, -inf }
 0x1e4   : > { %v2458_v14 = vrot.slane %v2364_v12, 2  ;;  %v2459_v19 = vrot.slane %v2364_v12, 4  ;;  %v2460_v60 = vrot.slane %v2364_v12, 6  ;;  %v3026_v43 = vsel %vm2605_vm4, %v2364_v12, -inf }
 0x1e5   : > { %v3002_v49 = vmax.f32 %v3000_v57, %v3001_v38  ;;  %v3008_v23 = vrot.slane %v3007_v24, 2  ;;  %v3015_v3 = vrot.slane %v3014_v20, 2  ;;  %v3022_v13 = vrot.slane %v3021_v32, 2 }
 0x1e6   : > { %v3027_v58 = vrot.slane %v3026_v43, 4  ;;  %v3033_v52 = vsel %vm2605_vm4, %v2458_v14, -inf  ;;  %v3040_v28 = vsel %vm2605_vm4, %v2459_v19, -inf  ;;  %v3047_v42 = vsel %vm2605_vm4, %v2460_v60, -inf }
 0x1e7   : > { %v3003_v30 = vrot.slane %v3002_v49, 1  ;;  %v3009_v62 = vmax.f32 %v3007_v24, %v3008_v23  ;;  %v3016_v55 = vmax.f32 %v3014_v20, %v3015_v3  ;;  %v3023_v59 = vmax.f32 %v3021_v32, %v3022_v13 }
 0x1e8   : > { %v3028_v8 = vmax.f32 %v3026_v43, %v3027_v58  ;;  %v3034_v46 = vrot.slane %v3033_v52, 4  ;;  %v3041_v44 = vrot.slane %v3040_v28, 4  ;;  %v3048_v7 = vrot.slane %v3047_v42, 4 }
 0x1e9   : > { %v3004_v48 = vmax.f32 %v3002_v49, %v3003_v30  ;;  %v3010_v31 = vrot.slane %v3009_v62, 1  ;;  %v3017_v53 = vrot.slane %v3016_v55, 1  ;;  %v3024_v51 = vrot.slane %v3023_v59, 1 }
 0x1ea   : > { %v3029_v41 = vrot.slane %v3028_v8, 2  ;;  %v3035_v10 = vmax.f32 %v3033_v52, %v3034_v46  ;;  %v3042_v33 = vmax.f32 %v3040_v28, %v3041_v44  ;;  %v3049_v37 = vmax.f32 %v3047_v42, %v3048_v7  ;;  %v1512_v46 = vpop.f32.mrf.mxu0 }
 0x1eb   : > { %v3011_v16 = vmax.f32 %v3009_v62, %v3010_v31  ;;  %v3018_v21 = vmax.f32 %v3016_v55, %v3017_v53  ;;  %v3025_v35 = vmax.f32 %v3023_v59, %v3024_v51  ;;  %v3576_v15 = vsel %vm3502_vm5, %v3004_v48, -inf  ;;  %v2246_v31 = vpop.f32.mrf.mxu2 }
 0x1ec   : > { %v3030_v27 = vmax.f32 %v3028_v8, %v3029_v41  ;;  %v3036_v4 = vrot.slane %v3035_v10, 2  ;;  %v3043_v56 = vrot.slane %v3042_v33, 2  ;;  %v3050_v36 = vrot.slane %v3049_v37, 2  ;;  %v1661_v8 = vpop.f32.mrf.mxu1 }
 0x1ed   : > { %v3579_v26 = vsel %vm3502_vm5, %v3011_v16, -inf  ;;  %v3582_v5 = vsel %vm3502_vm5, %v3018_v21, -inf  ;;  %v3585_v0 = vsel %vm3502_vm5, %v3025_v35, -inf  ;;  %v3577_v40 = vmax.f32 %v10290_v63, %v3576_v15 }
 0x1ee   : > { %v3580_v57 = vmax.f32 %v10293_v6, %v3579_v26  ;;  %v3583_v22 = vmax.f32 %v10296_v45, %v3582_v5  ;;  %v3031_v34 = vrot.slane %v3030_v27, 1  ;;  %v3037_v17 = vmax.f32 %v3035_v10, %v3036_v4 }
 0x1ef   : > { %v3044_v1 = vmax.f32 %v3042_v33, %v3043_v56  ;;  %v3051_v12 = vmax.f32 %v3049_v37, %v3050_v36  ;;  %v2333_v38 = vadd.f32 %v10064_v50, %v2297_v61  ;;  %v3586_v24 = vmax.f32 %v10299_v39, %v3585_v0 }
 0x1f0   : > { %v3813_v20 = vsel %vm3785_vm6, %v3580_v57, %v3577_v40  ;;  %v3032_v32 = vmax.f32 %v3030_v27, %v3031_v34  ;;  %v1659_v14 = vadd.f32 %v1658_v29, %v1509_v54  ;;  %v3038_v60 = vrot.slane %v3037_v17, 1 }
 0x1f1   : > { %v3814_v19 = vsel %vm3787_vm7, %v3583_v22, %v3813_v20  ;;  %v3045_v63 = vrot.slane %v3044_v1, 1  ;;  %v3052_v43 = vrot.slane %v3051_v12, 1  ;;  %v2365_v49 = vmax.f32 %v2333_v38, 0.0 }
 0x1f2   : > { %v3815_v6 = vsel %vm3789_vm8, %v3586_v24, %v3814_v19  ;;  %v3588_v45 = vsel %vm3502_vm5, %v3032_v32, -inf  ;;  %v2298_v23 = vadd.f32 %v2243_v11, %v1659_v14  ;;  %v3039_v3 = vmax.f32 %v3037_v17, %v3038_v60  ;;  %v1514_v60 = vpop.f32.mrf.mxu0 }
 0x1f3   : > { %v3046_v13 = vmax.f32 %v3044_v1, %v3045_v63  ;;  %v3053_v61 = vmax.f32 %v3051_v12, %v3052_v43  ;;  %v3589_v39 = vmax.f32 %v10303_v25, %v3588_v45  ;;  %v2461_v58 = vrot.slane %v2365_v49, 2 }
 0x1f4   : > { %v2462_v52 = vrot.slane %v2365_v49, 4  ;;  %v2463_v28 = vrot.slane %v2365_v49, 6  ;;  %v3054_v42 = vsel %vm2605_vm4, %v2365_v49, -inf  ;;  %v3591_v30 = vsel %vm3502_vm5, %v3039_v3, -inf  ;;  %v1663_v19 = vpop.f32.mrf.mxu1  ;;  %v2248_v49 = vpop.f32.mrf.mxu2 }
 0x1f5   : > { %v3594_v62 = vsel %vm3502_vm5, %v3046_v13, -inf  ;;  %v3597_v55 = vsel %vm3502_vm5, %v3053_v61, -inf  ;;  %v3816_v59 = vsel %vm3791_vm9, %v3589_v39, %v3815_v6  ;;  %v3592_v44 = vmax.f32 %v10310_v9, %v3591_v30 }
 0x1f6   : > { %v3595_v7 = vmax.f32 %v10313_v2, %v3594_v62  ;;  %v3598_v25 = vmax.f32 %v3596_v47, %v3597_v55  ;;  %v3055_v48 = vrot.slane %v3054_v42, 4  ;;  %v3061_v53 = vsel %vm2605_vm4, %v2461_v58, -inf }
 0x1f7   : > { %v3068_v51 = vsel %vm2605_vm4, %v2462_v52, -inf  ;;  %v3075_v41 = vsel %vm2605_vm4, %v2463_v28, -inf  ;;  %v2334_v10 = vadd.f32 %v10064_v50, %v2298_v23  ;;  %v3817_v33 = vsel %vm3793_vm10, %v3592_v44, %v3816_v59  ;;  %v10356_v59 = vld [vmem:[%s12604_s2] ss:$0 sm:$0xff] }
 0x1f8   : > { %v3056_v37 = vmax.f32 %v3054_v42, %v3055_v48  ;;  %v3062_v16 = vrot.slane %v3061_v53, 4  ;;  %v3069_v21 = vrot.slane %v3068_v51, 4  ;;  %v3818_v9 = vsel %vm3795_vm11, %v3595_v7, %v3817_v33 }
 0x1f9   : > { %v3076_v35 = vrot.slane %v3075_v41, 4  ;;  %v2366_v2 = vmax.f32 %v2334_v10, 0.0  ;;  %v1662_v15 = vadd.f32 %v1661_v8, %v1512_v46  ;;  %v3819_v29 = vsel %vm3797_vm12, %v3598_v25, %v3818_v9 }
 0x1fa   : > { %v3057_v54 = vrot.slane %v3056_v37, 2  ;;  %v3063_v47 = vmax.f32 %v3061_v53, %v3062_v16  ;;  %v3070_v27 = vmax.f32 %v3068_v51, %v3069_v21  ;;  %3860 = vst.msk [vmem:[#allocation2 + $0x41] sm:$0xff] %vm3502_vm5, %v3819_v29 }
 0x1fb   : > { %v3077_v4 = vmax.f32 %v3075_v41, %v3076_v35  ;;  %v2464_v56 = vrot.slane %v2366_v2, 2  ;;  %v2465_v50 = vrot.slane %v2366_v2, 4  ;;  %v2466_v11 = vrot.slane %v2366_v2, 6 }
 0x1fc   : > { %v3058_v26 = vmax.f32 %v3056_v37, %v3057_v54  ;;  %v3064_v5 = vrot.slane %v3063_v47, 2  ;;  %v3071_v0 = vrot.slane %v3070_v27, 2  ;;  %v3082_v36 = vsel %vm2605_vm4, %v2366_v2, -inf }
 0x1fd   : > { %v3078_v40 = vrot.slane %v3077_v4, 2  ;;  %v3083_v57 = vrot.slane %v3082_v36, 4  ;;  %v3089_v22 = vsel %vm2605_vm4, %v2464_v56, -inf  ;;  %v3096_v34 = vsel %vm2605_vm4, %v2465_v50, -inf }
 0x1fe   : > { %v3059_v17 = vrot.slane %v3058_v26, 1  ;;  %v3065_v1 = vmax.f32 %v3063_v47, %v3064_v5  ;;  %v3072_v12 = vmax.f32 %v3070_v27, %v3071_v0  ;;  %v3090_v38 = vrot.slane %v3089_v22, 4  ;;  %v1666_v47 = vpop.f32.mrf.mxu1  ;;  %v1517_v27 = vpop.f32.mrf.mxu0 }
 0x1ff   : > { %v3079_v24 = vmax.f32 %v3077_v4, %v3078_v40  ;;  %v3084_v20 = vmax.f32 %v3082_v36, %v3083_v57  ;;  %v3097_v32 = vrot.slane %v3096_v34, 4  ;;  %v3103_v14 = vsel %vm2605_vm4, %v2466_v11, -inf }
 0x200   : > { %v3066_v63 = vrot.slane %v3065_v1, 1  ;;  %v3073_v43 = vrot.slane %v3072_v12, 1  ;;  %v3091_v6 = vmax.f32 %v3089_v22, %v3090_v38  ;;  %v2299_v45 = vadd.f32 %v2246_v31, %v1662_v15 }
 0x201   : > { %v3080_v23 = vrot.slane %v3079_v24, 1  ;;  %v3085_v3 = vrot.slane %v3084_v20, 2  ;;  %v3098_v13 = vmax.f32 %v3096_v34, %v3097_v32  ;;  %v3104_v61 = vrot.slane %v3103_v14, 4  ;;  %v3997_v57 = vld [vmem:[#allocation2 + $0x41] sm:$0xff] }
 0x202   : > { %v3060_v39 = vmax.f32 %v3058_v26, %v3059_v17  ;;  %v3067_v58 = vmax.f32 %v3065_v1, %v3066_v63  ;;  %v3092_v52 = vrot.slane %v3091_v6, 2  ;;  %v3074_v28 = vmax.f32 %v3072_v12, %v3073_v43  ;;  %v2251_v26 = vpop.f32.mrf.mxu2  ;;  %v4005_v22 = vld [vmem:[#allocation2 + $0x42] sm:$0xff] }
 0x203   : > { %v3086_v42 = vmax.f32 %v3084_v20, %v3085_v3  ;;  %v3099_v30 = vrot.slane %v3098_v13, 2  ;;  %v3105_v62 = vmax.f32 %v3103_v14, %v3104_v61  ;;  %v2335_v8 = vadd.f32 %v10356_v59, %v2299_v45  ;;  %v3996_v14 = vld [vmem:[#allocation2 + $0x31] sm:$0xff] }
 0x204   : > { %v3093_v55 = vmax.f32 %v3091_v6, %v3092_v52  ;;  %v3081_v46 = vmax.f32 %v3079_v24, %v3080_v23  ;;  %v10360_v48 = vsel %vm3502_vm5, %v3060_v39, -inf  ;;  %v10363_v31 = vsel %vm3502_vm5, %v3067_v58, -inf }
 0x205   : > { %v3087_v44 = vrot.slane %v3086_v42, 1  ;;  %v3100_v7 = vmax.f32 %v3098_v13, %v3099_v30  ;;  %v3106_v25 = vrot.slane %v3105_v62, 2  ;;  %v2367_v51 = vmax.f32 %v2335_v8, 0.0 }
 0x206   : > { %v3094_v53 = vrot.slane %v3093_v55, 1  ;;  %v10366_v41 = vsel %vm3502_vm5, %v3074_v28, -inf  ;;  %v10369_v2 = vsel %vm3502_vm5, %v3081_v46, -inf  ;;  %v1664_v54 = vadd.f32 %v1663_v19, %v1514_v60  ;;  %v10381_v19 = vld [vmem:[#allocation2 + $0x32] sm:$0xff] }
 0x207   : > { %v3088_v10 = vmax.f32 %v3086_v42, %v3087_v44  ;;  %v3101_v33 = vrot.slane %v3100_v7, 1  ;;  %v3107_v37 = vmax.f32 %v3105_v62, %v3106_v25  ;;  %v2467_v21 = vrot.slane %v2367_v51, 2 }
 0x208   : > { %v3095_v16 = vmax.f32 %v3093_v55, %v3094_v53  ;;  %v2468_v9 = vrot.slane %v2367_v51, 4  ;;  %v2469_v35 = vrot.slane %v2367_v51, 6  ;;  %v3110_v29 = vsel %vm2605_vm4, %v2367_v51, -inf  ;;  %v10395_v51 = vpop.f32.mrf.mxu1 }
 0x209   : > { %v3108_v15 = vrot.slane %v3107_v37, 1  ;;  %v3102_v4 = vmax.f32 %v3100_v7, %v3101_v33  ;;  %v3111_v56 = vrot.slane %v3110_v29, 4  ;;  %v3117_v50 = vsel %vm2605_vm4, %v2467_v21, -inf }
 0x20a   : > { %v3124_v11 = vsel %vm2605_vm4, %v2468_v9, -inf  ;;  %v10375_v5 = vsel %vm3502_vm5, %v3088_v10, -inf  ;;  %v10378_v0 = vsel %vm3502_vm5, %v3095_v16, -inf  ;;  %v3118_v36 = vrot.slane %v3117_v50, 4  ;;  %v10397_v10 = vpop.f32.mrf.mxu0  ;;  %v10401_v9 = vpop.f32.mrf.mxu2 }
 0x20b   : > { %v3125_v40 = vrot.slane %v3124_v11, 4  ;;  %v3109_v34 = vmax.f32 %v3107_v37, %v3108_v15  ;;  %v3112_v17 = vmax.f32 %v3110_v29, %v3111_v56  ;;  %v3131_v1 = vsel %vm2605_vm4, %v2469_v35, -inf }
 0x20c   : > { %v2300_v12 = vadd.f32 %v2248_v49, %v1664_v54  ;;  %v3119_v38 = vmax.f32 %v3117_v50, %v3118_v36  ;;  %v3132_v20 = vrot.slane %v3131_v1, 4  ;;  %v1667_v32 = vadd.f32 %v1666_v47, %v1517_v27 }
 0x20d   : > { %v3126_v24 = vmax.f32 %v3124_v11, %v3125_v40  ;;  %v3113_v60 = vrot.slane %v3112_v17, 2  ;;  %v8841_v43 = vpack.i.bf16 %v3997_v57, %v3996_v14  ;;  %v8846_v6 = vpack.i.bf16 %v4005_v22, %v10381_v19 }
 0x20e   : > { %v2336_v63 = vadd.f32 %v10356_v59, %v2300_v12  ;;  %v3120_v45 = vrot.slane %v3119_v38, 2  ;;  %v3133_v3 = vmax.f32 %v3131_v1, %v3132_v20  ;;  %v2301_v13 = vadd.f32 %v2251_v26, %v1667_v32 }
 0x20f   : > { %v3127_v23 = vrot.slane %v3126_v24, 2  ;;  %v10386_v61 = vsel %vm3502_vm5, %v3102_v4, -inf  ;;  %v10389_v49 = vsel %vm3502_vm5, %v3109_v34, -inf  ;;  %v3114_v39 = vmax.f32 %v3112_v17, %v3113_v60  ;;  %8842 = vrot.lane.b32.xlu2 %v8841_v43, %s9015_s19  ;;  %8847 = vrot.lane.b32.xlu0 %v8846_v6, %s9016_s27 }
 0x210   : > { %v2368_v58 = vmax.f32 %v2336_v63, 0.0  ;;  %v3121_v52 = vmax.f32 %v3119_v38, %v3120_v45  ;;  %v3134_v42 = vrot.slane %v3133_v3, 2  ;;  %v2337_v30 = vadd.f32 %v10356_v59, %v2301_v13 }
 0x211   : > { %v3128_v28 = vmax.f32 %v3126_v24, %v3127_v23  ;;  %v3115_v62 = vrot.slane %v3114_v39, 1 }
 0x212   : > { %v2470_v55 = vrot.slane %v2368_v58, 2  ;;  %v2471_v8 = vrot.slane %v2368_v58, 4  ;;  %v2472_v46 = vrot.slane %v2368_v58, 6  ;;  %v3122_v44 = vrot.slane %v3121_v52, 1 }
 0x213   : > { %v3129_v7 = vrot.slane %v3128_v28, 1  ;;  %v3135_v25 = vmax.f32 %v3133_v3, %v3134_v42  ;;  %v3138_v53 = vsel %vm2605_vm4, %v2368_v58, -inf  ;;  %v3116_v33 = vmax.f32 %v3114_v39, %v3115_v62  ;;  %v1522_v58 = vpop.f32.mrf.mxu0  ;;  %v2256_v62 = vpop.f32.mrf.mxu2 }
 0x214   : > { %v3139_v37 = vrot.slane %v3138_v53, 4  ;;  %v3145_v16 = vsel %vm2605_vm4, %v2470_v55, -inf  ;;  %v3152_v21 = vsel %vm2605_vm4, %v2471_v8, -inf  ;;  %v3123_v35 = vmax.f32 %v3121_v52, %v3122_v44 }
 0x215   : > { %v3130_v15 = vmax.f32 %v3128_v28, %v3129_v7  ;;  %v3136_v29 = vrot.slane %v3135_v25, 1  ;;  %v3146_v54 = vrot.slane %v3145_v16, 4  ;;  %v3600_v47 = vsel %vm3502_vm5, %v3116_v33, -inf }
 0x216   : > { %v3140_v27 = vmax.f32 %v3138_v53, %v3139_v37  ;;  %v3153_v4 = vrot.slane %v3152_v21, 4  ;;  %v3159_v56 = vsel %vm2605_vm4, %v2472_v46, -inf  ;;  %v3601_v11 = vmax.f32 %v10360_v48, %v3600_v47 }
 0x217   : > { %v3137_v50 = vmax.f32 %v3135_v25, %v3136_v29  ;;  %v3603_v26 = vsel %vm3502_vm5, %v3123_v35, -inf  ;;  %v3606_v36 = vsel %vm3502_vm5, %v3130_v15, -inf  ;;  %v3147_v34 = vmax.f32 %v3145_v16, %v3146_v54 }
 0x218   : > { %v3604_v40 = vmax.f32 %v10363_v31, %v3603_v26  ;;  %v3607_v57 = vmax.f32 %v10366_v41, %v3606_v36  ;;  %v3141_v22 = vrot.slane %v3140_v27, 2  ;;  %v3154_v1 = vmax.f32 %v3152_v21, %v3153_v4 }
 0x219   : > { %v3609_v17 = vsel %vm3502_vm5, %v3137_v50, -inf  ;;  %v3160_v12 = vrot.slane %v3159_v56, 4  ;;  %v2369_v38 = vmax.f32 %v2337_v30, 0.0  ;;  %v3148_v32 = vrot.slane %v3147_v34, 2 }
 0x21a   : > { %v3610_v24 = vmax.f32 %v10369_v2, %v3609_v17  ;;  %v3820_v20 = vsel %vm3785_vm6, %v3604_v40, %v3601_v11  ;;  %v3142_v48 = vmax.f32 %v3140_v27, %v3141_v22  ;;  %v3155_v60 = vrot.slane %v3154_v1, 2  ;;  %v1671_v2 = vpop.f32.mrf.mxu1 }
 0x21b   : > { %v3821_v14 = vsel %vm3787_vm7, %v3607_v57, %v3820_v20  ;;  %v3161_v63 = vmax.f32 %v3159_v56, %v3160_v12  ;;  %v2473_v31 = vrot.slane %v2369_v38, 2  ;;  %v3149_v6 = vmax.f32 %v3147_v34, %v3148_v32  ;;  %v1524_v32 = vpop.f32.mrf.mxu0 }
 0x21c   : > { %v3822_v41 = vsel %vm3789_vm8, %v3610_v24, %v3821_v14  ;;  %v3143_v43 = vrot.slane %v3142_v48, 1  ;;  %v2474_v45 = vrot.slane %v2369_v38, 4  ;;  %v3156_v23 = vmax.f32 %v3154_v1, %v3155_v60 }
 0x21d   : > { %v3162_v3 = vrot.slane %v3161_v63, 2  ;;  %v2475_v13 = vrot.slane %v2369_v38, 6  ;;  %v3166_v39 = vsel %vm2605_vm4, %v2369_v38, -inf  ;;  %v3150_v28 = vrot.slane %v3149_v6, 1 }
 0x21e   : > { %v3144_v52 = vmax.f32 %v3142_v48, %v3143_v43  ;;  %v3167_v42 = vrot.slane %v3166_v39, 4  ;;  %v3173_v30 = vsel %vm2605_vm4, %v2473_v31, -inf  ;;  %v3157_v55 = vrot.slane %v3156_v23, 1  ;;  %v2258_v31 = vpop.f32.mrf.mxu2 }
 0x21f   : > { %v3163_v8 = vmax.f32 %v3161_v63, %v3162_v3  ;;  %v3174_v46 = vrot.slane %v3173_v30, 4  ;;  %v3180_v44 = vsel %vm2605_vm4, %v2474_v45, -inf  ;;  %v3151_v7 = vmax.f32 %v3149_v6, %v3150_v28 }
 0x220   : > { %v3612_v25 = vsel %vm3502_vm5, %v3144_v52, -inf  ;;  %v3168_v53 = vmax.f32 %v3166_v39, %v3167_v42  ;;  %v3181_v33 = vrot.slane %v3180_v44, 4  ;;  %v3158_v37 = vmax.f32 %v3156_v23, %v3157_v55 }
 0x221   : > { %v3164_v16 = vrot.slane %v3163_v8, 1  ;;  %v3613_v21 = vmax.f32 %v10375_v5, %v3612_v25  ;;  %v3175_v35 = vmax.f32 %v3173_v30, %v3174_v46  ;;  %v3615_v15 = vsel %vm3502_vm5, %v3151_v7, -inf }
 0x222   : > { %v3169_v29 = vrot.slane %v3168_v53, 2  ;;  %v3182_v54 = vmax.f32 %v3180_v44, %v3181_v33  ;;  %v3187_v47 = vsel %vm2605_vm4, %v2475_v13, -inf  ;;  %v3616_v4 = vmax.f32 %v10378_v0, %v3615_v15  ;;  %v1673_v48 = vpop.f32.mrf.mxu1 }
 0x223   : > { %v3165_v27 = vmax.f32 %v3163_v8, %v3164_v16  ;;  %v3618_v56 = vsel %vm3502_vm5, %v3158_v37, -inf  ;;  %v3823_v50 = vsel %vm3791_vm9, %v3613_v21, %v3822_v41  ;;  %v3176_v36 = vrot.slane %v3175_v35, 2 }
 0x224   : > { %v3619_v11 = vmax.f32 %v10386_v61, %v3618_v56  ;;  %v3170_v26 = vmax.f32 %v3168_v53, %v3169_v29  ;;  %v3183_v40 = vrot.slane %v3182_v54, 2  ;;  %v3824_v57 = vsel %vm3793_vm10, %v3616_v4, %v3823_v50 }
 0x225   : > { %v3621_v5 = vsel %vm3502_vm5, %v3165_v27, -inf  ;;  %v3188_v22 = vrot.slane %v3187_v47, 4  ;;  %v1669_v34 = vadd.f32 %v10395_v51, %v10397_v10  ;;  %v3177_v12 = vmax.f32 %v3175_v35, %v3176_v36 }
 0x226   : > { %v3622_v17 = vmax.f32 %v10389_v49, %v3621_v5  ;;  %v3825_v0 = vsel %vm3795_vm11, %v3619_v11, %v3824_v57  ;;  %v3171_v1 = vrot.slane %v3170_v26, 1  ;;  %v3184_v38 = vmax.f32 %v3182_v54, %v3183_v40 }
 0x227   : > { %v3189_v24 = vmax.f32 %v3187_v47, %v3188_v22  ;;  %v2302_v61 = vadd.f32 %v10401_v9, %v1669_v34  ;;  %v1672_v20 = vadd.f32 %v1671_v2, %v1522_v58  ;;  %v3178_v63 = vrot.slane %v3177_v12, 1 }
 0x228   : > { %v3826_v14 = vsel %vm3797_vm12, %v3622_v17, %v3825_v0  ;;  %v3172_v60 = vmax.f32 %v3170_v26, %v3171_v1  ;;  %v1674_v41 = vadd.f32 %v1673_v48, %v1524_v32  ;;  %v3185_v43 = vrot.slane %v3184_v38, 1 }
 0x229   : > { %3861 = vst.msk [vmem:[#allocation2 + $0x51] sm:$0xff] %vm3502_vm5, %v3826_v14  ;;  %v3190_v51 = vrot.slane %v3189_v24, 2  ;;  %v2338_v49 = vadd.f32 %v10356_v59, %v2302_v61  ;;  %v2303_v10 = vadd.f32 %v2256_v62, %v1672_v20  ;;  %v3179_v23 = vmax.f32 %v3177_v12, %v3178_v63 }
 0x22a   : > { %v2304_v9 = vadd.f32 %v2258_v31, %v1674_v41  ;;  %v10438_v13 = vsel %vm3502_vm5, %v3172_v60, -inf  ;;  %v3186_v58 = vmax.f32 %v3184_v38, %v3185_v43 }
 0x22b   : > { %v2370_v6 = vmax.f32 %v2338_v49, 0.0  ;;  %v2339_v45 = vadd.f32 %v10356_v59, %v2303_v10  ;;  %v3191_v3 = vmax.f32 %v3189_v24, %v3190_v51  ;;  %v1676_v51 = vpop.f32.mrf.mxu1  ;;  %v1527_v49 = vpop.f32.mrf.mxu0  ;;  %v3626_v10 = vsel %vm3502_vm5, %v3179_v23, -inf }
 0x22c   : > { %v2340_v8 = vadd.f32 %v10356_v59, %v2304_v9  ;;  %v10451_v41 = vsel %vm3502_vm5, %v3186_v58, -inf }
 0x22d   : > { %v2476_v39 = vrot.slane %v2370_v6, 2  ;;  %v2477_v2 = vrot.slane %v2370_v6, 4  ;;  %v2478_v52 = vrot.slane %v2370_v6, 6  ;;  %v3194_v28 = vsel %vm2605_vm4, %v2370_v6, -inf }
 0x22e   : > { %v2371_v42 = vmax.f32 %v2339_v45, 0.0  ;;  %v3195_v30 = vrot.slane %v3194_v28, 4  ;;  %v3192_v53 = vrot.slane %v3191_v3, 1  ;;  %v2372_v31 = vmax.f32 %v2340_v8, 0.0  ;;  %v8267_v45 = vld [vmem:[%s12605_s3 + $0x58] sm:$0xff] }
 0x22f   : > { %v3201_v62 = vsel %vm2605_vm4, %v2476_v39, -inf  ;;  %v3208_v55 = vsel %vm2605_vm4, %v2477_v2, -inf  ;;  %v3215_v7 = vsel %vm2605_vm4, %v2478_v52, -inf  ;;  %v2261_v52 = vpop.f32.mrf.mxu2  ;;  %4157 = vmatpush.bf16.msra.mxu3 %v8267_v45 }
 0x230   : > { %v3202_v46 = vrot.slane %v3201_v62, 4  ;;  %v3209_v44 = vrot.slane %v3208_v55, 4  ;;  %v2479_v25 = vrot.slane %v2371_v42, 2  ;;  %v3196_v33 = vmax.f32 %v3194_v28, %v3195_v30 }
 0x231   : > { %v3216_v37 = vrot.slane %v3215_v7, 4  ;;  %v2480_v16 = vrot.slane %v2371_v42, 4  ;;  %v2481_v15 = vrot.slane %v2371_v42, 6  ;;  %v3222_v29 = vsel %vm2605_vm4, %v2371_v42, -inf }
 0x232   : > { %v3203_v21 = vmax.f32 %v3201_v62, %v3202_v46  ;;  %v3210_v35 = vmax.f32 %v3208_v55, %v3209_v44  ;;  %v3197_v54 = vrot.slane %v3196_v33, 2  ;;  %v3223_v27 = vrot.slane %v3222_v29, 4  ;;  %v8266_v46 = vld [vmem:[%s12605_s3 + $0x50] sm:$0xff] }
 0x233   : > { %v3217_v47 = vmax.f32 %v3215_v7, %v3216_v37  ;;  %v3229_v4 = vsel %vm2605_vm4, %v2479_v25, -inf  ;;  %v3236_v26 = vsel %vm2605_vm4, %v2480_v16, -inf  ;;  %v3243_v0 = vsel %vm2605_vm4, %v2481_v15, -inf  ;;  %4158 = vmatpush.bf16.msra.mxu3 %v8266_v46 }
 0x234   : > { %v3204_v56 = vrot.slane %v3203_v21, 2  ;;  %v3211_v50 = vrot.slane %v3210_v35, 2  ;;  %v3230_v11 = vrot.slane %v3229_v4, 4  ;;  %v3198_v36 = vmax.f32 %v3196_v33, %v3197_v54 }
 0x235   : > { %v3218_v40 = vrot.slane %v3217_v47, 2  ;;  %v3224_v5 = vmax.f32 %v3222_v29, %v3223_v27  ;;  %v3237_v57 = vrot.slane %v3236_v26, 4  ;;  %v3193_v1 = vmax.f32 %v3191_v3, %v3192_v53 }
 0x236   : > { %v3205_v22 = vmax.f32 %v3203_v21, %v3204_v56  ;;  %v3212_v34 = vmax.f32 %v3210_v35, %v3211_v50  ;;  %v3231_v17 = vmax.f32 %v3229_v4, %v3230_v11  ;;  %v3199_v12 = vrot.slane %v3198_v36, 1 }
 0x237   : > { %v3225_v38 = vrot.slane %v3224_v5, 2  ;;  %v3238_v24 = vmax.f32 %v3236_v26, %v3237_v57  ;;  %v3219_v20 = vmax.f32 %v3217_v47, %v3218_v40  ;;  %v3244_v32 = vrot.slane %v3243_v0, 4  ;;  %v8265_v40 = vld [vmem:[%s12605_s3 + $0x48] sm:$0xff] }
 0x238   : > { %v3206_v61 = vrot.slane %v3205_v22, 1  ;;  %v3232_v48 = vrot.slane %v3231_v17, 2  ;;  %v3213_v14 = vrot.slane %v3212_v34, 1  ;;  %v10457_v9 = vsel %vm3502_vm5, %v3193_v1, -inf  ;;  %4159 = vmatpush.bf16.msra.mxu3 %v8265_v40 }
 0x239   : > { %v3226_v60 = vmax.f32 %v3224_v5, %v3225_v38  ;;  %v3239_v63 = vrot.slane %v3238_v24, 2  ;;  %v3245_v6 = vmax.f32 %v3243_v0, %v3244_v32  ;;  %v3200_v3 = vmax.f32 %v3198_v36, %v3199_v12  ;;  %v1529_v0 = vpop.f32.mrf.mxu0  ;;  %v2263_v32 = vpop.f32.mrf.mxu2 }
 0x23a   : > { %v3233_v43 = vmax.f32 %v3231_v17, %v3232_v48  ;;  %v3207_v28 = vmax.f32 %v3205_v22, %v3206_v61  ;;  %v3220_v42 = vrot.slane %v3219_v20, 1  ;;  %v3214_v58 = vmax.f32 %v3212_v34, %v3213_v14  ;;  %v1678_v17 = vpop.f32.mrf.mxu1 }
 0x23b   : > { %v3227_v39 = vrot.slane %v3226_v60, 1  ;;  %v3240_v2 = vmax.f32 %v3238_v24, %v3239_v63  ;;  %v3246_v23 = vrot.slane %v3245_v6, 2  ;;  %v2482_v8 = vrot.slane %v2372_v31, 2 }
 0x23c   : > { %v3234_v30 = vrot.slane %v3233_v43, 1  ;;  %v2483_v25 = vrot.slane %v2372_v31, 4  ;;  %v2484_v53 = vrot.slane %v2372_v31, 6  ;;  %v3250_v16 = vsel %vm2605_vm4, %v2372_v31, -inf }
 0x23d   : > { %v3228_v62 = vmax.f32 %v3226_v60, %v3227_v39  ;;  %v3241_v55 = vrot.slane %v3240_v2, 1  ;;  %v3247_v7 = vmax.f32 %v3245_v6, %v3246_v23  ;;  %v3257_v21 = vsel %vm2605_vm4, %v2482_v8, -inf  ;;  %v8263_v8 = vld [vmem:[%s12605_s3 + $0x38] sm:$0xff] }
 0x23e   : > { %v3235_v44 = vmax.f32 %v3233_v43, %v3234_v30  ;;  %v10465_v35 = vmax.f32 %v3219_v20, %v3220_v42  ;;  %v3251_v54 = vrot.slane %v3250_v16, 4  ;;  %v3258_v4 = vrot.slane %v3257_v21, 4 }
 0x23f   : > { %v3242_v33 = vmax.f32 %v3240_v2, %v3241_v55  ;;  %v3624_v37 = vsel %vm3502_vm5, %v3228_v62, -inf  ;;  %v3248_v15 = vrot.slane %v3247_v7, 1  ;;  %v3264_v56 = vsel %vm2605_vm4, %v2483_v25, -inf }
 0x240   : > { %v3627_v29 = vsel %vm3502_vm5, %v3235_v44, -inf  ;;  %v3625_v11 = vmax.f32 %v10438_v13, %v3624_v37  ;;  %v3252_v26 = vmax.f32 %v3250_v16, %v3251_v54  ;;  %v3265_v36 = vrot.slane %v3264_v56, 4 }
 0x241   : > { %v3628_v47 = vmax.f32 %v3626_v10, %v3627_v29  ;;  %v3630_v27 = vsel %vm3502_vm5, %v3242_v33, -inf  ;;  %v3249_v50 = vmax.f32 %v3247_v7, %v3248_v15  ;;  %v3259_v57 = vmax.f32 %v3257_v21, %v3258_v4 }
 0x242   : > { %v3631_v5 = vmax.f32 %v10451_v41, %v3630_v27  ;;  %v3271_v22 = vsel %vm2605_vm4, %v2484_v53, -inf  ;;  %v1677_v34 = vadd.f32 %v1676_v51, %v1527_v49  ;;  %v3635_v1 = vsel %vm3502_vm5, %v3200_v3, -inf  ;;  %v8264_v51 = vld [vmem:[%s12605_s3 + $0x40] sm:$0xff]  ;;  %v1681_v4 = vpop.f32.mrf.mxu1 }
 0x243   : > { %v3827_v12 = vsel %vm3785_vm6, %v3628_v47, %v3625_v11  ;;  %v3253_v38 = vrot.slane %v3252_v26, 2  ;;  %v3266_v13 = vmax.f32 %v3264_v56, %v3265_v36  ;;  %v3633_v24 = vsel %vm3502_vm5, %v3249_v50, -inf  ;;  %4160 = vmatpush.bf16.msra.mxu3 %v8264_v51  ;;  %v1532_v56 = vpop.f32.mrf.mxu0  ;;  %v8262_v50 = vld [vmem:[%s12605_s3 + $0x30] sm:$0xff] }
 0x244   : > { %v3260_v61 = vrot.slane %v3259_v57, 2  ;;  %v3272_v20 = vrot.slane %v3271_v22, 4  ;;  %v2305_v48 = vadd.f32 %v2261_v52, %v1677_v34  ;;  %v3638_v14 = vsel %vm3502_vm5, %v3207_v28, -inf }
 0x245   : > { %v3254_v60 = vmax.f32 %v3252_v26, %v3253_v38  ;;  %v3267_v63 = vrot.slane %v3266_v13, 2  ;;  %v1679_v31 = vadd.f32 %v1678_v17, %v1529_v0  ;;  %v3828_v49 = vsel %vm3787_vm7, %v3631_v5, %v3827_v12  ;;  %v2266_v17 = vpop.f32.mrf.mxu2 }
 0x246   : > { %v3261_v10 = vmax.f32 %v3259_v57, %v3260_v61  ;;  %v3273_v41 = vmax.f32 %v3271_v22, %v3272_v20  ;;  %v2341_v43 = vadd.f32 %v10356_v59, %v2305_v48  ;;  %v3634_v6 = vmax.f32 %v10457_v9, %v3633_v24 }
 0x247   : > { %v3255_v45 = vrot.slane %v3254_v60, 1  ;;  %v3268_v3 = vmax.f32 %v3266_v13, %v3267_v63  ;;  %v2306_v39 = vadd.f32 %v2263_v32, %v1679_v31  ;;  %v3641_v2 = vsel %vm3502_vm5, %v3214_v58, -inf  ;;  %4161 = vmatpush.bf16.msra.mxu3 %v8263_v8 }
 0x248   : > { %v3262_v52 = vrot.slane %v3261_v10, 1  ;;  %v3274_v28 = vrot.slane %v3273_v41, 2  ;;  %v2373_v42 = vmax.f32 %v2341_v43, 0.0  ;;  %v3829_v30 = vsel %vm3789_vm8, %v3634_v6, %v3828_v49 }
 0x249   : > { %v3256_v23 = vmax.f32 %v3254_v60, %v3255_v45  ;;  %v3269_v62 = vrot.slane %v3268_v3, 1  ;;  %v2342_v55 = vadd.f32 %v10356_v59, %v2306_v39  ;;  %v3644_v5 = vsel %vm3502_vm5, %v10465_v35, -inf }
 0x24a   : > { %v3263_v9 = vmax.f32 %v3261_v10, %v3262_v52  ;;  %v3275_v46 = vmax.f32 %v3273_v41, %v3274_v28  ;;  %v2485_v44 = vrot.slane %v2373_v42, 2  ;;  %v2486_v7 = vrot.slane %v2373_v42, 4  ;;  %v10515_v52 = vld [vmem:[#allocation2 + $0x1] sm:$0xff]  ;;  %v10517_v28 = vld [vmem:[#allocation2 + $0x11] sm:$0xff] }
 0x24b   : > { %v3270_v25 = vmax.f32 %v3268_v3, %v3269_v62  ;;  %v3636_v58 = vsel %vm3502_vm5, %v3256_v23, -inf  ;;  %v2487_v53 = vrot.slane %v2373_v42, 6  ;;  %v3278_v33 = vsel %vm2605_vm4, %v2373_v42, -inf  ;;  %4162 = vmatpush.bf16.msra.mxu3 %v8262_v50  ;;  %v10519_v62 = vpop.f32.mrf.mxu1 }
 0x24c   : > { %v3276_v37 = vrot.slane %v3275_v46, 1  ;;  %v3637_v16 = vmax.f32 %v3635_v1, %v3636_v58  ;;  %v3639_v21 = vsel %vm3502_vm5, %v3263_v9, -inf  ;;  %v3279_v15 = vrot.slane %v3278_v33, 4 }
 0x24d   : > { %v3640_v29 = vmax.f32 %v3638_v14, %v3639_v21  ;;  %v3642_v54 = vsel %vm3502_vm5, %v3270_v25, -inf  ;;  %v3285_v47 = vsel %vm2605_vm4, %v2485_v44, -inf  ;;  %v3292_v27 = vsel %vm2605_vm4, %v2486_v7, -inf  ;;  %v10523_v44 = vpop.permute.xlu1 %8837 }
 0x24e   : > { %v3277_v11 = vmax.f32 %v3275_v46, %v3276_v37  ;;  %v3643_v26 = vmax.f32 %v3641_v2, %v3642_v54  ;;  %v3830_v36 = vsel %vm3791_vm9, %v3637_v16, %v3829_v30  ;;  %v3280_v40 = vmax.f32 %v3278_v33, %v3279_v15 }
 0x24f   : > { %v3831_v57 = vsel %vm3793_vm10, %v3640_v29, %v3830_v36  ;;  %v3286_v22 = vrot.slane %v3285_v47, 4  ;;  %v3299_v34 = vsel %vm2605_vm4, %v2487_v53, -inf  ;;  %v3293_v12 = vrot.slane %v3292_v27, 4  ;;  %v10527_v53 = vld [vmem:[#allocation2 + $0x22] sm:$0xff] }
 0x250   : > { %v3645_v0 = vsel %vm3502_vm5, %v3277_v11, -inf  ;;  %v3832_v1 = vsel %vm3795_vm11, %v3643_v26, %v3831_v57  ;;  %v1682_v38 = vadd.f32 %v1681_v4, %v1532_v56  ;;  %v3300_v24 = vrot.slane %v3299_v34, 4 }
 0x251   : > { %v3646_v13 = vmax.f32 %v3644_v5, %v3645_v0  ;;  %v2374_v61 = vmax.f32 %v2342_v55, 0.0  ;;  %v3281_v20 = vrot.slane %v3280_v40, 2  ;;  %v3287_v32 = vmax.f32 %v3285_v47, %v3286_v22  ;;  %v10521_v55 = vpop.f32.mrf.mxu0 }
 0x252   : > { %v2307_v48 = vadd.f32 %v2266_v17, %v1682_v38  ;;  %v3294_v60 = vmax.f32 %v3292_v27, %v3293_v12  ;;  %v3301_v51 = vmax.f32 %v3299_v34, %v3300_v24  ;;  %v8871_v58 = vpack.i.bf16 %v10517_v28, %v10515_v52  ;;  %v10532_v27 = vpop.f32.mrf.mxu2 }
 0x253   : > { %v3833_v35 = vsel %vm3797_vm12, %v3646_v13, %v3832_v1  ;;  %v2488_v14 = vrot.slane %v2374_v61, 2  ;;  %v2489_v63 = vrot.slane %v2374_v61, 4  ;;  %v2490_v31 = vrot.slane %v2374_v61, 6 }
 0x254   : > { %3862 = vst.msk [vmem:[#allocation2 + $0x61] sm:$0xff] %vm3502_vm5, %v3833_v35  ;;  %v3306_v49 = vsel %vm2605_vm4, %v2374_v61, -inf  ;;  %v3282_v41 = vmax.f32 %v3280_v40, %v3281_v20  ;;  %v2343_v45 = vadd.f32 %v10356_v59, %v2307_v48  ;;  %v3288_v3 = vrot.slane %v3287_v32, 2  ;;  %v8833_v48 = vpop.permute.xlu0 %8832 }
 0x255   : > { %v3313_v10 = vsel %vm2605_vm4, %v2488_v14, -inf  ;;  %v3307_v43 = vrot.slane %v3306_v49, 4  ;;  %v3320_v39 = vsel %vm2605_vm4, %v2489_v63, -inf  ;;  %v3327_v2 = vsel %vm2605_vm4, %v2490_v31, -inf  ;;  %v1686_v63 = vpop.f32.mrf.mxu1 }
 0x256   : > { %v3314_v6 = vrot.slane %v3313_v10, 4  ;;  %v3295_v42 = vrot.slane %v3294_v60, 2  ;;  %v3302_v8 = vrot.slane %v3301_v51, 2  ;;  %v3321_v9 = vrot.slane %v3320_v39, 4 }
 0x257   : > { %v3308_v30 = vmax.f32 %v3306_v49, %v3307_v43  ;;  %v3328_v46 = vrot.slane %v3327_v2, 4  ;;  %v3283_v7 = vrot.slane %v3282_v41, 1  ;;  %v2375_v25 = vmax.f32 %v2343_v45, 0.0 }
 0x258   : > { %v3315_v23 = vmax.f32 %v3313_v10, %v3314_v6  ;;  %v3289_v33 = vmax.f32 %v3287_v32, %v3288_v3  ;;  %v3322_v16 = vmax.f32 %v3320_v39, %v3321_v9  ;;  %v8886_v21 = vpack.i.bf16 %v10381_v19, %v10527_v53 }
 0x259   : > { %v3309_v37 = vrot.slane %v3308_v30, 2  ;;  %v3296_v15 = vmax.f32 %v3294_v60, %v3295_v42  ;;  %v2491_v54 = vrot.slane %v2375_v25, 2  ;;  %v8840_v47 = vunpack.i.h.bf16 %v10523_v44  ;;  %v1537_v31 = vpop.f32.mrf.mxu0 }
 0x25a   : > { %v3316_v29 = vrot.slane %v3315_v23, 2  ;;  %v3303_v4 = vmax.f32 %v3301_v51, %v3302_v8  ;;  %v3329_v56 = vmax.f32 %v3327_v2, %v3328_v46  ;;  %v2492_v50 = vrot.slane %v2375_v25, 4 }
 0x25b   : > { %v2493_v11 = vrot.slane %v2375_v25, 6  ;;  %v3284_v26 = vmax.f32 %v3282_v41, %v3283_v7  ;;  %v3323_v36 = vrot.slane %v3322_v16, 2  ;;  %v3334_v40 = vsel %vm2605_vm4, %v2375_v25, -inf  ;;  %v10542_v7 = vld [vmem:[#allocation2 + $0x20] sm:$0xff]  ;;  %v2271_v25 = vpop.f32.mrf.mxu2 }
 0x25c   : > { %v3341_v5 = vsel %vm2605_vm4, %v2491_v54, -inf  ;;  %v3290_v57 = vrot.slane %v3289_v33, 1  ;;  %v3310_v22 = vmax.f32 %v3308_v30, %v3309_v37  ;;  %v3335_v34 = vrot.slane %v3334_v40, 4 }
 0x25d   : > { %v3342_v17 = vrot.slane %v3341_v5, 4  ;;  %v3297_v0 = vrot.slane %v3296_v15, 1  ;;  %v3317_v1 = vmax.f32 %v3315_v23, %v3316_v29  ;;  %v3348_v12 = vsel %vm2605_vm4, %v2492_v50, -inf }
 0x25e   : > { %v3355_v38 = vsel %vm2605_vm4, %v2493_v11, -inf  ;;  %v3304_v13 = vrot.slane %v3303_v4, 1  ;;  %v3330_v24 = vrot.slane %v3329_v56, 2  ;;  %v3336_v61 = vmax.f32 %v3334_v40, %v3335_v34  ;;  %v10553_v11 = vld [vmem:[#allocation2 + $0x62] sm:$0xff] }
 0x25f   : > { %v3343_v20 = vmax.f32 %v3341_v5, %v3342_v17  ;;  %v10539_v35 = vsel %vm3502_vm5, %v3284_v26, -inf  ;;  %v3324_v32 = vmax.f32 %v3322_v16, %v3323_v36  ;;  %v3349_v14 = vrot.slane %v3348_v12, 4  ;;  %v10544_v16 = vld [vmem:[#allocation2 + $0x10] sm:$0xff] }
 0x260   : > { %v3356_v60 = vrot.slane %v3355_v38, 4  ;;  %v3291_v51 = vmax.f32 %v3289_v33, %v3290_v57  ;;  %v3311_v49 = vrot.slane %v3310_v22, 1  ;;  %v3337_v10 = vrot.slane %v3336_v61, 2 }
 0x261   : > { %v3344_v41 = vrot.slane %v3343_v20, 2  ;;  %v3318_v43 = vrot.slane %v3317_v1, 1  ;;  %v3350_v6 = vmax.f32 %v3348_v12, %v3349_v14  ;;  %v8835_v3 = vunpack.i.h.bf16 %v8833_v48  ;;  %v10557_v12 = vld [vmem:[#allocation2 + $0x52] sm:$0xff] }
 0x262   : > { %v3357_v45 = vmax.f32 %v3355_v38, %v3356_v60  ;;  %v3331_v39 = vmax.f32 %v3329_v56, %v3330_v24  ;;  %v3338_v2 = vmax.f32 %v3336_v61, %v3337_v10  ;;  %v8839_v30 = vunpack.i.l.bf16 %v10523_v44 }
 0x263   : > { %v3345_v42 = vmax.f32 %v3343_v20, %v3344_v41  ;;  %v3325_v23 = vrot.slane %v3324_v32, 1  ;;  %v3351_v8 = vrot.slane %v3350_v6, 2  ;;  %v8834_v46 = vunpack.i.l.bf16 %v8833_v48 }
 0x264   : > { %v3358_v9 = vrot.slane %v3357_v45, 2  ;;  %v3339_v33 = vrot.slane %v3338_v2, 1  ;;  %v4075_v29 = vsel %vm3502_vm5, %v10542_v7, %v8835_v3  ;;  %v1684_v56 = vadd.f32 %v10519_v62, %v10521_v55  ;;  %v10559_v62 = vld [vmem:[#allocation2 + $0x61] sm:$0xff] }
 0x265   : > { %v3346_v37 = vrot.slane %v3345_v42, 1  ;;  %v3352_v54 = vmax.f32 %v3350_v6, %v3351_v8  ;;  %v4074_v44 = vsel %vm3502_vm5, %v10544_v16, %v8834_v46  ;;  %v4083_v50 = vsel %vm3961_vm14, %v4075_v29, %v8840_v47 }
 0x266   : > { %v3298_v26 = vmax.f32 %v3296_v15, %v3297_v0  ;;  %v3359_v36 = vmax.f32 %v3357_v45, %v3358_v9  ;;  %v4082_v40 = vsel %vm3961_vm14, %v4074_v44, %v8839_v30  ;;  %v3305_v5 = vmax.f32 %v3303_v4, %v3304_v13  ;;  %v10564_v4 = vld [vmem:[#allocation2 + $0x51] sm:$0xff] }
 0x267   : > { %v3312_v57 = vmax.f32 %v3310_v22, %v3311_v49  ;;  %v4090_v34 = vpack.c.bf16 %v4083_v50, %v4082_v40  ;;  %v2308_v17 = vadd.f32 %v10532_v27, %v1684_v56  ;;  %v3340_v55 = vmax.f32 %v3338_v2, %v3339_v33  ;;  %v1688_v22 = vpop.f32.mrf.mxu1  ;;  %v1539_v27 = vpop.f32.mrf.mxu0 }
 0x268   : > { %v3347_v38 = vmax.f32 %v3345_v42, %v3346_v37  ;;  %v1687_v24 = vadd.f32 %v1686_v63, %v1537_v31  ;;  %v8856_v47 = vpack.i.bf16 %v10553_v11, %v10557_v12  ;;  %v3319_v15 = vmax.f32 %v3317_v1, %v3318_v43  ;;  %v2273_v2 = vpop.f32.mrf.mxu2 }
 0x269   : > { %v3326_v0 = vmax.f32 %v3324_v32, %v3325_v23  ;;  %v3332_v61 = vrot.slane %v3331_v39, 1  ;;  %v3353_v20 = vrot.slane %v3352_v54, 1  ;;  %7944 = vmatmul.msk.bf16.vlgmr.msra.gmra.mxu3 %vm4142_vm15, %v4090_v34  ;;  %v3360_v13 = vrot.slane %v3359_v36, 1 }
 0x26a   : > { %v2344_v48 = vadd.f32 %v10356_v59, %v2308_v17  ;;  %8857 = vrot.lane.b32.xlu2 %v8856_v47, %s9016_s27  ;;  %v8851_v14 = vpack.i.bf16 %v10559_v62, %v10564_v4  ;;  %v2309_v60 = vadd.f32 %v2271_v25, %v1687_v24  ;;  %v3650_v1 = vsel %vm3502_vm5, %v3291_v51, -inf }
 0x26b   : > { %v10572_v32 = vsel %vm3502_vm5, %v3298_v26, -inf  ;;  %v10575_v63 = vsel %vm3502_vm5, %v3305_v5, -inf  ;;  %v10578_v31 = vsel %vm3502_vm5, %v3312_v57, -inf  ;;  %v3648_v49 = vsel %vm3502_vm5, %v3340_v55, -inf }
 0x26c   : > { %v3651_v10 = vsel %vm3502_vm5, %v3347_v38, -inf  ;;  %v2376_v41 = vmax.f32 %v2344_v48, 0.0  ;;  %8852 = vrot.lane.b32.xlu1 %v8851_v14, %s9015_s19  ;;  %v2345_v43 = vadd.f32 %v10356_v59, %v2309_v60  ;;  %v10584_v6 = vmax.f32 %v3331_v39, %v3332_v61 }
 0x26d   : > { %v10587_v51 = vsel %vm3502_vm5, %v3319_v15, -inf  ;;  %v10590_v45 = vsel %vm3502_vm5, %v3326_v0, -inf  ;;  %v3354_v3 = vmax.f32 %v3352_v54, %v3353_v20  ;;  %v3361_v42 = vmax.f32 %v3359_v36, %v3360_v13 }
 0x26e   : > { %v2494_v30 = vrot.slane %v2376_v41, 2  ;;  %v2495_v23 = vrot.slane %v2376_v41, 4  ;;  %v2496_v8 = vrot.slane %v2376_v41, 6  ;;  %v3649_v9 = vmax.f32 %v10539_v35, %v3648_v49 }
 0x26f   : > { %v3652_v46 = vmax.f32 %v3650_v1, %v3651_v10  ;;  %v3362_v25 = vsel %vm2605_vm4, %v2376_v41, -inf  ;;  %v2377_v59 = vmax.f32 %v2345_v43, 0.0  ;;  %v3654_v26 = vsel %vm3502_vm5, %v3354_v3, -inf  ;;  %v1691_v55 = vpop.f32.mrf.mxu1  ;;  %v1542_v38 = vpop.f32.mrf.mxu0 }
 0x270   : > { %v3363_v39 = vrot.slane %v3362_v25, 4  ;;  %v3369_v33 = vsel %vm2605_vm4, %v2494_v30, -inf  ;;  %v3376_v37 = vsel %vm2605_vm4, %v2495_v23, -inf  ;;  %v3383_v29 = vsel %vm2605_vm4, %v2496_v8, -inf  ;;  %v2276_v49 = vpop.f32.mrf.mxu2 }
 0x271   : > { %v3370_v56 = vrot.slane %v3369_v33, 4  ;;  %v3377_v54 = vrot.slane %v3376_v37, 4  ;;  %v3384_v44 = vrot.slane %v3383_v29, 4  ;;  %v2497_v50 = vrot.slane %v2377_v59, 2 }
 0x272   : > { %v3364_v36 = vmax.f32 %v3362_v25, %v3363_v39  ;;  %v3390_v35 = vsel %vm2605_vm4, %v2377_v59, -inf  ;;  %v1689_v40 = vadd.f32 %v1688_v22, %v1539_v27  ;;  %8872 = vrot.lane.b32.xlu2 %v8871_v58, %s9015_s19  ;;  %v3657_v5 = vsel %vm3502_vm5, %v3361_v42, -inf }
 0x273   : > { %v3371_v57 = vmax.f32 %v3369_v33, %v3370_v56  ;;  %v3378_v34 = vmax.f32 %v3376_v37, %v3377_v54  ;;  %v3385_v17 = vmax.f32 %v3383_v29, %v3384_v44  ;;  %v2498_v47 = vrot.slane %v2377_v59, 4 }
 0x274   : > { %v3365_v24 = vrot.slane %v3364_v36, 2  ;;  %v2499_v15 = vrot.slane %v2377_v59, 6  ;;  %v3391_v0 = vrot.slane %v3390_v35, 4  ;;  %v3397_v22 = vsel %vm2605_vm4, %v2497_v50, -inf }
 0x275   : > { %v3372_v61 = vrot.slane %v3371_v57, 2  ;;  %v3379_v20 = vrot.slane %v3378_v34, 2  ;;  %v3386_v13 = vrot.slane %v3385_v17, 2  ;;  %v3655_v27 = vmax.f32 %v10572_v32, %v3654_v26 }
 0x276   : > { %v3834_v52 = vsel %vm3785_vm6, %v3652_v46, %v3649_v9  ;;  %v3366_v28 = vmax.f32 %v3364_v36, %v3365_v24  ;;  %v1692_v58 = vadd.f32 %v1691_v55, %v1542_v38  ;;  %v3658_v48 = vmax.f32 %v10575_v63, %v3657_v5 }
 0x277   : > { %v3373_v14 = vmax.f32 %v3371_v57, %v3372_v61  ;;  %v3380_v60 = vmax.f32 %v3378_v34, %v3379_v20  ;;  %v3387_v1 = vmax.f32 %v3385_v17, %v3386_v13  ;;  %v3392_v41 = vmax.f32 %v3390_v35, %v3391_v0  ;;  %v10626_v35 = vld [vmem:[%s12604_s2] ss:$0 sm:$0xff] }
 0x278   : > { %v3367_v10 = vrot.slane %v3366_v28, 1  ;;  %v3398_v43 = vrot.slane %v3397_v22, 4  ;;  %v3404_v3 = vsel %vm2605_vm4, %v2498_v47, -inf  ;;  %v3411_v32 = vsel %vm2605_vm4, %v2499_v15, -inf }
 0x279   : > { %v3374_v42 = vrot.slane %v3373_v14, 1  ;;  %v3381_v30 = vrot.slane %v3380_v60, 1  ;;  %v3388_v23 = vrot.slane %v3387_v1, 1  ;;  %v3835_v8 = vsel %vm3787_vm7, %v3655_v27, %v3834_v52 }
 0x27a   : > { %v3368_v9 = vmax.f32 %v3366_v28, %v3367_v10  ;;  %v2310_v46 = vadd.f32 %v2273_v2, %v1689_v40  ;;  %8887 = vrot.lane.b32.xlu2 %v8886_v21, %s9016_s27  ;;  %v2311_v63 = vadd.f32 %v2276_v49, %v1692_v58  ;;  %v3405_v33 = vrot.slane %v3404_v3, 4 }
 0x27b   : > { %v3375_v25 = vmax.f32 %v3373_v14, %v3374_v42  ;;  %v3382_v59 = vmax.f32 %v3380_v60, %v3381_v30  ;;  %v3389_v39 = vmax.f32 %v3387_v1, %v3388_v23  ;;  %v3393_v29 = vrot.slane %v3392_v41, 2 }
 0x27c   : > { %v3660_v37 = vsel %vm3502_vm5, %v3368_v9, -inf  ;;  %v3399_v56 = vmax.f32 %v3397_v22, %v3398_v43  ;;  %v3412_v54 = vrot.slane %v3411_v32, 4  ;;  %v3836_v19 = vsel %vm3789_vm8, %v3658_v48, %v3835_v8 }
 0x27d   : > { %v3661_v44 = vmax.f32 %v10578_v31, %v3660_v37  ;;  %v3663_v50 = vsel %vm3502_vm5, %v3375_v25, -inf  ;;  %v3666_v2 = vsel %vm3502_vm5, %v3382_v59, -inf  ;;  %v3669_v26 = vsel %vm3502_vm5, %v3389_v39, -inf }
 0x27e   : > { %v3664_v21 = vmax.f32 %v10587_v51, %v3663_v50  ;;  %v3667_v36 = vmax.f32 %v10590_v45, %v3666_v2  ;;  %v2346_v40 = vadd.f32 %v10626_v35, %v2310_v46  ;;  %v3668_v31 = vsel %vm3502_vm5, %v10584_v6, -inf }
 0x27f   : > { %v3837_v5 = vsel %vm3791_vm9, %v3661_v44, %v3836_v19  ;;  %v3406_v57 = vmax.f32 %v3404_v3, %v3405_v33  ;;  %v3670_v34 = vmax.f32 %v3668_v31, %v3669_v26  ;;  %v3413_v55 = vmax.f32 %v3411_v32, %v3412_v54  ;;  %v10643_v32 = vld [vmem:[#allocation2 + $0x32] sm:$0xff]  ;;  %v1693_v54 = vpop.f32.mrf.mxu1  ;;  %v1544_v44 = vpop.f32.mrf.mxu0 }
 0x280   : > { %v3838_v17 = vsel %vm3793_vm10, %v3664_v21, %v3837_v5  ;;  %v3394_v45 = vmax.f32 %v3392_v41, %v3393_v29  ;;  %v3400_v38 = vrot.slane %v3399_v56, 2  ;;  %v2347_v24 = vadd.f32 %v10626_v35, %v2311_v63 }
 0x281   : > { %v3839_v51 = vsel %vm3795_vm11, %v3667_v36, %v3838_v17  ;;  %v2378_v15 = vmax.f32 %v2346_v40, 0.0  ;;  %v3407_v0 = vrot.slane %v3406_v57, 2  ;;  %v3414_v20 = vrot.slane %v3413_v55, 2  ;;  %v8843_v36 = vpop.permute.xlu2 %8842 }
 0x282   : > { %v3840_v47 = vsel %vm3797_vm12, %v3670_v34, %v3839_v51  ;;  %v3395_v6 = vrot.slane %v3394_v45, 1  ;;  %v3401_v61 = vmax.f32 %v3399_v56, %v3400_v38  ;;  %v2379_v13 = vmax.f32 %v2347_v24, 0.0  ;;  %v2278_v34 = vpop.f32.mrf.mxu2  ;;  %v8848_v24 = vpop.permute.xlu0 %8847 }
 0x283   : > { %3863 = vst.msk [vmem:[#allocation2 + $0x71] sm:$0xff] %vm3502_vm5, %v3840_v47  ;;  %v2500_v22 = vrot.slane %v2378_v15, 2  ;;  %v3408_v27 = vmax.f32 %v3406_v57, %v3407_v0  ;;  %v2501_v52 = vrot.slane %v2378_v15, 4  ;;  %v2502_v28 = vrot.slane %v2378_v15, 6 }
 0x284   : > { %v2503_v58 = vrot.slane %v2379_v13, 2  ;;  %v3418_v48 = vsel %vm2605_vm4, %v2378_v15, -inf  ;;  %v2504_v14 = vrot.slane %v2379_v13, 4  ;;  %v2505_v60 = vrot.slane %v2379_v13, 6 }
 0x285   : > { %v3446_v1 = vsel %vm2605_vm4, %v2379_v13, -inf  ;;  %v3396_v49 = vmax.f32 %v3394_v45, %v3395_v6  ;;  %v3402_v10 = vrot.slane %v3401_v61, 1  ;;  %v3415_v41 = vmax.f32 %v3413_v55, %v3414_v20 }
 0x286   : > { %v3447_v43 = vrot.slane %v3446_v1, 4  ;;  %v3425_v3 = vsel %vm2605_vm4, %v2500_v22, -inf  ;;  %v3453_v42 = vsel %vm2605_vm4, %v2503_v58, -inf  ;;  %v3460_v30 = vsel %vm2605_vm4, %v2504_v14, -inf }
 0x287   : > { %v3467_v23 = vsel %vm2605_vm4, %v2505_v60, -inf  ;;  %v3409_v8 = vrot.slane %v3408_v27, 1  ;;  %v3419_v9 = vrot.slane %v3418_v48, 4  ;;  %v3432_v46 = vsel %vm2605_vm4, %v2501_v52, -inf }
 0x288   : > { %v3448_v63 = vmax.f32 %v3446_v1, %v3447_v43  ;;  %v3439_v25 = vsel %vm2605_vm4, %v2502_v28, -inf  ;;  %v3454_v59 = vrot.slane %v3453_v42, 4  ;;  %v3461_v39 = vrot.slane %v3460_v30, 4 }
 0x289   : > { %v3468_v33 = vrot.slane %v3467_v23, 4  ;;  %v3416_v37 = vrot.slane %v3415_v41, 1  ;;  %v3426_v29 = vrot.slane %v3425_v3, 4  ;;  %v8916_v50 = vpack.i.bf16 %v10643_v32, %v10527_v53 }
 0x28a   : > { %v3449_v56 = vrot.slane %v3448_v63, 2  ;;  %v10650_v2 = vsel %vm3502_vm5, %v3396_v49, -inf  ;;  %v3433_v26 = vrot.slane %v3432_v46, 4  ;;  %v3455_v19 = vmax.f32 %v3453_v42, %v3454_v59  ;;  %v10652_v38 = vld [vmem:[#allocation2 + $0x71] sm:$0xff] }
 0x28b   : > { %v3462_v21 = vmax.f32 %v3460_v30, %v3461_v39  ;;  %v3403_v40 = vmax.f32 %v3401_v61, %v3402_v10  ;;  %v3410_v31 = vmax.f32 %v3408_v27, %v3409_v8  ;;  %v3440_v5 = vrot.slane %v3439_v25, 4  ;;  %v10666_v42 = vld [vmem:[#allocation2 + $0x30] sm:$0xff] }
 0x28c   : > { %v3469_v57 = vmax.f32 %v3467_v23, %v3468_v33  ;;  %v3420_v17 = vmax.f32 %v3418_v48, %v3419_v9  ;;  %v3456_v55 = vrot.slane %v3455_v19, 2  ;;  %v1694_v45 = vadd.f32 %v1693_v54, %v1544_v44 }
 0x28d   : > { %v3463_v51 = vrot.slane %v3462_v21, 2  ;;  %v3427_v47 = vmax.f32 %v3425_v3, %v3426_v29  ;;  %v3450_v15 = vmax.f32 %v3448_v63, %v3449_v56  ;;  %v8845_v0 = vunpack.i.h.bf16 %v8843_v36 }
 0x28e   : > { %v8844_v6 = vunpack.i.l.bf16 %v8843_v36  ;;  %v3434_v20 = vmax.f32 %v3432_v46, %v3433_v26  ;;  %v3457_v13 = vmax.f32 %v3455_v19, %v3456_v55  ;;  %v2312_v52 = vadd.f32 %v2278_v34, %v1694_v45 }
 0x28f   : > { %v3464_v22 = vmax.f32 %v3462_v21, %v3463_v51  ;;  %v3470_v61 = vrot.slane %v3469_v57, 2  ;;  %v10656_v27 = vpack.i.bf16 %v10652_v38, %v10559_v62  ;;  %v8850_v28 = vunpack.i.h.bf16 %v8848_v24  ;;  %v10668_v62 = vld [vmem:[#allocation2 + $0x40] sm:$0xff] }
 0x290   : > { %v8849_v58 = vunpack.i.l.bf16 %v8848_v24  ;;  %v10658_v48 = vmax.f32 %v3415_v41, %v3416_v37  ;;  %v3441_v14 = vmax.f32 %v3439_v25, %v3440_v5  ;;  %v3458_v60 = vrot.slane %v3457_v13, 1 }
 0x291   : > { %v2348_v1 = vadd.f32 %v10626_v35, %v2312_v52  ;;  %v10662_v49 = vsel %vm3502_vm5, %v3403_v40, -inf  ;;  %v3421_v10 = vrot.slane %v3420_v17, 2  ;;  %v3428_v43 = vrot.slane %v3427_v47, 2  ;;  %8902 = vrot.lane.b32.xlu2 %v10656_v27, %s9015_s19 }
 0x292   : > { %v3451_v3 = vrot.slane %v3450_v15, 1  ;;  %v3435_v30 = vrot.slane %v3434_v20, 2  ;;  %v3465_v41 = vrot.slane %v3464_v22, 1  ;;  %v4076_v23 = vsel %vm3502_vm5, %v10666_v42, %v8844_v6 }
 0x293   : > { %v4077_v35 = vsel %vm3502_vm5, %v10668_v62, %v8845_v0  ;;  %v3471_v8 = vmax.f32 %v3469_v57, %v3470_v61  ;;  %v2380_v9 = vmax.f32 %v2348_v1, 0.0  ;;  %v4084_v46 = vsel %vm3961_vm14, %v4076_v23, %v8849_v58 }
 0x294   : > { %v4085_v63 = vsel %vm3961_vm14, %v4077_v35, %v8850_v28  ;;  %v10677_v25 = vsel %vm3502_vm5, %v3410_v31, -inf  ;;  %v3442_v59 = vrot.slane %v3441_v14, 2  ;;  %v3459_v39 = vmax.f32 %v3457_v13, %v3458_v60 }
 0x295   : > { %v4091_v33 = vpack.c.bf16 %v4085_v63, %v4084_v46  ;;  %v3422_v37 = vmax.f32 %v3420_v17, %v3421_v10  ;;  %v3429_v29 = vmax.f32 %v3427_v47, %v3428_v43  ;;  %v3452_v56 = vmax.f32 %v3450_v15, %v3451_v3 }
 0x296   : > { %v2506_v54 = vrot.slane %v2380_v9, 2  ;;  %v3466_v44 = vmax.f32 %v3464_v22, %v3465_v41  ;;  %v2507_v26 = vrot.slane %v2380_v9, 4  ;;  %v2508_v19 = vrot.slane %v2380_v9, 6 }
 0x297   : > { %v3474_v21 = vsel %vm2605_vm4, %v2380_v9, -inf  ;;  %7945 = vmatmul.msk.bf16.gmra.mxu3 %vm4142_vm15, %v4091_v33  ;;  %v3436_v36 = vmax.f32 %v3434_v20, %v3435_v30  ;;  %v3472_v40 = vrot.slane %v3471_v8, 1  ;;  %v3675_v57 = vsel %vm3502_vm5, %v3459_v39, -inf }
 0x298   : > { %v3475_v5 = vrot.slane %v3474_v21, 4  ;;  %v3481_v31 = vsel %vm2605_vm4, %v2506_v54, -inf  ;;  %v3488_v17 = vsel %vm2605_vm4, %v2507_v26, -inf  ;;  %v3495_v55 = vsel %vm2605_vm4, %v2508_v19, -inf }
 0x299   : > { %v3482_v34 = vrot.slane %v3481_v31, 4  ;;  %v3443_v51 = vmax.f32 %v3441_v14, %v3442_v59  ;;  %v3489_v24 = vrot.slane %v3488_v17, 4  ;;  %v3496_v47 = vrot.slane %v3495_v55, 4  ;;  %8917 = vrot.lane.b32.xlu2 %v8916_v50, %s9016_s27 }
 0x29a   : > { %v3476_v45 = vmax.f32 %v3474_v21, %v3475_v5  ;;  %v3423_v15 = vrot.slane %v3422_v37, 1  ;;  %v3672_v0 = vsel %vm3502_vm5, %v3452_v56, -inf  ;;  %v3678_v6 = vsel %vm3502_vm5, %v3466_v44, -inf }
 0x29b   : > { %v3483_v20 = vmax.f32 %v3481_v31, %v3482_v34  ;;  %v3676_v13 = vmax.f32 %v10662_v49, %v3675_v57  ;;  %v3490_v52 = vmax.f32 %v3488_v17, %v3489_v24  ;;  %v3497_v61 = vmax.f32 %v3495_v55, %v3496_v47 }
 0x29c   : > { %v3477_v22 = vrot.slane %v3476_v45, 2  ;;  %v3430_v28 = vrot.slane %v3429_v29, 1  ;;  %v3437_v58 = vrot.slane %v3436_v36, 1  ;;  %v3473_v14 = vmax.f32 %v3471_v8, %v3472_v40 }
 0x29d   : > { %v3484_v60 = vrot.slane %v3483_v20, 2  ;;  %v3673_v1 = vmax.f32 %v10650_v2, %v3672_v0  ;;  %v3491_v53 = vrot.slane %v3490_v52, 2  ;;  %v3498_v32 = vrot.slane %v3497_v61, 2  ;;  %v4008_v0 = vld [vmem:[#allocation2 + $0x72] sm:$0xff] }
 0x29e   : > { %v3478_v10 = vmax.f32 %v3476_v45, %v3477_v22  ;;  %v3424_v50 = vmax.f32 %v3422_v37, %v3423_v15  ;;  %v3444_v43 = vrot.slane %v3443_v51, 1  ;;  %v3679_v3 = vmax.f32 %v10677_v25, %v3678_v6  ;;  %v4285_v15 = vld [vmem:[#allocation2 + $0x92] sm:$0xff] }
 0x29f   : > { %v3485_v30 = vmax.f32 %v3483_v20, %v3484_v60  ;;  %v3841_v41 = vsel %vm3785_vm6, %v3676_v13, %v3673_v1  ;;  %v3492_v23 = vmax.f32 %v3490_v52, %v3491_v53  ;;  %v3499_v35 = vmax.f32 %v3497_v61, %v3498_v32  ;;  %v3876_v61 = vld [vmem:[#allocation2 + $0x31] sm:$0xff]  ;;  %v3877_v53 = vld [vmem:[#allocation2 + $0x41] sm:$0xff] }
 0x2a0   : > { %v3479_v49 = vrot.slane %v3478_v10, 1  ;;  %v3431_v9 = vmax.f32 %v3429_v29, %v3430_v28  ;;  %v3438_v46 = vmax.f32 %v3436_v36, %v3437_v58  ;;  %v3681_v8 = vsel %vm3502_vm5, %v3473_v14, -inf  ;;  %v3881_v28 = vld [vmem:[#allocation2 + $0x2] sm:$0xff]  ;;  %v3882_v58 = vld [vmem:[#allocation2 + $0x12] sm:$0xff] }
 0x2a1   : > { %v3486_v63 = vrot.slane %v3485_v30, 1  ;;  %v3680_v2 = vsel %vm3502_vm5, %v10658_v48, -inf  ;;  %v3493_v39 = vrot.slane %v3492_v23, 1  ;;  %v3500_v33 = vrot.slane %v3499_v35, 1  ;;  %8932 = vrot.lane.b32.xlu2 %v10656_v27, %s9015_s19  ;;  %v3875_v14 = vld [vmem:[#allocation2 + $0x21] sm:$0xff] }
 0x2a2   : > { %v3480_v59 = vmax.f32 %v3478_v10, %v3479_v49  ;;  %v3445_v25 = vmax.f32 %v3443_v51, %v3444_v43  ;;  %v3683_v37 = vsel %vm3502_vm5, %v3424_v50, -inf  ;;  %v3842_v56 = vsel %vm3787_vm7, %v3679_v3, %v3841_v41  ;;  %v3885_v10 = vld [vmem:[#allocation2 + $0x42] sm:$0xff]  ;;  %v4277_v43 = vld [vmem:[#allocation2 + $0x91] sm:$0xff] }
 0x2a3   : > { %v3487_v54 = vmax.f32 %v3485_v30, %v3486_v63  ;;  %v3682_v29 = vmax.f32 %v3680_v2, %v3681_v8  ;;  %v3494_v44 = vmax.f32 %v3492_v23, %v3493_v39  ;;  %v3501_v26 = vmax.f32 %v3499_v35, %v3500_v33  ;;  %v10734_v35 = vld [vmem:[#allocation2 + $0x60] sm:$0xff]  ;;  %v8260_v39 = vld [vmem:[%s12605_s3 + $0x20] sm:$0xff]  ;;  %v8259_v33 = vld [vmem:[%s12605_s3 + $0x18] sm:$0xff] }
 0x2a4   : > { %v3684_v19 = vsel %vm3502_vm5, %v3480_v59, -inf  ;;  %v3686_v21 = vsel %vm3502_vm5, %v3431_v9, -inf  ;;  %v3689_v48 = vsel %vm3502_vm5, %v3438_v46, -inf  ;;  %v3692_v34 = vsel %vm3502_vm5, %v3445_v25, -inf  ;;  %v8261_v9 = vld [vmem:[%s12605_s3 + $0x28] sm:$0xff]  ;;  %v8258_v25 = vld [vmem:[%s12605_s3 + $0x10] sm:$0xff] }
 0x2a5   : > { %v3685_v36 = vmax.f32 %v3683_v37, %v3684_v19  ;;  %v3687_v40 = vsel %vm3502_vm5, %v3487_v54, -inf  ;;  %v3843_v27 = vsel %vm3789_vm8, %v3682_v29, %v3842_v56  ;;  %v3690_v31 = vsel %vm3502_vm5, %v3494_v44, -inf  ;;  %4234 = vmatpush.bf16.msrb.mxu3 %v8261_v9  ;;  %v8257_v37 = vld [vmem:[%s12605_s3 + $0x8] sm:$0xff]  ;;  %v8256_v56 = vld [vmem:[%s12605_s3] sm:$0xff] }
 0x2a6   : > { %v3688_v5 = vmax.f32 %v3686_v21, %v3687_v40  ;;  %v3693_v57 = vsel %vm3502_vm5, %v3501_v26, -inf  ;;  %v3691_v17 = vmax.f32 %v3689_v48, %v3690_v31  ;;  %v8881_v60 = vpack.i.bf16 %v3876_v61, %v3875_v14  ;;  %v10764_v40 = vld [vmem:[#allocation2 + $0x70] sm:$0xff] }
 0x2a7   : > { %v3844_v55 = vsel %vm3791_vm9, %v3685_v36, %v3843_v27  ;;  %v3694_v51 = vmax.f32 %v3692_v34, %v3693_v57  ;;  %v8876_v1 = vpack.i.bf16 %v3882_v58, %v3881_v28  ;;  %v8891_v32 = vpack.i.bf16 %v10564_v4, %v3877_v53  ;;  %v8273_v36 = vld [vmem:[%s12605_s3 + $0x88] sm:$0xff] }
 0x2a8   : > { %v3845_v45 = vsel %vm3793_vm10, %v3688_v5, %v3844_v55  ;;  %v8906_v50 = vpack.i.bf16 %v4008_v0, %v10553_v11  ;;  %v10732_v11 = vld [vmem:[#allocation2 + $0x50] sm:$0xff]  ;;  %vm4820_vm4 = vcmask 516096   ;;  %vm4866_vm9 = vcmask 519168  }
 0x2a9   : > { %v3846_v24 = vsel %vm3795_vm11, %v3691_v17, %v3845_v45  ;;  %4235 = vmatpush.bf16.msrb.mxu3 %v8260_v39  ;;  %v8272_v45 = vld [vmem:[%s12605_s3 + $0x80] sm:$0xff]  ;;  %4827 = vst.msk [vmem:[#allocation3 + $0x5] sm:$0x1] %vm4820_vm4, %v9014_v18 }
 0x2aa   : > { %v3847_v47 = vsel %vm3797_vm12, %v3694_v51, %v3846_v24  ;;  %4821 = vst.msk [vmem:[#allocation3] sm:$0x1] %vm4820_vm4, %v9014_v18 }
 0x2ab   : > { %3864 = vst.msk [vmem:[#allocation2 + $0x81] sm:$0xff] %vm3502_vm5, %v3847_v47 }
 0x2ac   : > { %4822 = vst.msk [vmem:[#allocation3 + $0x8] sm:$0x1] %vm4820_vm4, %v9014_v18 }
 0x2ad   : > { %4236 = vmatpush.bf16.msrb.mxu3 %v8259_v33  ;;  %4823 = vst.msk [vmem:[#allocation3 + $0x10] sm:$0x1] %vm4820_vm4, %v9014_v18 }
 0x2ae   : > { %4824 = vst.msk [vmem:[#allocation3 + $0x18] sm:$0x1] %vm4820_vm4, %v9014_v18 }
 0x2af   : > { %4825 = vst.msk [vmem:[#allocation3 + $0x20] sm:$0x1] %vm4820_vm4, %v9014_v18 }
 0x2b0   : > { %4828 = vst.msk [vmem:[#allocation3 + $0xd] sm:$0x1] %vm4820_vm4, %v9014_v18 }
 0x2b1   : > { %4237 = vmatpush.bf16.msrb.mxu3 %v8258_v25  ;;  %4829 = vst.msk [vmem:[#allocation3 + $0x15] sm:$0x1] %vm4820_vm4, %v9014_v18 }
 0x2b2   : > { %v4009_v6 = vld [vmem:[#allocation2 + $0x82] sm:$0xff]  ;;  %4830 = vst.msk [vmem:[#allocation3 + $0x1d] sm:$0x1] %vm4820_vm4, %v9014_v18 }
 0x2b3   : > { %v4001_v20 = vld [vmem:[#allocation2 + $0x81] sm:$0xff]  ;;  %v8866_v13 = vpack.i.bf16 %v4009_v6, %v4008_v0  ;;  %v8946_v52 = vpack.i.bf16 %v4285_v15, %v4009_v6  ;;  %4831 = vst.msk [vmem:[#allocation3 + $0x25] sm:$0x1] %vm4820_vm4, %v9014_v18 }
 0x2b4   : > { %v8861_v22 = vpack.i.bf16 %v4001_v20, %v10652_v38  ;;  %v8896_v38 = vpack.i.bf16 %v10557_v12, %v3885_v10  ;;  %v8941_v30 = vpack.i.bf16 %v4277_v43, %v4001_v20  ;;  %v10766_v27 = vld [vmem:[#allocation2 + $0x80] sm:$0xff]  ;;  %4826 = vst.msk [vmem:[#allocation3 + $0x28] sm:$0x1] %vm4820_vm4, %v9014_v18 }
 0x2b5   : > { %8867 = vrot.lane.b32.xlu1 %v8866_v13, %s9016_s27  ;;  %8947 = vrot.lane.b32.xlu2 %v8946_v52, %s9016_s27  ;;  %v3865_v15 = vld [vmem:[#allocation2] sm:$0xff]  ;;  %4832 = vst.msk [vmem:[#allocation3 + $0x2d] sm:$0x1] %vm4820_vm4, %v9014_v18 }
 0x2b6   : > { %8862 = vrot.lane.b32.xlu0 %v8861_v22, %s9015_s19  ;;  %4238 = vmatpush.bf16.msrb.mxu3 %v8257_v37 }
 0x2ba   : > { %4239 = vmatpush.bf16.msrb.mxu3 %v8256_v56  ;;  %v8269_v56 = vld [vmem:[%s12605_s3 + $0x68] sm:$0xff] }
 0x2bd   : > { %8882 = vrot.lane.b32.xlu1 %v8881_v60, %s9015_s19 }
 0x2be   : > { %8877 = vrot.lane.b32.xlu0 %v8876_v1, %s9016_s27  ;;  %4432 = vmatpush.bf16.msra.mxu3 %v8273_v36  ;;  %v8271_v1 = vld [vmem:[%s12605_s3 + $0x78] sm:$0xff] }
 0x2c2   : > { %4433 = vmatpush.bf16.msra.mxu3 %v8272_v45 }
 0x2c4   : > { %v8858_v3 = vpop.permute.xlu2 %8857 }
 0x2c5   : > { %8897 = vrot.lane.b32.xlu1 %v8896_v38, %s9016_s27  ;;  %v8860_v49 = vunpack.i.h.bf16 %v8858_v3  ;;  %v8859_v23 = vunpack.i.l.bf16 %v8858_v3 }
 0x2c6   : > { %8892 = vrot.lane.b32.xlu0 %v8891_v32, %s9015_s19  ;;  %4434 = vmatpush.bf16.msra.mxu3 %v8271_v1 }
 0x2cc   : > { %v8873_v54 = vpop.permute.xlu2 %8872 }
 0x2cd   : > { %8912 = vrot.lane.b32.xlu1 %v8881_v60, %s9015_s19  ;;  %v8875_v24 = vunpack.i.h.bf16 %v8873_v54  ;;  %v8874_v47 = vunpack.i.l.bf16 %v8873_v54 }
 0x2ce   : > { %8907 = vrot.lane.b32.xlu0 %v8906_v50, %s9016_s27 }
 0x2cf   : > { %v3953_v22 = vsel %vm3502_vm5, %v3865_v15, %v8874_v47  ;;  %v3954_v52 = vsel %vm3502_vm5, %v10544_v16, %v8875_v24  ;;  %v8270_v16 = vld [vmem:[%s12605_s3 + $0x70] sm:$0xff] }
 0x2d0   : > { %4435 = vmatpush.bf16.msra.mxu3 %v8270_v16 }
 0x2d4   : > { %v8888_v55 = vpop.permute.xlu2 %8887  ;;  %4436 = vmatpush.bf16.msra.mxu3 %v8269_v56 }
 0x2d5   : > { %8927 = vrot.lane.b32.xlu1 %v8896_v38, %s9016_s27 }
 0x2d6   : > { %8922 = vrot.lane.b32.xlu0 %v8891_v32, %s9015_s19 }
 0x2dd   : > { %8942 = vrot.lane.b32.xlu1 %v8941_v30, %s9015_s19 }
 0x2de   : > { %v8853_v12 = vpop.permute.xlu1 %8852  ;;  %8937 = vrot.lane.b32.xlu0 %v8906_v50, %s9016_s27 }
 0x2df   : > { %v8855_v41 = vunpack.i.h.bf16 %v8853_v12  ;;  %v8854_v4 = vunpack.i.l.bf16 %v8853_v12 }
 0x2e1   : > { %v4078_v46 = vsel %vm3502_vm5, %v10732_v11, %v8854_v4  ;;  %v4079_v8 = vsel %vm3502_vm5, %v10734_v35, %v8855_v41 }
 0x2e2   : > { %v4086_v63 = vsel %vm3961_vm14, %v4078_v46, %v8859_v23  ;;  %v4087_v2 = vsel %vm3961_vm14, %v4079_v8, %v8860_v49  ;;  %v8890_v46 = vunpack.i.h.bf16 %v8888_v55  ;;  %v8889_v8 = vunpack.i.l.bf16 %v8888_v55 }
 0x2e3   : > { %v4092_v59 = vpack.c.bf16 %v4087_v2, %v4086_v63 }
 0x2e5   : > { %7946 = vmatmul.msk.bf16.gmra.mxu3 %vm4142_vm15, %v4092_v59 }
 0x2eb   : > { %v8903_v20 = vpop.permute.xlu2 %8902 }
 0x2ec   : > { %v8905_v14 = vunpack.i.h.bf16 %v8903_v20  ;;  %v8904_v60 = vunpack.i.l.bf16 %v8903_v20 }
 0x2ee   : > { %v3959_v43 = vsel %vm3502_vm5, %v10734_v35, %v8904_v60  ;;  %v3960_v3 = vsel %vm3502_vm5, %v10764_v40, %v8905_v14 }
 0x2f3   : > { %v8918_v38 = vpop.permute.xlu2 %8917 }
 0x2fb   : > { %v8933_v39 = vpop.permute.xlu2 %8932 }
 0x2fc   : > { %v8935_v25 = vunpack.i.h.bf16 %v8933_v39  ;;  %v8934_v37 = vunpack.i.l.bf16 %v8933_v39 }
 0x327   : > { %v8868_v29 = vpop.permute.xlu1 %8867 }
 0x328   : > { %v8863_v44 = vpop.permute.xlu0 %8862  ;;  %v8870_v26 = vunpack.i.h.bf16 %v8868_v29  ;;  %v8869_v19 = vunpack.i.l.bf16 %v8868_v29 }
 0x329   : > { %v8865_v21 = vunpack.i.h.bf16 %v8863_v44  ;;  %v8864_v48 = vunpack.i.l.bf16 %v8863_v44 }
 0x32b   : > { %v4080_v5 = vsel %vm3502_vm5, %v10764_v40, %v8864_v48  ;;  %v4081_v31 = vsel %vm3502_vm5, %v10766_v27, %v8865_v21  ;;  %v4355_v21 = vsel %vm3502_vm5, %v10764_v40, %v8935_v25 }
 0x32c   : > { %v4088_v57 = vsel %vm3961_vm14, %v4080_v5, %v8869_v19  ;;  %v4089_v34 = vsel %vm3961_vm14, %v4081_v31, %v8870_v26  ;;  %v8268_v26 = vld [vmem:[%s12605_s3 + $0x60] sm:$0xff]  ;;  %v4354_v19 = vsel %vm3502_vm5, %v10734_v35, %v8934_v37 }
 0x32d   : > { %v4093_v17 = vpack.c.bf16 %v4089_v34, %v4088_v57  ;;  %4437 = vmatpush.bf16.msra.mxu3 %v8268_v26 }
 0x32f   : > { %7947 = vmatmul.msk.bf16.gmra.mxu3 %vm4142_vm15, %v4093_v17  ;;  %v8883_v10 = vpop.permute.xlu1 %8882 }
 0x330   : > { %v8878_v51 = vpop.permute.xlu0 %8877  ;;  %v8885_v30 = vunpack.i.h.bf16 %v8883_v10  ;;  %v8884_v12 = vunpack.i.l.bf16 %v8883_v10 }
 0x331   : > { %v8880_v0 = vunpack.i.h.bf16 %v8878_v51  ;;  %v8879_v6 = vunpack.i.l.bf16 %v8878_v51 }
 0x332   : > { %v3955_v23 = vsel %vm3502_vm5, %v10542_v7, %v8884_v12  ;;  %v3956_v9 = vsel %vm3502_vm5, %v10666_v42, %v8885_v30 }
 0x333   : > { %v3962_v61 = vsel %vm3961_vm14, %v3953_v22, %v8879_v6  ;;  %v3963_v28 = vsel %vm3961_vm14, %v3954_v52, %v8880_v0  ;;  %v3964_v2 = vsel %vm3961_vm14, %v3955_v23, %v8889_v8  ;;  %v3965_v59 = vsel %vm3961_vm14, %v3956_v9, %v8890_v46 }
 0x334   : > { %v3970_v58 = vpack.c.bf16 %v3963_v28, %v3962_v61  ;;  %v3971_v33 = vpack.c.bf16 %v3965_v59, %v3964_v2  ;;  %v8919_v22 = vunpack.i.l.bf16 %v8918_v38  ;;  %v4164_v28 = vpop.f32.mrf.mxu3 }
 0x337   : > { %v8898_v48 = vpop.permute.xlu1 %8897 }
 0x338   : > { %v8893_v13 = vpop.permute.xlu0 %8892  ;;  %v8900_v17 = vunpack.i.h.bf16 %v8898_v48  ;;  %v8899_v55 = vunpack.i.l.bf16 %v8898_v48  ;;  %v10867_v48 = vld [vmem:[%s12606_s4] ss:$0 sm:$0xff] }
 0x339   : > { %v8895_v36 = vunpack.i.h.bf16 %v8893_v13  ;;  %v8894_v5 = vunpack.i.l.bf16 %v8893_v13  ;;  %v8920_v13 = vunpack.i.h.bf16 %v8918_v38 }
 0x33b   : > { %v3957_v51 = vsel %vm3502_vm5, %v10668_v62, %v8894_v5  ;;  %v3958_v35 = vsel %vm3502_vm5, %v10732_v11, %v8895_v36 }
 0x33c   : > { %v3966_v45 = vsel %vm3961_vm14, %v3957_v51, %v8899_v55  ;;  %v3967_v40 = vsel %vm3961_vm14, %v3958_v35, %v8900_v17  ;;  %v4166_v10 = vpop.f32.mrf.mxu3  ;;  %v8281_v17 = vld [vmem:[%s12607_s5 + $0x38] sm:$0xff] }
 0x33d   : > { %v3972_v24 = vpack.c.bf16 %v3967_v40, %v3966_v45  ;;  %v8305_v55 = vld [vmem:[%s12607_s5 + $0xf8] sm:$0xff]  ;;  %5227 = vmatpush.bf16.msrb.mxu0 %v8281_v17 }
 0x33e   : > { %5420 = vmatpush.bf16.msrb.mxu1 %v8305_v55 }
 0x33f   : > { %7972 = vmatmul.msk.bf16.vlgmr.msrb.gmra.mxu3 %vm4142_vm15, %v3970_v58  ;;  %v8913_v47 = vpop.permute.xlu1 %8912 }
 0x340   : > { %v8908_v53 = vpop.permute.xlu0 %8907  ;;  %v8915_v15 = vunpack.i.h.bf16 %v8913_v47  ;;  %v8914_v0 = vunpack.i.l.bf16 %v8913_v47 }
 0x341   : > { %v8910_v32 = vunpack.i.h.bf16 %v8908_v53  ;;  %v8909_v50 = vunpack.i.l.bf16 %v8908_v53 }
 0x342   : > { %v4351_v6 = vsel %vm3502_vm5, %v10666_v42, %v8915_v15  ;;  %v4350_v20 = vsel %vm3502_vm5, %v10542_v7, %v8914_v0 }
 0x343   : > { %v3968_v41 = vsel %vm3961_vm14, %v3959_v43, %v8909_v50  ;;  %v3969_v4 = vsel %vm3961_vm14, %v3960_v3, %v8910_v32  ;;  %v4358_v52 = vsel %vm3961_vm14, %v4350_v20, %v8919_v22  ;;  %v4359_v61 = vsel %vm3961_vm14, %v4351_v6, %v8920_v13 }
 0x344   : > { %v3973_v49 = vpack.c.bf16 %v3969_v4, %v3968_v41  ;;  %v4366_v58 = vpack.c.bf16 %v4359_v61, %v4358_v52  ;;  %v10836_v43 = vpop.f32.mrf.mxu3  ;;  %v4269_v4 = vld [vmem:[#allocation2 + $0x90] sm:$0xff] }
 0x347   : > { %v8928_v14 = vpop.permute.xlu1 %8927 }
 0x348   : > { %v8923_v63 = vpop.permute.xlu0 %8922  ;;  %v8930_v53 = vunpack.i.h.bf16 %v8928_v14  ;;  %v8929_v32 = vunpack.i.l.bf16 %v8928_v14 }
 0x349   : > { %v8925_v60 = vunpack.i.h.bf16 %v8923_v63  ;;  %v8924_v1 = vunpack.i.l.bf16 %v8923_v63 }
 0x34b   : > { %v4352_v42 = vsel %vm3502_vm5, %v10668_v62, %v8924_v1  ;;  %v4353_v7 = vsel %vm3502_vm5, %v10732_v11, %v8925_v60  ;;  %v8948_v11 = vpop.permute.xlu2 %8947 }
 0x34c   : > { %v4360_v38 = vsel %vm3961_vm14, %v4352_v42, %v8929_v32  ;;  %v4361_v50 = vsel %vm3961_vm14, %v4353_v7, %v8930_v53  ;;  %v10839_v3 = vpop.f32.mrf.mxu3  ;;  %v8950_v9 = vunpack.i.h.bf16 %v8948_v11  ;;  %v8949_v46 = vunpack.i.l.bf16 %v8948_v11 }
 0x34d   : > { %v4367_v16 = vpack.c.bf16 %v4361_v50, %v4360_v38 }
 0x34f   : > { %7973 = vmatmul.msk.bf16.gmra.mxu3 %vm4142_vm15, %v3971_v33  ;;  %v8943_v30 = vpop.permute.xlu1 %8942 }
 0x350   : > { %v8938_v54 = vpop.permute.xlu0 %8937  ;;  %v8945_v62 = vunpack.i.h.bf16 %v8943_v30  ;;  %v8944_v41 = vunpack.i.l.bf16 %v8943_v30 }
 0x351   : > { %v8940_v29 = vunpack.i.h.bf16 %v8938_v54  ;;  %v8939_v44 = vunpack.i.l.bf16 %v8938_v54 }
 0x352   : > { %v4357_v23 = vsel %vm3502_vm5, %v4269_v4, %v8945_v62 }
 0x353   : > { %v4362_v31 = vsel %vm3961_vm14, %v4354_v19, %v8939_v44  ;;  %v4363_v57 = vsel %vm3961_vm14, %v4355_v21, %v8940_v29  ;;  %v4365_v2 = vsel %vm3961_vm14, %v4357_v23, %v8950_v9 }
 0x354   : > { %v4368_v34 = vpack.c.bf16 %v4363_v57, %v4362_v31 }
 0x35f   : > { %7974 = vmatmul.msk.bf16.gmra.mxu3 %vm4142_vm15, %v3972_v24 }
 0x368   : > { %v10842_v12 = vpop.f32.mrf.mxu3 }
 0x36f   : > { %7975 = vmatmul.msk.bf16.gmra.mxu3 %vm4142_vm15, %v3973_v49  ;;  %v4356_v49 = vsel %vm3502_vm5, %v10766_v27, %v8944_v41 }
 0x370   : > { %v10847_v8 = vpop.f32.mrf.mxu3  ;;  %v4364_v63 = vsel %vm3961_vm14, %v4356_v49, %v8949_v46 }
 0x371   : > { %v4369_v59 = vpack.c.bf16 %v4365_v2, %v4364_v63 }
 0x37f   : > { %8000 = vmatmul.msk.bf16.vlgmr.msra.gmra.mxu3 %vm4142_vm15, %v4366_v58 }
 0x38f   : > { %8001 = vmatmul.msk.bf16.gmra.mxu3 %vm4142_vm15, %v4367_v16 }
 0x39f   : > { %8002 = vmatmul.msk.bf16.gmra.mxu3 %vm4142_vm15, %v4368_v34  ;;  %v8309_v34 = vld [vmem:[%s12607_s5 + $0x118] sm:$0xff] }
 0x3a0   : > { %5438 = vmatpush.bf16.msrb.mxu2 %v8309_v34 }
 0x3af   : > { %8003 = vmatmul.msk.bf16.gmra.mxu3 %vm4142_vm15, %v4369_v59 }
 0x3b2   : > { %v4179_v39 = vpop.f32.mrf.mxu3 }
 0x3ba   : > { %v10852_v33 = vpop.f32.mrf.mxu3 }
 0x3c2   : > { %v4241_v25 = vpop.f32.mrf.mxu3 }
 0x3c3   : > { %v4242_v21 = vadd.f32 %v4241_v25, %v4164_v28 }
 0x3ca   : > { %v4243_v37 = vpop.f32.mrf.mxu3 }
 0x3cb   : > { %v4244_v51 = vadd.f32 %v4243_v37, %v4166_v10 }
 0x3d2   : > { %v4246_v56 = vpop.f32.mrf.mxu3 }
 0x3d3   : > { %v4247_v53 = vadd.f32 %v4246_v56, %v10836_v43 }
 0x3da   : > { %v10854_v27 = vpop.f32.mrf.mxu3 }
 0x3e2   : > { %v10856_v54 = vpop.f32.mrf.mxu3 }
 0x3ea   : > { %v10858_v29 = vpop.f32.mrf.mxu3 }
 0x3f2   : > { %v4256_v44 = vpop.f32.mrf.mxu3 }
 0x3f3   : > { %v10860_v26 = vadd.f32 %v4256_v44, %v4179_v39 }
 0x3fa   : > { %v10862_v19 = vpop.f32.mrf.mxu3 }
 0x402   : > { %v4439_v36 = vpop.f32.mrf.mxu3 }
 0x403   : > { %v4459_v5 = vadd.f32 %v4439_v36, %v4242_v21 }
 0x405   : > { %v4471_v31 = vadd.f32 %v10867_v48, %v4459_v5  ;;  %v4249_v5 = vadd.f32 %v10854_v27, %v10839_v3 }
 0x407   : > { %v4479_v57 = vmax.f32 %v4471_v31, 0.0  ;;  %v10893_v31 = vadd.f32 %v10856_v54, %v10842_v12 }
 0x409   : > { %v4495_v35 = vrot.slane %v4479_v57, 2  ;;  %v4496_v45 = vrot.slane %v4479_v57, 4  ;;  %v4497_v40 = vrot.slane %v4479_v57, 6  ;;  %v4544_v24 = vsel %vm4543_vm1, %v4479_v57, -inf }
 0x40a   : > { %v4545_v47 = vrot.slane %v4544_v24, 4  ;;  %v4441_v15 = vpop.f32.mrf.mxu3  ;;  %v10897_v57 = vadd.f32 %v10858_v29, %v10847_v8 }
 0x40b   : > { %v4551_v0 = vsel %vm4543_vm1, %v4495_v35, -inf  ;;  %v4558_v6 = vsel %vm4543_vm1, %v4496_v45, -inf  ;;  %v4565_v20 = vsel %vm4543_vm1, %v4497_v40, -inf  ;;  %v4460_v13 = vadd.f32 %v4441_v15, %v4244_v51 }
 0x40c   : > { %v4546_v22 = vmax.f32 %v4544_v24, %v4545_v47  ;;  %v4552_v52 = vrot.slane %v4551_v0, 4  ;;  %v4559_v61 = vrot.slane %v4558_v6, 4  ;;  %v4566_v28 = vrot.slane %v4565_v20, 4 }
 0x40d   : > { %v4472_v58 = vadd.f32 %v10867_v48, %v4460_v13 }
 0x40e   : > { %v4547_v14 = vrot.slane %v4546_v22, 2  ;;  %v4553_v60 = vmax.f32 %v4551_v0, %v4552_v52  ;;  %v4560_v1 = vmax.f32 %v4558_v6, %v4559_v61  ;;  %v4567_v10 = vmax.f32 %v4565_v20, %v4566_v28 }
 0x40f   : > { %v4480_v32 = vmax.f32 %v4472_v58, 0.0 }
 0x410   : > { %v4548_v42 = vmax.f32 %v4546_v22, %v4547_v14  ;;  %v4554_v7 = vrot.slane %v4553_v60, 2  ;;  %v4561_v38 = vrot.slane %v4560_v1, 2  ;;  %v4568_v50 = vrot.slane %v4567_v10, 2 }
 0x411   : > { %v4498_v16 = vrot.slane %v4480_v32, 2  ;;  %v4499_v30 = vrot.slane %v4480_v32, 4  ;;  %v4500_v62 = vrot.slane %v4480_v32, 6  ;;  %v4572_v41 = vsel %vm4543_vm1, %v4480_v32, -inf }
 0x412   : > { %v4549_v4 = vrot.slane %v4548_v42, 1  ;;  %v4555_v11 = vmax.f32 %v4553_v60, %v4554_v7  ;;  %v4562_v49 = vmax.f32 %v4560_v1, %v4561_v38  ;;  %v4569_v23 = vmax.f32 %v4567_v10, %v4568_v50  ;;  %v4444_v9 = vpop.f32.mrf.mxu3 }
 0x413   : > { %v4573_v46 = vrot.slane %v4572_v41, 4  ;;  %v4579_v63 = vsel %vm4543_vm1, %v4498_v16, -inf  ;;  %v4586_v43 = vsel %vm4543_vm1, %v4499_v30, -inf  ;;  %v4593_v2 = vsel %vm4543_vm1, %v4500_v62, -inf }
 0x414   : > { %v4550_v59 = vmax.f32 %v4548_v42, %v4549_v4  ;;  %v4556_v39 = vrot.slane %v4555_v11, 1  ;;  %v4563_v25 = vrot.slane %v4562_v49, 1  ;;  %v4570_v37 = vrot.slane %v4569_v23, 1 }
 0x415   : > { %v4574_v56 = vmax.f32 %v4572_v41, %v4573_v46  ;;  %v4580_v44 = vrot.slane %v4579_v63, 4  ;;  %v4587_v21 = vrot.slane %v4586_v43, 4  ;;  %v4594_v36 = vrot.slane %v4593_v2, 4 }
 0x416   : > { %v4557_v34 = vmax.f32 %v4555_v11, %v4556_v39  ;;  %v4564_v45 = vmax.f32 %v4562_v49, %v4563_v25  ;;  %v4571_v40 = vmax.f32 %v4569_v23, %v4570_v37  ;;  %v4768_v24 = vsel %vm3961_vm14, %v4550_v59, -inf  ;;  %v4875_v39 = vld [vmem:[#allocation3 + $0x1] sm:$0xf] }
 0x417   : > { %v4575_v17 = vrot.slane %v4574_v56, 2  ;;  %v4581_v55 = vmax.f32 %v4579_v63, %v4580_v44  ;;  %v4588_v51 = vmax.f32 %v4586_v43, %v4587_v21  ;;  %v4595_v35 = vmax.f32 %v4593_v2, %v4594_v36  ;;  %4887 = vrot.lane.b32.xlu0 %v4875_v39, %s9016_s27 }
 0x418   : > { %v4461_v47 = vadd.f32 %v4444_v9, %v4247_v53  ;;  %v4771_v12 = vsel %vm3961_vm14, %v4557_v34, -inf  ;;  %v4774_v22 = vsel %vm3961_vm14, %v4564_v45, -inf  ;;  %v4777_v52 = vsel %vm3961_vm14, %v4571_v40, -inf }
 0x419   : > { %v4576_v15 = vmax.f32 %v4574_v56, %v4575_v17  ;;  %v4582_v3 = vrot.slane %v4581_v55, 2  ;;  %v4589_v27 = vrot.slane %v4588_v51, 2  ;;  %v4596_v0 = vrot.slane %v4595_v35, 2 }
 0x41a   : > { %v4473_v54 = vadd.f32 %v10867_v48, %v4461_v47  ;;  %v4446_v8 = vpop.f32.mrf.mxu3 }
 0x41b   : > { %v4577_v29 = vrot.slane %v4576_v15, 1  ;;  %v4583_v6 = vmax.f32 %v4581_v55, %v4582_v3  ;;  %v4590_v20 = vmax.f32 %v4588_v51, %v4589_v27  ;;  %v4597_v13 = vmax.f32 %v4595_v35, %v4596_v0 }
 0x41c   : > { %v4481_v61 = vmax.f32 %v4473_v54, 0.0  ;;  %v4462_v28 = vadd.f32 %v4446_v8, %v4249_v5 }
 0x41d   : > { %v4578_v58 = vmax.f32 %v4576_v15, %v4577_v29  ;;  %v4584_v14 = vrot.slane %v4583_v6, 1  ;;  %v4591_v60 = vrot.slane %v4590_v20, 1  ;;  %v4598_v1 = vrot.slane %v4597_v13, 1 }
 0x41e   : > { %v4501_v10 = vrot.slane %v4481_v61, 2  ;;  %v4502_v53 = vrot.slane %v4481_v61, 4  ;;  %v4503_v32 = vrot.slane %v4481_v61, 6  ;;  %v4600_v42 = vsel %vm4543_vm1, %v4481_v61, -inf }
 0x41f   : > { %v4585_v7 = vmax.f32 %v4583_v6, %v4584_v14  ;;  %v4592_v38 = vmax.f32 %v4590_v20, %v4591_v60  ;;  %v4599_v50 = vmax.f32 %v4597_v13, %v4598_v1  ;;  %v4769_v16 = vsel %vm3961_vm14, %v4578_v58, -inf }
 0x420   : > { %v4770_v30 = vmax.f32 %v4768_v24, %v4769_v16  ;;  %v4601_v62 = vrot.slane %v4600_v42, 4  ;;  %v4607_v41 = vsel %vm4543_vm1, %v4501_v10, -inf  ;;  %v4614_v4 = vsel %vm4543_vm1, %v4502_v53, -inf }
 0x421   : > { %v4772_v11 = vsel %vm3961_vm14, %v4585_v7, -inf  ;;  %v4775_v49 = vsel %vm3961_vm14, %v4592_v38, -inf  ;;  %v4778_v23 = vsel %vm3961_vm14, %v4599_v50, -inf  ;;  %v4608_v9 = vrot.slane %v4607_v41, 4 }
 0x422   : > { %v4773_v46 = vmax.f32 %v4771_v12, %v4772_v11  ;;  %v4776_v63 = vmax.f32 %v4774_v22, %v4775_v49  ;;  %v4779_v43 = vmax.f32 %v4777_v52, %v4778_v23  ;;  %v4602_v2 = vmax.f32 %v4600_v42, %v4601_v62  ;;  %v4449_v59 = vpop.f32.mrf.mxu3 }
 0x423   : > { %v4609_v25 = vmax.f32 %v4607_v41, %v4608_v9  ;;  %v4615_v37 = vrot.slane %v4614_v4, 4  ;;  %v4621_v56 = vsel %vm4543_vm1, %v4503_v32, -inf  ;;  %v4474_v44 = vadd.f32 %v10867_v48, %v4462_v28 }
 0x424   : > { %v4849_v21 = vsel %vm3785_vm6, %v4773_v46, %v4770_v30  ;;  %v4603_v36 = vrot.slane %v4602_v2, 2  ;;  %v4622_v5 = vrot.slane %v4621_v56, 4  ;;  %v4463_v34 = vadd.f32 %v4449_v59, %v10893_v31 }
 0x425   : > { %v4850_v17 = vsel %vm3787_vm7, %v4776_v63, %v4849_v21  ;;  %v4610_v55 = vrot.slane %v4609_v25, 2  ;;  %v4616_v51 = vmax.f32 %v4614_v4, %v4615_v37  ;;  %v4482_v35 = vmax.f32 %v4474_v44, 0.0 }
 0x426   : > { %v4851_v45 = vsel %vm3789_vm8, %v4779_v43, %v4850_v17  ;;  %v4604_v40 = vmax.f32 %v4602_v2, %v4603_v36  ;;  %v4623_v24 = vmax.f32 %v4621_v56, %v4622_v5  ;;  %v4475_v47 = vadd.f32 %v10867_v48, %v4463_v34 }
 0x427   : > { %4867 = vst.msk [vmem:[#allocation3 + $0x9] sm:$0xf] %vm4866_vm9, %v4851_v45  ;;  %v4611_v31 = vmax.f32 %v4609_v25, %v4610_v55  ;;  %v4617_v15 = vrot.slane %v4616_v51, 2  ;;  %v4504_v3 = vrot.slane %v4482_v35, 2  ;;  %v4505_v27 = vrot.slane %v4482_v35, 4 }
 0x428   : > { %v4605_v0 = vrot.slane %v4604_v40, 1  ;;  %v4624_v12 = vrot.slane %v4623_v24, 2  ;;  %v4506_v54 = vrot.slane %v4482_v35, 6  ;;  %v4628_v8 = vsel %vm4543_vm1, %v4482_v35, -inf }
 0x429   : > { %v4612_v29 = vrot.slane %v4611_v31, 1  ;;  %v4618_v6 = vmax.f32 %v4616_v51, %v4617_v15  ;;  %v4629_v20 = vrot.slane %v4628_v8, 4  ;;  %v4635_v13 = vsel %vm4543_vm1, %v4504_v3, -inf }
 0x42a   : > { %v4606_v22 = vmax.f32 %v4604_v40, %v4605_v0  ;;  %v4625_v52 = vmax.f32 %v4623_v24, %v4624_v12  ;;  %v4636_v61 = vrot.slane %v4635_v13, 4  ;;  %v4642_v28 = vsel %vm4543_vm1, %v4505_v27, -inf  ;;  %v4451_v58 = vpop.f32.mrf.mxu3 }
 0x42b   : > { %v4613_v14 = vmax.f32 %v4611_v31, %v4612_v29  ;;  %v4619_v60 = vrot.slane %v4618_v6, 1  ;;  %v4630_v1 = vmax.f32 %v4628_v8, %v4629_v20  ;;  %v4643_v10 = vrot.slane %v4642_v28, 4  ;;  %v8304_v31 = vld [vmem:[%s12607_s5 + $0xf0] sm:$0xff] }
 0x42c   : > { %v4626_v53 = vrot.slane %v4625_v52, 1  ;;  %v4780_v32 = vsel %vm3961_vm14, %v4606_v22, -inf  ;;  %v4637_v42 = vmax.f32 %v4635_v13, %v4636_v61  ;;  %v4649_v7 = vsel %vm4543_vm1, %v4506_v54, -inf  ;;  %5421 = vmatpush.bf16.msrb.mxu1 %v8304_v31 }
 0x42d   : > { %v4620_v38 = vmax.f32 %v4618_v6, %v4619_v60  ;;  %v4783_v50 = vsel %vm3961_vm14, %v4613_v14, -inf  ;;  %v4631_v18 = vrot.slane %v4630_v1, 2  ;;  %v4644_v16 = vmax.f32 %v4642_v28, %v4643_v10 }
 0x42e   : > { %v4627_v30 = vmax.f32 %v4625_v52, %v4626_v53  ;;  %v4638_v62 = vrot.slane %v4637_v42, 2  ;;  %v4650_v41 = vrot.slane %v4649_v7, 4  ;;  %v4483_v4 = vmax.f32 %v4475_v47, 0.0  ;;  %v4876_v11 = vld [vmem:[#allocation3 + $0x9] sm:$0xf] }
 0x42f   : > { %v4786_v49 = vsel %vm3961_vm14, %v4620_v38, -inf  ;;  %v4632_v23 = vmax.f32 %v4630_v1, %v4631_v18  ;;  %v4645_v9 = vrot.slane %v4644_v16, 2  ;;  %v4464_v46 = vadd.f32 %v4451_v58, %v10897_v57  ;;  %4889 = vrot.lane.b32.xlu1 %v4876_v11, %s9016_s27  ;;  %v8280_v47 = vld [vmem:[%s12607_s5 + $0x30] sm:$0xff] }
 0x430   : > { %v4789_v63 = vsel %vm3961_vm14, %v4627_v30, -inf  ;;  %v4639_v43 = vmax.f32 %v4637_v42, %v4638_v62  ;;  %v4651_v2 = vmax.f32 %v4649_v7, %v4650_v41  ;;  %v4507_v59 = vrot.slane %v4483_v4, 2  ;;  %5228 = vmatpush.bf16.msrb.mxu0 %v8280_v47  ;;  %v4964_v6 = vld [vmem:[#allocation3 + $0x9] sm:$0xf] }
 0x431   : > { %v4633_v39 = vrot.slane %v4632_v23, 1  ;;  %v4646_v25 = vmax.f32 %v4644_v16, %v4645_v9  ;;  %v4508_v37 = vrot.slane %v4483_v4, 4  ;;  %v4509_v56 = vrot.slane %v4483_v4, 6 }
 0x432   : > { %v4640_v44 = vrot.slane %v4639_v43, 1  ;;  %v4652_v21 = vrot.slane %v4651_v2, 2  ;;  %v4656_v36 = vsel %vm4543_vm1, %v4483_v4, -inf  ;;  %v4663_v5 = vsel %vm4543_vm1, %v4507_v59, -inf  ;;  %v4454_v34 = vpop.f32.mrf.mxu3 }
 0x433   : > { %v4634_v17 = vmax.f32 %v4632_v23, %v4633_v39  ;;  %v4647_v57 = vrot.slane %v4646_v25, 1  ;;  %v4657_v55 = vrot.slane %v4656_v36, 4  ;;  %v4664_v51 = vrot.slane %v4663_v5, 4 }
 0x434   : > { %v4641_v35 = vmax.f32 %v4639_v43, %v4640_v44  ;;  %v4653_v45 = vmax.f32 %v4651_v2, %v4652_v21  ;;  %v4670_v40 = vsel %vm4543_vm1, %v4508_v37, -inf  ;;  %v4677_v24 = vsel %vm4543_vm1, %v4509_v56, -inf }
 0x435   : > { %v4648_v15 = vmax.f32 %v4646_v25, %v4647_v57  ;;  %v4781_v3 = vsel %vm3961_vm14, %v4634_v17, -inf  ;;  %v4658_v27 = vmax.f32 %v4656_v36, %v4657_v55  ;;  %v4665_v0 = vmax.f32 %v4663_v5, %v4664_v51 }
 0x436   : > { %v4654_v12 = vrot.slane %v4653_v45, 1  ;;  %v4782_v54 = vmax.f32 %v4780_v32, %v4781_v3  ;;  %v4784_v8 = vsel %vm3961_vm14, %v4641_v35, -inf  ;;  %v4671_v29 = vrot.slane %v4670_v40, 4 }
 0x437   : > { %v4785_v20 = vmax.f32 %v4783_v50, %v4784_v8  ;;  %v4787_v13 = vsel %vm3961_vm14, %v4648_v15, -inf  ;;  %v4659_v22 = vrot.slane %v4658_v27, 2  ;;  %v4666_v52 = vrot.slane %v4665_v0, 2  ;;  %4976 = vrot.lane.b32.xlu1 %v4964_v6, %s9016_s27 }
 0x438   : > { %v4655_v61 = vmax.f32 %v4653_v45, %v4654_v12  ;;  %v4788_v28 = vmax.f32 %v4786_v49, %v4787_v13  ;;  %v4672_v58 = vmax.f32 %v4670_v40, %v4671_v29  ;;  %v4678_v14 = vrot.slane %v4677_v24, 4 }
 0x439   : > { %v4852_v60 = vsel %vm3785_vm6, %v4785_v20, %v4782_v54  ;;  %v4660_v1 = vmax.f32 %v4658_v27, %v4659_v22  ;;  %v4667_v10 = vmax.f32 %v4665_v0, %v4666_v52  ;;  %v4476_v53 = vadd.f32 %v10867_v48, %v4464_v46 }
 0x43a   : > { %v4790_v32 = vsel %vm3961_vm14, %v4655_v61, -inf  ;;  %v4853_v42 = vsel %vm3787_vm7, %v4788_v28, %v4852_v60  ;;  %v4673_v7 = vrot.slane %v4672_v58, 2  ;;  %v4679_v38 = vmax.f32 %v4677_v24, %v4678_v14  ;;  %v4456_v50 = vpop.f32.mrf.mxu3  ;;  %v8308_v28 = vld [vmem:[%s12607_s5 + $0x110] sm:$0xff] }
 0x43b   : > { %v4259_v18 = vadd.f32 %v10862_v19, %v10852_v33  ;;  %v4791_v16 = vmax.f32 %v4789_v63, %v4790_v32  ;;  %v4661_v30 = vrot.slane %v4660_v1, 1  ;;  %v4484_v62 = vmax.f32 %v4476_v53, 0.0  ;;  %v8303_v53 = vld [vmem:[%s12607_s5 + $0xe8] sm:$0xff]  ;;  %5439 = vmatpush.bf16.msrb.mxu2 %v8308_v28 }
 0x43c   : > { %v4668_v41 = vrot.slane %v4667_v10, 1  ;;  %v4680_v4 = vrot.slane %v4679_v38, 2  ;;  %v4465_v23 = vadd.f32 %v4454_v34, %v10860_v26  ;;  %v4674_v46 = vmax.f32 %v4672_v58, %v4673_v7  ;;  %v8279_v58 = vld [vmem:[%s12607_s5 + $0x28] sm:$0xff]  ;;  %5422 = vmatpush.bf16.msrb.mxu1 %v8303_v53 }
 0x43d   : > { %v4854_v11 = vsel %vm3789_vm8, %v4791_v16, %v4853_v42  ;;  %v4510_v49 = vrot.slane %v4484_v62, 2  ;;  %v4466_v9 = vadd.f32 %v4456_v50, %v4259_v18  ;;  %v4511_v43 = vrot.slane %v4484_v62, 4  ;;  %5229 = vmatpush.bf16.msrb.mxu0 %v8279_v58  ;;  %v8307_v58 = vld [vmem:[%s12607_s5 + $0x108] sm:$0xff] }
 0x43e   : > { %4868 = vst.msk [vmem:[#allocation3 + $0x11] sm:$0xf] %vm4866_vm9, %v4854_v11  ;;  %v4512_v2 = vrot.slane %v4484_v62, 6  ;;  %v4662_v59 = vmax.f32 %v4660_v1, %v4661_v30  ;;  %v4684_v39 = vsel %vm4543_vm1, %v4484_v62, -inf  ;;  %v4669_v19 = vmax.f32 %v4667_v10, %v4668_v41 }
 0x43f   : > { %v4691_v33 = vsel %vm4543_vm1, %v4510_v49, -inf  ;;  %v4681_v63 = vmax.f32 %v4679_v38, %v4680_v4  ;;  %v4685_v25 = vrot.slane %v4684_v39, 4  ;;  %v4698_v56 = vsel %vm4543_vm1, %v4511_v43, -inf  ;;  %5440 = vmatpush.bf16.msrb.mxu2 %v8307_v58 }
 0x440   : > { %v4692_v37 = vrot.slane %v4691_v33, 4  ;;  %v4705_v44 = vsel %vm4543_vm1, %v4512_v2, -inf  ;;  %v4477_v26 = vadd.f32 %v10867_v48, %v4465_v23  ;;  %v4478_v21 = vadd.f32 %v10867_v48, %v4466_v9 }
 0x441   : > { %v4675_v36 = vrot.slane %v4674_v46, 1  ;;  %v4686_v5 = vmax.f32 %v4684_v39, %v4685_v25  ;;  %v4792_v17 = vsel %vm3961_vm14, %v4662_v59, -inf  ;;  %v4699_v57 = vrot.slane %v4698_v56, 4 }
 0x442   : > { %v4693_v34 = vmax.f32 %v4691_v33, %v4692_v37  ;;  %v4706_v55 = vrot.slane %v4705_v44, 4  ;;  %v4485_v51 = vmax.f32 %v4477_v26, 0.0  ;;  %v4682_v35 = vrot.slane %v4681_v63, 1 }
 0x443   : > { %v4795_v45 = vsel %vm3961_vm14, %v4669_v19, -inf  ;;  %v4687_v40 = vrot.slane %v4686_v5, 2  ;;  %v4700_v47 = vmax.f32 %v4698_v56, %v4699_v57  ;;  %v4676_v14 = vmax.f32 %v4674_v46, %v4675_v36 }
 0x444   : > { %v4694_v24 = vrot.slane %v4693_v34, 2  ;;  %v4707_v31 = vmax.f32 %v4705_v44, %v4706_v55  ;;  %v4513_v15 = vrot.slane %v4485_v51, 2  ;;  %v4514_v3 = vrot.slane %v4485_v51, 4 }
 0x445   : > { %v4877_v27 = vld [vmem:[#allocation3 + $0x11] sm:$0xf]  ;;  %v4688_v0 = vmax.f32 %v4686_v5, %v4687_v40  ;;  %v4515_v12 = vrot.slane %v4485_v51, 6  ;;  %v4712_v54 = vsel %vm4543_vm1, %v4485_v51, -inf  ;;  %v4701_v8 = vrot.slane %v4700_v47, 2 }
 0x446   : > { %v4695_v48 = vmax.f32 %v4693_v34, %v4694_v24  ;;  %4891 = vrot.lane.b32.xlu2 %v4877_v27, %s9016_s27  ;;  %v4708_v29 = vrot.slane %v4707_v31, 2  ;;  %v4713_v6 = vrot.slane %v4712_v54, 4  ;;  %v4719_v20 = vsel %vm4543_vm1, %v4513_v15, -inf  ;;  %v4965_v43 = vld [vmem:[#allocation3 + $0x11] sm:$0xf] }
 0x447   : > { %v4689_v13 = vrot.slane %v4688_v0, 1  ;;  %v4720_v52 = vrot.slane %v4719_v20, 4  ;;  %v4726_v61 = vsel %vm4543_vm1, %v4514_v3, -inf  ;;  %v4683_v60 = vmax.f32 %v4681_v63, %v4682_v35  ;;  %v5260_v3 = vld [vmem:[#allocation3 + $0x11] sm:$0xf] }
 0x448   : > { %v4696_v22 = vrot.slane %v4695_v48, 1  ;;  %v4702_v1 = vmax.f32 %v4700_v47, %v4701_v8  ;;  %v4709_v10 = vmax.f32 %v4707_v31, %v4708_v29  ;;  %v4727_v7 = vrot.slane %v4726_v61, 4 }
 0x449   : > { %v4690_v32 = vmax.f32 %v4688_v0, %v4689_v13  ;;  %v4733_v38 = vsel %vm4543_vm1, %v4515_v12, -inf  ;;  %v4714_v16 = vmax.f32 %v4712_v54, %v4713_v6  ;;  %v4486_v30 = vmax.f32 %v4478_v21, 0.0  ;;  %v8278_v13 = vld [vmem:[%s12607_s5 + $0x20] sm:$0xff] }
 0x44a   : > { %v4697_v42 = vmax.f32 %v4695_v48, %v4696_v22  ;;  %v4703_v50 = vrot.slane %v4702_v1, 1  ;;  %v4710_v18 = vrot.slane %v4709_v10, 1  ;;  %v4721_v4 = vmax.f32 %v4719_v20, %v4720_v52  ;;  %v8302_v22 = vld [vmem:[%s12607_s5 + $0xe0] sm:$0xff]  ;;  %5230 = vmatpush.bf16.msrb.mxu0 %v8278_v13  ;;  %v4873_v13 = vld [vmem:[#allocation3 + $0x10] sm:$0xf] }
 0x44b   : > { %v4793_v62 = vsel %vm3961_vm14, %v4690_v32, -inf  ;;  %v4734_v11 = vrot.slane %v4733_v38, 4  ;;  %v4798_v2 = vsel %vm3961_vm14, %v4676_v14, -inf  ;;  %v4801_v59 = vsel %vm3961_vm14, %v4683_v60, -inf  ;;  %5423 = vmatpush.bf16.msrb.mxu1 %v8302_v22 }
 0x44c   : > { %v4796_v41 = vsel %vm3961_vm14, %v4697_v42, -inf  ;;  %v4704_v49 = vmax.f32 %v4702_v1, %v4703_v50  ;;  %v4711_v23 = vmax.f32 %v4709_v10, %v4710_v18  ;;  %v4794_v9 = vmax.f32 %v4792_v17, %v4793_v62  ;;  %v8277_v10 = vld [vmem:[%s12607_s5 + $0x18] sm:$0xff] }
 0x44d   : > { %v4797_v46 = vmax.f32 %v4795_v45, %v4796_v41  ;;  %v4728_v39 = vmax.f32 %v4726_v61, %v4727_v7  ;;  %v4715_v25 = vrot.slane %v4714_v16, 2  ;;  %v4735_v44 = vmax.f32 %v4733_v38, %v4734_v11  ;;  %v5263_v38 = vld [vmem:[#allocation3 + $0x29] sm:$0xf]  ;;  %v8301_v50 = vld [vmem:[%s12607_s5 + $0xd8] sm:$0xff] }
 0x44e   : > { %4978 = vrot.lane.b32.xlu2 %v4965_v43, %s9016_s27  ;;  %v4799_v33 = vsel %vm3961_vm14, %v4704_v49, -inf  ;;  %v4802_v19 = vsel %vm3961_vm14, %v4711_v23, -inf  ;;  %v4516_v26 = vrot.slane %v4486_v30, 2  ;;  %v4722_v21 = vrot.slane %v4721_v4, 2  ;;  %5231 = vmatpush.bf16.msrb.mxu0 %v8277_v10  ;;  %v4968_v10 = vld [vmem:[#allocation3 + $0xa] sm:$0xf] }
 0x44f   : > { %v4855_v63 = vsel %vm3785_vm6, %v4797_v46, %v4794_v9  ;;  %v4800_v37 = vmax.f32 %v4798_v2, %v4799_v33  ;;  %v4803_v56 = vmax.f32 %v4801_v59, %v4802_v19  ;;  %v4517_v36 = vrot.slane %v4486_v30, 4  ;;  %5424 = vmatpush.bf16.msrb.mxu1 %v8301_v50 }
 0x450   : > { %v4729_v34 = vrot.slane %v4728_v39, 2  ;;  %v4518_v17 = vrot.slane %v4486_v30, 6  ;;  %v4740_v57 = vsel %vm4543_vm1, %v4486_v30, -inf  ;;  %v4716_v51 = vmax.f32 %v4714_v16, %v4715_v25 }
 0x451   : > { %v4856_v5 = vsel %vm3787_vm7, %v4800_v37, %v4855_v63  ;;  %v4741_v35 = vrot.slane %v4740_v57, 4  ;;  %v4736_v45 = vrot.slane %v4735_v44, 2  ;;  %v4747_v40 = vsel %vm4543_vm1, %v4516_v26, -inf }
 0x452   : > { %v4857_v55 = vsel %vm3789_vm8, %v4803_v56, %v4856_v5  ;;  %v4754_v24 = vsel %vm4543_vm1, %v4517_v36, -inf  ;;  %v4723_v47 = vmax.f32 %v4721_v4, %v4722_v21  ;;  %v4748_v15 = vrot.slane %v4747_v40, 4 }
 0x453   : > { %4869 = vst.msk [vmem:[#allocation3 + $0x19] sm:$0xf] %vm4866_vm9, %v4857_v55  ;;  %v4742_v31 = vmax.f32 %v4740_v57, %v4741_v35  ;;  %v4730_v27 = vmax.f32 %v4728_v39, %v4729_v34  ;;  %v4755_v0 = vrot.slane %v4754_v24, 4  ;;  %v4761_v48 = vsel %vm4543_vm1, %v4518_v17, -inf }
 0x454   : > { %v4717_v12 = vrot.slane %v4716_v51, 1  ;;  %v4749_v8 = vmax.f32 %v4747_v40, %v4748_v15  ;;  %v4737_v29 = vmax.f32 %v4735_v44, %v4736_v45  ;;  %v4762_v20 = vrot.slane %v4761_v48, 4  ;;  %v4879_v40 = vld [vmem:[#allocation3 + $0x2] sm:$0xf]  ;;  %v8293_v15 = vld [vmem:[%s12607_s5 + $0x98] sm:$0xff] }
 0x455   : > { %v4743_v54 = vrot.slane %v4742_v31, 2  ;;  %v4756_v6 = vmax.f32 %v4754_v24, %v4755_v0  ;;  %v4724_v52 = vrot.slane %v4723_v47, 1  ;;  %v4731_v14 = vrot.slane %v4730_v27, 1  ;;  %v4871_v24 = vld [vmem:[#allocation3] sm:$0xf]  ;;  %5124 = vmatpush.bf16.msrb.mxu3 %v8293_v15 }
 0x456   : > { %5272 = vrot.lane.b32.xlu2 %v5260_v3, %s9016_s27  ;;  %v4750_v28 = vrot.slane %v4749_v8, 2  ;;  %v4763_v1 = vmax.f32 %v4761_v48, %v4762_v20  ;;  %v4718_v53 = vmax.f32 %v4716_v51, %v4717_v12  ;;  %v4738_v18 = vrot.slane %v4737_v29, 1  ;;  %v8276_v3 = vld [vmem:[%s12607_s5 + $0x10] sm:$0xff] }
 0x457   : > { %v4744_v61 = vmax.f32 %v4742_v31, %v4743_v54  ;;  %v4757_v60 = vrot.slane %v4756_v6, 2  ;;  %v4725_v62 = vmax.f32 %v4723_v47, %v4724_v52  ;;  %v4732_v11 = vmax.f32 %v4730_v27, %v4731_v14  ;;  %v8300_v27 = vld [vmem:[%s12607_s5 + $0xd0] sm:$0xff]  ;;  %5232 = vmatpush.bf16.msrb.mxu0 %v8276_v3  ;;  %v8291_v54 = vld [vmem:[%s12607_s5 + $0x88] sm:$0xff] }
 0x458   : > { %v4751_v42 = vmax.f32 %v4749_v8, %v4750_v28  ;;  %v4764_v30 = vrot.slane %v4763_v1, 2  ;;  %v4804_v9 = vsel %vm3961_vm14, %v4718_v53, -inf  ;;  %v4739_v2 = vmax.f32 %v4737_v29, %v4738_v18  ;;  %v8292_v12 = vld [vmem:[%s12607_s5 + $0x90] sm:$0xff]  ;;  %5425 = vmatpush.bf16.msrb.mxu1 %v8300_v27  ;;  %v4881_v8 = vld [vmem:[#allocation3 + $0x12] sm:$0xf] }
 0x459   : > { %v4745_v32 = vrot.slane %v4744_v61, 1  ;;  %v4758_v16 = vmax.f32 %v4756_v6, %v4757_v60  ;;  %v4807_v19 = vsel %vm3961_vm14, %v4725_v62, -inf  ;;  %v4810_v25 = vsel %vm3961_vm14, %v4732_v11, -inf  ;;  %5125 = vmatpush.bf16.msrb.mxu3 %v8292_v12  ;;  %v4880_v29 = vld [vmem:[#allocation3 + $0xa] sm:$0xf]  ;;  %v8295_v12 = vld [vmem:[%s12607_s5 + $0xa8] sm:$0xff] }
 0x45a   : > { %v4878_v7 = vld [vmem:[#allocation3 + $0x19] sm:$0xf]  ;;  %v4752_v4 = vrot.slane %v4751_v42, 1  ;;  %v4765_v23 = vmax.f32 %v4763_v1, %v4764_v30  ;;  %v4813_v36 = vsel %vm3961_vm14, %v4739_v2, -inf  ;;  %v4911_v47 = vrot.slane %v4879_v40, 4 }
 0x45b   : > { %4893 = vrot.lane.b32.xlu0 %v4878_v7, %s9016_s27  ;;  %v4746_v41 = vmax.f32 %v4744_v61, %v4745_v32  ;;  %v4759_v49 = vrot.slane %v4758_v16, 1  ;;  %v4966_v21 = vld [vmem:[#allocation3 + $0x19] sm:$0xf]  ;;  %v4913_v6 = vrot.slane %v4881_v8, 4  ;;  %v4912_v52 = vrot.slane %v4880_v29, 4 }
 0x45c   : > { %v4753_v46 = vmax.f32 %v4751_v42, %v4752_v4  ;;  %v4766_v39 = vrot.slane %v4765_v23, 1  ;;  %v5261_v51 = vld [vmem:[#allocation3 + $0x19] sm:$0xf]  ;;  %v4872_v28 = vld [vmem:[#allocation3 + $0x8] sm:$0xf]  ;;  %v5000_v50 = vrot.slane %v4968_v10, 4 }
 0x45d   : > { %v4805_v43 = vsel %vm3961_vm14, %v4746_v41, -inf  ;;  %v4760_v59 = vmax.f32 %v4758_v16, %v4759_v49  ;;  %5126 = vmatpush.bf16.msrb.mxu3 %v8291_v54  ;;  %v4969_v1 = vld [vmem:[#allocation3 + $0x12] sm:$0xf]  ;;  %v5257_v54 = vld [vmem:[#allocation3 + $0x18] sm:$0xf] }
 0x45e   : > { %5278 = vrot.lane.b32.xlu2 %v5263_v38, %s9016_s27  ;;  %v4806_v33 = vmax.f32 %v4804_v9, %v4805_v43  ;;  %v4808_v63 = vsel %vm3961_vm14, %v4753_v46, -inf  ;;  %v4767_v37 = vmax.f32 %v4765_v23, %v4766_v39  ;;  %v4961_v53 = vld [vmem:[#allocation3 + $0x10] sm:$0xf]  ;;  %v5001_v42 = vrot.slane %v4969_v1, 4  ;;  %v4960_v38 = vld [vmem:[#allocation3 + $0x8] sm:$0xf] }
 0x45f   : > { %v4809_v56 = vmax.f32 %v4807_v19, %v4808_v63  ;;  %v4811_v44 = vsel %vm3961_vm14, %v4760_v59, -inf  ;;  %v5264_v11 = vld [vmem:[#allocation3 + $0x12] sm:$0xf]  ;;  %v8290_v39 = vld [vmem:[%s12607_s5 + $0x80] sm:$0xff]  ;;  %v5259_v1 = vld [vmem:[#allocation3 + $0x28] sm:$0xf] }
 0x460   : > { %v4812_v26 = vmax.f32 %v4810_v25, %v4811_v44  ;;  %v4814_v5 = vsel %vm3961_vm14, %v4767_v37, -inf  ;;  %v5256_v49 = vld [vmem:[#allocation3 + $0x10] sm:$0xf]  ;;  %v5296_v46 = vrot.slane %v5264_v11, 4  ;;  %v8306_v19 = vld [vmem:[%s12607_s5 + $0x100] sm:$0xff]  ;;  %v8299_v37 = vld [vmem:[%s12607_s5 + $0xc8] sm:$0xff] }
 0x461   : > { %v4858_v34 = vsel %vm3785_vm6, %v4809_v56, %v4806_v33  ;;  %v4815_v17 = vmax.f32 %v4813_v36, %v4814_v5  ;;  %v8275_v33 = vld [vmem:[%s12607_s5 + $0x8] sm:$0xff]  ;;  %5127 = vmatpush.bf16.msrb.mxu3 %v8290_v39  ;;  %v8289_v63 = vld [vmem:[%s12607_s5 + $0x78] sm:$0xff]  ;;  %v8274_v25 = vld [vmem:[%s12607_s5] sm:$0xff]  ;;  %5441 = vmatpush.bf16.msrb.mxu2 %v8306_v19 }
 0x462   : > { %v4859_v57 = vsel %vm3787_vm7, %v4812_v26, %v4858_v34  ;;  %5233 = vmatpush.bf16.msrb.mxu0 %v8275_v33  ;;  %5426 = vmatpush.bf16.msrb.mxu1 %v8299_v37  ;;  %v4882_v56 = vld [vmem:[#allocation3 + $0x1a] sm:$0xf]  ;;  %v8288_v44 = vld [vmem:[%s12607_s5 + $0x70] sm:$0xff]  ;;  %v8287_v5 = vld [vmem:[%s12607_s5 + $0x68] sm:$0xff] }
 0x463   : > { %4980 = vrot.lane.b32.xlu0 %v4966_v21, %s9016_s27  ;;  %v4860_v55 = vsel %vm3789_vm8, %v4815_v17, %v4859_v57  ;;  %v4914_v26 = vrot.slane %v4882_v56, 4  ;;  %v4874_v36 = vld [vmem:[#allocation3 + $0x18] sm:$0xf] }
 0x464   : > { %4870 = vst.msk [vmem:[#allocation3 + $0x21] sm:$0xf] %vm4866_vm9, %v4860_v55  ;;  %v4970_v57 = vld [vmem:[#allocation3 + $0x1a] sm:$0xf] }
 0x465   : > { %5128 = vmatpush.bf16.msrb.mxu3 %v8289_v63  ;;  %v8286_v55 = vld [vmem:[%s12607_s5 + $0x60] sm:$0xff] }
 0x466   : > { %5234 = vmatpush.bf16.msrb.mxu0 %v8274_v25 }
 0x469   : > { %5129 = vmatpush.bf16.msrb.mxu3 %v8288_v44 }
 0x46b   : > { %5274 = vrot.lane.b32.xlu0 %v5261_v51, %s9016_s27  ;;  %v4967_v35 = vld [vmem:[#allocation3 + $0x21] sm:$0xf]  ;;  %v8297_v51 = vld [vmem:[%s12607_s5 + $0xb8] sm:$0xff] }
 0x46c   : > { %4982 = vrot.lane.b32.xlu1 %v4967_v35, %s9016_s27  ;;  %v5262_v45 = vld [vmem:[#allocation3 + $0x21] sm:$0xf]  ;;  %v4962_v35 = vld [vmem:[#allocation3 + $0x18] sm:$0xf] }
 0x46d   : > { %5130 = vmatpush.bf16.msrb.mxu3 %v8287_v5 }
 0x471   : > { %5131 = vmatpush.bf16.msrb.mxu3 %v8286_v55 }
 0x474   : > { %5276 = vrot.lane.b32.xlu1 %v5262_v45, %s9016_s27  ;;  %v5002_v45 = vrot.slane %v4970_v57, 4 }
 0x475   : > { %5142 = vmatpush.bf16.msra.mxu3 %v8297_v51 }
 0x489   : > { %v4888_v31 = vpop.permute.xlu0 %4887 }
 0x48a   : > { %v4899_v0 = vsel %vm3961_vm14, %v4871_v24, %v4888_v31  ;;  %v8298_v24 = vld [vmem:[%s12607_s5 + $0xc0] sm:$0xff]  ;;  %v8296_v31 = vld [vmem:[%s12607_s5 + $0xb0] sm:$0xff] }
 0x48b   : > { %v4915_v48 = vsel %vm1454_vm0, %v4899_v0, %v4911_v47  ;;  %5427 = vmatpush.bf16.msrb.mxu1 %v8298_v24  ;;  %5143 = vmatpush.bf16.msra.mxu3 %v8296_v31  ;;  %v8201_v31 = vld [vmem:[%s12609_s7 + $0x60] sm:$0xf] }
 0x48c   : > { %4919 = vst [vmem:[#allocation1] ss:$2 sm:$0xff] %v4915_v48  ;;  %v5265_v48 = vld [vmem:[#allocation3 + $0x1a] sm:$0xf] }
 0x48d   : > { %v5297_v8 = vrot.slane %v5265_v48, 4  ;;  %v8203_v48 = vld [vmem:[%s12609_s7 + $0x68] sm:$0xf0] }
 0x48f   : > { %5144 = vmatpush.bf16.msra.mxu3 %v8295_v12 }
 0x4a0   : > { %v4892_v20 = vpop.permute.xlu2 %4891 }
 0x4a1   : > { %v4901_v22 = vsel %vm3961_vm14, %v4873_v13, %v4892_v20  ;;  %v4890_v61 = vpop.permute.xlu1 %4889  ;;  %v4971_v20 = vld [vmem:[#allocation3 + $0x22] sm:$0xf] }
 0x4a2   : > { %v4917_v58 = vsel %vm1454_vm0, %v4901_v22, %v4913_v6  ;;  %v4900_v14 = vsel %vm3961_vm14, %v4872_v28, %v4890_v61  ;;  %v8294_v22 = vld [vmem:[%s12607_s5 + $0xa0] sm:$0xff]  ;;  %v5003_v61 = vrot.slane %v4971_v20, 4  ;;  %v8321_v20 = vld [vmem:[%s12609_s7 + $0x54] sm:$0xf0] }
 0x4a3   : > { %4923 = vst [vmem:[#allocation1 + $0x10] ss:$2 sm:$0xff] %v4917_v58  ;;  %v4916_v60 = vsel %vm1454_vm0, %v4900_v14, %v4912_v52  ;;  %v4963_v52 = vld [vmem:[#allocation3 + $0x20] sm:$0xf]  ;;  %v5267_v14 = vld [vmem:[#allocation3 + $0x2a] sm:$0xf]  ;;  %5145 = vmatpush.bf16.msra.mxu3 %v8294_v22 }
 0x4a4   : > { %4921 = vst [vmem:[#allocation1 + $0x1] ss:$2 sm:$0xff] %v4916_v60  ;;  %v8195_v22 = vld [vmem:[%s12609_s7 + $0x58] sm:$0xf0] }
 0x4a8   : > { %v4979_v32 = vpop.permute.xlu2 %4978 }
 0x4a9   : > { %v4989_v7 = vsel %vm3961_vm14, %v4961_v53, %v4979_v32  ;;  %v4977_v18 = vpop.permute.xlu1 %4976  ;;  %v5299_v53 = vrot.slane %v5267_v14, 4 }
 0x4aa   : > { %v4988_v16 = vsel %vm3961_vm14, %v4960_v38, %v4977_v18  ;;  %v5005_v30 = vsel %vm1454_vm0, %v4989_v7, %v5001_v42  ;;  %v5266_v42 = vld [vmem:[#allocation3 + $0x22] sm:$0xf] }
 0x4ab   : > { %v4926_v62 = vld.sshfl [vmem:[#allocation1] sm:$0xff pattern:$0x75316420]  ;;  %v11076_v41 = vld.sshfl [vmem:[#allocation1 + $0x8] sm:$0xff pattern:$0x75316420]  ;;  %v5004_v4 = vsel %vm1454_vm0, %v4988_v16, %v5000_v50 }
 0x4ac   : > { %5010 = vst [vmem:[#allocation1 + $0x1] ss:$2 sm:$0xff] %v5005_v30  ;;  %v5258_v38 = vld [vmem:[#allocation3 + $0x20] sm:$0xf]  ;;  %v5298_v50 = vrot.slane %v5266_v42, 4  ;;  %v8285_v30 = vld [vmem:[%s12607_s5 + $0x58] sm:$0xff] }
 0x4ad   : > { %5008 = vst [vmem:[#allocation1] ss:$2 sm:$0xff] %v5004_v4 }
 0x4b0   : > { %v5273_v23 = vpop.permute.xlu2 %5272 }
 0x4b1   : > { %v5284_v9 = vsel %vm3961_vm14, %v5256_v49, %v5273_v23  ;;  %v8284_v23 = vld [vmem:[%s12607_s5 + $0x50] sm:$0xff] }
 0x4b2   : > { %v5300_v43 = vsel %vm1454_vm0, %v5284_v9, %v5296_v46  ;;  %v8283_v9 = vld [vmem:[%s12607_s5 + $0x48] sm:$0xff] }
 0x4b4   : > { %v11081_v2 = vld.sshfl [vmem:[#allocation1] sm:$0xff pattern:$0x75316420]  ;;  %v11083_v59 = vld.sshfl [vmem:[#allocation1 + $0x8] sm:$0xff pattern:$0x75316420] }
 0x4b5   : > { %5304 = vst [vmem:[#allocation1] ss:$2 sm:$0xff] %v5300_v43 }
 0x4b8   : > { %v5279_v10 = vpop.permute.xlu2 %5278 }
 0x4b9   : > { %v5287_v32 = vsel %vm3961_vm14, %v5259_v1, %v5279_v10  ;;  %v8185_v10 = vld [vmem:[%s12609_s7 + $0x40] sm:$0xf] }
 0x4ba   : > { %v5303_v7 = vsel %vm1454_vm0, %v5287_v32, %v5299_v53  ;;  %v8319_v53 = vld [vmem:[%s12609_s7 + $0x44] sm:$0xf0] }
 0x4cd   : > { %v4894_v21 = vpop.permute.xlu0 %4893 }
 0x4ce   : > { %v4902_v34 = vsel %vm3961_vm14, %v4874_v36, %v4894_v21 }
 0x4cf   : > { %v4918_v17 = vsel %vm1454_vm0, %v4902_v34, %v4914_v26 }
 0x4d0   : > { %4925 = vst [vmem:[#allocation1 + $0x11] ss:$2 sm:$0xff] %v4918_v17 }
 0x4d5   : > { %v4981_v40 = vpop.permute.xlu0 %4980 }
 0x4d6   : > { %v4990_v47 = vsel %vm3961_vm14, %v4962_v35, %v4981_v40  ;;  %v8324_v40 = vld [vmem:[%s12609_s7 + $0x74] sm:$0xf] }
 0x4d7   : > { %v4928_v15 = vld.sshfl [vmem:[#allocation1 + $0x10] sm:$0xff pattern:$0x75316420]  ;;  %v11124_v3 = vld.sshfl [vmem:[#allocation1 + $0x18] sm:$0xff pattern:$0x75316420]  ;;  %v5006_v27 = vsel %vm1454_vm0, %v4990_v47, %v5002_v45 }
 0x4d8   : > { %5012 = vst [vmem:[#allocation1 + $0x10] ss:$2 sm:$0xff] %v5006_v27  ;;  %v4934_v0 = vpack.c.bf16 %v4928_v15, %v4926_v62  ;;  %v4935_v37 = vpack.c.bf16 %v11124_v3, %v11076_v41  ;;  %v8209_v41 = vld [vmem:[%s12609_s7 + $0x70] sm:$0xf]  ;;  %v8325_v45 = vld [vmem:[%s12609_s7 + $0x74] sm:$0xf0] }
 0x4d9   : > { %v8210_v24 = vor.u32 %v8325_v45, %v8209_v41  ;;  %v8211_v47 = vld [vmem:[%s12609_s7 + $0x78] sm:$0xf0]  ;;  %v8323_v15 = vld [vmem:[%s12609_s7 + $0x64] sm:$0xf0] }
 0x4da   : > { %5235 = vmatmul.bf16.vlgmr.msrb.gmra.mxu0 %v4934_v0  ;;  %v8214_v27 = vor.u32 %v8324_v40, %v8211_v47  ;;  %v8322_v0 = vld [vmem:[%s12609_s7 + $0x64] sm:$0xf]  ;;  %v8171_v47 = vld [vmem:[%s12609_s7 + $0x28] sm:$0xf0] }
 0x4dc   : > { %5665 = vmatpush.bf16.msra.mxu0 %v8214_v27 }
 0x4dd   : > { %v5275_v29 = vpop.permute.xlu0 %5274 }
 0x4de   : > { %v5285_v6 = vsel %vm3961_vm14, %v5257_v54, %v5275_v29  ;;  %v4983_v28 = vpop.permute.xlu1 %4982  ;;  %v8202_v54 = vor.u32 %v8323_v15, %v8201_v31 }
 0x4df   : > { %v5301_v13 = vsel %vm1454_vm0, %v5285_v6, %v5297_v8  ;;  %v4991_v58 = vsel %vm3961_vm14, %v4963_v52, %v4983_v28  ;;  %v8193_v8 = vld [vmem:[%s12609_s7 + $0x50] sm:$0xf]  ;;  %v8206_v6 = vor.u32 %v8322_v0, %v8203_v48 }
 0x4e0   : > { %5306 = vst [vmem:[#allocation1 + $0x1] ss:$2 sm:$0xff] %v5301_v13  ;;  %v5007_v60 = vsel %vm1454_vm0, %v4991_v58, %v5003_v61  ;;  %v8320_v13 = vld [vmem:[%s12609_s7 + $0x54] sm:$0xf] }
 0x4e1   : > { %5014 = vst [vmem:[#allocation1 + $0x11] ss:$2 sm:$0xff] %v5007_v60  ;;  %v8194_v60 = vor.u32 %v8321_v20, %v8193_v8  ;;  %v8198_v1 = vor.u32 %v8320_v13, %v8195_v22  ;;  %5666 = vmatpush.bf16.msra.mxu0 %v8206_v6  ;;  %v8313_v13 = vld [vmem:[%s12609_s7 + $0x14] sm:$0xf0] }
 0x4e5   : > { %5667 = vmatpush.bf16.msra.mxu0 %v8198_v1  ;;  %v8163_v1 = vld [vmem:[%s12609_s7 + $0x18] sm:$0xf0] }
 0x4e6   : > { %v5277_v18 = vpop.permute.xlu1 %5276 }
 0x4e7   : > { %v5286_v16 = vsel %vm3961_vm14, %v5258_v38, %v5277_v18  ;;  %v5311_v46 = vld.sshfl [vmem:[#allocation1] sm:$0xff pattern:$0x75316420]  ;;  %v5312_v43 = vld.sshfl [vmem:[#allocation1 + $0x8] sm:$0xff pattern:$0x75316420] }
 0x4e8   : > { %v5017_v62 = vld.sshfl [vmem:[#allocation1 + $0x10] sm:$0xff pattern:$0x75316420]  ;;  %v5018_v4 = vld.sshfl [vmem:[#allocation1 + $0x18] sm:$0xff pattern:$0x75316420]  ;;  %v5302_v11 = vsel %vm1454_vm0, %v5286_v16, %v5298_v50 }
 0x4e9   : > { %5310 = vst [vmem:[#allocation1 + $0x11] ss:$2 sm:$0xff] %v5303_v7  ;;  %v5023_v49 = vpack.c.bf16 %v5017_v62, %v11081_v2  ;;  %v8282_v2 = vld [vmem:[%s12607_s5 + $0x40] sm:$0xff]  ;;  %v5024_v25 = vpack.c.bf16 %v5018_v4, %v11083_v59  ;;  %vm5472_vm0 = vcmask 1041408   ;;  %v8187_v4 = vld [vmem:[%s12609_s7 + $0x48] sm:$0xf0] }
 0x4ea   : > { %5308 = vst [vmem:[#allocation1 + $0x10] ss:$2 sm:$0xff] %v5302_v11  ;;  %v11163_v59 = vld [vmem:[%s12608_s6] ss:$0 sm:$0xff]  ;;  %v8318_v62 = vld [vmem:[%s12609_s7 + $0x44] sm:$0xf] }
 0x4eb   : > { %5132 = vmatmul.bf16.vlgmr.msrb.gmra.mxu3 %v5023_v49 }
 0x4ec   : > { %5245 = vmatpush.bf16.msrb.mxu3 %v8285_v30 }
 0x4f0   : > { %5246 = vmatpush.bf16.msrb.mxu3 %v8284_v23 }
 0x4f1   : > { %v5313_v39 = vld.sshfl [vmem:[#allocation1 + $0x10] sm:$0xff pattern:$0x75316420]  ;;  %v5314_v33 = vld.sshfl [vmem:[#allocation1 + $0x18] sm:$0xff pattern:$0x75316420] }
 0x4f2   : > { %v5319_v19 = vpack.c.bf16 %v5313_v39, %v5311_v46  ;;  %v5320_v63 = vpack.c.bf16 %v5314_v33, %v5312_v43 }
 0x4f4   : > { %5428 = vmatmul.bf16.vlgmr.msrb.gmra.mxu1 %v5319_v19  ;;  %8150 = vmatmul.msk.bf16.vlgmr.msrb.gmra.mxu2 %vm3961_vm14, %v5320_v63  ;;  %v8177_v19 = vld [vmem:[%s12609_s7 + $0x30] sm:$0xf] }
 0x4f5   : > { %5247 = vmatpush.bf16.msrb.mxu3 %v8283_v9  ;;  %v8186_v9 = vor.u32 %v8319_v53, %v8185_v10 }
 0x4f9   : > { %5248 = vmatpush.bf16.msrb.mxu3 %v8282_v2  ;;  %v8190_v2 = vor.u32 %v8318_v62, %v8187_v4 }
 0x4fb   : > { %8052 = vmatmul.msk.bf16.vlgmr.msra.gmra.mxu3 %vm3961_vm14, %v5024_v25  ;;  %v8317_v25 = vld [vmem:[%s12609_s7 + $0x34] sm:$0xf0]  ;;  %5668 = vmatpush.bf16.msra.mxu0 %v8190_v2 }
 0x4fd   : > { %5652 = vmatpush.bf16.msra.mxu3 %v8210_v24  ;;  %v8314_v24 = vld [vmem:[%s12609_s7 + $0x24] sm:$0xf] }
 0x4fe   : > { %v8174_v20 = vor.u32 %v8314_v24, %v8171_v47 }
 0x501   : > { %5653 = vmatpush.bf16.msra.mxu3 %v8202_v54  ;;  %v8161_v54 = vld [vmem:[%s12609_s7 + $0x10] sm:$0xf] }
 0x505   : > { %5654 = vmatpush.bf16.msra.mxu3 %v8194_v60  ;;  %v8312_v60 = vld [vmem:[%s12609_s7 + $0x14] sm:$0xf] }
 0x506   : > { %v8166_v4 = vor.u32 %v8312_v60, %v8163_v1 }
 0x509   : > { %5655 = vmatpush.bf16.msra.mxu3 %v8186_v9 }
 0x50b   : > { %8101 = vmatmul.msk.bf16.vlgmr.msrb.gmra.mxu3 %vm3961_vm14, %v4935_v37  ;;  %v8316_v37 = vld [vmem:[%s12609_s7 + $0x34] sm:$0xf] }
 0x557   : > { %v5236_v5 = vpop.f32.mrf.mxu0 }
 0x55f   : > { %v5238_v52 = vpop.f32.mrf.mxu0 }
 0x56e   : > { %v5133_v56 = vpop.f32.mrf.mxu3 }
 0x571   : > { %v5429_v17 = vpop.f32.mrf.mxu1 }
 0x576   : > { %v5135_v44 = vpop.f32.mrf.mxu3 }
 0x577   : > { %v5443_v34 = vpop.f32.mrf.mxu2 }
 0x578   : > { %v5444_v51 = vadd.f32 %v5443_v34, %v5429_v17  ;;  %v8315_v34 = vld [vmem:[%s12609_s7 + $0x24] sm:$0xf0] }
 0x579   : > { %v5431_v32 = vpop.f32.mrf.mxu1 }
 0x57e   : > { %v5147_v26 = vpop.f32.mrf.mxu3 }
 0x57f   : > { %v5148_v36 = vadd.f32 %v5147_v26, %v5133_v56  ;;  %v5445_v61 = vpop.f32.mrf.mxu2  ;;  %v8179_v56 = vld [vmem:[%s12609_s7 + $0x38] sm:$0xf0] }
 0x580   : > { %v5446_v18 = vadd.f32 %v5445_v61, %v5431_v32  ;;  %v8182_v45 = vor.u32 %v8316_v37, %v8179_v56 }
 0x581   : > { %v5237_v57 = vadd.f32 %v5236_v5, %v5148_v36  ;;  %v8169_v5 = vld [vmem:[%s12609_s7 + $0x20] sm:$0xf] }
 0x582   : > { %v8170_v40 = vor.u32 %v8315_v34, %v8169_v5  ;;  %5669 = vmatpush.bf16.msra.mxu0 %v8182_v45 }
 0x586   : > { %v5149_v21 = vpop.f32.mrf.mxu3  ;;  %5670 = vmatpush.bf16.msra.mxu0 %v8174_v20 }
 0x587   : > { %v5150_v12 = vadd.f32 %v5149_v21, %v5135_v44 }
 0x589   : > { %v5239_v58 = vadd.f32 %v5238_v52, %v5150_v12 }
 0x58a   : > { %5671 = vmatpush.bf16.msra.mxu0 %v8166_v4 }
 0x58e   : > { %v5250_v55 = vpop.f32.mrf.mxu3 }
 0x58f   : > { %v5251_v35 = vadd.f32 %v5250_v55, %v5237_v57 }
 0x591   : > { %v5448_v3 = vadd.f32 %v5444_v51, %v5251_v35  ;;  %v8178_v35 = vor.u32 %v8317_v25, %v8177_v19 }
 0x593   : > { %v5454_v29 = vadd.f32 %v11163_v59, %v5448_v3  ;;  %5656 = vmatpush.bf16.msra.mxu3 %v8178_v35 }
 0x595   : > { %v5456_v28 = vmax.f32 %v5454_v29, 0.0 }
 0x596   : > { %v5252_v14 = vpop.f32.mrf.mxu3 }
 0x597   : > { %v5460_v42 = vrot.slane %v5456_v28, 2  ;;  %v5461_v7 = vrot.slane %v5456_v28, 4  ;;  %v5462_v38 = vrot.slane %v5456_v28, 6  ;;  %v5473_v50 = vsel %vm5472_vm0, %v5456_v28, -inf  ;;  %5657 = vmatpush.bf16.msra.mxu3 %v8170_v40 }
 0x598   : > { %v5474_v16 = vrot.slane %v5473_v50, 4  ;;  %v5253_v30 = vadd.f32 %v5252_v14, %v5239_v58 }
 0x599   : > { %v5480_v11 = vsel %vm5472_vm0, %v5460_v42, -inf  ;;  %v5487_v49 = vsel %vm5472_vm0, %v5461_v7, -inf  ;;  %v5494_v23 = vsel %vm5472_vm0, %v5462_v38, -inf  ;;  %v8162_v42 = vor.u32 %v8313_v13, %v8161_v54  ;;  %v5553_v54 = vld [vmem:[%s12610_s8] sm:$0x3] }
 0x59a   : > { %v5475_v46 = vmax.f32 %v5473_v50, %v5474_v16  ;;  %v5481_v43 = vrot.slane %v5480_v11, 4  ;;  %v5488_v39 = vrot.slane %v5487_v49, 4  ;;  %v5495_v33 = vrot.slane %v5494_v23, 4 }
 0x59b   : > { %v5449_v63 = vadd.f32 %v5446_v18, %v5253_v30  ;;  %5658 = vmatpush.bf16.msra.mxu3 %v8162_v42  ;;  %v5555_v13 = vperm.slane %v5553_v54, 0 }
 0x59c   : > { %v5476_v44 = vrot.slane %v5475_v46, 2  ;;  %v5482_v26 = vmax.f32 %v5480_v11, %v5481_v43  ;;  %v5489_v21 = vmax.f32 %v5487_v49, %v5488_v39  ;;  %v5496_v36 = vmax.f32 %v5494_v23, %v5495_v33  ;;  %v8153_v11 = vld [vmem:[%s12609_s7] sm:$0xf]  ;;  %v8311_v49 = vld [vmem:[%s12609_s7 + $0x4] sm:$0xf0] }
 0x59d   : > { %v5455_v17 = vadd.f32 %v11163_v59, %v5449_v63  ;;  %v8155_v43 = vld [vmem:[%s12609_s7 + $0x8] sm:$0xf0]  ;;  %v8154_v37 = vor.u32 %v8311_v49, %v8153_v11  ;;  %v8329_v11 = vld [vmem:[%s12611_s9 + $0x18] sm:$0xff] }
 0x59e   : > { %v5483_v57 = vrot.slane %v5482_v26, 2  ;;  %v5490_v55 = vrot.slane %v5489_v21, 2  ;;  %v5497_v51 = vrot.slane %v5496_v36, 2  ;;  %v5477_v31 = vmax.f32 %v5475_v46, %v5476_v44  ;;  %v8310_v46 = vld [vmem:[%s12609_s7 + $0x4] sm:$0xf]  ;;  %5800 = vmatpush.bf16.msra.mxu1 %v8329_v11 }
 0x59f   : > { %v5457_v41 = vmax.f32 %v5455_v17, 0.0  ;;  %5659 = vmatpush.bf16.msra.mxu3 %v8154_v37 }
 0x5a0   : > { %v5484_v15 = vmax.f32 %v5482_v26, %v5483_v57  ;;  %v5491_v59 = vmax.f32 %v5489_v21, %v5490_v55  ;;  %v5498_v3 = vmax.f32 %v5496_v36, %v5497_v51  ;;  %v5478_v58 = vrot.slane %v5477_v31, 1 }
 0x5a1   : > { %v5463_v27 = vrot.slane %v5457_v41, 2  ;;  %v5464_v0 = vrot.slane %v5457_v41, 4  ;;  %v5465_v48 = vrot.slane %v5457_v41, 6  ;;  %v5501_v12 = vsel %vm5472_vm0, %v5457_v41, -inf }
 0x5a2   : > { %v5485_v8 = vrot.slane %v5484_v15, 1  ;;  %v5492_v29 = vrot.slane %v5491_v59, 1  ;;  %v5499_v6 = vrot.slane %v5498_v3, 1  ;;  %v5502_v22 = vrot.slane %v5501_v12, 4 }
 0x5a3   : > { %v5508_v52 = vsel %vm5472_vm0, %v5463_v27, -inf  ;;  %v5515_v61 = vsel %vm5472_vm0, %v5464_v0, -inf  ;;  %v5522_v28 = vsel %vm5472_vm0, %v5465_v48, -inf  ;;  %v5479_v23 = vmax.f32 %v5477_v31, %v5478_v58 }
 0x5a4   : > { %v5509_v14 = vrot.slane %v5508_v52, 4  ;;  %v5503_v10 = vmax.f32 %v5501_v12, %v5502_v22  ;;  %v5516_v53 = vrot.slane %v5515_v61, 4  ;;  %v5523_v32 = vrot.slane %v5522_v28, 4 }
 0x5a5   : > { %v5486_v7 = vmax.f32 %v5484_v15, %v5485_v8  ;;  %v5493_v38 = vmax.f32 %v5491_v59, %v5492_v29  ;;  %v5500_v50 = vmax.f32 %v5498_v3, %v5499_v6  ;;  %v8158_v21 = vor.u32 %v8310_v46, %v8155_v43  ;;  %v8327_v43 = vld [vmem:[%s12611_s9 + $0x8] sm:$0xff] }
 0x5a6   : > { %v5510_v18 = vmax.f32 %v5508_v52, %v5509_v14  ;;  %v5504_v16 = vrot.slane %v5503_v10, 2  ;;  %v5517_v30 = vmax.f32 %v5515_v61, %v5516_v53  ;;  %v5524_v62 = vmax.f32 %v5522_v28, %v5523_v32 }
 0x5a7   : > { %v5529_v63 = vmax.f32 %v5479_v23, %v5493_v38  ;;  %v5530_v2 = vmax.f32 %v5486_v7, %v5500_v50  ;;  %5672 = vmatpush.bf16.msra.mxu0 %v8158_v21  ;;  %v5556_v8 = vperm.slane %v5553_v54, 1  ;;  %v8328_v23 = vld [vmem:[%s12611_s9 + $0x10] sm:$0xff] }
 0x5a8   : > { %v5511_v9 = vrot.slane %v5510_v18, 2  ;;  %v5505_v39 = vmax.f32 %v5503_v10, %v5504_v16  ;;  %v5518_v33 = vrot.slane %v5517_v30, 2  ;;  %v5525_v19 = vrot.slane %v5524_v62, 2  ;;  %5801 = vmatpush.bf16.msra.mxu1 %v8328_v23 }
 0x5a9   : > { %v5533_v17 = vpack.c.bf16 %v5529_v63, %v5529_v63  ;;  %v5534_v55 = vpack.c.bf16 %v5530_v2, %v5530_v2  ;;  %v8326_v63 = vld [vmem:[%s12611_s9] sm:$0xff] }
 0x5aa   : > { %v5512_v25 = vmax.f32 %v5510_v18, %v5511_v9  ;;  %v5506_v56 = vrot.slane %v5505_v39, 1  ;;  %v5519_v44 = vmax.f32 %v5517_v30, %v5518_v33  ;;  %v5526_v26 = vmax.f32 %v5524_v62, %v5525_v19 }
 0x5ab   : > { %v5563_v24 = vunpack.c.l.b16 %v5533_v17  ;;  %v5564_v47 = vunpack.c.l.b16 %v5534_v55 }
 0x5ac   : > { %v5513_v36 = vrot.slane %v5512_v25, 1  ;;  %v5520_v5 = vrot.slane %v5519_v44, 1  ;;  %v5527_v34 = vrot.slane %v5526_v26, 1  ;;  %v5507_v51 = vmax.f32 %v5505_v39, %v5506_v56  ;;  %5802 = vmatpush.bf16.msra.mxu1 %v8327_v43 }
 0x5ad   : > { %v5567_v27 = vsel %vm3785_vm6, %v5564_v47, %v5563_v24  ;;  %vm5727_vm6 = vcmask 1040384  }
 0x5ae   : > { %v5514_v57 = vmax.f32 %v5512_v25, %v5513_v36  ;;  %v5521_v35 = vmax.f32 %v5519_v44, %v5520_v5  ;;  %v5528_v41 = vmax.f32 %v5526_v26, %v5527_v34 }
 0x5b0   : > { %v5531_v45 = vmax.f32 %v5507_v51, %v5521_v35  ;;  %v5532_v40 = vmax.f32 %v5514_v57, %v5528_v41  ;;  %5803 = vmatpush.bf16.msra.mxu1 %v8326_v63 }
 0x5b2   : > { %v5535_v31 = vpack.c.bf16 %v5531_v45, %v5531_v45  ;;  %v5536_v15 = vpack.c.bf16 %v5532_v40, %v5532_v40  ;;  %v8998_v45 = vld [vmem:[%s12612_s10] ss:$0 sm:$0xff] }
 0x5b4   : > { %v5565_v59 = vunpack.c.l.b16 %v5535_v31  ;;  %v5566_v3 = vunpack.c.l.b16 %v5536_v15 }
 0x5b6   : > { %v5568_v0 = vsel %vm3787_vm7, %v5565_v59, %v5567_v27  ;;  %vm5736_vm7 = vcmask 1042432  }
 0x5b7   : > { %v5569_v48 = vsel %vm3789_vm8, %v5566_v3, %v5568_v0 }
 0x5b8   : > { %v5570_v12 = vpack.c.b16 %v5569_v48, %v5569_v48 }
 0x5ba   : > { %5660 = vmatmul.bf16.vlgmr.msra.gmra.mxu3 %v5570_v12  ;;  %5673 = vmatmul.bf16.vlgmr.msra.gmra.mxu0 %v5570_v12 }
 0x637   : > { %v5674_v29 = vpop.f32.mrf.mxu0 }
 0x638   : > { %v5675_v6 = vadd.f32 %v5674_v29, %v5556_v8 }
 0x63a   : > { %v5679_v20 = vmax.f32 %v5675_v6, 0.0 }
 0x63c   : > { %v5707_v22 = vperm.slane %v5679_v20, 0  ;;  %v5689_v52 = vrot.slane %v5679_v20, 2  ;;  %v5688_v61 = vrot.slane %v5679_v20, 1  ;;  %v5690_v53 = vrot.slane %v5679_v20, 3 }
 0x63d   : > { %v5661_v28 = vpop.f32.mrf.mxu3 }
 0x63e   : > { %v5662_v58 = vadd.f32 %v5661_v28, %v5555_v13  ;;  %5715 = vrot.lane.b32.xlu1 %v5707_v22, %s9016_s27  ;;  %v5709_v14 = vperm.slane %v5689_v52, 0  ;;  %v5708_v60 = vperm.slane %v5688_v61, 0  ;;  %v5710_v42 = vperm.slane %v5690_v53, 0 }
 0x63f   : > { %v5676_v1 = vpop.f32.mrf.mxu0 }
 0x640   : > { %v5678_v10 = vmax.f32 %v5662_v58, 0.0  ;;  %5719 = vrot.lane.b32.xlu0 %v5709_v14, %s9016_s27  ;;  %5717 = vrot.lane.b32.xlu2 %v5708_v60, %s9016_s27 }
 0x642   : > { %v5682_v32 = vrot.slane %v5678_v10, 2  ;;  %v5691_v38 = vperm.slane %v5678_v10, 0  ;;  %v5681_v18 = vrot.slane %v5678_v10, 1  ;;  %v5683_v16 = vrot.slane %v5678_v10, 3 }
 0x644   : > { %v5693_v50 = vperm.slane %v5682_v32, 0  ;;  %v5692_v30 = vperm.slane %v5681_v18, 0  ;;  %v5694_v62 = vperm.slane %v5683_v16, 0 }
 0x645   : > { %v5663_v7 = vpop.f32.mrf.mxu3 }
 0x646   : > { %5721 = vrot.lane.b32.xlu1 %v5710_v42, %s9016_s27 }
 0x648   : > { %5695 = vrot.lane.b32.xlu0 %v5691_v38, %s9016_s27  ;;  %5699 = vrot.lane.b32.xlu2 %v5693_v50, %s9016_s27 }
 0x64e   : > { %5697 = vrot.lane.b32.xlu1 %v5692_v30, %s9016_s27 }
 0x650   : > { %5701 = vrot.lane.b32.xlu0 %v5694_v62, %s9016_s27 }
 0x69a   : > { %v5718_v4 = vpop.permute.xlu2 %5717 }
 0x6a2   : > { %v5700_v49 = vpop.permute.xlu2 %5699 }
 0x6a3   : > { %v5730_v9 = vsel %vm5727_vm6, %v5682_v32, %v5700_v49 }
 0x6a4   : > { %v5734_v33 = vsel %vm5472_vm0, %v5730_v9, %v5709_v14 }
 0x6b0   : > { %v5716_v46 = vpop.permute.xlu1 %5715 }
 0x6b2   : > { %v5720_v39 = vpop.permute.xlu0 %5719 }
 0x6b3   : > { %v5739_v19 = vsel %vm5736_vm7, %v5734_v33, %v5720_v39 }
 0x6b4   : > { %5749 = vst [vmem:[#allocation1 + $0x10] ss:$2 sm:$0xff] %v5739_v19 }
 0x6b8   : > { %v5722_v2 = vpop.permute.xlu1 %5721 }
 0x6ba   : > { %v5696_v25 = vpop.permute.xlu0 %5695 }
 0x6bb   : > { %v5728_v37 = vsel %vm5727_vm6, %v5678_v10, %v5696_v25 }
 0x6bc   : > { %v5732_v56 = vsel %vm5472_vm0, %v5728_v37, %v5707_v22 }
 0x6bd   : > { %v5737_v44 = vsel %vm5736_vm7, %v5732_v56, %v5716_v46 }
 0x6be   : > { %5745 = vst [vmem:[#allocation1] ss:$2 sm:$0xff] %v5737_v44 }
 0x6c0   : > { %v5698_v26 = vpop.permute.xlu1 %5697 }
 0x6c1   : > { %v5729_v21 = vsel %vm5727_vm6, %v5681_v18, %v5698_v26 }
 0x6c2   : > { %v5733_v36 = vsel %vm5472_vm0, %v5729_v21, %v5708_v60  ;;  %v5702_v5 = vpop.permute.xlu0 %5701 }
 0x6c3   : > { %v5738_v34 = vsel %vm5736_vm7, %v5733_v36, %v5718_v4  ;;  %v5731_v17 = vsel %vm5727_vm6, %v5683_v16, %v5702_v5 }
 0x6c4   : > { %5747 = vst [vmem:[#allocation1 + $0x1] ss:$2 sm:$0xff] %v5738_v34  ;;  %v5735_v57 = vsel %vm5472_vm0, %v5731_v17, %v5710_v42  ;;  %v8331_v17 = vld [vmem:[%s12613_s11 + $0x8] sm:$0xff] }
 0x6c5   : > { %v5740_v55 = vsel %vm5736_vm7, %v5735_v57, %v5722_v2  ;;  %6147 = vmatpush.bf16.msra.mxu2 %v8331_v17 }
 0x6c6   : > { %5751 = vst [vmem:[#allocation1 + $0x11] ss:$2 sm:$0xff] %v5740_v55 }
 0x6cb   : > { %v5752_v51 = vld.sshfl [vmem:[#allocation1] sm:$0xff pattern:$0x75316420] }
 0x6cd   : > { %v5753_v35 = vld.sshfl [vmem:[#allocation1 + $0x10] sm:$0xff pattern:$0x75316420] }
 0x6ce   : > { %v5756_v41 = vpack.c.bf16 %v5753_v35, %v5752_v51 }
 0x6d0   : > { %8231 = vmatmul.msk.bf16.vlgmr.msra.gmra.mxu1 %vm3961_vm14, %v5756_v41 }
 0x74d   : > { %v5805_v40 = vpop.f32.mrf.mxu1 }
 0x74e   : > { %v5806_v24 = vadd.f32 %v8998_v45, %v5805_v40  ;;  %v8330_v40 = vld [vmem:[%s12613_s11] sm:$0xff] }
 0x74f   : > { %6148 = vmatpush.bf16.msra.mxu2 %v8330_v40 }
 0x750   : > { %v11313_v47 = vmax.f32 %v5806_v24, 0.0 }
 0x752   : > { %v5842_v31 = vperm.slane %v11313_v47, 0  ;;  %v5815_v15 = vrot.slane %v11313_v47, 2  ;;  %v5814_v59 = vrot.slane %v11313_v47, 1  ;;  %v5816_v3 = vrot.slane %v11313_v47, 3 }
 0x753   : > { %v5818_v12 = vrot.slane %v11313_v47, 5  ;;  %v5817_v54 = vrot.slane %v11313_v47, 4  ;;  %v5819_v8 = vrot.slane %v11313_v47, 6  ;;  %v5820_v13 = vrot.slane %v11313_v47, 7 }
 0x754   : > { %5954 = vrot.lane.b32.xlu1 %v5842_v31, %s9015_s19  ;;  %5906 = vrot.lane.b32.xlu0 %v5842_v31, %s9016_s27  ;;  %v5844_v27 = vperm.slane %v5815_v15, 0  ;;  %v5843_v0 = vperm.slane %v5814_v59, 0  ;;  %v5845_v48 = vperm.slane %v5816_v3, 0 }
 0x755   : > { %5858 = vrot.lane.b32.xlu2 %v5842_v31, %s9017_s30  ;;  %v5847_v29 = vperm.slane %v5818_v12, 0  ;;  %v5846_v6 = vperm.slane %v5817_v54, 0  ;;  %v5848_v20 = vperm.slane %v5819_v8, 0  ;;  %v5849_v22 = vperm.slane %v5820_v13, 0  ;;  %v5807_v52 = vpop.f32.mrf.mxu1 }
 0x756   : > { %v5808_v61 = vadd.f32 %v8998_v45, %v5807_v52 }
 0x758   : > { %v11361_v28 = vmax.f32 %v5808_v61, 0.0 }
 0x75a   : > { %v5850_v58 = vperm.slane %v11361_v28, 0  ;;  %v5823_v14 = vrot.slane %v11361_v28, 3  ;;  %v5822_v60 = vrot.slane %v11361_v28, 2  ;;  %v5821_v1 = vrot.slane %v11361_v28, 1 }
 0x75b   : > { %v5826_v42 = vrot.slane %v11361_v28, 6  ;;  %v5825_v7 = vrot.slane %v11361_v28, 5  ;;  %v5824_v38 = vrot.slane %v11361_v28, 4  ;;  %v5827_v30 = vrot.slane %v11361_v28, 7 }
 0x75c   : > { %5862 = vrot.lane.b32.xlu1 %v5844_v27, %s9017_s30  ;;  %5860 = vrot.lane.b32.xlu0 %v5843_v0, %s9017_s30  ;;  %v5853_v10 = vperm.slane %v5823_v14, 0  ;;  %v5852_v53 = vperm.slane %v5822_v60, 0  ;;  %v5851_v32 = vperm.slane %v5821_v1, 0 }
 0x75d   : > { %5864 = vrot.lane.b32.xlu2 %v5845_v48, %s9017_s30  ;;  %v5856_v50 = vperm.slane %v5826_v42, 0  ;;  %v5855_v18 = vperm.slane %v5825_v7, 0  ;;  %v5854_v16 = vperm.slane %v5824_v38, 0  ;;  %v5857_v62 = vperm.slane %v5827_v30, 0 }
 0x764   : > { %5868 = vrot.lane.b32.xlu1 %v5847_v29, %s9017_s30  ;;  %5866 = vrot.lane.b32.xlu0 %v5846_v6, %s9017_s30 }
 0x765   : > { %5870 = vrot.lane.b32.xlu2 %v5848_v20, %s9017_s30 }
 0x76c   : > { %5908 = vrot.lane.b32.xlu1 %v5843_v0, %s9016_s27  ;;  %5872 = vrot.lane.b32.xlu0 %v5849_v22, %s9017_s30 }
 0x76d   : > { %5910 = vrot.lane.b32.xlu2 %v5844_v27, %s9016_s27 }
 0x774   : > { %5914 = vrot.lane.b32.xlu1 %v5846_v6, %s9016_s27  ;;  %5912 = vrot.lane.b32.xlu0 %v5845_v48, %s9016_s27 }
 0x775   : > { %5916 = vrot.lane.b32.xlu2 %v5847_v29, %s9016_s27 }
 0x77c   : > { %5920 = vrot.lane.b32.xlu1 %v5849_v22, %s9016_s27  ;;  %5918 = vrot.lane.b32.xlu0 %v5848_v20, %s9016_s27 }
 0x77d   : > { %5956 = vrot.lane.b32.xlu2 %v5843_v0, %s9015_s19 }
 0x784   : > { %5960 = vrot.lane.b32.xlu1 %v5845_v48, %s9015_s19  ;;  %5958 = vrot.lane.b32.xlu0 %v5844_v27, %s9015_s19 }
 0x785   : > { %5962 = vrot.lane.b32.xlu2 %v5846_v6, %s9015_s19 }
 0x78c   : > { %5966 = vrot.lane.b32.xlu1 %v5848_v20, %s9015_s19  ;;  %5964 = vrot.lane.b32.xlu0 %v5847_v29, %s9015_s19 }
 0x78d   : > { %5968 = vrot.lane.b32.xlu2 %v5849_v22, %s9015_s19 }
 0x794   : > { %5874 = vrot.lane.b32.xlu1 %v5850_v58, %s9017_s30  ;;  %5970 = vrot.lane.b32.xlu0 %v5850_v58, %s9015_s19 }
 0x795   : > { %5922 = vrot.lane.b32.xlu2 %v5850_v58, %s9016_s27 }
 0x79c   : > { %5880 = vrot.lane.b32.xlu1 %v5853_v10, %s9017_s30  ;;  %5878 = vrot.lane.b32.xlu0 %v5852_v53, %s9017_s30 }
 0x79d   : > { %5876 = vrot.lane.b32.xlu2 %v5851_v32, %s9017_s30 }
 0x7a4   : > { %5886 = vrot.lane.b32.xlu1 %v5856_v50, %s9017_s30  ;;  %5884 = vrot.lane.b32.xlu0 %v5855_v18, %s9017_s30 }
 0x7a5   : > { %5882 = vrot.lane.b32.xlu2 %v5854_v16, %s9017_s30 }
 0x7ac   : > { %5926 = vrot.lane.b32.xlu1 %v5852_v53, %s9016_s27  ;;  %5924 = vrot.lane.b32.xlu0 %v5851_v32, %s9016_s27 }
 0x7ad   : > { %5888 = vrot.lane.b32.xlu2 %v5857_v62, %s9017_s30 }
 0x7af   : > { %v5859_v4 = vpop.permute.xlu2 %5858 }
 0x7b0   : > { %v6002_v23 = vsel %vm5727_vm6, %v11313_v47, %v5859_v4 }
 0x7b4   : > { %5932 = vrot.lane.b32.xlu1 %v5855_v18, %s9016_s27  ;;  %5930 = vrot.lane.b32.xlu0 %v5854_v16, %s9016_s27 }
 0x7b5   : > { %5928 = vrot.lane.b32.xlu2 %v5853_v10, %s9016_s27 }
 0x7b7   : > { %v5865_v11 = vpop.permute.xlu2 %5864 }
 0x7b8   : > { %v6005_v29 = vsel %vm5727_vm6, %v5816_v3, %v5865_v11 }
 0x7bc   : > { %5972 = vrot.lane.b32.xlu1 %v5851_v32, %s9015_s19  ;;  %5936 = vrot.lane.b32.xlu0 %v5857_v62, %s9016_s27 }
 0x7bd   : > { %5934 = vrot.lane.b32.xlu2 %v5856_v50, %s9016_s27 }
 0x7bf   : > { %v5871_v49 = vpop.permute.xlu2 %5870 }
 0x7c0   : > { %v6008_v3 = vsel %vm5727_vm6, %v5819_v8, %v5871_v49 }
 0x7c4   : > { %5978 = vrot.lane.b32.xlu1 %v5854_v16, %s9015_s19  ;;  %5976 = vrot.lane.b32.xlu0 %v5853_v10, %s9015_s19 }
 0x7c5   : > { %5974 = vrot.lane.b32.xlu2 %v5852_v53, %s9015_s19 }
 0x7c6   : > { %v5955_v9 = vpop.permute.xlu1 %5954  ;;  %v5907_v46 = vpop.permute.xlu0 %5906 }
 0x7c7   : > { %v6018_v43 = vsel %vm5472_vm0, %v6002_v23, %v5907_v46  ;;  %v5911_v39 = vpop.permute.xlu2 %5910 }
 0x7c8   : > { %v6034_v33 = vsel %vm5736_vm7, %v6018_v43, %v5955_v9 }
 0x7c9   : > { %6066 = vst [vmem:[#allocation1] ss:$2 sm:$0xff] %v6034_v33 }
 0x7cc   : > { %5984 = vrot.lane.b32.xlu1 %v5857_v62, %s9015_s19  ;;  %5982 = vrot.lane.b32.xlu0 %v5856_v50, %s9015_s19 }
 0x7cd   : > { %5980 = vrot.lane.b32.xlu2 %v5855_v18, %s9015_s19 }
 0x7ce   : > { %v5863_v19 = vpop.permute.xlu1 %5862  ;;  %v5861_v63 = vpop.permute.xlu0 %5860 }
 0x7cf   : > { %v5917_v2 = vpop.permute.xlu2 %5916  ;;  %v6003_v44 = vsel %vm5727_vm6, %v5814_v59, %v5861_v63 }
 0x7d6   : > { %v5869_v25 = vpop.permute.xlu1 %5868  ;;  %v5867_v37 = vpop.permute.xlu0 %5866 }
 0x7d7   : > { %v5957_v56 = vpop.permute.xlu2 %5956  ;;  %v6006_v57 = vsel %vm5727_vm6, %v5817_v54, %v5867_v37  ;;  %v6004_v54 = vsel %vm5727_vm6, %v5815_v15, %v5863_v19  ;;  %v6007_v15 = vsel %vm5727_vm6, %v5818_v12, %v5869_v25 }
 0x7d8   : > { %v6023_v32 = vsel %vm5472_vm0, %v6007_v15, %v5917_v2 }
 0x7de   : > { %v5909_v26 = vpop.permute.xlu1 %5908  ;;  %v5873_v21 = vpop.permute.xlu0 %5872 }
 0x7df   : > { %v5963_v36 = vpop.permute.xlu2 %5962  ;;  %v6019_v5 = vsel %vm5472_vm0, %v6003_v44, %v5909_v26  ;;  %v6009_v24 = vsel %vm5727_vm6, %v5820_v13, %v5873_v21  ;;  %v6020_v13 = vsel %vm5472_vm0, %v6004_v54, %v5911_v39 }
 0x7e0   : > { %v6035_v34 = vsel %vm5736_vm7, %v6019_v5, %v5957_v56 }
 0x7e1   : > { %6068 = vst [vmem:[#allocation1 + $0x1] ss:$2 sm:$0xff] %v6035_v34 }
 0x7e6   : > { %v5915_v55 = vpop.permute.xlu1 %5914  ;;  %v5913_v51 = vpop.permute.xlu0 %5912 }
 0x7e7   : > { %v5969_v35 = vpop.permute.xlu2 %5968  ;;  %v6022_v41 = vsel %vm5472_vm0, %v6006_v57, %v5915_v55  ;;  %v6021_v6 = vsel %vm5472_vm0, %v6005_v29, %v5913_v51 }
 0x7e8   : > { %v6038_v45 = vsel %vm5736_vm7, %v6022_v41, %v5963_v36  ;;  %v6081_v18 = vld.sshfl [vmem:[#allocation1] sm:$0xff pattern:$0x75316420] }
 0x7e9   : > { %6074 = vst [vmem:[#allocation1 + $0x20] ss:$2 sm:$0xff] %v6038_v45 }
 0x7ee   : > { %v5921_v31 = vpop.permute.xlu1 %5920  ;;  %v5919_v59 = vpop.permute.xlu0 %5918 }
 0x7ef   : > { %v5923_v27 = vpop.permute.xlu2 %5922  ;;  %v6025_v0 = vsel %vm5472_vm0, %v6009_v24, %v5921_v31  ;;  %v6024_v10 = vsel %vm5472_vm0, %v6008_v3, %v5919_v59 }
 0x7f0   : > { %v6041_v48 = vsel %vm5736_vm7, %v6025_v0, %v5969_v35 }
 0x7f1   : > { %6080 = vst [vmem:[#allocation1 + $0x31] ss:$2 sm:$0xff] %v6041_v48 }
 0x7f6   : > { %v5961_v20 = vpop.permute.xlu1 %5960  ;;  %v5959_v22 = vpop.permute.xlu0 %5958 }
 0x7f7   : > { %v5877_v52 = vpop.permute.xlu2 %5876  ;;  %v6037_v61 = vsel %vm5736_vm7, %v6021_v6, %v5961_v20  ;;  %v6036_v58 = vsel %vm5736_vm7, %v6020_v13, %v5959_v22 }
 0x7f8   : > { %6072 = vst [vmem:[#allocation1 + $0x11] ss:$2 sm:$0xff] %v6037_v61 }
 0x7f9   : > { %6070 = vst [vmem:[#allocation1 + $0x10] ss:$2 sm:$0xff] %v6036_v58 }
 0x7fe   : > { %v5967_v53 = vpop.permute.xlu1 %5966  ;;  %v5965_v50 = vpop.permute.xlu0 %5964 }
 0x7ff   : > { %v5883_v16 = vpop.permute.xlu2 %5882  ;;  %v6040_v62 = vsel %vm5736_vm7, %v6024_v10, %v5967_v53  ;;  %v6039_v4 = vsel %vm5736_vm7, %v6023_v32, %v5965_v50  ;;  %v11500_v10 = vld [vmem:[%s12614_s12] ss:$0 sm:$0xff] }
 0x800   : > { %v6082_v11 = vld.sshfl [vmem:[#allocation1 + $0x10] sm:$0xff pattern:$0x75316420]  ;;  %6078 = vst [vmem:[#allocation1 + $0x30] ss:$2 sm:$0xff] %v6040_v62  ;;  %v6014_v59 = vsel %vm5727_vm6, %v5824_v38, %v5883_v16 }
 0x801   : > { %6076 = vst [vmem:[#allocation1 + $0x21] ss:$2 sm:$0xff] %v6039_v4  ;;  %v6105_v12 = vpack.c.bf16 %v6082_v11, %v6081_v18 }
 0x803   : > { %8240 = vmatmul.msk.bf16.vlgmr.msra.gmra.mxu2 %vm3502_vm5, %v6105_v12 }
 0x806   : > { %v5875_v47 = vpop.permute.xlu1 %5874  ;;  %v5971_v8 = vpop.permute.xlu0 %5970 }
 0x807   : > { %v5889_v49 = vpop.permute.xlu2 %5888  ;;  %v6010_v23 = vsel %vm5727_vm6, %v11361_v28, %v5875_v47  ;;  %v6084_v43 = vld.sshfl [vmem:[#allocation1 + $0x30] sm:$0xff pattern:$0x75316420] }
 0x808   : > { %v6026_v9 = vsel %vm5472_vm0, %v6010_v23, %v5923_v27  ;;  %v6083_v39 = vld.sshfl [vmem:[#allocation1 + $0x20] sm:$0xff pattern:$0x75316420]  ;;  %v6017_v38 = vsel %vm5727_vm6, %v5827_v30, %v5889_v49 }
 0x809   : > { %v6042_v46 = vsel %vm5736_vm7, %v6026_v9, %v5971_v8  ;;  %v6106_v2 = vpack.c.bf16 %v6084_v43, %v6083_v39 }
 0x80a   : > { %6085 = vst [vmem:[#allocation1] ss:$2 sm:$0xff] %v6042_v46 }
 0x80e   : > { %v5881_v33 = vpop.permute.xlu1 %5880  ;;  %v5879_v19 = vpop.permute.xlu0 %5878 }
 0x80f   : > { %v5929_v63 = vpop.permute.xlu2 %5928  ;;  %v6012_v44 = vsel %vm5727_vm6, %v5822_v60, %v5879_v19  ;;  %v6011_v60 = vsel %vm5727_vm6, %v5821_v1, %v5877_v52 }
 0x813   : > { %8241 = vmatmul.msk.bf16.gmra.mxu2 %vm3502_vm5, %v6106_v2 }
 0x816   : > { %v5887_v25 = vpop.permute.xlu1 %5886  ;;  %v5885_v37 = vpop.permute.xlu0 %5884 }
 0x817   : > { %v5935_v56 = vpop.permute.xlu2 %5934  ;;  %v6015_v17 = vsel %vm5727_vm6, %v5825_v7, %v5885_v37  ;;  %v6013_v7 = vsel %vm5727_vm6, %v5823_v14, %v5881_v33  ;;  %v6016_v14 = vsel %vm5727_vm6, %v5826_v42, %v5887_v25 }
 0x818   : > { %v6029_v1 = vsel %vm5472_vm0, %v6013_v7, %v5929_v63  ;;  %v6032_v13 = vsel %vm5472_vm0, %v6016_v14, %v5935_v56 }
 0x81e   : > { %v5927_v26 = vpop.permute.xlu1 %5926  ;;  %v5925_v21 = vpop.permute.xlu0 %5924 }
 0x81f   : > { %v5975_v36 = vpop.permute.xlu2 %5974  ;;  %v6028_v5 = vsel %vm5472_vm0, %v6012_v44, %v5927_v26  ;;  %v6027_v45 = vsel %vm5472_vm0, %v6011_v60, %v5925_v21 }
 0x820   : > { %v6044_v34 = vsel %vm5736_vm7, %v6028_v5, %v5975_v36 }
 0x821   : > { %6087 = vst [vmem:[#allocation1 + $0x10] ss:$2 sm:$0xff] %v6044_v34 }
 0x826   : > { %v5933_v57 = vpop.permute.xlu1 %5932  ;;  %v5931_v55 = vpop.permute.xlu0 %5930 }
 0x827   : > { %v5981_v51 = vpop.permute.xlu2 %5980  ;;  %v6031_v35 = vsel %vm5472_vm0, %v6015_v17, %v5933_v57  ;;  %v6030_v27 = vsel %vm5472_vm0, %v6014_v59, %v5931_v55 }
 0x828   : > { %v6047_v41 = vsel %vm5736_vm7, %v6031_v35, %v5981_v51 }
 0x829   : > { %6090 = vst [vmem:[#allocation1 + $0x21] ss:$2 sm:$0xff] %v6047_v41 }
 0x82e   : > { %v5973_v40 = vpop.permute.xlu1 %5972  ;;  %v5937_v24 = vpop.permute.xlu0 %5936 }
 0x82f   : > { %v6043_v31 = vsel %vm5736_vm7, %v6027_v45, %v5973_v40  ;;  %v6033_v6 = vsel %vm5472_vm0, %v6017_v38, %v5937_v24 }
 0x830   : > { %6086 = vst [vmem:[#allocation1 + $0x1] ss:$2 sm:$0xff] %v6043_v31 }
 0x836   : > { %v5979_v0 = vpop.permute.xlu1 %5978  ;;  %v5977_v48 = vpop.permute.xlu0 %5976 }
 0x837   : > { %v6046_v54 = vsel %vm5736_vm7, %v6030_v27, %v5979_v0  ;;  %v6045_v29 = vsel %vm5736_vm7, %v6029_v1, %v5977_v48  ;;  %v6093_v52 = vld.sshfl [vmem:[#allocation1] sm:$0xff pattern:$0x75316420] }
 0x838   : > { %6089 = vst [vmem:[#allocation1 + $0x20] ss:$2 sm:$0xff] %v6046_v54 }
 0x839   : > { %6088 = vst [vmem:[#allocation1 + $0x11] ss:$2 sm:$0xff] %v6045_v29 }
 0x83e   : > { %v5985_v20 = vpop.permute.xlu1 %5984  ;;  %v5983_v22 = vpop.permute.xlu0 %5982 }
 0x83f   : > { %v6049_v61 = vsel %vm5736_vm7, %v6033_v6, %v5985_v20  ;;  %v6048_v58 = vsel %vm5736_vm7, %v6032_v13, %v5983_v22  ;;  %v6095_v42 = vld.sshfl [vmem:[#allocation1 + $0x20] sm:$0xff pattern:$0x75316420] }
 0x840   : > { %v6094_v15 = vld.sshfl [vmem:[#allocation1 + $0x10] sm:$0xff pattern:$0x75316420]  ;;  %6092 = vst [vmem:[#allocation1 + $0x31] ss:$2 sm:$0xff] %v6049_v61 }
 0x841   : > { %6091 = vst [vmem:[#allocation1 + $0x30] ss:$2 sm:$0xff] %v6048_v58  ;;  %v6107_v3 = vpack.c.bf16 %v6094_v15, %v6093_v52 }
 0x843   : > { %8242 = vmatmul.msk.bf16.gmra.mxu2 %vm3502_vm5, %v6107_v3 }
 0x848   : > { %v6096_v28 = vld.sshfl [vmem:[#allocation1 + $0x30] sm:$0xff pattern:$0x75316420] }
 0x849   : > { %v6108_v30 = vpack.c.bf16 %v6096_v28, %v6095_v42 }
 0x853   : > { %8243 = vmatmul.msk.bf16.gmra.mxu2 %vm3502_vm5, %v6108_v30 }
 0x886   : > { %v6150_v53 = vpop.f32.mrf.mxu2 }
 0x887   : > { %v6151_v32 = vadd.f32 %v11500_v10, %v6150_v53 }
 0x889   : > { %v11503_v50 = vmax.f32 %v6151_v32, 0.0 }
 0x88b   : > { %v6298_v18 = vperm.slane %v11503_v50, 0  ;;  %v6187_v16 = vrot.slane %v11503_v50, 2  ;;  %v6188_v4 = vrot.slane %v11503_v50, 3  ;;  %v6190_v11 = vrot.slane %v11503_v50, 5 }
 0x88c   : > { %v6191_v8 = vrot.slane %v11503_v50, 6  ;;  %v6186_v49 = vrot.slane %v11503_v50, 1  ;;  %v6189_v46 = vrot.slane %v11503_v50, 4  ;;  %v6192_v39 = vrot.slane %v11503_v50, 7 }
 0x88d   : > { %6554 = vrot.lane.b32.xlu0 %v6298_v18, %s9017_s30  ;;  %6362 = vrot.lane.b32.xlu2 %v6298_v18, %s9018_s18  ;;  %v6300_v62 = vperm.slane %v6187_v16, 0  ;;  %v6301_v12 = vperm.slane %v6188_v4, 0  ;;  %v6303_v47 = vperm.slane %v6190_v11, 0 }
 0x88e   : > { %v6304_v23 = vperm.slane %v6191_v8, 0  ;;  %v6299_v9 = vperm.slane %v6186_v49, 0  ;;  %v6302_v43 = vperm.slane %v6189_v46, 0  ;;  %v6305_v33 = vperm.slane %v6192_v39, 0  ;;  %v6152_v19 = vpop.f32.mrf.mxu2 }
 0x88f   : > { %6366 = vrot.lane.b32.xlu1 %v6300_v62, %s9018_s18  ;;  %v6153_v63 = vadd.f32 %v11500_v10, %v6152_v19 }
 0x891   : > { %v11549_v2 = vmax.f32 %v6153_v63, 0.0 }
 0x893   : > { %v6306_v25 = vperm.slane %v11549_v2, 0  ;;  %v6195_v37 = vrot.slane %v11549_v2, 3  ;;  %v6193_v44 = vrot.slane %v11549_v2, 1  ;;  %v6198_v26 = vrot.slane %v11549_v2, 6 }
 0x894   : > { %v6196_v5 = vrot.slane %v11549_v2, 4  ;;  %v6194_v34 = vrot.slane %v11549_v2, 2  ;;  %v6199_v55 = vrot.slane %v11549_v2, 7  ;;  %v6197_v51 = vrot.slane %v11549_v2, 5 }
 0x895   : > { %6746 = vrot.lane.b32.xlu0 %v6298_v18, %s9019_s20  ;;  %6368 = vrot.lane.b32.xlu2 %v6301_v12, %s9018_s18  ;;  %v6309_v56 = vperm.slane %v6195_v37, 0  ;;  %v6307_v21 = vperm.slane %v6193_v44, 0  ;;  %v6312_v36 = vperm.slane %v6198_v26, 0 }
 0x896   : > { %v6310_v17 = vperm.slane %v6196_v5, 0  ;;  %v6308_v57 = vperm.slane %v6194_v34, 0  ;;  %v6313_v35 = vperm.slane %v6199_v55, 0  ;;  %v6311_v41 = vperm.slane %v6197_v51, 0  ;;  %v6155_v7 = vpop.f32.mrf.mxu2 }
 0x897   : > { %6372 = vrot.lane.b32.xlu1 %v6303_v47, %s9018_s18  ;;  %v6156_v27 = vadd.f32 %v11500_v10, %v6155_v7 }
 0x899   : > { %v11606_v1 = vmax.f32 %v6156_v27, 0.0 }
 0x89b   : > { %v6314_v6 = vperm.slane %v11606_v1, 0  ;;  %v6202_v61 = vrot.slane %v11606_v1, 3  ;;  %v6201_v58 = vrot.slane %v11606_v1, 2  ;;  %v6200_v28 = vrot.slane %v11606_v1, 1 }
 0x89d   : > { %6374 = vrot.lane.b32.xlu2 %v6304_v23, %s9018_s18  ;;  %6364 = vrot.lane.b32.xlu0 %v6299_v9, %s9018_s18  ;;  %v11625_v42 = vperm.slane %v6202_v61, 0  ;;  %v11629_v30 = vperm.slane %v6201_v58, 0  ;;  %v6315_v32 = vperm.slane %v6200_v28, 0 }
 0x89f   : > { %6556 = vrot.lane.b32.xlu1 %v6299_v9, %s9017_s30 }
 0x8a5   : > { %6558 = vrot.lane.b32.xlu2 %v6300_v62, %s9017_s30  ;;  %6370 = vrot.lane.b32.xlu0 %v6302_v43, %s9018_s18 }
 0x8a7   : > { %6562 = vrot.lane.b32.xlu1 %v6302_v43, %s9017_s30 }
 0x8ad   : > { %6564 = vrot.lane.b32.xlu2 %v6303_v47, %s9017_s30  ;;  %6376 = vrot.lane.b32.xlu0 %v6305_v33, %s9018_s18 }
 0x8af   : > { %6568 = vrot.lane.b32.xlu1 %v6305_v33, %s9017_s30 }
 0x8b5   : > { %6750 = vrot.lane.b32.xlu2 %v6300_v62, %s9019_s20  ;;  %6560 = vrot.lane.b32.xlu0 %v6301_v12, %s9017_s30 }
 0x8b7   : > { %6748 = vrot.lane.b32.xlu1 %v6299_v9, %s9019_s20  ;;  %v6203_v9 = vrot.slane %v11606_v1, 4 }
 0x8b9   : > { %v6318_v19 = vperm.slane %v6203_v9, 0 }
 0x8bd   : > { %6756 = vrot.lane.b32.xlu2 %v6303_v47, %s9019_s20  ;;  %6566 = vrot.lane.b32.xlu0 %v6304_v23, %s9017_s30  ;;  %v6204_v47 = vrot.slane %v11606_v1, 5 }
 0x8bf   : > { %6754 = vrot.lane.b32.xlu1 %v6302_v43, %s9019_s20 }
 0x8c5   : > { %6758 = vrot.lane.b32.xlu2 %v6304_v23, %s9019_s20  ;;  %6752 = vrot.lane.b32.xlu0 %v6301_v12, %s9019_s20  ;;  %v6205_v12 = vrot.slane %v11606_v1, 6 }
 0x8c7   : > { %6378 = vrot.lane.b32.xlu1 %v6306_v25, %s9018_s18  ;;  %v11648_v43 = vperm.slane %v6205_v12, 0 }
 0x8cd   : > { %6570 = vrot.lane.b32.xlu2 %v6306_v25, %s9017_s30  ;;  %6760 = vrot.lane.b32.xlu0 %v6305_v33, %s9019_s20  ;;  %v6319_v33 = vperm.slane %v6204_v47, 0 }
 0x8cf   : > { %6384 = vrot.lane.b32.xlu1 %v6309_v56, %s9018_s18 }
 0x8d5   : > { %6380 = vrot.lane.b32.xlu2 %v6307_v21, %s9018_s18  ;;  %6762 = vrot.lane.b32.xlu0 %v6306_v25, %s9019_s20 }
 0x8d7   : > { %6390 = vrot.lane.b32.xlu1 %v6312_v36, %s9018_s18 }
 0x8dd   : > { %6386 = vrot.lane.b32.xlu2 %v6310_v17, %s9018_s18  ;;  %6382 = vrot.lane.b32.xlu0 %v6308_v57, %s9018_s18 }
 0x8df   : > { %6574 = vrot.lane.b32.xlu1 %v6308_v57, %s9017_s30 }
 0x8e5   : > { %6392 = vrot.lane.b32.xlu2 %v6313_v35, %s9018_s18  ;;  %6388 = vrot.lane.b32.xlu0 %v6311_v41, %s9018_s18 }
 0x8e7   : > { %v6363_v60 = vpop.permute.xlu2 %6362  ;;  %6580 = vrot.lane.b32.xlu1 %v6311_v41, %s9017_s30 }
 0x8e8   : > { %v6938_v0 = vsel %vm5727_vm6, %v11503_v50, %v6363_v60 }
 0x8ed   : > { %6576 = vrot.lane.b32.xlu2 %v6309_v56, %s9017_s30  ;;  %6572 = vrot.lane.b32.xlu0 %v6307_v21, %s9017_s30 }
 0x8ef   : > { %v11590_v45 = vpop.permute.xlu2 %6368  ;;  %6764 = vrot.lane.b32.xlu1 %v6307_v21, %s9019_s20  ;;  %v6206_v21 = vrot.slane %v11606_v1, 7 }
 0x8f5   : > { %6582 = vrot.lane.b32.xlu2 %v6312_v36, %s9017_s30  ;;  %6578 = vrot.lane.b32.xlu0 %v6310_v17, %s9017_s30 }
 0x8f7   : > { %v11595_v40 = vpop.permute.xlu2 %6374  ;;  %6766 = vrot.lane.b32.xlu1 %v6308_v57, %s9019_s20 }
 0x8fd   : > { %6768 = vrot.lane.b32.xlu2 %v6309_v56, %s9019_s20  ;;  %6584 = vrot.lane.b32.xlu0 %v6313_v35, %s9017_s30 }
 0x8ff   : > { %v6559_v24 = vpop.permute.xlu2 %6558  ;;  %6772 = vrot.lane.b32.xlu1 %v6311_v41, %s9019_s20  ;;  %v6555_v31 = vpop.permute.xlu0 %6554 }
 0x900   : > { %v7002_v48 = vsel %vm5472_vm0, %v6938_v0, %v6555_v31 }
 0x901   : > { %v6367_v59 = vpop.permute.xlu1 %6366 }
 0x902   : > { %v6940_v20 = vsel %vm5727_vm6, %v6187_v16, %v6367_v59 }
 0x903   : > { %v7004_v22 = vsel %vm5472_vm0, %v6940_v20, %v6559_v24 }
 0x905   : > { %6776 = vrot.lane.b32.xlu2 %v6313_v35, %s9019_s20  ;;  %6770 = vrot.lane.b32.xlu0 %v6310_v17, %s9019_s20 }
 0x907   : > { %v6565_v54 = vpop.permute.xlu2 %6564  ;;  %6774 = vrot.lane.b32.xlu1 %v6312_v36, %s9019_s20  ;;  %v6747_v29 = vpop.permute.xlu0 %6746  ;;  %v6321_v36 = vperm.slane %v6206_v21, 0 }
 0x908   : > { %v7066_v14 = vsel %vm5736_vm7, %v7002_v48, %v6747_v29 }
 0x909   : > { %7194 = vst [vmem:[#allocation1] ss:$2 sm:$0xff] %v7066_v14  ;;  %v6373_v38 = vpop.permute.xlu1 %6372 }
 0x90a   : > { %v6943_v53 = vsel %vm5727_vm6, %v6190_v11, %v6373_v38  ;;  %v6157_v38 = vpop.f32.mrf.mxu2 }
 0x90b   : > { %v7007_v16 = vsel %vm5472_vm0, %v6943_v53, %v6565_v54 }
 0x90d   : > { %6778 = vrot.lane.b32.xlu2 %v6314_v6, %s9019_s20  ;;  %6394 = vrot.lane.b32.xlu0 %v6314_v6, %s9018_s18 }
 0x90f   : > { %v6751_v13 = vpop.permute.xlu2 %6750  ;;  %6586 = vrot.lane.b32.xlu1 %v6314_v6, %s9017_s30  ;;  %v6365_v52 = vpop.permute.xlu0 %6364 }
 0x910   : > { %v7068_v15 = vsel %vm5736_vm7, %v7004_v22, %v6751_v13  ;;  %v6939_v17 = vsel %vm5727_vm6, %v6186_v49, %v6365_v52  ;;  %v6944_v49 = vsel %vm5727_vm6, %v6191_v8, %v11595_v40  ;;  %v6941_v8 = vsel %vm5727_vm6, %v6188_v4, %v11590_v45 }
 0x911   : > { %7198 = vst [vmem:[#allocation1 + $0x10] ss:$2 sm:$0xff] %v7068_v15  ;;  %v6557_v3 = vpop.permute.xlu1 %6556  ;;  %v6158_v13 = vadd.f32 %v11500_v10, %v6157_v38 }
 0x912   : > { %v7003_v41 = vsel %vm5472_vm0, %v6939_v17, %v6557_v3 }
 0x913   : > { %v11706_v4 = vmax.f32 %v6158_v13, 0.0 }
 0x915   : > { %6400 = vrot.lane.b32.xlu0 %v11625_v42, %s9018_s18  ;;  %6398 = vrot.lane.b32.xlu2 %v11629_v30, %s9018_s18 }
 0x917   : > { %v6757_v18 = vpop.permute.xlu2 %6756  ;;  %6396 = vrot.lane.b32.xlu1 %v6315_v32, %s9018_s18  ;;  %v6371_v62 = vpop.permute.xlu0 %6370 }
 0x918   : > { %v7071_v11 = vsel %vm5736_vm7, %v7007_v16, %v6757_v18  ;;  %v6942_v31 = vsel %vm5727_vm6, %v6189_v46, %v6371_v62  ;;  %v6209_v18 = vrot.slane %v11706_v4, 3 }
 0x919   : > { %7204 = vst [vmem:[#allocation1 + $0x21] ss:$2 sm:$0xff] %v7071_v11  ;;  %v6563_v23 = vpop.permute.xlu1 %6562 }
 0x91a   : > { %v7006_v0 = vsel %vm5472_vm0, %v6942_v31, %v6563_v23  ;;  %v11729_v23 = vperm.slane %v6209_v18, 0 }
 0x91d   : > { %6406 = vrot.lane.b32.xlu0 %v11648_v43, %s9018_s18  ;;  %6404 = vrot.lane.b32.xlu2 %v6319_v33, %s9018_s18 }
 0x91f   : > { %v6759_v63 = vpop.permute.xlu2 %6758  ;;  %6402 = vrot.lane.b32.xlu1 %v6318_v19, %s9018_s18  ;;  %v6377_v25 = vpop.permute.xlu0 %6376 }
 0x920   : > { %v6945_v22 = vsel %vm5727_vm6, %v6192_v39, %v6377_v25  ;;  %v6322_v39 = vperm.slane %v11706_v4, 0 }
 0x921   : > { %v6569_v56 = vpop.permute.xlu1 %6568 }
 0x922   : > { %v7009_v45 = vsel %vm5472_vm0, %v6945_v22, %v6569_v56  ;;  %v6208_v56 = vrot.slane %v11706_v4, 2 }
 0x925   : > { %6590 = vrot.lane.b32.xlu0 %v11629_v30, %s9017_s30  ;;  %6588 = vrot.lane.b32.xlu2 %v6315_v32, %s9017_s30 }
 0x927   : > { %v6571_v57 = vpop.permute.xlu2 %6570  ;;  %6408 = vrot.lane.b32.xlu1 %v6321_v36, %s9018_s18  ;;  %v6561_v35 = vpop.permute.xlu0 %6560 }
 0x928   : > { %v7005_v40 = vsel %vm5472_vm0, %v6941_v8, %v6561_v35 }
 0x929   : > { %v6749_v60 = vpop.permute.xlu1 %6748 }
 0x92a   : > { %v7067_v24 = vsel %vm5736_vm7, %v7003_v41, %v6749_v60  ;;  %v6207_v60 = vrot.slane %v11706_v4, 1 }
 0x92b   : > { %7196 = vst [vmem:[#allocation1 + $0x1] ss:$2 sm:$0xff] %v7067_v24 }
 0x92d   : > { %6596 = vrot.lane.b32.xlu0 %v6319_v33, %s9017_s30  ;;  %6594 = vrot.lane.b32.xlu2 %v6318_v19, %s9017_s30 }
 0x92f   : > { %v11679_v7 = vpop.permute.xlu2 %6380  ;;  %6592 = vrot.lane.b32.xlu1 %v11625_v42, %s9017_s30  ;;  %v6567_v59 = vpop.permute.xlu0 %6566 }
 0x930   : > { %v7008_v27 = vsel %vm5472_vm0, %v6944_v49, %v6567_v59  ;;  %v6211_v59 = vrot.slane %v11706_v4, 5 }
 0x931   : > { %v7072_v48 = vsel %vm5736_vm7, %v7008_v27, %v6759_v63  ;;  %v6755_v54 = vpop.permute.xlu1 %6754  ;;  %v6212_v63 = vrot.slane %v11706_v4, 6  ;;  %v6323_v27 = vperm.slane %v6207_v60, 0 }
 0x932   : > { %7206 = vst [vmem:[#allocation1 + $0x30] ss:$2 sm:$0xff] %v7072_v48  ;;  %v7070_v46 = vsel %vm5736_vm7, %v7006_v0, %v6755_v54  ;;  %v11722_v16 = vld.sshfl [vmem:[#allocation1] sm:$0xff pattern:$0x75316420]  ;;  %v6947_v0 = vsel %vm5727_vm6, %v6193_v44, %v11679_v7 }
 0x933   : > { %7202 = vst [vmem:[#allocation1 + $0x20] ss:$2 sm:$0xff] %v7070_v46  ;;  %v6210_v46 = vrot.slane %v11706_v4, 4 }
 0x935   : > { %6780 = vrot.lane.b32.xlu0 %v6315_v32, %s9019_s20  ;;  %6600 = vrot.lane.b32.xlu2 %v6321_v36, %s9017_s30  ;;  %v6326_v38 = vperm.slane %v6210_v46, 0 }
 0x937   : > { %v11694_v29 = vpop.permute.xlu2 %6386  ;;  %6598 = vrot.lane.b32.xlu1 %v11648_v43, %s9017_s30  ;;  %v6753_v14 = vpop.permute.xlu0 %6752 }
 0x938   : > { %v7069_v6 = vsel %vm5736_vm7, %v7005_v40, %v6753_v14 }
 0x939   : > { %7200 = vst [vmem:[#allocation1 + $0x11] ss:$2 sm:$0xff] %v7069_v6  ;;  %v6379_v20 = vpop.permute.xlu1 %6378 }
 0x93d   : > { %6782 = vrot.lane.b32.xlu0 %v11629_v30, %s9019_s20  ;;  %6786 = vrot.lane.b32.xlu2 %v6318_v19, %s9019_s20  ;;  %v6946_v30 = vsel %vm5727_vm6, %v11549_v2, %v6379_v20  ;;  %v6213_v20 = vrot.slane %v11706_v4, 7 }
 0x93e   : > { %v7010_v32 = vsel %vm5472_vm0, %v6946_v30, %v6571_v57 }
 0x93f   : > { %v11709_v52 = vpop.permute.xlu2 %6392  ;;  %6784 = vrot.lane.b32.xlu1 %v11625_v42, %s9019_s20  ;;  %v6761_v15 = vpop.permute.xlu0 %6760 }
 0x940   : > { %v7073_v3 = vsel %vm5736_vm7, %v7009_v45, %v6761_v15  ;;  %v11755_v24 = vld.sshfl [vmem:[#allocation1 + $0x10] sm:$0xff pattern:$0x75316420]  ;;  %v6329_v15 = vperm.slane %v6213_v20, 0 }
 0x941   : > { %7208 = vst [vmem:[#allocation1 + $0x31] ss:$2 sm:$0xff] %v7073_v3  ;;  %v6385_v50 = vpop.permute.xlu1 %6384  ;;  %v6953_v3 = vsel %vm5727_vm6, %v6199_v55, %v11709_v52  ;;  %v6950_v55 = vsel %vm5727_vm6, %v6196_v5, %v11694_v29  ;;  %v6160_v5 = vpop.f32.mrf.mxu2 }
 0x942   : > { %v6949_v17 = vsel %vm5727_vm6, %v6195_v37, %v6385_v50  ;;  %v6327_v37 = vperm.slane %v6211_v59, 0 }
 0x945   : > { %6788 = vrot.lane.b32.xlu0 %v6319_v33, %s9019_s20  ;;  %6410 = vrot.lane.b32.xlu2 %v6322_v39, %s9018_s18 }
 0x947   : > { %v6577_v53 = vpop.permute.xlu2 %6576  ;;  %6792 = vrot.lane.b32.xlu1 %v6321_v36, %s9019_s20  ;;  %v6763_v42 = vpop.permute.xlu0 %6762  ;;  %v11742_v36 = vperm.slane %v6212_v63, 0 }
 0x948   : > { %v7074_v62 = vsel %vm5736_vm7, %v7010_v32, %v6763_v42  ;;  %v7013_v57 = vsel %vm5472_vm0, %v6949_v17, %v6577_v53  ;;  %v11799_v53 = vld.sshfl [vmem:[#allocation1 + $0x30] sm:$0xff pattern:$0x75316420] }
 0x949   : > { %7213 = vst [vmem:[#allocation1] ss:$2 sm:$0xff] %v7074_v62  ;;  %v11725_v11 = vpop.permute.xlu1 %6390 }
 0x94d   : > { %6790 = vrot.lane.b32.xlu0 %v11648_v43, %s9019_s20  ;;  %6416 = vrot.lane.b32.xlu2 %v11729_v23, %s9018_s18  ;;  %v6324_v43 = vperm.slane %v6208_v56, 0 }
 0x94f   : > { %v11735_v33 = vpop.permute.xlu2 %6582  ;;  %6794 = vrot.lane.b32.xlu1 %v6322_v39, %s9019_s20  ;;  %v6383_v19 = vpop.permute.xlu0 %6382 }
 0x950   : > { %v6948_v44 = vsel %vm5727_vm6, %v6194_v34, %v6383_v19 }
 0x951   : > { %v6575_v25 = vpop.permute.xlu1 %6574 }
 0x952   : > { %v7012_v13 = vsel %vm5472_vm0, %v6948_v44, %v6575_v25 }
 0x955   : > { %6602 = vrot.lane.b32.xlu0 %v6322_v39, %s9017_s30  ;;  %6422 = vrot.lane.b32.xlu2 %v11742_v36, %s9018_s18 }
 0x957   : > { %v6769_v35 = vpop.permute.xlu2 %6768  ;;  %6414 = vrot.lane.b32.xlu1 %v6324_v43, %s9018_s18  ;;  %v6389_v41 = vpop.permute.xlu0 %6388 }
 0x958   : > { %v7077_v31 = vsel %vm5736_vm7, %v7013_v57, %v6769_v35  ;;  %v6951_v34 = vsel %vm5727_vm6, %v6197_v51, %v6389_v41  ;;  %v11803_v51 = vld.sshfl [vmem:[#allocation1 + $0x20] sm:$0xff pattern:$0x75316420]  ;;  %v6952_v57 = vsel %vm5727_vm6, %v6198_v26, %v11725_v11 }
 0x959   : > { %7216 = vst [vmem:[#allocation1 + $0x11] ss:$2 sm:$0xff] %v7077_v31  ;;  %v6581_v49 = vpop.permute.xlu1 %6580  ;;  %v6161_v31 = vadd.f32 %v11500_v10, %v6160_v5 }
 0x95a   : > { %v7015_v32 = vsel %vm5472_vm0, %v6951_v34, %v6581_v49 }
 0x95d   : > { %6412 = vrot.lane.b32.xlu0 %v6323_v27, %s9018_s18  ;;  %6606 = vrot.lane.b32.xlu2 %v6324_v43, %s9017_s30 }
 0x95f   : > { %v6777_v48 = vpop.permute.xlu2 %6776  ;;  %6420 = vrot.lane.b32.xlu1 %v6327_v37, %s9018_s18  ;;  %v6573_v54 = vpop.permute.xlu0 %6572 }
 0x960   : > { %v7011_v8 = vsel %vm5472_vm0, %v6947_v0, %v6573_v54 }
 0x961   : > { %v6765_v40 = vpop.permute.xlu1 %6764 }
 0x962   : > { %v7075_v14 = vsel %vm5736_vm7, %v7011_v8, %v6765_v40 }
 0x963   : > { %7214 = vst [vmem:[#allocation1 + $0x1] ss:$2 sm:$0xff] %v7075_v14 }
 0x965   : > { %6418 = vrot.lane.b32.xlu0 %v6326_v38, %s9018_s18  ;;  %6612 = vrot.lane.b32.xlu2 %v6327_v37, %s9017_s30 }
 0x967   : > { %v6779_v7 = vpop.permute.xlu2 %6778  ;;  %6604 = vrot.lane.b32.xlu1 %v6323_v27, %s9017_s30  ;;  %v6579_v6 = vpop.permute.xlu0 %6578 }
 0x968   : > { %v7014_v52 = vsel %vm5472_vm0, %v6950_v55, %v6579_v6 }
 0x969   : > { %v6767_v22 = vpop.permute.xlu1 %6766 }
 0x96a   : > { %v7076_v45 = vsel %vm5736_vm7, %v7012_v13, %v6767_v22  ;;  %v11835_v0 = vld.sshfl [vmem:[#allocation1] sm:$0xff pattern:$0x75316420] }
 0x96b   : > { %7215 = vst [vmem:[#allocation1 + $0x10] ss:$2 sm:$0xff] %v7076_v45 }
 0x96d   : > { %6424 = vrot.lane.b32.xlu0 %v6329_v15, %s9018_s18  ;;  %6796 = vrot.lane.b32.xlu2 %v6323_v27, %s9019_s20 }
 0x96f   : > { %v11795_v50 = vpop.permute.xlu2 %6398  ;;  %6610 = vrot.lane.b32.xlu1 %v6326_v38, %s9017_s30  ;;  %v6585_v39 = vpop.permute.xlu0 %6584 }
 0x970   : > { %v7017_v30 = vsel %vm5472_vm0, %v6953_v3, %v6585_v39 }
 0x971   : > { %v7081_v42 = vsel %vm5736_vm7, %v7017_v30, %v6777_v48  ;;  %v6773_v62 = vpop.permute.xlu1 %6772 }
 0x972   : > { %7220 = vst [vmem:[#allocation1 + $0x31] ss:$2 sm:$0xff] %v7081_v42  ;;  %v7079_v19 = vsel %vm5736_vm7, %v7015_v32, %v6773_v62 }
 0x973   : > { %7218 = vst [vmem:[#allocation1 + $0x21] ss:$2 sm:$0xff] %v7079_v19 }
 0x975   : > { %6608 = vrot.lane.b32.xlu0 %v11729_v23, %s9017_s30  ;;  %6798 = vrot.lane.b32.xlu2 %v6324_v43, %s9019_s20  ;;  %v7016_v43 = vsel %vm5472_vm0, %v6952_v57, %v11735_v33  ;;  %v11832_v33 = vmax.f32 %v6161_v31, 0.0 }
 0x977   : > { %v11814_v25 = vpop.permute.xlu2 %6404  ;;  %6616 = vrot.lane.b32.xlu1 %v6329_v15, %s9017_s30  ;;  %v6771_v17 = vpop.permute.xlu0 %6770  ;;  %v6216_v14 = vrot.slane %v11832_v33, 3  ;;  %v6214_v44 = vrot.slane %v11832_v33, 1  ;;  %v6219_v6 = vrot.slane %v11832_v33, 6  ;;  %v6215_v39 = vrot.slane %v11832_v33, 2 }
 0x978   : > { %v7078_v35 = vsel %vm5736_vm7, %v7014_v52, %v6771_v17  ;;  %v6217_v30 = vrot.slane %v11832_v33, 4  ;;  %v6218_v17 = vrot.slane %v11832_v33, 5  ;;  %v6220_v57 = vrot.slane %v11832_v33, 7 }
 0x979   : > { %7217 = vst [vmem:[#allocation1 + $0x20] ss:$2 sm:$0xff] %v7078_v35  ;;  %v6775_v41 = vpop.permute.xlu1 %6774  ;;  %v6331_v13 = vperm.slane %v6214_v44, 0  ;;  %v11865_v45 = vperm.slane %v6219_v6, 0  ;;  %v6332_v62 = vperm.slane %v6215_v39, 0 }
 0x97a   : > { %v7080_v29 = vsel %vm5736_vm7, %v7016_v43, %v6775_v41  ;;  %v6334_v19 = vperm.slane %v6217_v30, 0  ;;  %v6335_v43 = vperm.slane %v6218_v17, 0  ;;  %v6337_v41 = vperm.slane %v6220_v57, 0 }
 0x97b   : > { %7219 = vst [vmem:[#allocation1 + $0x30] ss:$2 sm:$0xff] %v7080_v29 }
 0x97d   : > { %6614 = vrot.lane.b32.xlu0 %v11742_v36, %s9017_s30  ;;  %6804 = vrot.lane.b32.xlu2 %v6327_v37, %s9019_s20  ;;  %v6330_v37 = vperm.slane %v11832_v33, 0 }
 0x97f   : > { %v6589_v2 = vpop.permute.xlu2 %6588  ;;  %6802 = vrot.lane.b32.xlu1 %v6326_v38, %s9019_s20  ;;  %v6395_v26 = vpop.permute.xlu0 %6394  ;;  %v6333_v38 = vperm.slane %v6216_v14, 0 }
 0x980   : > { %v6954_v11 = vsel %vm5727_vm6, %v11606_v1, %v6395_v26 }
 0x981   : > { %v6587_v49 = vpop.permute.xlu1 %6586 }
 0x982   : > { %v7018_v27 = vsel %vm5472_vm0, %v6954_v11, %v6587_v49 }
 0x983   : > { %v7082_v48 = vsel %vm5736_vm7, %v7018_v27, %v6779_v7 }
 0x984   : > { %7225 = vst [vmem:[#allocation1] ss:$2 sm:$0xff] %v7082_v48 }
 0x985   : > { %6800 = vrot.lane.b32.xlu0 %v11729_v23, %s9019_s20  ;;  %6806 = vrot.lane.b32.xlu2 %v11742_v36, %s9019_s20 }
 0x987   : > { %v6595_v54 = vpop.permute.xlu2 %6594  ;;  %6426 = vrot.lane.b32.xlu1 %v6330_v37, %s9018_s18  ;;  %v6401_v8 = vpop.permute.xlu0 %6400 }
 0x989   : > { %v6397_v40 = vpop.permute.xlu1 %6396 }
 0x98a   : > { %v6955_v5 = vsel %vm5727_vm6, %v6200_v28, %v6397_v40  ;;  %v6956_v28 = vsel %vm5727_vm6, %v6201_v58, %v11795_v50  ;;  %v6959_v50 = vsel %vm5727_vm6, %v6204_v47, %v11814_v25 }
 0x98b   : > { %v7019_v31 = vsel %vm5472_vm0, %v6955_v5, %v6589_v2 }
 0x98d   : > { %6808 = vrot.lane.b32.xlu0 %v6329_v15, %s9019_s20  ;;  %6618 = vrot.lane.b32.xlu2 %v6330_v37, %s9017_s30 }
 0x98f   : > { %v11849_v23 = vpop.permute.xlu2 %6600  ;;  %6432 = vrot.lane.b32.xlu1 %v6333_v38, %s9018_s18  ;;  %v11852_v36 = vpop.permute.xlu0 %6406 }
 0x991   : > { %v6403_v7 = vpop.permute.xlu1 %6402 }
 0x992   : > { %v6958_v22 = vsel %vm5727_vm6, %v6203_v9, %v6403_v7  ;;  %v11872_v9 = vld.sshfl [vmem:[#allocation1 + $0x20] sm:$0xff pattern:$0x75316420] }
 0x993   : > { %v7022_v34 = vsel %vm5472_vm0, %v6958_v22, %v6595_v54  ;;  %v6957_v54 = vsel %vm5727_vm6, %v6202_v61, %v6401_v8 }
 0x995   : > { %6810 = vrot.lane.b32.xlu0 %v6330_v37, %s9019_s20  ;;  %6428 = vrot.lane.b32.xlu2 %v6331_v13, %s9018_s18  ;;  %v11910_v37 = vld.sshfl [vmem:[#allocation1 + $0x10] sm:$0xff pattern:$0x75316420] }
 0x997   : > { %v6787_v15 = vpop.permute.xlu2 %6786  ;;  %6438 = vrot.lane.b32.xlu1 %v11865_v45, %s9018_s18  ;;  %v6591_v3 = vpop.permute.xlu0 %6590 }
 0x998   : > { %v7086_v32 = vsel %vm5736_vm7, %v7022_v34, %v6787_v15  ;;  %v7020_v27 = vsel %vm5472_vm0, %v6956_v28, %v6591_v3 }
 0x999   : > { %7229 = vst [vmem:[#allocation1 + $0x20] ss:$2 sm:$0xff] %v7086_v32  ;;  %v6409_v42 = vpop.permute.xlu1 %6408  ;;  %v11932_v32 = vld.sshfl [vmem:[#allocation1 + $0x30] sm:$0xff pattern:$0x75316420] }
 0x99a   : > { %v6961_v61 = vsel %vm5727_vm6, %v6206_v21, %v6409_v42  ;;  %v6960_v21 = vsel %vm5727_vm6, %v6205_v12, %v11852_v36 }
 0x99d   : > { %6430 = vrot.lane.b32.xlu0 %v6332_v62, %s9018_s18  ;;  %6434 = vrot.lane.b32.xlu2 %v6334_v19, %s9018_s18 }
 0x99f   : > { %v11881_v55 = vpop.permute.xlu2 %6410  ;;  %6622 = vrot.lane.b32.xlu1 %v6332_v62, %s9017_s30  ;;  %v6597_v52 = vpop.permute.xlu0 %6596 }
 0x9a0   : > { %v7023_v8 = vsel %vm5472_vm0, %v6959_v50, %v6597_v52  ;;  %v6962_v12 = vsel %vm5727_vm6, %v11706_v4, %v11881_v55 }
 0x9a1   : > { %v6593_v35 = vpop.permute.xlu1 %6592 }
 0x9a2   : > { %v7021_v7 = vsel %vm5472_vm0, %v6957_v54, %v6593_v35 }
 0x9a5   : > { %6436 = vrot.lane.b32.xlu0 %v6335_v43, %s9018_s18  ;;  %6440 = vrot.lane.b32.xlu2 %v6337_v41, %s9018_s18 }
 0x9a7   : > { %v11895_v29 = vpop.permute.xlu2 %6416  ;;  %6812 = vrot.lane.b32.xlu1 %v6331_v13, %s9019_s20  ;;  %v6781_v26 = vpop.permute.xlu0 %6780 }
 0x9a8   : > { %v7083_v11 = vsel %vm5736_vm7, %v7019_v31, %v6781_v26 }
 0x9a9   : > { %7226 = vst [vmem:[#allocation1 + $0x1] ss:$2 sm:$0xff] %v7083_v11  ;;  %v6599_v49 = vpop.permute.xlu1 %6598 }
 0x9aa   : > { %v7024_v25 = vsel %vm5472_vm0, %v6960_v21, %v6599_v49 }
 0x9ad   : > { %6620 = vrot.lane.b32.xlu0 %v6331_v13, %s9017_s30  ;;  %6624 = vrot.lane.b32.xlu2 %v6333_v38, %s9017_s30 }
 0x9af   : > { %v11907_v48 = vpop.permute.xlu2 %6422  ;;  %6814 = vrot.lane.b32.xlu1 %v6332_v62, %s9019_s20  ;;  %v6783_v2 = vpop.permute.xlu0 %6782 }
 0x9b0   : > { %v7084_v40 = vsel %vm5736_vm7, %v7020_v27, %v6783_v2  ;;  %v6162_v62 = vpop.f32.mrf.mxu2  ;;  %v11956_v31 = vld.sshfl [vmem:[#allocation1] sm:$0xff pattern:$0x75316420] }
 0x9b1   : > { %7227 = vst [vmem:[#allocation1 + $0x10] ss:$2 sm:$0xff] %v7084_v40  ;;  %v6785_v13 = vpop.permute.xlu1 %6784 }
 0x9b2   : > { %v7085_v58 = vsel %vm5736_vm7, %v7021_v7, %v6785_v13 }
 0x9b3   : > { %7228 = vst [vmem:[#allocation1 + $0x11] ss:$2 sm:$0xff] %v7085_v58 }
 0x9b5   : > { %6626 = vrot.lane.b32.xlu0 %v6334_v19, %s9017_s30  ;;  %6816 = vrot.lane.b32.xlu2 %v6333_v38, %s9019_s20  ;;  %v7025_v38 = vsel %vm5472_vm0, %v6961_v61, %v11849_v23 }
 0x9b7   : > { %v6607_v22 = vpop.permute.xlu2 %6606  ;;  %6628 = vrot.lane.b32.xlu1 %v6335_v43, %s9017_s30  ;;  %v6789_v15 = vpop.permute.xlu0 %6788 }
 0x9b8   : > { %v7087_v34 = vsel %vm5736_vm7, %v7023_v8, %v6789_v15 }
 0x9b9   : > { %7230 = vst [vmem:[#allocation1 + $0x21] ss:$2 sm:$0xff] %v7087_v34  ;;  %v6793_v3 = vpop.permute.xlu1 %6792 }
 0x9ba   : > { %v7089_v47 = vsel %vm5736_vm7, %v7025_v38, %v6793_v3  ;;  %v11969_v54 = vld.sshfl [vmem:[#allocation1 + $0x10] sm:$0xff pattern:$0x75316420] }
 0x9bb   : > { %7232 = vst [vmem:[#allocation1 + $0x31] ss:$2 sm:$0xff] %v7089_v47 }
 0x9bd   : > { %6820 = vrot.lane.b32.xlu0 %v6335_v43, %s9019_s20  ;;  %6818 = vrot.lane.b32.xlu2 %v6334_v19, %s9019_s20  ;;  %v6163_v43 = vadd.f32 %v11500_v10, %v6162_v62 }
 0x9bf   : > { %v6613_v42 = vpop.permute.xlu2 %6612  ;;  %6630 = vrot.lane.b32.xlu1 %v11865_v45, %s9017_s30  ;;  %v6791_v23 = vpop.permute.xlu0 %6790  ;;  %v11949_v1 = vmax.f32 %v6163_v43, 0.0 }
 0x9c0   : > { %v7088_v52 = vsel %vm5736_vm7, %v7024_v25, %v6791_v23  ;;  %v11988_v3 = vld.sshfl [vmem:[#allocation1 + $0x20] sm:$0xff pattern:$0x75316420] }
 0x9c1   : > { %7231 = vst [vmem:[#allocation1 + $0x30] ss:$2 sm:$0xff] %v7088_v52  ;;  %v6795_v35 = vpop.permute.xlu1 %6794  ;;  %v6223_v27 = vrot.slane %v11949_v1, 3  ;;  %v6222_v2 = vrot.slane %v11949_v1, 2  ;;  %v6221_v7 = vrot.slane %v11949_v1, 1  ;;  %v6226_v34 = vrot.slane %v11949_v1, 6 }
 0x9c2   : > { %v6225_v38 = vrot.slane %v11949_v1, 5  ;;  %v6224_v25 = vrot.slane %v11949_v1, 4 }
 0x9c3   : > { %v6341_v13 = vperm.slane %v6223_v27, 0  ;;  %v6340_v58 = vperm.slane %v6222_v2, 0  ;;  %v6339_v61 = vperm.slane %v6221_v7, 0  ;;  %v6344_v62 = vperm.slane %v6226_v34, 0 }
 0x9c4   : > { %v6343_v52 = vperm.slane %v6225_v38, 0 }
 0x9c5   : > { %6822 = vrot.lane.b32.xlu0 %v11865_v45, %s9019_s20  ;;  %6632 = vrot.lane.b32.xlu2 %v6337_v41, %s9017_s30  ;;  %v6338_v45 = vperm.slane %v11949_v1, 0 }
 0x9c7   : > { %v6797_v36 = vpop.permute.xlu2 %6796  ;;  %6824 = vrot.lane.b32.xlu1 %v6337_v41, %s9019_s20  ;;  %v6603_v19 = vpop.permute.xlu0 %6602 }
 0x9c8   : > { %v7026_v5 = vsel %vm5472_vm0, %v6962_v12, %v6603_v19 }
 0x9c9   : > { %v7090_v26 = vsel %vm5736_vm7, %v7026_v5, %v6795_v35  ;;  %v6415_v11 = vpop.permute.xlu1 %6414 }
 0x9ca   : > { %7237 = vst [vmem:[#allocation1] ss:$2 sm:$0xff] %v7090_v26  ;;  %v6964_v49 = vsel %vm5727_vm6, %v6208_v56, %v6415_v11 }
 0x9cb   : > { %v7028_v41 = vsel %vm5472_vm0, %v6964_v49, %v6607_v22 }
 0x9cd   : > { %6442 = vrot.lane.b32.xlu0 %v6338_v45, %s9018_s18  ;;  %6634 = vrot.lane.b32.xlu2 %v6338_v45, %s9017_s30 }
 0x9cf   : > { %v6799_v55 = vpop.permute.xlu2 %6798  ;;  %6826 = vrot.lane.b32.xlu1 %v6338_v45, %s9019_s20  ;;  %v6413_v28 = vpop.permute.xlu0 %6412  ;;  %v6968_v45 = vsel %vm5727_vm6, %v6212_v63, %v11907_v48 }
 0x9d0   : > { %v7092_v40 = vsel %vm5736_vm7, %v7028_v41, %v6799_v55  ;;  %v6963_v47 = vsel %vm5727_vm6, %v6207_v60, %v6413_v28  ;;  %v6342_v60 = vperm.slane %v6224_v25, 0 }
 0x9d1   : > { %7239 = vst [vmem:[#allocation1 + $0x10] ss:$2 sm:$0xff] %v7092_v40  ;;  %v6421_v56 = vpop.permute.xlu1 %6420  ;;  %v12025_v40 = vld.sshfl [vmem:[#allocation1 + $0x30] sm:$0xff pattern:$0x75316420] }
 0x9d2   : > { %v6967_v50 = vsel %vm5727_vm6, %v6211_v59, %v6421_v56 }
 0x9d3   : > { %v7031_v22 = vsel %vm5472_vm0, %v6967_v50, %v6613_v42 }
 0x9d5   : > { %6448 = vrot.lane.b32.xlu0 %v6341_v13, %s9018_s18  ;;  %6446 = vrot.lane.b32.xlu2 %v6340_v58, %s9018_s18 }
 0x9d7   : > { %v6805_v8 = vpop.permute.xlu2 %6804  ;;  %6444 = vrot.lane.b32.xlu1 %v6339_v61, %s9018_s18  ;;  %v6419_v15 = vpop.permute.xlu0 %6418 }
 0x9d8   : > { %v7095_v59 = vsel %vm5736_vm7, %v7031_v22, %v6805_v8  ;;  %v6966_v41 = vsel %vm5727_vm6, %v6210_v46, %v6419_v15  ;;  %v6965_v46 = vsel %vm5727_vm6, %v6209_v18, %v11895_v29 }
 0x9d9   : > { %7242 = vst [vmem:[#allocation1 + $0x21] ss:$2 sm:$0xff] %v7095_v59  ;;  %v6605_v21 = vpop.permute.xlu1 %6604 }
 0x9da   : > { %v7027_v42 = vsel %vm5472_vm0, %v6963_v47, %v6605_v21 }
 0x9db   : > { %v7091_v23 = vsel %vm5736_vm7, %v7027_v42, %v6797_v36  ;;  %v6227_v36 = vrot.slane %v11949_v1, 7 }
 0x9dc   : > { %7238 = vst [vmem:[#allocation1 + $0x1] ss:$2 sm:$0xff] %v7091_v23 }
 0x9dd   : > { %6454 = vrot.lane.b32.xlu0 %v6344_v62, %s9018_s18  ;;  %6452 = vrot.lane.b32.xlu2 %v6343_v52, %s9018_s18  ;;  %v6345_v19 = vperm.slane %v6227_v36, 0 }
 0x9df   : > { %v6807_v35 = vpop.permute.xlu2 %6806  ;;  %6450 = vrot.lane.b32.xlu1 %v6342_v60, %s9018_s18  ;;  %v6425_v43 = vpop.permute.xlu0 %6424 }
 0x9e0   : > { %v6969_v18 = vsel %vm5727_vm6, %v6213_v20, %v6425_v43 }
 0x9e1   : > { %v6611_v12 = vpop.permute.xlu1 %6610 }
 0x9e2   : > { %v7030_v56 = vsel %vm5472_vm0, %v6966_v41, %v6611_v12 }
 0x9e3   : > { %v12060_v43 = vld.sshfl [vmem:[#allocation1] sm:$0xff pattern:$0x75316420] }
 0x9e5   : > { %6636 = vrot.lane.b32.xlu0 %v6339_v61, %s9017_s30  ;;  %6828 = vrot.lane.b32.xlu2 %v6339_v61, %s9019_s20 }
 0x9e7   : > { %v6619_v5 = vpop.permute.xlu2 %6618  ;;  %6456 = vrot.lane.b32.xlu1 %v6345_v19, %s9018_s18  ;;  %v6609_v26 = vpop.permute.xlu0 %6608 }
 0x9e8   : > { %v7029_v48 = vsel %vm5472_vm0, %v6965_v46, %v6609_v26 }
 0x9e9   : > { %v6617_v11 = vpop.permute.xlu1 %6616 }
 0x9ea   : > { %v7033_v29 = vsel %vm5472_vm0, %v6969_v18, %v6617_v11 }
 0x9ed   : > { %6638 = vrot.lane.b32.xlu0 %v6340_v58, %s9017_s30  ;;  %6830 = vrot.lane.b32.xlu2 %v6340_v58, %s9019_s20 }
 0x9ef   : > { %6640 = vrot.lane.b32.xlu1 %v6341_v13, %s9017_s30  ;;  %v12019_v49 = vpop.permute.xlu2 %6428  ;;  %v6615_v55 = vpop.permute.xlu0 %6614 }
 0x9f0   : > { %v7032_v28 = vsel %vm5472_vm0, %v6968_v45, %v6615_v55 }
 0x9f1   : > { %v7096_v58 = vsel %vm5736_vm7, %v7032_v28, %v6807_v35  ;;  %v6803_v50 = vpop.permute.xlu1 %6802 }
 0x9f2   : > { %7243 = vst [vmem:[#allocation1 + $0x30] ss:$2 sm:$0xff] %v7096_v58  ;;  %v7094_v63 = vsel %vm5736_vm7, %v7030_v56, %v6803_v50 }
 0x9f3   : > { %7241 = vst [vmem:[#allocation1 + $0x20] ss:$2 sm:$0xff] %v7094_v63 }
 0x9f5   : > { %6832 = vrot.lane.b32.xlu0 %v6341_v13, %s9019_s20  ;;  %6644 = vrot.lane.b32.xlu2 %v6343_v52, %s9017_s30  ;;  %v6165_v13 = vpop.f32.mrf.mxu2 }
 0x9f6   : > { %v6166_v42 = vadd.f32 %v11500_v10, %v6165_v13 }
 0x9f7   : > { %6642 = vrot.lane.b32.xlu1 %v6342_v60, %s9017_s30  ;;  %v12038_v61 = vpop.permute.xlu2 %6434  ;;  %v6801_v8 = vpop.permute.xlu0 %6800 }
 0x9f8   : > { %v7093_v22 = vsel %vm5736_vm7, %v7029_v48, %v6801_v8  ;;  %v12054_v35 = vmax.f32 %v6166_v42, 0.0 }
 0x9f9   : > { %7240 = vst [vmem:[#allocation1 + $0x11] ss:$2 sm:$0xff] %v7093_v22  ;;  %v6427_v15 = vpop.permute.xlu1 %6426 }
 0x9fa   : > { %v6229_v26 = vrot.slane %v12054_v35, 2  ;;  %v6346_v11 = vperm.slane %v12054_v35, 0  ;;  %v6228_v41 = vrot.slane %v12054_v35, 1  ;;  %v6232_v50 = vrot.slane %v12054_v35, 5 }
 0x9fb   : > { %v6230_v8 = vrot.slane %v12054_v35, 3  ;;  %v6231_v22 = vrot.slane %v12054_v35, 4 }
 0x9fc   : > { %v12090_v63 = vperm.slane %v6232_v50, 0 }
 0x9fd   : > { %6834 = vrot.lane.b32.xlu0 %v6342_v60, %s9019_s20  ;;  %6646 = vrot.lane.b32.xlu2 %v6344_v62, %s9017_s30  ;;  %v6970_v60 = vsel %vm5727_vm6, %v11832_v33, %v6427_v15  ;;  %v6349_v13 = vperm.slane %v6230_v8, 0  ;;  %v6350_v18 = vperm.slane %v6231_v22, 0 }
 0x9fe   : > { %v7034_v20 = vsel %vm5472_vm0, %v6970_v60, %v6619_v5  ;;  %v6234_v60 = vrot.slane %v12054_v35, 7 }
 0x9ff   : > { %6836 = vrot.lane.b32.xlu1 %v6343_v52, %s9019_s20  ;;  %v12048_v59 = vpop.permute.xlu2 %6440  ;;  %v6809_v47 = vpop.permute.xlu0 %6808 }
 0xa00   : > { %v7097_v21 = vsel %vm5736_vm7, %v7033_v29, %v6809_v47  ;;  %v12080_v28 = vld.sshfl [vmem:[#allocation1 + $0x10] sm:$0xff pattern:$0x75316420]  ;;  %v6971_v47 = vsel %vm5727_vm6, %v6214_v44, %v12019_v49  ;;  %v6353_v49 = vperm.slane %v6234_v60, 0 }
 0xa01   : > { %7244 = vst [vmem:[#allocation1 + $0x31] ss:$2 sm:$0xff] %v7097_v21  ;;  %v6433_v23 = vpop.permute.xlu1 %6432 }
 0xa05   : > { %6648 = vrot.lane.b32.xlu0 %v6345_v19, %s9017_s30  ;;  %6840 = vrot.lane.b32.xlu2 %v6345_v19, %s9019_s20  ;;  %v6973_v19 = vsel %vm5727_vm6, %v6216_v14, %v6433_v23  ;;  %v6347_v14 = vperm.slane %v6228_v41, 0  ;;  %v6233_v23 = vrot.slane %v12054_v35, 6 }
 0xa07   : > { %6838 = vrot.lane.b32.xlu1 %v6344_v62, %s9019_s20  ;;  %v6625_v4 = vpop.permute.xlu2 %6624  ;;  %v6811_v52 = vpop.permute.xlu0 %6810  ;;  %v12071_v62 = vperm.slane %v6229_v26, 0  ;;  %v6352_v44 = vperm.slane %v6233_v23, 0 }
 0xa08   : > { %v7098_v10 = vsel %vm5736_vm7, %v7034_v20, %v6811_v52  ;;  %v7037_v5 = vsel %vm5472_vm0, %v6973_v19, %v6625_v4 }
 0xa09   : > { %7249 = vst [vmem:[#allocation1] ss:$2 sm:$0xff] %v7098_v10  ;;  %v12063_v12 = vpop.permute.xlu1 %6438 }
 0xa0d   : > { %6650 = vrot.lane.b32.xlu0 %v6346_v11, %s9017_s30  ;;  %6458 = vrot.lane.b32.xlu2 %v6346_v11, %s9018_s18 }
 0xa0f   : > { %v6817_v45 = vpop.permute.xlu2 %6816  ;;  %6462 = vrot.lane.b32.xlu1 %v12071_v62, %s9018_s18  ;;  %v6431_v55 = vpop.permute.xlu0 %6430 }
 0xa10   : > { %v7101_v56 = vsel %vm5736_vm7, %v7037_v5, %v6817_v45  ;;  %v6972_v29 = vsel %vm5727_vm6, %v6215_v39, %v6431_v55  ;;  %v12129_v55 = vld.sshfl [vmem:[#allocation1 + $0x20] sm:$0xff pattern:$0x75316420] }
 0xa11   : > { %7252 = vst [vmem:[#allocation1 + $0x11] ss:$2 sm:$0xff] %v7101_v56  ;;  %v6623_v58 = vpop.permute.xlu1 %6622 }
 0xa12   : > { %v7036_v20 = vsel %vm5472_vm0, %v6972_v29, %v6623_v58 }
 0xa15   : > { %6842 = vrot.lane.b32.xlu2 %v6346_v11, %s9019_s20  ;;  %6460 = vrot.lane.b32.xlu0 %v6347_v14, %s9018_s18  ;;  %v6974_v11 = vsel %vm5727_vm6, %v6217_v30, %v12038_v61 }
 0xa17   : > { %v6819_v46 = vpop.permute.xlu2 %6818  ;;  %6468 = vrot.lane.b32.xlu1 %v12090_v63, %s9018_s18  ;;  %v6437_v48 = vpop.permute.xlu0 %6436 }
 0xa18   : > { %v6975_v30 = vsel %vm5727_vm6, %v6218_v17, %v6437_v48  ;;  %v6976_v17 = vsel %vm5727_vm6, %v6219_v6, %v12063_v12  ;;  %v6167_v12 = vpop.f32.mrf.mxu2 }
 0xa19   : > { %v6813_v15 = vpop.permute.xlu1 %6812 }
 0xa1d   : > { %6464 = vrot.lane.b32.xlu2 %v6349_v13, %s9018_s18  ;;  %6466 = vrot.lane.b32.xlu0 %v6350_v18, %s9018_s18 }
 0xa1f   : > { %v6633_v21 = vpop.permute.xlu2 %6632  ;;  %6652 = vrot.lane.b32.xlu1 %v6347_v14, %s9017_s30  ;;  %v6621_v42 = vpop.permute.xlu0 %6620 }
 0xa20   : > { %v7035_v4 = vsel %vm5472_vm0, %v6971_v47, %v6621_v42  ;;  %v6977_v42 = vsel %vm5727_vm6, %v6220_v57, %v12048_v59 }
 0xa21   : > { %v7099_v52 = vsel %vm5736_vm7, %v7035_v4, %v6813_v15  ;;  %v6815_v39 = vpop.permute.xlu1 %6814  ;;  %v12157_v4 = vld.sshfl [vmem:[#allocation1 + $0x30] sm:$0xff pattern:$0x75316420] }
 0xa22   : > { %7250 = vst [vmem:[#allocation1 + $0x1] ss:$2 sm:$0xff] %v7099_v52  ;;  %v7100_v10 = vsel %vm5736_vm7, %v7036_v20, %v6815_v39  ;;  %v7041_v20 = vsel %vm5472_vm0, %v6977_v42, %v6633_v21 }
 0xa23   : > { %7251 = vst [vmem:[#allocation1 + $0x10] ss:$2 sm:$0xff] %v7100_v10 }
 0xa25   : > { %6470 = vrot.lane.b32.xlu2 %v6352_v44, %s9018_s18  ;;  %6472 = vrot.lane.b32.xlu0 %v6353_v49, %s9018_s18 }
 0xa27   : > { %v6635_v19 = vpop.permute.xlu2 %6634  ;;  %6654 = vrot.lane.b32.xlu1 %v12071_v62, %s9017_s30  ;;  %v6627_v5 = vpop.permute.xlu0 %6626 }
 0xa28   : > { %v7038_v45 = vsel %vm5472_vm0, %v6974_v11, %v6627_v5 }
 0xa29   : > { %v7102_v56 = vsel %vm5736_vm7, %v7038_v45, %v6819_v46  ;;  %v6629_v58 = vpop.permute.xlu1 %6628  ;;  %v12176_v45 = vld.sshfl [vmem:[#allocation1] sm:$0xff pattern:$0x75316420] }
 0xa2a   : > { %7253 = vst [vmem:[#allocation1 + $0x20] ss:$2 sm:$0xff] %v7102_v56  ;;  %v7039_v61 = vsel %vm5472_vm0, %v6975_v30, %v6629_v58 }
 0xa2d   : > { %6656 = vrot.lane.b32.xlu2 %v6349_v13, %s9017_s30  ;;  %6844 = vrot.lane.b32.xlu0 %v6347_v14, %s9019_s20 }
 0xa2f   : > { %v12138_v15 = vpop.permute.xlu2 %6446  ;;  %6848 = vrot.lane.b32.xlu1 %v6349_v13, %s9019_s20  ;;  %v6821_v29 = vpop.permute.xlu0 %6820 }
 0xa30   : > { %v7103_v47 = vsel %vm5736_vm7, %v7039_v61, %v6821_v29 }
 0xa31   : > { %7254 = vst [vmem:[#allocation1 + $0x21] ss:$2 sm:$0xff] %v7103_v47  ;;  %v6631_v46 = vpop.permute.xlu1 %6630 }
 0xa32   : > { %v7040_v14 = vsel %vm5472_vm0, %v6976_v17, %v6631_v46 }
 0xa35   : > { %6658 = vrot.lane.b32.xlu2 %v6350_v18, %s9017_s30  ;;  %6846 = vrot.lane.b32.xlu0 %v12071_v62, %s9019_s20 }
 0xa37   : > { %v12150_v48 = vpop.permute.xlu2 %6452  ;;  %6850 = vrot.lane.b32.xlu1 %v6350_v18, %s9019_s20  ;;  %v6823_v13 = vpop.permute.xlu0 %6822  ;;  %v9003_v18 = vld [vmem:[%s12614_s12] ss:$0 sm:$0xff] }
 0xa38   : > { %v7104_v62 = vsel %vm5736_vm7, %v7040_v14, %v6823_v13  ;;  %v6168_v39 = vadd.f32 %v9003_v18, %v6167_v12 }
 0xa39   : > { %7255 = vst [vmem:[#allocation1 + $0x30] ss:$2 sm:$0xff] %v7104_v62  ;;  %v6825_v6 = vpop.permute.xlu1 %6824 }
 0xa3a   : > { %v7105_v52 = vsel %vm5736_vm7, %v7041_v20, %v6825_v6  ;;  %v12172_v21 = vmax.f32 %v6168_v39, 0.0 }
 0xa3b   : > { %7256 = vst [vmem:[#allocation1 + $0x31] ss:$2 sm:$0xff] %v7105_v52 }
 0xa3c   : > { %v6235_v30 = vrot.slane %v12172_v21, 1  ;;  %v6238_v47 = vrot.slane %v12172_v21, 4  ;;  %v6237_v17 = vrot.slane %v12172_v21, 3  ;;  %v6241_v20 = vrot.slane %v12172_v21, 7 }
 0xa3d   : > { %6852 = vrot.lane.b32.xlu2 %v12090_v63, %s9019_s20  ;;  %6660 = vrot.lane.b32.xlu0 %v12090_v63, %s9017_s30  ;;  %v6354_v63 = vperm.slane %v12172_v21, 0  ;;  %v6236_v6 = vrot.slane %v12172_v21, 2  ;;  %v6240_v39 = vrot.slane %v12172_v21, 6 }
 0xa3e   : > { %v12194_v14 = vperm.slane %v6238_v47, 0 }
 0xa3f   : > { %v6829_v33 = vpop.permute.xlu2 %6828  ;;  %6664 = vrot.lane.b32.xlu1 %v6353_v49, %s9017_s30  ;;  %v6443_v57 = vpop.permute.xlu0 %6442 }
 0xa40   : > { %v6978_v59 = vsel %vm5727_vm6, %v11949_v1, %v6443_v57  ;;  %v12212_v57 = vperm.slane %v6241_v20, 0 }
 0xa41   : > { %v6827_v10 = vpop.permute.xlu1 %6826  ;;  %v7042_v11 = vsel %vm5472_vm0, %v6978_v59, %v6635_v19  ;;  %v6355_v19 = vperm.slane %v6235_v30, 0  ;;  %v12221_v59 = vperm.slane %v6240_v39, 0 }
 0xa42   : > { %v7106_v5 = vsel %vm5736_vm7, %v7042_v11, %v6827_v10 }
 0xa43   : > { %7261 = vst [vmem:[#allocation1] ss:$2 sm:$0xff] %v7106_v5  ;;  %v6239_v5 = vrot.slane %v12172_v21, 5 }
 0xa45   : > { %6854 = vrot.lane.b32.xlu2 %v6352_v44, %s9019_s20  ;;  %6662 = vrot.lane.b32.xlu0 %v6352_v44, %s9017_s30 }
 0xa47   : > { %v6831_v56 = vpop.permute.xlu2 %6830  ;;  %6474 = vrot.lane.b32.xlu1 %v6354_v63, %s9018_s18  ;;  %v6449_v58 = vpop.permute.xlu0 %6448 }
 0xa49   : > { %v6445_v61 = vpop.permute.xlu1 %6444 }
 0xa4a   : > { %v6979_v13 = vsel %vm5727_vm6, %v6221_v7, %v6445_v61  ;;  %v6356_v7 = vperm.slane %v6236_v6, 0 }
 0xa4d   : > { %6476 = vrot.lane.b32.xlu2 %v6355_v19, %s9018_s18  ;;  %6856 = vrot.lane.b32.xlu0 %v6353_v49, %s9019_s20  ;;  %v6357_v49 = vperm.slane %v6237_v17, 0 }
 0xa4f   : > { %v6645_v29 = vpop.permute.xlu2 %6644  ;;  %6666 = vrot.lane.b32.xlu1 %v6354_v63, %s9017_s30  ;;  %v12188_v44 = vpop.permute.xlu0 %6454 }
 0xa51   : > { %v6451_v46 = vpop.permute.xlu1 %6450 }
 0xa55   : > { %6482 = vrot.lane.b32.xlu2 %v12194_v14, %s9018_s18  ;;  %6858 = vrot.lane.b32.xlu0 %v6354_v63, %s9019_s20 }
 0xa57   : > { %v6647_v42 = vpop.permute.xlu2 %6646  ;;  %6480 = vrot.lane.b32.xlu1 %v6357_v49, %s9018_s18  ;;  %v6637_v62 = vpop.permute.xlu0 %6636 }
 0xa58   : > { %v7043_v12 = vsel %vm5472_vm0, %v6979_v13, %v6637_v62  ;;  %v12232_v62 = vld.sshfl [vmem:[#allocation1 + $0x10] sm:$0xff pattern:$0x75316420] }
 0xa59   : > { %v7107_v52 = vsel %vm5736_vm7, %v7043_v12, %v6829_v33  ;;  %v6457_v18 = vpop.permute.xlu1 %6456  ;;  %v6980_v33 = vsel %vm5727_vm6, %v6222_v2, %v12138_v15  ;;  %v6359_v12 = vperm.slane %v6239_v5, 0  ;;  %v6981_v2 = vsel %vm5727_vm6, %v6223_v27, %v6449_v58 }
 0xa5a   : > { %7262 = vst [vmem:[#allocation1 + $0x1] ss:$2 sm:$0xff] %v7107_v52 }
 0xa5d   : > { %6488 = vrot.lane.b32.xlu2 %v12212_v57, %s9018_s18  ;;  %6478 = vrot.lane.b32.xlu0 %v6356_v7, %s9018_s18 }
 0xa5f   : > { %v6841_v10 = vpop.permute.xlu2 %6840  ;;  %6486 = vrot.lane.b32.xlu1 %v12221_v59, %s9018_s18  ;;  %v6639_v11 = vpop.permute.xlu0 %6638 }
 0xa60   : > { %v7044_v63 = vsel %vm5472_vm0, %v6980_v33, %v6639_v11 }
 0xa61   : > { %v7108_v61 = vsel %vm5736_vm7, %v7044_v63, %v6831_v56  ;;  %v6641_v13 = vpop.permute.xlu1 %6640  ;;  %v6982_v63 = vsel %vm5727_vm6, %v6224_v25, %v6451_v46 }
 0xa62   : > { %7263 = vst [vmem:[#allocation1 + $0x10] ss:$2 sm:$0xff] %v7108_v61  ;;  %v7045_v15 = vsel %vm5472_vm0, %v6981_v2, %v6641_v13  ;;  %v12256_v2 = vld.sshfl [vmem:[#allocation1 + $0x20] sm:$0xff pattern:$0x75316420] }
 0xa65   : > { %6668 = vrot.lane.b32.xlu2 %v6355_v19, %s9017_s30  ;;  %6484 = vrot.lane.b32.xlu0 %v6359_v12, %s9018_s18 }
 0xa67   : > { %v6459_v52 = vpop.permute.xlu2 %6458  ;;  %6860 = vrot.lane.b32.xlu1 %v6355_v19, %s9019_s20  ;;  %v6833_v56 = vpop.permute.xlu0 %6832  ;;  %v6983_v19 = vsel %vm5727_vm6, %v6225_v38, %v12150_v48  ;;  %v6985_v38 = vsel %vm5727_vm6, %v6227_v36, %v6457_v18 }
 0xa68   : > { %v7109_v33 = vsel %vm5736_vm7, %v7045_v15, %v6833_v56  ;;  %v7047_v15 = vsel %vm5472_vm0, %v6983_v19, %v6645_v29  ;;  %v6984_v29 = vsel %vm5727_vm6, %v6226_v34, %v12188_v44  ;;  %v6986_v1 = vsel %vm5727_vm6, %v12054_v35, %v6459_v52 }
 0xa69   : > { %v6643_v11 = vpop.permute.xlu1 %6642  ;;  %7264 = vst [vmem:[#allocation1 + $0x11] ss:$2 sm:$0xff] %v7109_v33 }
 0xa6a   : > { %v7046_v27 = vsel %vm5472_vm0, %v6982_v63, %v6643_v11  ;;  %v12274_v63 = vld.sshfl [vmem:[#allocation1 + $0x30] sm:$0xff pattern:$0x75316420] }
 0xa6d   : > { %6670 = vrot.lane.b32.xlu2 %v6356_v7, %s9017_s30  ;;  %6672 = vrot.lane.b32.xlu0 %v6357_v49, %s9017_s30 }
 0xa6f   : > { %v6843_v58 = vpop.permute.xlu2 %6842  ;;  %6862 = vrot.lane.b32.xlu1 %v6356_v7, %s9019_s20  ;;  %v6835_v61 = vpop.permute.xlu0 %6834 }
 0xa70   : > { %v7110_v13 = vsel %vm5736_vm7, %v7046_v27, %v6835_v61  ;;  %v12286_v27 = vld.sshfl [vmem:[#allocation1] sm:$0xff pattern:$0x75316420] }
 0xa71   : > { %v6837_v56 = vpop.permute.xlu1 %6836  ;;  %7265 = vst [vmem:[#allocation1 + $0x20] ss:$2 sm:$0xff] %v7110_v13 }
 0xa72   : > { %v7111_v25 = vsel %vm5736_vm7, %v7047_v15, %v6837_v56 }
 0xa73   : > { %7266 = vst [vmem:[#allocation1 + $0x21] ss:$2 sm:$0xff] %v7111_v25 }
 0xa75   : > { %6864 = vrot.lane.b32.xlu2 %v6357_v49, %s9019_s20  ;;  %6674 = vrot.lane.b32.xlu0 %v12194_v14, %s9017_s30  ;;  %v7048_v49 = vsel %vm5472_vm0, %v6984_v29, %v6647_v42 }
 0xa77   : > { %v6465_v48 = vpop.permute.xlu2 %6464  ;;  %6676 = vrot.lane.b32.xlu1 %v6359_v12, %s9017_s30  ;;  %v6649_v46 = vpop.permute.xlu0 %6648 }
 0xa78   : > { %v7049_v7 = vsel %vm5472_vm0, %v6985_v38, %v6649_v46 }
 0xa79   : > { %v7113_v33 = vsel %vm5736_vm7, %v7049_v7, %v6841_v10  ;;  %v6839_v11 = vpop.permute.xlu1 %6838 }
 0xa7a   : > { %v7112_v36 = vsel %vm5736_vm7, %v7048_v49, %v6839_v11  ;;  %7268 = vst [vmem:[#allocation1 + $0x31] ss:$2 sm:$0xff] %v7113_v33  ;;  %v7270_v11 = vld.sshfl [vmem:[#allocation1 + $0x10] sm:$0xff pattern:$0x75316420] }
 0xa7b   : > { %7267 = vst [vmem:[#allocation1 + $0x30] ss:$2 sm:$0xff] %v7112_v36 }
 0xa7d   : > { %6866 = vrot.lane.b32.xlu2 %v12194_v14, %s9019_s20  ;;  %6868 = vrot.lane.b32.xlu0 %v6359_v12, %s9019_s20 }
 0xa7f   : > { %v6471_v34 = vpop.permute.xlu2 %6470  ;;  %6678 = vrot.lane.b32.xlu1 %v12221_v59, %s9017_s30  ;;  %v6651_v44 = vpop.permute.xlu0 %6650 }
 0xa80   : > { %v7050_v42 = vsel %vm5472_vm0, %v6986_v1, %v6651_v44 }
 0xa81   : > { %v7114_v18 = vsel %vm5736_vm7, %v7050_v42, %v6843_v58  ;;  %v6463_v10 = vpop.permute.xlu1 %6462 }
 0xa82   : > { %7273 = vst [vmem:[#allocation1] ss:$2 sm:$0xff] %v7114_v18  ;;  %v8951_v18 = vpack.i.bf16 %v11722_v16, %v12176_v45  ;;  %v8953_v16 = vpack.i.bf16 %v11755_v24, %v12232_v62 }
 0xa85   : > { %6680 = vrot.lane.b32.xlu2 %v12212_v57, %s9017_s30  ;;  %6870 = vrot.lane.b32.xlu0 %v12221_v59, %s9019_s20  ;;  %v6989_v59 = vsel %vm5727_vm6, %v6230_v8, %v6465_v48 }
 0xa87   : > { %v6657_v14 = vpop.permute.xlu2 %6656  ;;  %6872 = vrot.lane.b32.xlu1 %v12212_v57, %s9019_s20  ;;  %v6461_v12 = vpop.permute.xlu0 %6460 }
 0xa88   : > { %v6987_v25 = vsel %vm5727_vm6, %v6228_v41, %v6461_v12  ;;  %v7053_v29 = vsel %vm5472_vm0, %v6989_v59, %v6657_v14  ;;  %v6988_v41 = vsel %vm5727_vm6, %v6229_v26, %v6463_v10  ;;  %v7271_v12 = vld.sshfl [vmem:[#allocation1 + $0x20] sm:$0xff pattern:$0x75316420] }
 0xa89   : > { %v6469_v52 = vpop.permute.xlu1 %6468 }
 0xa8f   : > { %v6659_v61 = vpop.permute.xlu2 %6658  ;;  %v6467_v19 = vpop.permute.xlu0 %6466 }
 0xa90   : > { %v6990_v36 = vsel %vm5727_vm6, %v6231_v22, %v6467_v19  ;;  %v6991_v22 = vsel %vm5727_vm6, %v6232_v50, %v6469_v52 }
 0xa91   : > { %v6653_v13 = vpop.permute.xlu1 %6652  ;;  %v7054_v42 = vsel %vm5472_vm0, %v6990_v36, %v6659_v61 }
 0xa92   : > { %v7051_v38 = vsel %vm5472_vm0, %v6987_v25, %v6653_v13 }
 0xa97   : > { %v6473_v58 = vpop.permute.xlu0 %6472  ;;  %v6853_v15 = vpop.permute.xlu2 %6852 }
 0xa98   : > { %v6993_v24 = vsel %vm5727_vm6, %v6234_v60, %v6473_v58 }
 0xa99   : > { %v6655_v56 = vpop.permute.xlu1 %6654 }
 0xa9a   : > { %v7052_v8 = vsel %vm5472_vm0, %v6988_v41, %v6655_v56  ;;  %v6992_v56 = vsel %vm5727_vm6, %v6233_v23, %v6471_v34 }
 0xa9f   : > { %v6845_v46 = vpop.permute.xlu0 %6844  ;;  %v6855_v49 = vpop.permute.xlu2 %6854 }
 0xaa0   : > { %v7115_v57 = vsel %vm5736_vm7, %v7051_v38, %v6845_v46  ;;  %v7272_v46 = vld.sshfl [vmem:[#allocation1 + $0x30] sm:$0xff pattern:$0x75316420] }
 0xaa1   : > { %v6849_v7 = vpop.permute.xlu1 %6848  ;;  %7274 = vst [vmem:[#allocation1 + $0x1] ss:$2 sm:$0xff] %v7115_v57 }
 0xaa2   : > { %v7117_v33 = vsel %vm5736_vm7, %v7053_v29, %v6849_v7  ;;  %v8957_v29 = vpack.i.bf16 %v11799_v53, %v12274_v63  ;;  %v8961_v63 = vpack.i.bf16 %v11910_v37, %v7270_v11 }
 0xaa3   : > { %7276 = vst [vmem:[#allocation1 + $0x11] ss:$2 sm:$0xff] %v7117_v33 }
 0xaa7   : > { %v6847_v48 = vpop.permute.xlu0 %6846  ;;  %v6477_v26 = vpop.permute.xlu2 %6476 }
 0xaa8   : > { %v7116_v1 = vsel %vm5736_vm7, %v7052_v8, %v6847_v48  ;;  %v7281_v58 = vld.sshfl [vmem:[#allocation1] sm:$0xff pattern:$0x75316420]  ;;  %v6995_v48 = vsel %vm5727_vm6, %v6235_v30, %v6477_v26 }
 0xaa9   : > { %v6851_v44 = vpop.permute.xlu1 %6850  ;;  %7275 = vst [vmem:[#allocation1 + $0x10] ss:$2 sm:$0xff] %v7116_v1 }
 0xaaa   : > { %v7118_v14 = vsel %vm5736_vm7, %v7054_v42, %v6851_v44  ;;  %v8963_v42 = vpack.i.bf16 %v11872_v9, %v7271_v12  ;;  %v8965_v12 = vpack.i.bf16 %v11932_v32, %v7272_v46 }
 0xaab   : > { %8952 = vxpose.xlu2.b32.start [1/16] (narrow) %v8951_v18, 16  ;;  %7277 = vst [vmem:[#allocation1 + $0x20] ss:$2 sm:$0xff] %v7118_v14 }
 0xaaf   : > { %v6661_v10 = vpop.permute.xlu0 %6660  ;;  %v6483_v45 = vpop.permute.xlu2 %6482 }
 0xab0   : > { %v7055_v19 = vsel %vm5472_vm0, %v6991_v22, %v6661_v10  ;;  %v7282_v22 = vld.sshfl [vmem:[#allocation1 + $0x10] sm:$0xff pattern:$0x75316420] }
 0xab1   : > { %v7119_v13 = vsel %vm5736_vm7, %v7055_v19, %v6853_v15  ;;  %v6665_v61 = vpop.permute.xlu1 %6664  ;;  %v8955_v15 = vpack.i.bf16 %v11803_v51, %v12256_v2 }
 0xab2   : > { %7278 = vst [vmem:[#allocation1 + $0x21] ss:$2 sm:$0xff] %v7119_v13  ;;  %v7057_v62 = vsel %vm5472_vm0, %v6993_v24, %v6665_v61 }
 0xab3   : > { %8954 = vxpose.xlu2.b32.cont [2/16] (narrow) %v8953_v16, 16 }
 0xab7   : > { %v6663_v25 = vpop.permute.xlu0 %6662  ;;  %v12334_v23 = vpop.permute.xlu2 %6488 }
 0xab8   : > { %v7056_v38 = vsel %vm5472_vm0, %v6992_v56, %v6663_v25  ;;  %v8967_v56 = vpack.i.bf16 %v11956_v31, %v7281_v58  ;;  %v9020_v58 = vmov 0  }
 0xab9   : > { %v7120_v50 = vsel %vm5736_vm7, %v7056_v38, %v6855_v49  ;;  %v6475_v52 = vpop.permute.xlu1 %6474  ;;  %v8959_v49 = vpack.i.bf16 %v11835_v0, %v12286_v27  ;;  %v7283_v32 = vld.sshfl [vmem:[#allocation1 + $0x20] sm:$0xff pattern:$0x75316420]  ;;  %8993 = vset.pattern.permute.xlu0 %v9020_v58  ;;  %8994 = vset.pattern.permute.xlu1 %v9020_v58  ;;  %v7450_v58 = vld [vmem:[%s12617_s15 + $0x28] sm:$0xff] }
 0xaba   : > { %7279 = vst [vmem:[#allocation1 + $0x30] ss:$2 sm:$0xff] %v7120_v50  ;;  %v6994_v51 = vsel %vm5727_vm6, %v12172_v21, %v6475_v52  ;;  %v8969_v52 = vpack.i.bf16 %v11969_v54, %v7282_v22 }
 0xabb   : > { %8956 = vxpose.xlu2.b32.cont [3/16] (narrow) %v8955_v15, 16 }
 0xabf   : > { %v6857_v59 = vpop.permute.xlu0 %6856  ;;  %v6669_v33 = vpop.permute.xlu2 %6668 }
 0xac0   : > { %v7121_v34 = vsel %vm5736_vm7, %v7057_v62, %v6857_v59  ;;  %v7059_v1 = vsel %vm5472_vm0, %v6995_v48, %v6669_v33  ;;  %v7471_v33 = vld [vmem:[%s12617_s15 + $0xd0] sm:$0xff]  ;;  %v7465_v48 = vld [vmem:[%s12617_s15 + $0xa0] sm:$0xff] }
 0xac1   : > { %v6667_v57 = vpop.permute.xlu1 %6666  ;;  %7280 = vst [vmem:[#allocation1 + $0x31] ss:$2 sm:$0xff] %v7121_v34 }
 0xac2   : > { %v7058_v35 = vsel %vm5472_vm0, %v6994_v51, %v6667_v57  ;;  %v8971_v57 = vpack.i.bf16 %v11988_v3, %v7283_v32  ;;  %v7507_v32 = vld [vmem:[%s12617_s15 + $0x1f0] sm:$0xff] }
 0xac3   : > { %8958 = vxpose.xlu2.b32.cont [4/16] (narrow) %v8957_v29, 16 }
 0xac7   : > { %v6859_v2 = vpop.permute.xlu0 %6858  ;;  %v6671_v36 = vpop.permute.xlu2 %6670 }
 0xac8   : > { %v7122_v60 = vsel %vm5736_vm7, %v7058_v35, %v6859_v2  ;;  %v7284_v59 = vld.sshfl [vmem:[#allocation1 + $0x30] sm:$0xff pattern:$0x75316420] }
 0xac9   : > { %v6481_v7 = vpop.permute.xlu1 %6480  ;;  %7285 = vst [vmem:[#allocation1] ss:$2 sm:$0xff] %v7122_v60  ;;  %v8973_v29 = vpack.i.bf16 %v12025_v40, %v7284_v59  ;;  %v7397_v40 = vld [vmem:[%s12616_s14] sm:$0xff] }
 0xaca   : > { %v6997_v11 = vsel %vm5727_vm6, %v6237_v17, %v6481_v7  ;;  %v6998_v17 = vsel %vm5727_vm6, %v6238_v47, %v6483_v45  ;;  %7401 = vperm.xlu0 %8993, %v7397_v40   ;;  %v7504_v7 = vld [vmem:[%s12617_s15 + $0x1d8] sm:$0xff]  ;;  %v7497_v59 = vld [vmem:[%s12617_s15 + $0x1a0] sm:$0xff]  ;;  %v7483_v40 = vld [vmem:[%s12617_s15 + $0x130] sm:$0xff] }
 0xacb   : > { %8960 = vxpose.xlu2.b32.cont [5/16] (narrow) %v8959_v49, 16  ;;  %v7473_v49 = vld [vmem:[%s12617_s15 + $0xe0] sm:$0xff] }
 0xacf   : > { %v6479_v41 = vpop.permute.xlu0 %6478  ;;  %v6865_v27 = vpop.permute.xlu2 %6864 }
 0xad0   : > { %v6996_v37 = vsel %vm5727_vm6, %v6236_v6, %v6479_v41  ;;  %v7502_v41 = vld [vmem:[%s12617_s15 + $0x1c8] sm:$0xff] }
 0xad1   : > { %v6487_v53 = vpop.permute.xlu1 %6486  ;;  %v7060_v9 = vsel %vm5472_vm0, %v6996_v37, %v6671_v36  ;;  %v7467_v36 = vld [vmem:[%s12617_s15 + $0xb0] sm:$0xff]  ;;  %v7492_v37 = vld [vmem:[%s12617_s15 + $0x178] sm:$0xff] }
 0xad2   : > { %v7000_v31 = vsel %vm5727_vm6, %v6240_v39, %v6487_v53  ;;  %v7469_v53 = vld [vmem:[%s12617_s15 + $0xc0] sm:$0xff] }
 0xad3   : > { %8962 = vxpose.xlu2.b32.cont [6/16] (narrow) %v8961_v63, 16  ;;  %v7500_v63 = vld [vmem:[%s12617_s15 + $0x1b8] sm:$0xff] }
 0xad7   : > { %v6485_v8 = vpop.permute.xlu0 %6484  ;;  %v6867_v19 = vpop.permute.xlu2 %6866 }
 0xad8   : > { %v6999_v25 = vsel %vm5727_vm6, %v6239_v5, %v6485_v8  ;;  %v7001_v5 = vsel %vm5727_vm6, %v6241_v20, %v12334_v23  ;;  %v7498_v8 = vld [vmem:[%s12617_s15 + $0x1a8] sm:$0xff] }
 0xad9   : > { %v6861_v44 = vpop.permute.xlu1 %6860 }
 0xada   : > { %v7123_v0 = vsel %vm5736_vm7, %v7059_v1, %v6861_v44  ;;  %v7496_v1 = vld [vmem:[%s12617_s15 + $0x198] sm:$0xff]  ;;  %v7463_v44 = vld [vmem:[%s12617_s15 + $0x90] sm:$0xff] }
 0xadb   : > { %8964 = vxpose.xlu2.b32.cont [7/16] (narrow) %v8963_v42, 16  ;;  %7286 = vst [vmem:[#allocation1 + $0x1] ss:$2 sm:$0xff] %v7123_v0  ;;  %v7494_v42 = vld [vmem:[%s12617_s15 + $0x188] sm:$0xff]  ;;  %v7461_v0 = vld [vmem:[%s12617_s15 + $0x80] sm:$0xff] }
 0xadf   : > { %v6673_v18 = vpop.permute.xlu0 %6672  ;;  %v6681_v15 = vpop.permute.xlu2 %6680 }
 0xae0   : > { %v7061_v30 = vsel %vm5472_vm0, %v6997_v11, %v6673_v18  ;;  %v7065_v54 = vsel %vm5472_vm0, %v7001_v5, %v6681_v15  ;;  %v7459_v11 = vld [vmem:[%s12617_s15 + $0x70] sm:$0xff]  ;;  %v7490_v18 = vld [vmem:[%s12617_s15 + $0x168] sm:$0xff]  ;;  %v7472_v15 = vld [vmem:[%s12617_s15 + $0xd8] sm:$0xff] }
 0xae1   : > { %v7125_v14 = vsel %vm5736_vm7, %v7061_v30, %v6865_v27  ;;  %v6863_v26 = vpop.permute.xlu1 %6862  ;;  %v7457_v30 = vld [vmem:[%s12617_s15 + $0x60] sm:$0xff]  ;;  %v7499_v5 = vld [vmem:[%s12617_s15 + $0x1b0] sm:$0xff] }
 0xae2   : > { %v7124_v10 = vsel %vm5736_vm7, %v7060_v9, %v6863_v26  ;;  %7288 = vst [vmem:[#allocation1 + $0x11] ss:$2 sm:$0xff] %v7125_v14  ;;  %v7293_v51 = vld.sshfl [vmem:[#allocation1] sm:$0xff pattern:$0x75316420]  ;;  %v7488_v14 = vld [vmem:[%s12617_s15 + $0x158] sm:$0xff] }
 0xae3   : > { %8966 = vxpose.xlu2.b32.cont [8/16] (narrow) %v8965_v12, 16  ;;  %7287 = vst [vmem:[#allocation1 + $0x10] ss:$2 sm:$0xff] %v7124_v10  ;;  %v8975_v21 = vpack.i.bf16 %v12060_v43, %v7293_v51  ;;  %v7398_v43 = vld [vmem:[%s12616_s14 + $0x8] sm:$0xff]  ;;  %v7455_v26 = vld [vmem:[%s12617_s15 + $0x50] sm:$0xff]  ;;  %v7453_v12 = vld [vmem:[%s12617_s15 + $0x40] sm:$0xff] }
 0xae4   : > { %7406 = vperm.xlu1 %8994, %v7398_v43   ;;  %v7486_v9 = vld [vmem:[%s12617_s15 + $0x148] sm:$0xff]  ;;  %v7491_v51 = vld [vmem:[%s12617_s15 + $0x170] sm:$0xff]  ;;  %v7452_v43 = vld [vmem:[%s12617_s15 + $0x38] sm:$0xff] }
 0xae7   : > { %v6675_v6 = vpop.permute.xlu0 %6674 }
 0xae8   : > { %v7062_v13 = vsel %vm5472_vm0, %v6998_v17, %v6675_v6  ;;  %v7484_v6 = vld [vmem:[%s12617_s15 + $0x138] sm:$0xff] }
 0xae9   : > { %v7126_v61 = vsel %vm5736_vm7, %v7062_v13, %v6867_v19  ;;  %v6677_v16 = vpop.permute.xlu1 %6676 }
 0xaea   : > { %7289 = vst [vmem:[#allocation1 + $0x20] ss:$2 sm:$0xff] %v7126_v61  ;;  %v7063_v38 = vsel %vm5472_vm0, %v6999_v25, %v6677_v16  ;;  %v7294_v20 = vld.sshfl [vmem:[#allocation1 + $0x10] sm:$0xff pattern:$0x75316420]  ;;  %v7476_v25 = vld [vmem:[%s12617_s15 + $0xf8] sm:$0xff] }
 0xaeb   : > { %8968 = vxpose.xlu2.b32.cont [9/16] (narrow) %v8967_v56, 16  ;;  %v8977_v23 = vpack.i.bf16 %v12080_v28, %v7294_v20  ;;  %v7508_v28 = vld [vmem:[%s12617_s15 + $0x1f8] sm:$0xff]  ;;  %v7451_v61 = vld [vmem:[%s12617_s15 + $0x30] sm:$0xff]  ;;  %v7489_v20 = vld [vmem:[%s12617_s15 + $0x160] sm:$0xff] }
 0xaec   : > { %7578 = vmatpush.msrb.mxu2 %v7508_v28  ;;  %v7481_v28 = vld [vmem:[%s12617_s15 + $0x120] sm:$0xff] }
 0xaef   : > { %v6869_v50 = vpop.permute.xlu0 %6868 }
 0xaf0   : > { %v7127_v47 = vsel %vm5736_vm7, %v7063_v38, %v6869_v50  ;;  %v8332_v38 = vld [vmem:[%s12615_s13] sm:$0xff] }
 0xaf1   : > { %v6679_v45 = vpop.permute.xlu1 %6678  ;;  %7290 = vst [vmem:[#allocation1 + $0x21] ss:$2 sm:$0xff] %v7127_v47  ;;  %v7449_v50 = vld [vmem:[%s12617_s15 + $0x20] sm:$0xff]  ;;  %v7482_v47 = vld [vmem:[%s12617_s15 + $0x128] sm:$0xff] }
 0xaf2   : > { %v7064_v46 = vsel %vm5472_vm0, %v7000_v31, %v6679_v45  ;;  %v7505_v45 = vld [vmem:[%s12617_s15 + $0x1e0] sm:$0xff]  ;;  %v7503_v31 = vld [vmem:[%s12617_s15 + $0x1d0] sm:$0xff] }
 0xaf3   : > { %8970 = vxpose.xlu2.b32.cont [10/16] (narrow) %v8969_v52, 16  ;;  %v7474_v52 = vld [vmem:[%s12617_s15 + $0xe8] sm:$0xff] }
 0xaf7   : > { %v6871_v24 = vpop.permute.xlu0 %6870 }
 0xaf8   : > { %v7128_v62 = vsel %vm5736_vm7, %v7064_v46, %v6871_v24  ;;  %v7295_v35 = vld.sshfl [vmem:[#allocation1 + $0x20] sm:$0xff pattern:$0x75316420]  ;;  %v7470_v24 = vld [vmem:[%s12617_s15 + $0xc8] sm:$0xff] }
 0xaf9   : > { %v6873_v34 = vpop.permute.xlu1 %6872  ;;  %7291 = vst [vmem:[#allocation1 + $0x30] ss:$2 sm:$0xff] %v7128_v62  ;;  %v8979_v2 = vpack.i.bf16 %v12129_v55, %v7295_v35  ;;  %v7506_v55 = vld [vmem:[%s12617_s15 + $0x1e8] sm:$0xff]  ;;  %v7501_v46 = vld [vmem:[%s12617_s15 + $0x1c0] sm:$0xff]  ;;  %v7468_v62 = vld [vmem:[%s12617_s15 + $0xb8] sm:$0xff] }
 0xafa   : > { %v7129_v39 = vsel %vm5736_vm7, %v7065_v54, %v6873_v34  ;;  %7579 = vmatpush.msrb.mxu2 %v7506_v55  ;;  %v7466_v54 = vld [vmem:[%s12617_s15 + $0xa8] sm:$0xff]  ;;  %v7495_v34 = vld [vmem:[%s12617_s15 + $0x190] sm:$0xff] }
 0xafb   : > { %8972 = vxpose.xlu2.b32.cont [11/16] (narrow) %v8971_v57, 16  ;;  %7292 = vst [vmem:[#allocation1 + $0x31] ss:$2 sm:$0xff] %v7129_v39  ;;  %v7464_v57 = vld [vmem:[%s12617_s15 + $0x98] sm:$0xff]  ;;  %v7493_v39 = vld [vmem:[%s12617_s15 + $0x180] sm:$0xff]  ;;  %v7487_v35 = vld [vmem:[%s12617_s15 + $0x150] sm:$0xff] }
 0xafc   : > { %7580 = vmatpush.msrb.mxu2 %v7504_v7  ;;  %v7447_v55 = vld [vmem:[%s12617_s15 + $0x10] sm:$0xff]  ;;  %v7448_v7 = vld [vmem:[%s12617_s15 + $0x18] sm:$0xff] }
 0xafe   : > { %7581 = vmatpush.msrb.mxu2 %v7502_v41  ;;  %v7477_v41 = vld [vmem:[%s12617_s15 + $0x100] sm:$0xff] }
 0xb00   : > { %7582 = vmatpush.msrb.mxu2 %v7500_v63  ;;  %v7478_v63 = vld [vmem:[%s12617_s15 + $0x108] sm:$0xff] }
 0xb02   : > { %v7296_v3 = vld.sshfl [vmem:[#allocation1 + $0x30] sm:$0xff pattern:$0x75316420]  ;;  %7583 = vmatpush.msrb.mxu2 %v7498_v8 }
 0xb03   : > { %8974 = vxpose.xlu2.b32.cont [12/16] (narrow) %v8973_v29, 16  ;;  %v8981_v60 = vpack.i.bf16 %v12157_v4, %v7296_v3  ;;  %v7475_v4 = vld [vmem:[%s12617_s15 + $0xf0] sm:$0xff]  ;;  %v7462_v29 = vld [vmem:[%s12617_s15 + $0x88] sm:$0xff]  ;;  %v7485_v3 = vld [vmem:[%s12617_s15 + $0x140] sm:$0xff] }
 0xb04   : > { %7509 = vmatpush.msrb.mxu0 %v7475_v4  ;;  %7584 = vmatpush.msrb.mxu2 %v7496_v1  ;;  %v7479_v4 = vld [vmem:[%s12617_s15 + $0x110] sm:$0xff] }
 0xb06   : > { %7510 = vmatpush.msrb.mxu0 %v7473_v49  ;;  %7585 = vmatpush.msrb.mxu2 %v7494_v42  ;;  %v7480_v49 = vld [vmem:[%s12617_s15 + $0x118] sm:$0xff] }
 0xb08   : > { %7511 = vmatpush.msrb.mxu0 %v7471_v33  ;;  %7586 = vmatpush.msrb.mxu2 %v7492_v37  ;;  %v7445_v33 = vld [vmem:[%s12617_s15] sm:$0xff] }
 0xb0a   : > { %7512 = vmatpush.msrb.mxu0 %v7469_v53  ;;  %7587 = vmatpush.msrb.mxu2 %v7490_v18  ;;  %v7446_v53 = vld [vmem:[%s12617_s15 + $0x8] sm:$0xff] }
 0xb0b   : > { %8976 = vxpose.xlu2.b32.cont [13/16] (narrow) %v8975_v21, 16  ;;  %v7460_v21 = vld [vmem:[%s12617_s15 + $0x78] sm:$0xff] }
 0xb0c   : > { %7513 = vmatpush.msrb.mxu0 %v7467_v36  ;;  %7588 = vmatpush.msrb.mxu2 %v7488_v14 }
 0xb0e   : > { %7514 = vmatpush.msrb.mxu0 %v7465_v48  ;;  %7589 = vmatpush.msrb.mxu2 %v7486_v9 }
 0xb10   : > { %7515 = vmatpush.msrb.mxu0 %v7463_v44  ;;  %7590 = vmatpush.msrb.mxu2 %v7484_v6 }
 0xb12   : > { %7516 = vmatpush.msrb.mxu0 %v7461_v0  ;;  %7591 = vmatpush.msrb.mxu2 %v7482_v47 }
 0xb13   : > { %8978 = vxpose.xlu2.b32.cont [14/16] (narrow) %v8977_v23, 16  ;;  %v7458_v23 = vld [vmem:[%s12617_s15 + $0x68] sm:$0xff] }
 0xb14   : > { %7517 = vmatpush.msrb.mxu0 %v7459_v11  ;;  %7592 = vmatpush.msrb.mxu2 %v7480_v49 }
 0xb16   : > { %7518 = vmatpush.msrb.mxu0 %v7457_v30  ;;  %7593 = vmatpush.msrb.mxu2 %v7478_v63 }
 0xb18   : > { %7519 = vmatpush.msrb.mxu0 %v7455_v26 }
 0xb1a   : > { %7520 = vmatpush.msrb.mxu0 %v7453_v12 }
 0xb1b   : > { %8980 = vxpose.xlu2.b32.cont [15/16] (narrow) %v8979_v2, 16  ;;  %v7456_v2 = vld [vmem:[%s12617_s15 + $0x58] sm:$0xff] }
 0xb1c   : > { %7521 = vmatpush.msrb.mxu0 %v7451_v61 }
 0xb1e   : > { %7522 = vmatpush.msrb.mxu0 %v7449_v50 }
 0xb20   : > { %7523 = vmatpush.msrb.mxu0 %v7447_v55 }
 0xb22   : > { %7524 = vmatpush.msrb.mxu0 %v7445_v33 }
 0xb23   : > { %8982 = vxpose.xlu2.b32.end [16/16] (narrow) %v8981_v60, 16  ;;  %v7454_v60 = vld [vmem:[%s12617_s15 + $0x48] sm:$0xff] }
 0xb3c   : > { %v7402_v36 = vpop.permute.xlu0 %7401 }
 0xb44   : > { %v8983_v27 = vpop.trf.xlu2 }
 0xb45   : > { %v8987_v22 = vunpack.i.h.bf16 %v8983_v27  ;;  %v8984_v10 = vunpack.i.l.bf16 %v8983_v27 }
 0xb4c   : > { %v8988_v17 = vpop.trf.xlu2 }
 0xb4d   : > { %v8992_v19 = vunpack.i.h.bf16 %v8988_v17  ;;  %v8989_v13 = vunpack.i.l.bf16 %v8988_v17 }
 0xb4f   : > { %v7393_v16 = vpack.c.bf16 %v8992_v19, %v8987_v22  ;;  %v7394_v56 = vpack.c.bf16 %v8989_v13, %v8984_v10 }
 0xb51   : > { %7424 = vmatpush.bf16.msrb.mxu1 %v7393_v16  ;;  %7438 = vmatpush.bf16.msrb.mxu3 %v7394_v56 }
 0xb54   : > { %8249 = vmatmul.msk.bf16.vlgmr.msrb.gmra.mxu3 %vm908_vm2, %v8332_v38  ;;  %8248 = vmatmul.msk.bf16.vlgmr.msrb.gmra.mxu1 %vm908_vm2, %v8332_v38 }
 0xb55   : > { %7532 = vmatpush.msra.mxu1 %v7507_v32  ;;  %7555 = vmatpush.msra.mxu3 %v7476_v25 }
 0xb56   : > { %v7407_v44 = vpop.permute.xlu1 %7406 }
 0xb57   : > { %7533 = vmatpush.msra.mxu1 %v7505_v45  ;;  %7556 = vmatpush.msra.mxu3 %v7474_v52 }
 0xb59   : > { %7534 = vmatpush.msra.mxu1 %v7503_v31  ;;  %7557 = vmatpush.msra.mxu3 %v7472_v15 }
 0xb5b   : > { %7535 = vmatpush.msra.mxu1 %v7501_v46  ;;  %7558 = vmatpush.msra.mxu3 %v7470_v24 }
 0xb5d   : > { %7536 = vmatpush.msra.mxu1 %v7499_v5  ;;  %7559 = vmatpush.msra.mxu3 %v7468_v62 }
 0xb5f   : > { %7537 = vmatpush.msra.mxu1 %v7497_v59  ;;  %7560 = vmatpush.msra.mxu3 %v7466_v54 }
 0xb61   : > { %7538 = vmatpush.msra.mxu1 %v7495_v34  ;;  %7561 = vmatpush.msra.mxu3 %v7464_v57 }
 0xb63   : > { %7539 = vmatpush.msra.mxu1 %v7493_v39  ;;  %7562 = vmatpush.msra.mxu3 %v7462_v29 }
 0xb65   : > { %7540 = vmatpush.msra.mxu1 %v7491_v51  ;;  %7563 = vmatpush.msra.mxu3 %v7460_v21 }
 0xb67   : > { %7541 = vmatpush.msra.mxu1 %v7489_v20  ;;  %7564 = vmatpush.msra.mxu3 %v7458_v23 }
 0xb69   : > { %7542 = vmatpush.msra.mxu1 %v7487_v35  ;;  %7565 = vmatpush.msra.mxu3 %v7456_v2 }
 0xb6b   : > { %7543 = vmatpush.msra.mxu1 %v7485_v3  ;;  %7566 = vmatpush.msra.mxu3 %v7454_v60 }
 0xb6d   : > { %7544 = vmatpush.msra.mxu1 %v7483_v40  ;;  %7567 = vmatpush.msra.mxu3 %v7452_v43 }
 0xb6f   : > { %7545 = vmatpush.msra.mxu1 %v7481_v28  ;;  %7568 = vmatpush.msra.mxu3 %v7450_v58 }
 0xb71   : > { %7546 = vmatpush.msra.mxu1 %v7479_v4  ;;  %7569 = vmatpush.msra.mxu3 %v7448_v7 }
 0xb73   : > { %7547 = vmatpush.msra.mxu1 %v7477_v41  ;;  %7570 = vmatpush.msra.mxu3 %v7446_v53 }
 0xbd1   : > { %v7426_v8 = vpop.f32.mrf.mxu1 }
 0xbd2   : > { %v7427_v48 = vadd.f32 %v7426_v8, %v7402_v36 }
 0xbd4   : > { %7525 = vmatmul.f32.vlgmr.msrb.gmra.mxu0 %v7427_v48  ;;  %7571 = vmatmul.f32.vlgmr.msra.gmra.mxu3 %v7427_v48 }
 0xbd7   : > { %v7440_v1 = vpop.f32.mrf.mxu3 }
 0xbd8   : > { %v7441_v42 = vadd.f32 %v7440_v1, %v7402_v36 }
 0xbd9   : > { %v7428_v0 = vpop.f32.mrf.mxu1 }
 0xbda   : > { %7548 = vmatmul.f32.vlgmr.msra.gmra.mxu1 %v7441_v42  ;;  %7594 = vmatmul.f32.vlgmr.msrb.gmra.mxu2 %v7441_v42  ;;  %v7429_v27 = vadd.f32 %v7428_v0, %v7407_v44 }
 0xbdc   : > { %7528 = vmatmul.f32.gmra.mxu0 %v7429_v27  ;;  %7574 = vmatmul.f32.gmra.mxu3 %v7429_v27 }
 0xbdf   : > { %v7442_v37 = vpop.f32.mrf.mxu3 }
 0xbe0   : > { %v7443_v11 = vadd.f32 %v7442_v37, %v7407_v44 }
 0xbe2   : > { %7551 = vmatmul.f32.gmra.mxu1 %v7443_v11  ;;  %7597 = vmatmul.f32.gmra.mxu2 %v7443_v11 }
 0xc51   : > { %v7526_v18 = vpop.f32.mrf.mxu0 }
 0xc57   : > { %v7549_v30 = vpop.f32.mrf.mxu1  ;;  %v7572_v26 = vpop.f32.mrf.mxu3 }
 0xc58   : > { %v7550_v14 = vadd.f32 %v7549_v30, %v7526_v18 }
 0xc59   : > { %v7529_v22 = vpop.f32.mrf.mxu0 }
 0xc5a   : > { %7601 = vst [vmem:[%s521_s29] sm:$0xff] %v7550_v14 }
 0xc5d   : > { %v7595_v9 = vpop.f32.mrf.mxu2 }
 0xc5e   : > { %v7596_v12 = vadd.f32 %v7595_v9, %v7572_v26 }
 0xc5f   : > { %v7552_v10 = vpop.f32.mrf.mxu1  ;;  %v7575_v6 = vpop.f32.mrf.mxu3 }
 0xc60   : > { %7602 = vst [vmem:[%s521_s29 + $0x8] sm:$0xff] %v7596_v12  ;;  %v7553_v17 = vadd.f32 %v7552_v10, %v7529_v22 }
 0xc62   : > { %7603 = vst [vmem:[%s521_s29 + $0x10] sm:$0x1] %v7553_v17 }
 0xc65   : > { %v7598_v19 = vpop.f32.mrf.mxu2 }
 0xc66   : > { %v7599_v13 = vadd.f32 %v7598_v19, %v7575_v6 }
 0xc68   : > { %7604 = vst [vmem:[%s521_s29 + $0x18] sm:$0x1] %v7599_v13 }
 0xc69 PF: > { %s26_s21 = sadd.s32 1, %s9010_s21  }
 0xc6a   : > { %p23_p4 = scmp.ge.s32.totalorder %s26_s21, 4  }
 0xc6c   :  { %25 = sbr.rel (!%p23_p4) target bundleno = 2 (0x2), region = 148 }

</bundles_post_ra>
